<compile_context>
chip_gen: v7x
topology: tpu7x:2x2x1
jax: 0.10.0
libtpu: 0.0.40
codegen_flags: <defaults>
</compile_context>

<pallas_src>
import jax
import jax.numpy as jnp
import numpy as np
from jax import lax
from jax.experimental import pallas as pl
from jax.experimental.pallas import tpu as pltpu


# ------------------------------- Pallas kernel -------------------------------

def _make_kernel(D, H, W, Cin, Cout):
    C2 = 2 * Cin                 # stacked (img, pts) input channels
    WCo = W * Cout               # one encoder's (w, co) lane slab
    NL1 = 2 * WCo                # conv7 output lanes: (source, w, co)
    NL2 = W * 16                 # conv3 output lanes: (w, c16)
    DH = D * H
    Wp1, Wp2 = W + 6, W + 2      # zero-padded W extents (halo 3 / halo 1)

    def kernel(x_ref, w1_ref, s1_ref, b1_ref, w2_ref, s2_ref, b2_ref, w3_ref,
               o_ref, xpad_ref, epad_ref):
        # ---- padded (halo=3) stacked input volume via VMEM scratch ----------
        xpad_ref[...] = jnp.zeros_like(xpad_ref)
        xpad_ref[3:3 + D, 3:3 + H, 3 * C2:3 * C2 + W * C2] = x_ref[...]
        xp = xpad_ref[...]                               # (D+6, H+6, Wp1*C2) bf16

        # ---- 7x7x7 patches: unfold only (kd, kh); kw lives in the weight ----
        y = jnp.concatenate([xp[:, j:j + H, :] for j in range(7)], axis=-1)
        y = jnp.concatenate([y[j:j + D, :, :] for j in range(7)], axis=-1)
        p1 = y.reshape(DH, 7 * 7 * Wp1 * C2)             # (DH, K1) bf16

        # ---- img_enc & pts_enc fused: conv7 -> BN -> ReLU (one MXU dot) -----
        # enc lanes: (source, w, co) -> 2*W*Cout = 128 lane-dense columns.
        enc = jnp.dot(p1, w1_ref[...], preferred_element_type=jnp.float32)
        enc = jnp.maximum(enc * s1_ref[...] + b1_ref[...], 0.0)   # (DH, NL1) f32

        # ---- padded (halo=1) encoded volume for the 3x3x3 conv --------------
        epad_ref[...] = jnp.zeros_like(epad_ref)
        encb = enc.astype(jnp.bfloat16).reshape(D, H, NL1)
        epad_ref[1:1 + D, 1:1 + H, Cout:Cout + WCo] = encb[:, :, :WCo]
        off = Wp2 * Cout + Cout
        epad_ref[1:1 + D, 1:1 + H, off:off + WCo] = encb[:, :, WCo:]
        ep = epad_ref[...]                               # (D+2, H+2, 2*Wp2*Cout)

        # ---- vis_enc: conv3 -> BN -> ReLU ------------------------------------
        z = jnp.concatenate([ep[:, j:j + H, :] for j in range(3)], axis=-1)
        z = jnp.concatenate([z[j:j + D, :, :] for j in range(3)], axis=-1)
        p2 = z.reshape(DH, 9 * 2 * Wp2 * Cout)           # (DH, K2) bf16
        hid = jnp.dot(p2, w2_ref[...], preferred_element_type=jnp.float32)
        hid = jnp.maximum(hid * s2_ref[...] + b2_ref[...], 0.0)   # (DH, NL2) f32

        # ---- 1x1x1 conv (16 -> 1, broadcast over co lanes) + sigmoid --------
        vw = jax.nn.sigmoid(
            jnp.dot(hid, w3_ref[...], preferred_element_type=jnp.float32))
        # vw: (DH, W*Cout); value depends only on the voxel (constant over co)

        # ---- weighted fusion, channels-last (d,h) x (w, co) ------------------
        o_ref[...] = vw * enc[:, :WCo] + (1.0 - vw) * enc[:, WCo:]

    return kernel


# ----------------------------- weight preparation -----------------------------

def _fold_bn(gamma, beta, mean, var, eps=1e-3):
    scale = gamma / jnp.sqrt(var + eps)
    bias = beta - mean * scale
    return scale.astype(jnp.float32), bias.astype(jnp.float32)


def _build_w1(img_w, pts_w, Cin, Cout, W):
    """Block-diagonal (img|pts) conv7 weight, Toeplitz-expanded over the padded
    W axis.  rows: (kd, kh, w', c) with c in [0, 2*Cin) (img channels first);
    cols: (source, w, co) with source 0 = img, 1 = pts."""
    Wp = W + 6
    wd = jnp.zeros((7, 7, 7, 2 * Cin, 2, Cout), jnp.float32)
    wd = wd.at[:, :, :, :Cin, 0, :].set(
        jnp.transpose(img_w, (2, 3, 4, 1, 0)).astype(jnp.float32))
    wd = wd.at[:, :, :, Cin:, 1, :].set(
        jnp.transpose(pts_w, (2, 3, 4, 1, 0)).astype(jnp.float32))
    t1 = jnp.zeros((7, 7, Wp, 2 * Cin, 2, W, Cout), jnp.float32)
    for w in range(W):
        t1 = t1.at[:, :, w:w + 7, :, :, w, :].set(wd)
    return t1.reshape(7 * 7 * Wp * 2 * Cin, 2 * W * Cout).astype(jnp.bfloat16)


def _build_w2(vis_w, Cout, W):
    """vis_enc conv3 weight, Toeplitz-expanded over the padded W axis.
    rows: (kd, kh, source, w', co8); cols: (w, c16)."""
    Wp = W + 2
    vd = jnp.transpose(vis_w, (2, 3, 4, 1, 0)).astype(jnp.float32)
    vd = vd.reshape(3, 3, 3, 2, Cout, 16)            # (kd, kh, kw, src, co8, c16)
    vd = jnp.transpose(vd, (0, 1, 3, 2, 4, 5))       # (kd, kh, src, kw, co8, c16)
    t2 = jnp.zeros((3, 3, 2, Wp, Cout, W, 16), jnp.float32)
    for w in range(W):
        t2 = t2.at[:, :, :, w:w + 3, :, w, :].set(vd)
    return t2.reshape(3 * 3 * 2 * Wp * Cout, W * 16).astype(jnp.bfloat16)


def _build_w3(w3_vec, Cout, W):
    """16->1 1x1x1 conv as a (W*16, W*Cout) matrix; the single output channel
    is broadcast over the Cout lanes of each voxel so the sigmoid and fusion
    stay lane-dense (no per-voxel lane expansion inside the kernel)."""
    m = jnp.zeros((W, 16, W, Cout), jnp.float32)
    for w in range(W):
        m = m.at[w, :, w, :].set(
            jnp.broadcast_to(w3_vec.astype(jnp.float32)[:, None], (16, Cout)))
    return m.reshape(W * 16, W * Cout)


# --------------------------------- JAX glue -----------------------------------

@jax.jit
def visfuser_forward(img_voxel_feats, pts_voxel_feats, params):
    """Inputs NCDHW (B, Cin, D, H, W) float32; output NCDHW (B, Cout, D, H, W)."""
    B, Cin, D, H, W = img_voxel_feats.shape
    Cout = params["img_conv_w"].shape[0]
    C2 = 2 * Cin
    DH = D * H
    K1 = 7 * 7 * (W + 6) * C2
    K2 = 9 * 2 * (W + 2) * Cout
    NL1 = 2 * W * Cout
    NL2 = W * 16
    WCo = W * Cout

    # stacked, channels-last, UNPADDED, bf16 input; lane dim = W*2*Cin
    x = jnp.concatenate([img_voxel_feats, pts_voxel_feats], axis=1)
    x = jnp.transpose(x, (0, 2, 3, 4, 1)).reshape(B, D, H, W * C2)
    x = x.astype(jnp.bfloat16)

    w1 = _build_w1(params["img_conv_w"], params["pts_conv_w"], Cin, Cout, W)
    w2 = _build_w2(params["vis_conv1_w"], Cout, W)
    w3 = _build_w3(params["vis_conv2_w"].reshape(16), Cout, W)
    s_i, b_i = _fold_bn(*params["img_bn"])
    s_p, b_p = _fold_bn(*params["pts_bn"])
    s1 = jnp.concatenate([jnp.tile(s_i, W), jnp.tile(s_p, W)]).reshape(1, NL1)
    b1 = jnp.concatenate([jnp.tile(b_i, W), jnp.tile(b_p, W)]).reshape(1, NL1)
    s2v, b2v = _fold_bn(*params["vis_bn"])
    s2 = jnp.tile(s2v, W).reshape(1, NL2)
    b2 = jnp.tile(b2v, W).reshape(1, NL2)

    kernel = _make_kernel(D, H, W, Cin, Cout)

    def const(shape):
        n = len(shape)
        return pl.BlockSpec(shape, lambda b: (0,) * n)

    cost = pl.CostEstimate(
        flops=int(2 * B * DH * (K1 * NL1 + K2 * NL2 + NL2 * WCo)),
        transcendentals=int(B * DH * WCo),
        bytes_accessed=int(B * (D * H * W * C2 * 2 + DH * WCo * 4)
                           + 2 * (K1 * NL1 + K2 * NL2) + 4 * NL2 * WCo),
    )

    out = pl.pallas_call(
        kernel,
        out_shape=jax.ShapeDtypeStruct((B, DH, WCo), jnp.float32),
        grid=(B,),
        in_specs=[
            pl.BlockSpec((None, D, H, W * C2), lambda b: (b, 0, 0, 0)),
            const((K1, NL1)),
            const((1, NL1)),
            const((1, NL1)),
            const((K2, NL2)),
            const((1, NL2)),
            const((1, NL2)),
            const((NL2, WCo)),
        ],
        out_specs=pl.BlockSpec((None, DH, WCo), lambda b: (b, 0, 0)),
        scratch_shapes=[
            pltpu.VMEM((D + 6, H + 6, (W + 6) * C2), jnp.bfloat16),
            pltpu.VMEM((D + 2, H + 2, 2 * (W + 2) * Cout), jnp.bfloat16),
        ],
        compiler_params=pltpu.CompilerParams(
            dimension_semantics=("parallel",),
            vmem_limit_bytes=32 * 1024 * 1024,
        ),
        cost_estimate=cost,
    )(x, w1, s1, b1, w2, s2, b2, w3)

    # tiny output: NCDHW permute done once in XLA
    out = out.reshape(B, D, H, W, Cout)
    return jnp.transpose(out, (0, 4, 1, 2, 3))


# --------------------- pure-JAX reference (validation only) -------------------

def _reference_forward(img, pts, params):
    """XLA-conv reference that mirrors the kernel's bf16 rounding of conv
    operands (f32 accumulation / element-wise math)."""
    def bf(v):
        return v.astype(jnp.bfloat16).astype(jnp.float32)

    def conv(xv, wv, pad):
        return lax.conv_general_dilated(
            bf(xv), bf(wv), (1, 1, 1), [(pad, pad)] * 3,
            dimension_numbers=("NCDHW", "OIDHW", "NCDHW"))

    def bn(xv, p):
        s, b = _fold_bn(*p)
        return xv * s[None, :, None, None, None] + b[None, :, None, None, None]

    img_e = jax.nn.relu(bn(conv(img, params["img_conv_w"], 3), params["img_bn"]))
    pts_e = jax.nn.relu(bn(conv(pts, params["pts_conv_w"], 3), params["pts_bn"]))
    cat = jnp.concatenate([img_e, pts_e], axis=1)
    hid = jax.nn.relu(bn(conv(cat, params["vis_conv1_w"], 1), params["vis_bn"]))
    w3 = params["vis_conv2_w"].reshape(1, 16, 1, 1, 1).astype(jnp.float32)
    vw = jax.nn.sigmoid(jnp.sum(hid * w3, axis=1, keepdims=True))
    return vw * img_e + (1.0 - vw) * pts_e


# ------------------------------ parameter init --------------------------------

def init_params(key, in_channels, out_channels):
    ks = jax.random.split(key, 8)

    def conv(k, shape, fan_in):
        return (jax.random.normal(k, shape, jnp.float32) / jnp.sqrt(fan_in)).astype(jnp.float32)

    def bn(k, c):
        k1, k2, k3, k4 = jax.random.split(k, 4)
        gamma = 1.0 + 0.1 * jax.random.normal(k1, (c,), jnp.float32)
        beta = 0.1 * jax.random.normal(k2, (c,), jnp.float32)
        mean = 0.1 * jax.random.normal(k3, (c,), jnp.float32)
        var = 1.0 + 0.1 * jax.random.uniform(k4, (c,), jnp.float32)
        return gamma, beta, mean, var

    return {
        "img_conv_w": conv(ks[0], (out_channels, in_channels, 7, 7, 7), in_channels * 343),
        "img_bn": bn(ks[1], out_channels),
        "pts_conv_w": conv(ks[2], (out_channels, in_channels, 7, 7, 7), in_channels * 343),
        "pts_bn": bn(ks[3], out_channels),
        "vis_conv1_w": conv(ks[4], (16, 2 * out_channels, 3, 3, 3), 2 * out_channels * 27),
        "vis_bn": bn(ks[5], 16),
        "vis_conv2_w": conv(ks[6], (1, 16, 1, 1, 1), 16),
    }


if __name__ == "__main__":
    in_channels, out_channels = 4, 8
    B, D, H, W = 2, 8, 8, 8

    key = jax.random.PRNGKey(0)
    k_img, k_pts, k_par = jax.random.split(key, 3)
    img_voxel_feats = jax.random.normal(k_img, (B, in_channels, D, H, W), jnp.float32)
    pts_voxel_feats = jax.random.normal(k_pts, (B, in_channels, D, H, W), jnp.float32)
    params = init_params(k_par, in_channels, out_channels)

    out = visfuser_forward(img_voxel_feats, pts_voxel_feats, params)
    out = jax.block_until_ready(out)
    assert out.shape == (B, out_channels, D, H, W)

    ref = _reference_forward(img_voxel_feats, pts_voxel_feats, params)
    np.testing.assert_allclose(np.asarray(out), np.asarray(ref), rtol=2e-3, atol=2e-3)

    print("KERNEL_OK")
</pallas_src>

<mosaic_0001>
module attributes {stable_mosaic.version = 11 : i64} {
  func.func @kernel(%arg0: i32, %arg1: memref<1x8x8x64xbf16, #tpu.memory_space<vmem>>, %arg2: memref<5488x128xbf16, #tpu.memory_space<vmem>>, %arg3: memref<1x128xf32, #tpu.memory_space<vmem>>, %arg4: memref<1x128xf32, #tpu.memory_space<vmem>>, %arg5: memref<1440x128xbf16, #tpu.memory_space<vmem>>, %arg6: memref<1x128xf32, #tpu.memory_space<vmem>>, %arg7: memref<1x128xf32, #tpu.memory_space<vmem>>, %arg8: memref<128x64xf32, #tpu.memory_space<vmem>>, %arg9: memref<1x64x64xf32, #tpu.memory_space<vmem>>, %arg10: memref<14x14x112xbf16, #tpu.memory_space<vmem>>, %arg11: memref<10x10x160xbf16, #tpu.memory_space<vmem>>) attributes {dimension_semantics = [#tpu.dimension_semantics<parallel>], iteration_bounds = array<i64: 2>, scalar_prefetch = 0 : i64, scratch_operands = 2 : i64, tpu.core_type = #tpu.core_type<tc>, window_params = [{transform_indices = @transform_0, window_bounds = array<i64: 1, 8, 8, 64>}, {pipeline_mode = #tpu.pipeline_mode<synchronous>, transform_indices = @transform_1, window_bounds = array<i64: 5488, 128>}, {pipeline_mode = #tpu.pipeline_mode<synchronous>, transform_indices = @transform_2, window_bounds = array<i64: 1, 128>}, {pipeline_mode = #tpu.pipeline_mode<synchronous>, transform_indices = @transform_3, window_bounds = array<i64: 1, 128>}, {pipeline_mode = #tpu.pipeline_mode<synchronous>, transform_indices = @transform_4, window_bounds = array<i64: 1440, 128>}, {pipeline_mode = #tpu.pipeline_mode<synchronous>, transform_indices = @transform_5, window_bounds = array<i64: 1, 128>}, {pipeline_mode = #tpu.pipeline_mode<synchronous>, transform_indices = @transform_6, window_bounds = array<i64: 1, 128>}, {pipeline_mode = #tpu.pipeline_mode<synchronous>, transform_indices = @transform_7, window_bounds = array<i64: 128, 64>}, {transform_indices = @transform_8, window_bounds = array<i64: 1, 64, 64>}]} {
    %cst = arith.constant 0.000000e+00 : bf16
    %0 = vector.broadcast %cst : bf16 to vector<14x14x112xbf16>
    %c0 = arith.constant 0 : index
    %c0_0 = arith.constant 0 : index
    %c0_1 = arith.constant 0 : index
    %1 = vector.load %arg10[%c0, %c0_0, %c0_1] : memref<14x14x112xbf16, #tpu.memory_space<vmem>>, vector<14x14x112xbf16>
    tpu.vector_store %arg10[%c0, %c0_0, %c0_1], %0 {strides = array<i32>} : memref<14x14x112xbf16, #tpu.memory_space<vmem>>, vector<14x14x112xbf16>,
    %c0_2 = arith.constant 0 : index
    %c0_3 = arith.constant 0 : index
    %c0_4 = arith.constant 0 : index
    %c0_5 = arith.constant 0 : index
    %2 = vector.load %arg1[%c0_2, %c0_3, %c0_4, %c0_5] : memref<1x8x8x64xbf16, #tpu.memory_space<vmem>>, vector<1x8x8x64xbf16>
    %3 = vector.shape_cast %2 : vector<1x8x8x64xbf16> to vector<8x8x64xbf16>
    %c3 = arith.constant 3 : index
    %c3_6 = arith.constant 3 : index
    %c24 = arith.constant 24 : index
    %4 = vector.load %arg10[%c3, %c3_6, %c24] : memref<14x14x112xbf16, #tpu.memory_space<vmem>>, vector<8x8x64xbf16>
    tpu.vector_store %arg10[%c3, %c3_6, %c24], %3 {strides = array<i32>} : memref<14x14x112xbf16, #tpu.memory_space<vmem>>, vector<8x8x64xbf16>,
    %c0_7 = arith.constant 0 : index
    %c0_8 = arith.constant 0 : index
    %c0_9 = arith.constant 0 : index
    %5 = vector.load %arg10[%c0_7, %c0_8, %c0_9] : memref<14x14x112xbf16, #tpu.memory_space<vmem>>, vector<14x14x112xbf16>
    %6 = vector.extract_strided_slice %5 {offsets = [0, 0, 0], sizes = [14, 8, 112], strides = [1, 1, 1]} : vector<14x14x112xbf16> to vector<14x8x112xbf16>
    %7 = vector.extract_strided_slice %5 {offsets = [0, 1, 0], sizes = [14, 8, 112], strides = [1, 1, 1]} : vector<14x14x112xbf16> to vector<14x8x112xbf16>
    %8 = vector.extract_strided_slice %5 {offsets = [0, 2, 0], sizes = [14, 8, 112], strides = [1, 1, 1]} : vector<14x14x112xbf16> to vector<14x8x112xbf16>
    %9 = vector.extract_strided_slice %5 {offsets = [0, 3, 0], sizes = [14, 8, 112], strides = [1, 1, 1]} : vector<14x14x112xbf16> to vector<14x8x112xbf16>
    %10 = vector.extract_strided_slice %5 {offsets = [0, 4, 0], sizes = [14, 8, 112], strides = [1, 1, 1]} : vector<14x14x112xbf16> to vector<14x8x112xbf16>
    %11 = vector.extract_strided_slice %5 {offsets = [0, 5, 0], sizes = [14, 8, 112], strides = [1, 1, 1]} : vector<14x14x112xbf16> to vector<14x8x112xbf16>
    %12 = vector.extract_strided_slice %5 {offsets = [0, 6, 0], sizes = [14, 8, 112], strides = [1, 1, 1]} : vector<14x14x112xbf16> to vector<14x8x112xbf16>
    %13 = tpu.concatenate %6, %7, %8, %9, %10, %11, %12 in 2 : vector<14x8x112xbf16>, vector<14x8x112xbf16>, vector<14x8x112xbf16>, vector<14x8x112xbf16>, vector<14x8x112xbf16>, vector<14x8x112xbf16>, vector<14x8x112xbf16> -> vector<14x8x784xbf16>
    %14 = vector.extract_strided_slice %13 {offsets = [0, 0, 0], sizes = [8, 8, 784], strides = [1, 1, 1]} : vector<14x8x784xbf16> to vector<8x8x784xbf16>
    %15 = vector.extract_strided_slice %13 {offsets = [1, 0, 0], sizes = [8, 8, 784], strides = [1, 1, 1]} : vector<14x8x784xbf16> to vector<8x8x784xbf16>
    %16 = vector.extract_strided_slice %13 {offsets = [2, 0, 0], sizes = [8, 8, 784], strides = [1, 1, 1]} : vector<14x8x784xbf16> to vector<8x8x784xbf16>
    %17 = vector.extract_strided_slice %13 {offsets = [3, 0, 0], sizes = [8, 8, 784], strides = [1, 1, 1]} : vector<14x8x784xbf16> to vector<8x8x784xbf16>
    %18 = vector.extract_strided_slice %13 {offsets = [4, 0, 0], sizes = [8, 8, 784], strides = [1, 1, 1]} : vector<14x8x784xbf16> to vector<8x8x784xbf16>
    %19 = vector.extract_strided_slice %13 {offsets = [5, 0, 0], sizes = [8, 8, 784], strides = [1, 1, 1]} : vector<14x8x784xbf16> to vector<8x8x784xbf16>
    %20 = vector.extract_strided_slice %13 {offsets = [6, 0, 0], sizes = [8, 8, 784], strides = [1, 1, 1]} : vector<14x8x784xbf16> to vector<8x8x784xbf16>
    %21 = tpu.concatenate %14, %15, %16, %17, %18, %19, %20 in 2 : vector<8x8x784xbf16>, vector<8x8x784xbf16>, vector<8x8x784xbf16>, vector<8x8x784xbf16>, vector<8x8x784xbf16>, vector<8x8x784xbf16>, vector<8x8x784xbf16> -> vector<8x8x5488xbf16>
    %22 = vector.shape_cast %21 : vector<8x8x5488xbf16> to vector<64x5488xbf16>
    %c0_10 = arith.constant 0 : index
    %c0_11 = arith.constant 0 : index
    %23 = vector.load %arg2[%c0_10, %c0_11] : memref<5488x128xbf16, #tpu.memory_space<vmem>>, vector<5488x128xbf16>
    %cst_12 = arith.constant dense<0.000000e+00> : vector<64x128xf32>
    %24 = tpu.matmul %22, %23, %cst_12 {dimension_numbers = #tpu.dot_dimension_numbers<[1], [0], [0], [1], [0, 0, 1, 1], [], []>} : vector<64x5488xbf16>, vector<5488x128xbf16>, vector<64x128xf32> -> vector<64x128xf32>
    %c0_13 = arith.constant 0 : index
    %c0_14 = arith.constant 0 : index
    %25 = vector.load %arg3[%c0_13, %c0_14] : memref<1x128xf32, #tpu.memory_space<vmem>>, vector<1x128xf32>
    %26 = vector.broadcast %25 : vector<1x128xf32> to vector<64x128xf32>
    %27 = arith.mulf %24, %26 : vector<64x128xf32>
    %c0_15 = arith.constant 0 : index
    %c0_16 = arith.constant 0 : index
    %28 = vector.load %arg4[%c0_15, %c0_16] : memref<1x128xf32, #tpu.memory_space<vmem>>, vector<1x128xf32>
    %29 = vector.broadcast %28 : vector<1x128xf32> to vector<64x128xf32>
    %30 = arith.addf %27, %29 : vector<64x128xf32>
    %cst_17 = arith.constant 0.000000e+00 : f32
    %31 = vector.broadcast %cst_17 : f32 to vector<64x128xf32>
    %32 = arith.maximumf %30, %31 : vector<64x128xf32>
    %cst_18 = arith.constant 0.000000e+00 : bf16
    %33 = vector.broadcast %cst_18 : bf16 to vector<10x10x160xbf16>
    %c0_19 = arith.constant 0 : index
    %c0_20 = arith.constant 0 : index
    %c0_21 = arith.constant 0 : index
    %34 = vector.load %arg11[%c0_19, %c0_20, %c0_21] : memref<10x10x160xbf16, #tpu.memory_space<vmem>>, vector<10x10x160xbf16>
    tpu.vector_store %arg11[%c0_19, %c0_20, %c0_21], %33 {strides = array<i32>} : memref<10x10x160xbf16, #tpu.memory_space<vmem>>, vector<10x10x160xbf16>,
    %35 = arith.truncf %32 : vector<64x128xf32> to vector<64x128xbf16>
    %36 = vector.shape_cast %35 : vector<64x128xbf16> to vector<8x8x128xbf16>
    %37 = vector.extract_strided_slice %36 {offsets = [0, 0, 0], sizes = [8, 8, 64], strides = [1, 1, 1]} : vector<8x8x128xbf16> to vector<8x8x64xbf16>
    %c1 = arith.constant 1 : index
    %c1_22 = arith.constant 1 : index
    %c8 = arith.constant 8 : index
    %38 = vector.load %arg11[%c1, %c1_22, %c8] : memref<10x10x160xbf16, #tpu.memory_space<vmem>>, vector<8x8x64xbf16>
    tpu.vector_store %arg11[%c1, %c1_22, %c8], %37 {strides = array<i32>} : memref<10x10x160xbf16, #tpu.memory_space<vmem>>, vector<8x8x64xbf16>,
    %39 = vector.extract_strided_slice %36 {offsets = [0, 0, 64], sizes = [8, 8, 64], strides = [1, 1, 1]} : vector<8x8x128xbf16> to vector<8x8x64xbf16>
    %c1_23 = arith.constant 1 : index
    %c1_24 = arith.constant 1 : index
    %c88 = arith.constant 88 : index
    %40 = vector.load %arg11[%c1_23, %c1_24, %c88] : memref<10x10x160xbf16, #tpu.memory_space<vmem>>, vector<8x8x64xbf16>
    tpu.vector_store %arg11[%c1_23, %c1_24, %c88], %39 {strides = array<i32>} : memref<10x10x160xbf16, #tpu.memory_space<vmem>>, vector<8x8x64xbf16>,
    %c0_25 = arith.constant 0 : index
    %c0_26 = arith.constant 0 : index
    %c0_27 = arith.constant 0 : index
    %41 = vector.load %arg11[%c0_25, %c0_26, %c0_27] : memref<10x10x160xbf16, #tpu.memory_space<vmem>>, vector<10x10x160xbf16>
    %42 = vector.extract_strided_slice %41 {offsets = [0, 0, 0], sizes = [10, 8, 160], strides = [1, 1, 1]} : vector<10x10x160xbf16> to vector<10x8x160xbf16>
    %43 = vector.extract_strided_slice %41 {offsets = [0, 1, 0], sizes = [10, 8, 160], strides = [1, 1, 1]} : vector<10x10x160xbf16> to vector<10x8x160xbf16>
    %44 = vector.extract_strided_slice %41 {offsets = [0, 2, 0], sizes = [10, 8, 160], strides = [1, 1, 1]} : vector<10x10x160xbf16> to vector<10x8x160xbf16>
    %45 = tpu.concatenate %42, %43, %44 in 2 : vector<10x8x160xbf16>, vector<10x8x160xbf16>, vector<10x8x160xbf16> -> vector<10x8x480xbf16>
    %46 = vector.extract_strided_slice %45 {offsets = [0, 0, 0], sizes = [8, 8, 480], strides = [1, 1, 1]} : vector<10x8x480xbf16> to vector<8x8x480xbf16>
    %47 = vector.extract_strided_slice %45 {offsets = [1, 0, 0], sizes = [8, 8, 480], strides = [1, 1, 1]} : vector<10x8x480xbf16> to vector<8x8x480xbf16>
    %48 = vector.extract_strided_slice %45 {offsets = [2, 0, 0], sizes = [8, 8, 480], strides = [1, 1, 1]} : vector<10x8x480xbf16> to vector<8x8x480xbf16>
    %49 = tpu.concatenate %46, %47, %48 in 2 : vector<8x8x480xbf16>, vector<8x8x480xbf16>, vector<8x8x480xbf16> -> vector<8x8x1440xbf16>
    %50 = vector.shape_cast %49 : vector<8x8x1440xbf16> to vector<64x1440xbf16>
    %c0_28 = arith.constant 0 : index
    %c0_29 = arith.constant 0 : index
    %51 = vector.load %arg5[%c0_28, %c0_29] : memref<1440x128xbf16, #tpu.memory_space<vmem>>, vector<1440x128xbf16>
    %cst_30 = arith.constant dense<0.000000e+00> : vector<64x128xf32>
    %52 = tpu.matmul %50, %51, %cst_30 {dimension_numbers = #tpu.dot_dimension_numbers<[1], [0], [0], [1], [0, 0, 1, 1], [], []>} : vector<64x1440xbf16>, vector<1440x128xbf16>, vector<64x128xf32> -> vector<64x128xf32>
    %c0_31 = arith.constant 0 : index
    %c0_32 = arith.constant 0 : index
    %53 = vector.load %arg6[%c0_31, %c0_32] : memref<1x128xf32, #tpu.memory_space<vmem>>, vector<1x128xf32>
    %54 = vector.broadcast %53 : vector<1x128xf32> to vector<64x128xf32>
    %55 = arith.mulf %52, %54 : vector<64x128xf32>
    %c0_33 = arith.constant 0 : index
    %c0_34 = arith.constant 0 : index
    %56 = vector.load %arg7[%c0_33, %c0_34] : memref<1x128xf32, #tpu.memory_space<vmem>>, vector<1x128xf32>
    %57 = vector.broadcast %56 : vector<1x128xf32> to vector<64x128xf32>
    %58 = arith.addf %55, %57 : vector<64x128xf32>
    %cst_35 = arith.constant 0.000000e+00 : f32
    %59 = vector.broadcast %cst_35 : f32 to vector<64x128xf32>
    %60 = arith.maximumf %58, %59 : vector<64x128xf32>
    %c0_36 = arith.constant 0 : index
    %c0_37 = arith.constant 0 : index
    %61 = vector.load %arg8[%c0_36, %c0_37] : memref<128x64xf32, #tpu.memory_space<vmem>>, vector<128x64xf32>
    %cst_38 = arith.constant dense<0.000000e+00> : vector<64x64xf32>
    %62 = tpu.matmul %60, %61, %cst_38 {dimension_numbers = #tpu.dot_dimension_numbers<[1], [0], [0], [1], [0, 0, 1, 1], [], []>} : vector<64x128xf32>, vector<128x64xf32>, vector<64x64xf32> -> vector<64x64xf32>
    %63 = arith.negf %62 : vector<64x64xf32>
    %64 = math.exp %63 : vector<64x64xf32>
    %cst_39 = arith.constant 1.000000e+00 : f32
    %65 = vector.broadcast %cst_39 : f32 to vector<64x64xf32>
    %66 = arith.addf %65, %64 : vector<64x64xf32>
    %67 = arith.divf %65, %66 : vector<64x64xf32>
    %68 = vector.extract_strided_slice %32 {offsets = [0, 0], sizes = [64, 64], strides = [1, 1]} : vector<64x128xf32> to vector<64x64xf32>
    %69 = arith.mulf %67, %68 : vector<64x64xf32>
    %cst_40 = arith.constant 1.000000e+00 : f32
    %70 = vector.broadcast %cst_40 : f32 to vector<64x64xf32>
    %71 = arith.subf %70, %67 : vector<64x64xf32>
    %72 = vector.extract_strided_slice %32 {offsets = [0, 64], sizes = [64, 64], strides = [1, 1]} : vector<64x128xf32> to vector<64x64xf32>
    %73 = arith.mulf %71, %72 : vector<64x64xf32>
    %74 = arith.addf %69, %73 : vector<64x64xf32>
    %c0_41 = arith.constant 0 : index
    %c0_42 = arith.constant 0 : index
    %c0_43 = arith.constant 0 : index
    %75 = vector.load %arg9[%c0_41, %c0_42, %c0_43] : memref<1x64x64xf32, #tpu.memory_space<vmem>>, vector<1x64x64xf32>
    %76 = vector.shape_cast %75 : vector<1x64x64xf32> to vector<64x64xf32>
    %77 = vector.shape_cast %74 : vector<64x64xf32> to vector<1x64x64xf32>
    tpu.vector_store %arg9[%c0_41, %c0_42, %c0_43], %77 {strides = array<i32>} : memref<1x64x64xf32, #tpu.memory_space<vmem>>, vector<1x64x64xf32>,
    return
  }
  func.func @transform_0(%arg0: i32) -> (i32, i32, i32, i32) {
    %c0_i32 = arith.constant 0 : i32
    %c0_i32_0 = arith.constant 0 : i32
    %c0_i32_1 = arith.constant 0 : i32
    %c0_i32_2 = arith.constant 0 : i32
    return %arg0, %c0_i32, %c0_i32_0, %c0_i32_1 : i32, i32, i32, i32
  }
  func.func @transform_1(%arg0: i32) -> (i32, i32) {
    %c0_i32 = arith.constant 0 : i32
    %c0_i32_0 = arith.constant 0 : i32
    %c0_i32_1 = arith.constant 0 : i32
    return %c0_i32, %c0_i32_0 : i32, i32
  }
  func.func @transform_2(%arg0: i32) -> (i32, i32) {
    %c0_i32 = arith.constant 0 : i32
    %c0_i32_0 = arith.constant 0 : i32
    %c0_i32_1 = arith.constant 0 : i32
    return %c0_i32, %c0_i32_0 : i32, i32
  }
  func.func @transform_3(%arg0: i32) -> (i32, i32) {
    %c0_i32 = arith.constant 0 : i32
    %c0_i32_0 = arith.constant 0 : i32
    %c0_i32_1 = arith.constant 0 : i32
    return %c0_i32, %c0_i32_0 : i32, i32
  }
  func.func @transform_4(%arg0: i32) -> (i32, i32) {
    %c0_i32 = arith.constant 0 : i32
    %c0_i32_0 = arith.constant 0 : i32
    %c0_i32_1 = arith.constant 0 : i32
    return %c0_i32, %c0_i32_0 : i32, i32
  }
  func.func @transform_5(%arg0: i32) -> (i32, i32) {
    %c0_i32 = arith.constant 0 : i32
    %c0_i32_0 = arith.constant 0 : i32
    %c0_i32_1 = arith.constant 0 : i32
    return %c0_i32, %c0_i32_0 : i32, i32
  }
  func.func @transform_6(%arg0: i32) -> (i32, i32) {
    %c0_i32 = arith.constant 0 : i32
    %c0_i32_0 = arith.constant 0 : i32
    %c0_i32_1 = arith.constant 0 : i32
    return %c0_i32, %c0_i32_0 : i32, i32
  }
  func.func @transform_7(%arg0: i32) -> (i32, i32) {
    %c0_i32 = arith.constant 0 : i32
    %c0_i32_0 = arith.constant 0 : i32
    %c0_i32_1 = arith.constant 0 : i32
    return %c0_i32, %c0_i32_0 : i32, i32
  }
  func.func @transform_8(%arg0: i32) -> (i32, i32, i32) {
    %c0_i32 = arith.constant 0 : i32
    %c0_i32_0 = arith.constant 0 : i32
    %c0_i32_1 = arith.constant 0 : i32
    return %arg0, %c0_i32, %c0_i32_0 : i32, i32, i32
  }
}

</mosaic_0001>

<bundles_post_ra>
// kernel: tile.33
= control target key start
LH: loop header
LB: loop body
LE: loop exit
PB: predicated region body
PF: predicated region fallthrough
CT: control target
= control target key end

     0   :  { %s22_s0 = inlined_call_operand.vmem [shape: f32[8], index: 0, kind: input, shape index: {}]   ;;  %s23_s1 = inlined_call_operand.vmem [shape: f32[8,8], index: 1, kind: output, shape index: {}]  }
   0x1   :  { %v4_v0 = vld [vmem:[%s22_s0] ss:$0 sm:$0xff] }
   0x2   :  { %5 = vst [vmem:[%s23_s1] sm:$0xff] %v4_v0 }

// kernel: tile.34
= control target key start
LH: loop header
LB: loop body
LE: loop exit
PB: predicated region body
PF: predicated region fallthrough
CT: control target
= control target key end

     0   :  { %s67_s10 = smov 56   ;;  %s68_s11 = smov 40   ;;  %vm3_vm0 = vcmask 64512   ;;  %vm9_vm1 = vcmask 523712   ;;  %vm15_vm2 = vcmask 458112   ;;  %vm21_vm3 = vcmask 392512   ;;  %s111_s0 = inlined_call_operand.vmem [shape: f32[8,8], index: 0, kind: input, shape index: {}]   ;;  %s112_s1 = inlined_call_operand.vmem [shape: f32[64], index: 1, kind: output, shape index: {}]  }
   0x1   :  { %v53_v0 = vld [vmem:[%s111_s0 + $0x7] sm:$0x1]   ;;  %v55_v1 = vld [vmem:[%s111_s0 + $0x5] sm:$0x1]   ;;  %v54_v2 = vld [vmem:[%s111_s0 + $0x6] sm:$0x1]  }
   0x2   :  { %7 = vrot.lane.b32.xlu0 %v53_v0, %s67_s10  ;;  %19 = vrot.lane.b32.xlu1 %v55_v1, %s68_s11  ;;  %v56_v3 = vld [vmem:[%s111_s0 + $0x4] sm:$0x1]   ;;  %v2_v4 = vld [vmem:[%s111_s0] sm:$0x1]   ;;  %s69_s18 = smov 48   ;;  %s70_s19 = smov 32  }
   0x3   :  { %4 = vst.msk [vmem:[#allocation0] sm:$0x1] %vm3_vm0, %v2_v4   ;;  %v57_v5 = vld [vmem:[%s111_s0 + $0x3] sm:$0x1]   ;;  %v58_v6 = vld [vmem:[%s111_s0 + $0x2] sm:$0x1]  }
   0x4   :  { %s71_s24 = smov 24   ;;  %s72_s25 = smov 16   ;;  %v59_v7 = vld [vmem:[%s111_s0 + $0x1] sm:$0x1]   ;;  %vm27_vm4 = vcmask 326912   ;;  %vm33_vm5 = vcmask 261312  }
   0x5   :  { %s73_s0 = smov 8   ;;  %vm39_vm6 = vcmask 195712   ;;  %vm45_vm7 = vcmask 130112  }
   0x6   :  { %13 = vrot.lane.b32.xlu0 %v54_v2, %s69_s18  ;;  %25 = vrot.lane.b32.xlu1 %v56_v3, %s70_s19 }
   0xa   :  { %31 = vrot.lane.b32.xlu0 %v57_v5, %s71_s24  ;;  %37 = vrot.lane.b32.xlu1 %v58_v6, %s72_s25 }
   0xe   :  { %43 = vrot.lane.b32.xlu0 %v59_v7, %s73_s0 }
  0x74   :  { %v8_v8 = vpop.permute.xlu0 %7   ;;  %v20_v9 = vpop.permute.xlu1 %19  }
  0x75   :  { %10 = vst.msk [vmem:[#allocation0] sm:$0x1] %vm9_vm1, %v8_v8  }
  0x78   :  { %v14_v10 = vpop.permute.xlu0 %13   ;;  %v26_v11 = vpop.permute.xlu1 %25  }
  0x79   :  { %16 = vst.msk [vmem:[#allocation0] sm:$0x1] %vm15_vm2, %v14_v10  }
  0x7a   :  { %22 = vst.msk [vmem:[#allocation0] sm:$0x1] %vm21_vm3, %v20_v9  }
  0x7b   :  { %28 = vst.msk [vmem:[#allocation0] sm:$0x1] %vm27_vm4, %v26_v11  }
  0x7c   :  { %v32_v12 = vpop.permute.xlu0 %31   ;;  %v38_v13 = vpop.permute.xlu1 %37  }
  0x7d   :  { %34 = vst.msk [vmem:[#allocation0] sm:$0x1] %vm33_vm5, %v32_v12  }
  0x7e   :  { %40 = vst.msk [vmem:[#allocation0] sm:$0x1] %vm39_vm6, %v38_v13  }
  0x80   :  { %v44_v14 = vpop.permute.xlu0 %43  }
  0x81   :  { %46 = vst.msk [vmem:[#allocation0] sm:$0x1] %vm45_vm7, %v44_v14  }
  0x88   :  { %v50_v15 = vld [vmem:[#allocation0] sm:$0x1] }
  0x89   :  { %52 = vst [vmem:[%s112_s1] sm:$0x1] %v50_v15 }

// kernel: tile.53
= control target key start
LH: loop header
LB: loop body
LE: loop exit
PB: predicated region body
PF: predicated region fallthrough
CT: control target
= control target key end

     0   :  { %s22_s0 = inlined_call_operand.vmem [shape: f32[16], index: 0, kind: input, shape index: {}]   ;;  %s23_s1 = inlined_call_operand.vmem [shape: f32[8,16], index: 1, kind: output, shape index: {}]  }
   0x1   :  { %v4_v0 = vld [vmem:[%s22_s0] ss:$0 sm:$0xff] }
   0x2   :  { %5 = vst [vmem:[%s23_s1] sm:$0xff] %v4_v0 }

// kernel: tile.54
= control target key start
LH: loop header
LB: loop body
LE: loop exit
PB: predicated region body
PF: predicated region fallthrough
CT: control target
= control target key end

     0   :  { %s67_s10 = smov 112   ;;  %s68_s11 = smov 80   ;;  %vm3_vm0 = vcmask 130048   ;;  %vm9_vm1 = vcmask 1048448   ;;  %vm15_vm2 = vcmask 917248   ;;  %vm21_vm3 = vcmask 786048   ;;  %s111_s0 = inlined_call_operand.vmem [shape: f32[8,16], index: 0, kind: input, shape index: {}]   ;;  %s112_s1 = inlined_call_operand.vmem [shape: f32[1,128], index: 1, kind: output, shape index: {}]  }
   0x1   :  { %v53_v0 = vld [vmem:[%s111_s0 + $0x7] sm:$0x1]   ;;  %v55_v1 = vld [vmem:[%s111_s0 + $0x5] sm:$0x1]   ;;  %v54_v2 = vld [vmem:[%s111_s0 + $0x6] sm:$0x1]  }
   0x2   :  { %7 = vrot.lane.b32.xlu0 %v53_v0, %s67_s10  ;;  %19 = vrot.lane.b32.xlu1 %v55_v1, %s68_s11  ;;  %v56_v3 = vld [vmem:[%s111_s0 + $0x4] sm:$0x1]   ;;  %v2_v4 = vld [vmem:[%s111_s0] sm:$0x1]   ;;  %s69_s18 = smov 96   ;;  %s70_s19 = smov 64  }
   0x3   :  { %4 = vst.msk [vmem:[#allocation0] sm:$0x1] %vm3_vm0, %v2_v4   ;;  %v57_v5 = vld [vmem:[%s111_s0 + $0x3] sm:$0x1]   ;;  %v58_v6 = vld [vmem:[%s111_s0 + $0x2] sm:$0x1]  }
   0x4   :  { %s71_s24 = smov 48   ;;  %s72_s25 = smov 32   ;;  %v59_v7 = vld [vmem:[%s111_s0 + $0x1] sm:$0x1]   ;;  %vm27_vm4 = vcmask 654848   ;;  %vm33_vm5 = vcmask 523648  }
   0x5   :  { %s73_s0 = smov 16   ;;  %vm39_vm6 = vcmask 392448   ;;  %vm45_vm7 = vcmask 261248  }
   0x6   :  { %13 = vrot.lane.b32.xlu0 %v54_v2, %s69_s18  ;;  %25 = vrot.lane.b32.xlu1 %v56_v3, %s70_s19 }
   0xa   :  { %31 = vrot.lane.b32.xlu0 %v57_v5, %s71_s24  ;;  %37 = vrot.lane.b32.xlu1 %v58_v6, %s72_s25 }
   0xe   :  { %43 = vrot.lane.b32.xlu0 %v59_v7, %s73_s0 }
  0x74   :  { %v8_v8 = vpop.permute.xlu0 %7   ;;  %v20_v9 = vpop.permute.xlu1 %19  }
  0x75   :  { %10 = vst.msk [vmem:[#allocation0] sm:$0x1] %vm9_vm1, %v8_v8  }
  0x78   :  { %v14_v10 = vpop.permute.xlu0 %13   ;;  %v26_v11 = vpop.permute.xlu1 %25  }
  0x79   :  { %16 = vst.msk [vmem:[#allocation0] sm:$0x1] %vm15_vm2, %v14_v10  }
  0x7a   :  { %22 = vst.msk [vmem:[#allocation0] sm:$0x1] %vm21_vm3, %v20_v9  }
  0x7b   :  { %28 = vst.msk [vmem:[#allocation0] sm:$0x1] %vm27_vm4, %v26_v11  }
  0x7c   :  { %v32_v12 = vpop.permute.xlu0 %31   ;;  %v38_v13 = vpop.permute.xlu1 %37  }
  0x7d   :  { %34 = vst.msk [vmem:[#allocation0] sm:$0x1] %vm33_vm5, %v32_v12  }
  0x7e   :  { %40 = vst.msk [vmem:[#allocation0] sm:$0x1] %vm39_vm6, %v38_v13  }
  0x80   :  { %v44_v14 = vpop.permute.xlu0 %43  }
  0x81   :  { %46 = vst.msk [vmem:[#allocation0] sm:$0x1] %vm45_vm7, %v44_v14  }
  0x88   :  { %v50_v15 = vld [vmem:[#allocation0] sm:$0x1] }
  0x89   :  { %52 = vst [vmem:[%s112_s1] sm:$0x1] %v50_v15 }

// kernel: visfuser_forward.1
= control target key start
LH: loop header
LB: loop body
LE: loop exit
PB: predicated region body
PF: predicated region fallthrough
CT: control target
= control target key end

     0   :  { %s12561_s27 = smov 0   ;;  %s17340_s0 = inlined_call_operand.vmem [shape: bf16[2,8,8,64], index: 0, kind: input, shape index: {}]   ;;  %s17341_s1 = inlined_call_operand.vmem [shape: bf16[5488,128], index: 1, kind: input, shape index: {}]   ;;  %s17342_s2 = inlined_call_operand.vmem [shape: f32[1,128], index: 2, kind: input, shape index: {}]   ;;  %s17343_s3 = inlined_call_operand.vmem [shape: f32[1,128], index: 3, kind: input, shape index: {}]   ;;  %s17344_s4 = inlined_call_operand.vmem [shape: bf16[1440,128], index: 4, kind: input, shape index: {}]   ;;  %s17345_s5 = inlined_call_operand.vmem [shape: f32[1,128], index: 5, kind: input, shape index: {}]   ;;  %s17346_s6 = inlined_call_operand.vmem [shape: f32[1,128], index: 6, kind: input, shape index: {}]   ;;  %s17347_s7 = inlined_call_operand.vmem [shape: f32[128,64], index: 7, kind: input, shape index: {}]   ;;  %s17348_s8 = inlined_call_operand.vmem [shape: f32[2,64,64], index: 8, kind: output, shape index: {}]  }
   0x1 LB: > { %s10034_s28 = sadd.s32 4294967295, %s12504_s27   ;;  %p10038_p0 = scmp.ge.s32.totalorder %s12504_s27, 1  ;;  %s12504_s27 = sphi %s12561_s27, %s18_s27  }
   0x2   : > { %p262_p1 = scmp.lt.s32.totalorder %s12504_s27, 3 }
   0x4   : > { %p263_p2 = pnand %p10038_p0, %p262_p1 }
   0x6   : > { %266 = sbr.rel (%p263_p2) target bundleno = 2335 (0x91f), region = 52 }
   0xd   : > { %p12571_p3 = scmp.lt.s32.totalorder %s10034_s28, 1  ;;  %vm307_vm0 = vcmask 912384   ;;  %vm309_vm1 = vcmask 911360   ;;  %v17349_v0 = vmov 0   ;;  %s12507_s12 = smov 24   ;;  %v11999_v29 = vld [vmem:[%s17341_s1 + $0x40] sm:$0xff]  }
   0xe   : > { %313 = vst.msk [vmem:[#allocation2 + $0x10] sm:$0xf] %vm307_vm0, %v17349_v0  ;;  %308 = vst.msk [vmem:[#allocation2] sm:$0xf] %vm307_vm0, %v17349_v0  ;;  %v12000_v32 = vld [vmem:[%s17341_s1] sm:$0xff]   ;;  %10789 = vmatprep.subr.bf16.mxu0 %v11999_v29  ;;  %v12001_v48 = vld [vmem:[%s17341_s1 + $0x48] sm:$0xff]  }
   0xf   : > { %314 = vst.msk [vmem:[#allocation2 + $0x14] sm:$0x7] %vm309_vm1, %v17349_v0  ;;  %310 = vst.msk [vmem:[#allocation2 + $0x4] sm:$0x7] %vm309_vm1, %v17349_v0  ;;  %s17694_s28 = smov (!%p12571_p3, %s10034_s28), 1  ;;  %10790 = vmatpush3.bf16.msra.mxu0 %v12000_v32  ;;  %v12002_v49 = vld [vmem:[%s17341_s1 + $0x8] sm:$0xff]  }
  0x10   : > { %311 = vst.msk [vmem:[#allocation2 + $0x8] sm:$0xf] %vm307_vm0, %v17349_v0  ;;  %315 = vst.msk [vmem:[#allocation2 + $0x18] sm:$0xf] %vm307_vm0, %v17349_v0  ;;  %s10779_s30 = sshll.u32 %s17694_s28, 5  ;;  %v12003_v50 = vld [vmem:[%s17341_s1 + $0x50] sm:$0xff]   ;;  %10791 = vmatprep.subr.bf16.mxu0 %v12001_v48 }
  0x11   : > { %312 = vst.msk [vmem:[#allocation2 + $0xc] sm:$0x7] %vm309_vm1, %v17349_v0  ;;  %316 = vst.msk [vmem:[#allocation2 + $0x1c] sm:$0x7] %vm309_vm1, %v17349_v0  ;;  %s12641_s11 = scalar_lea.vmem %s17340_s0, %s10779_s30  ;;  %v12004_v51 = vld [vmem:[%s17341_s1 + $0xc0] sm:$0xff]   ;;  %v12005_v57 = vld [vmem:[%s17341_s1 + $0x10] sm:$0xff]  }
  0x12   : > { %317 = vst.msk [vmem:[#allocation2 + $0x20] sm:$0xf] %vm307_vm0, %v17349_v0  ;;  %319 = vst.msk [vmem:[#allocation2 + $0x28] sm:$0xf] %vm307_vm0, %v17349_v0  ;;  %v338_v1 = vld [vmem:[%s12641_s11 + $0x4] sm:$0xf]  ;;  %10829 = vmatprep.subr.bf16.mxu1 %v12004_v51 }
  0x13   : > { %318 = vst.msk [vmem:[#allocation2 + $0x24] sm:$0x7] %vm309_vm1, %v17349_v0  ;;  %320 = vst.msk [vmem:[#allocation2 + $0x2c] sm:$0x7] %vm309_vm1, %v17349_v0  ;;  %v337_v2 = vld [vmem:[%s12641_s11] sm:$0xf]  ;;  %10792 = vmatpush3.bf16.msra.mxu0 %v12002_v49 }
  0x14   : > { %321 = vst.msk [vmem:[#allocation2 + $0x30] sm:$0xf] %vm307_vm0, %v17349_v0  ;;  %323 = vst.msk [vmem:[#allocation2 + $0x38] sm:$0xf] %vm307_vm0, %v17349_v0  ;;  %v339_v3 = vld [vmem:[%s12641_s11 + $0x8] sm:$0xf]  ;;  %10793 = vmatprep.subr.bf16.mxu0 %v12003_v50 }
  0x15   : > { %322 = vst.msk [vmem:[#allocation2 + $0x34] sm:$0x7] %vm309_vm1, %v17349_v0  ;;  %324 = vst.msk [vmem:[#allocation2 + $0x3c] sm:$0x7] %vm309_vm1, %v17349_v0  ;;  %v355_v4 = vshrl.u32 %v338_v1, 16  ;;  %v358_v5 = vshll.u32 %v338_v1, 16 }
  0x16   : > { %325 = vst.msk [vmem:[#allocation2 + $0x40] sm:$0xf] %vm307_vm0, %v17349_v0  ;;  %327 = vst.msk [vmem:[#allocation2 + $0x48] sm:$0xf] %vm307_vm0, %v17349_v0  ;;  %v346_v6 = vshrl.u32 %v337_v2, 16  ;;  %v349_v7 = vshll.u32 %v337_v2, 16 }
  0x17   : > { %326 = vst.msk [vmem:[#allocation2 + $0x44] sm:$0x7] %vm309_vm1, %v17349_v0  ;;  %328 = vst.msk [vmem:[#allocation2 + $0x4c] sm:$0x7] %vm309_vm1, %v17349_v0  ;;  %v340_v8 = vld [vmem:[%s12641_s11 + $0xc] sm:$0xf]  ;;  %10794 = vmatpush3.bf16.msra.mxu0 %v12005_v57 }
  0x18   : > { %329 = vst.msk [vmem:[#allocation2 + $0x50] sm:$0xf] %vm307_vm0, %v17349_v0  ;;  %331 = vst.msk [vmem:[#allocation2 + $0x58] sm:$0xf] %vm307_vm0, %v17349_v0  ;;  %v364_v9 = vshrl.u32 %v339_v3, 16  ;;  %v367_v10 = vshll.u32 %v339_v3, 16 }
  0x19   : > { %330 = vst.msk [vmem:[#allocation2 + $0x54] sm:$0x7] %vm309_vm1, %v17349_v0  ;;  %332 = vst.msk [vmem:[#allocation2 + $0x5c] sm:$0x7] %vm309_vm1, %v17349_v0  ;;  %v373_v11 = vshrl.u32 %v340_v8, 16  ;;  %v376_v12 = vshll.u32 %v340_v8, 16 }
  0x1a   : > { %333 = vst.msk [vmem:[#allocation2 + $0x60] sm:$0xf] %vm307_vm0, %v17349_v0  ;;  %335 = vst.msk [vmem:[#allocation2 + $0x68] sm:$0xf] %vm307_vm0, %v17349_v0  ;;  %v357_v13 = vrot.slane %v355_v4, 6  ;;  %v360_v14 = vrot.slane %v358_v5, 7 }
  0x1b   : > { %334 = vst.msk [vmem:[#allocation2 + $0x64] sm:$0x7] %vm309_vm1, %v17349_v0  ;;  %336 = vst.msk [vmem:[#allocation2 + $0x6c] sm:$0x7] %vm309_vm1, %v17349_v0  ;;  %v348_v15 = vrot.slane %v346_v6, 6  ;;  %v351_v16 = vrot.slane %v349_v7, 7 }
  0x1c   : > { %v366_v17 = vrot.slane %v364_v9, 6  ;;  %v369_v18 = vrot.slane %v367_v10, 7  ;;  %v341_v19 = vld [vmem:[%s12641_s11 + $0x10] sm:$0xf]  ;;  %v361_v20 = vor.u32 %v360_v14, %v357_v13  ;;  %v375_v22 = vrot.slane %v373_v11, 6  ;;  %v12006_v63 = vld [vmem:[%s17341_s1 + $0x80] sm:$0xff]  }
  0x1d   : > { %v352_v21 = vor.u32 %v351_v16, %v348_v15  ;;  %v378_v23 = vrot.slane %v376_v12, 7  ;;  %v382_v26 = vshrl.u32 %v341_v19, 16  ;;  %v385_v27 = vshll.u32 %v341_v19, 16  ;;  %v342_v28 = vld [vmem:[%s12641_s11 + $0x14] sm:$0xf]  ;;  %10830 = vmatpush3.bf16.msra.mxu1 %v12006_v63  ;;  %v12007_v5 = vld [vmem:[%s17341_s1 + $0x58] sm:$0xff]  }
  0x1e   : > { %421 = vrot.lane.b32.xlu1 %v361_v20, %s12507_s12  ;;  %v362_v24 = vrot.slane %v361_v20, 4  ;;  %v370_v25 = vor.u32 %v369_v18, %v366_v17  ;;  %v391_v30 = vshrl.u32 %v342_v28, 16  ;;  %v394_v31 = vshll.u32 %v342_v28, 16  ;;  %v524_v37 = vld [vmem:[#allocation2 + $0x10] sm:$0xf]  ;;  %v12008_v7 = vld [vmem:[%s17341_s1 + $0xc8] sm:$0xff]   ;;  %10795 = vmatprep.subr.bf16.mxu0 %v12007_v5 }
  0x1f   : > { %417 = vrot.lane.b32.xlu0 %v352_v21, %s12507_s12  ;;  %v379_v34 = vor.u32 %v378_v23, %v375_v22  ;;  %v384_v35 = vrot.slane %v382_v26, 6  ;;  %v387_v36 = vrot.slane %v385_v27, 7  ;;  %v525_v38 = vld [vmem:[#allocation2 + $0x14] sm:$0x7]  ;;  %v522_v39 = vld [vmem:[#allocation2 + $0x8] sm:$0xf]  ;;  %10831 = vmatprep.subr.bf16.mxu1 %v12008_v7 }
  0x20   : > { %v371_v33 = vrot.slane %v370_v25, 4  ;;  %v523_v40 = vld [vmem:[#allocation2 + $0xc] sm:$0x7]  ;;  %v353_v41 = vrot.slane %v352_v21, 4  ;;  %v393_v42 = vrot.slane %v391_v30, 6  ;;  %v396_v43 = vrot.slane %v394_v31, 7 }
  0x21   : > { %v380_v44 = vrot.slane %v379_v34, 4  ;;  %v388_v45 = vor.u32 %v387_v36, %v384_v35  ;;  %v12661_v46 = vcombine.low %v524_v37, %v525_v38  ;;  %v12663_v47 = vcombine.low %v522_v39, %v523_v40  ;;  %v343_v53 = vld [vmem:[%s12641_s11 + $0x18] sm:$0xf]  ;;  %v520_v61 = vld [vmem:[#allocation2] sm:$0xf]  ;;  %v12010_v13 = vld [vmem:[%s17341_s1 + $0x88] sm:$0xff]  }
  0x22   : > { %423 = vrot.lane.b32.xlu1 %v362_v24, %s12507_s12  ;;  %v397_v52 = vor.u32 %v396_v43, %v393_v42  ;;  %v400_v59 = vshrl.u32 %v343_v53, 16  ;;  %v403_v60 = vshll.u32 %v343_v53, 16  ;;  %v521_v62 = vld [vmem:[#allocation2 + $0x4] sm:$0x7]  ;;  %v12009_v12 = vld [vmem:[%s17341_s1 + $0x18] sm:$0xff]   ;;  %10832 = vmatpush3.bf16.msra.mxu1 %v12010_v13  ;;  %v12012_v15 = vld [vmem:[%s17341_s1 + $0xd0] sm:$0xff]  }
  0x23   : > { %425 = vrot.lane.b32.xlu0 %v370_v25, %s12507_s12  ;;  %v389_v54 = vrot.slane %v388_v45, 4  ;;  %v12681_v55 = vshll.u32 %v12661_v46, 16  ;;  %v12684_v56 = vshll.u32 %v12663_v47, 16  ;;  %v12690_v58 = vshrl.u32 %v12661_v46, 16  ;;  %10796 = vmatpush3.bf16.msra.mxu0 %v12009_v12  ;;  %v12011_v14 = vld [vmem:[%s17341_s1 + $0x60] sm:$0xff]   ;;  %s12508_s23 = smov 112  }
  0x24   : > { %v398_v1 = vrot.slane %v397_v52, 4  ;;  %v12696_v2 = vshrl.u32 %v12663_v47, 16  ;;  %v12705_v6 = vcombine.low %v520_v61, %v521_v62  ;;  %v402_v10 = vrot.slane %v400_v59, 6  ;;  %v12013_v20 = vld [vmem:[%s17341_s1 + $0x20] sm:$0xff]   ;;  %10797 = vmatprep.subr.bf16.mxu0 %v12011_v14  ;;  %10833 = vmatprep.subr.bf16.mxu1 %v12012_v15  ;;  %v12014_v21 = vld [vmem:[%s17341_s1 + $0x90] sm:$0xff]   ;;  %v12015_v22 = vld [vmem:[%s17341_s1 + $0x68] sm:$0xff]  }
  0x25   : > { %v637_v3 = vrot.slane %v12681_v55, 1  ;;  %v630_v4 = vrot.slane %v12684_v56, 1  ;;  %v405_v11 = vrot.slane %v403_v60, 7  ;;  %v746_v16 = vrot.slane %v12661_v46, 1  ;;  %v12016_v24 = vld [vmem:[%s17341_s1 + $0xd8] sm:$0xff]   ;;  %s12509_s14 = smov 96  }
  0x26   : > { %427 = vrot.lane.b32.xlu1 %v371_v33, %s12507_s12  ;;  %v745_v17 = vrot.slane %v12663_v47, 1  ;;  %v12731_v19 = vshll.u32 %v12705_v6, 16  ;;  %v12743_v23 = vshrl.u32 %v12705_v6, 16  ;;  %10834 = vmatpush3.bf16.msra.mxu1 %v12014_v21  ;;  %v12017_v27 = vld [vmem:[%s17341_s1 + $0x28] sm:$0xff]   ;;  %v744_v28 = vrot.slane %v12705_v6, 1  ;;  %v12018_v29 = vld [vmem:[%s17341_s1 + $0x98] sm:$0xff]  }
  0x27   : > { %429 = vrot.lane.b32.xlu0 %v379_v34, %s12507_s12  ;;  %v638_v8 = vor.u32 %v637_v3, %v12690_v58  ;;  %v631_v9 = vor.u32 %v630_v4, %v12696_v2  ;;  %v406_v18 = vor.u32 %v405_v11, %v402_v10  ;;  %10798 = vmatpush3.bf16.msra.mxu0 %v12013_v20  ;;  %v789_v30 = vrot.slane %v12696_v2, 1  ;;  %v12019_v31 = vld [vmem:[%s17341_s1 + $0x70] sm:$0xff]   ;;  %v12020_v36 = vld [vmem:[%s17341_s1 + $0xe0] sm:$0xff]   ;;  %v12024_v39 = vld [vmem:[%s17341_s1 + $0x78] sm:$0xff]   ;;  %s12510_s21 = smov 80   ;;  %s12511_s30 = smov 64  }
  0x28   : > { %v623_v26 = vrot.slane %v12731_v19, 1  ;;  %10799 = vmatprep.subr.bf16.mxu0 %v12015_v22  ;;  %10835 = vmatprep.subr.bf16.mxu1 %v12016_v24  ;;  %v790_v33 = vrot.slane %v12684_v56, 2  ;;  %v786_v34 = vrot.slane %v12743_v23, 1  ;;  %v787_v35 = vrot.slane %v12731_v19, 2  ;;  %v12021_v37 = vld [vmem:[%s17341_s1 + $0x30] sm:$0xff]   ;;  %v12022_v38 = vld [vmem:[%s17341_s1 + $0xa0] sm:$0xff]  }
  0x29   : > { %v407_v25 = vrot.slane %v406_v18, 4  ;;  %v857_v42 = vrot.slane %v12663_v47, 2  ;;  %v856_v43 = vrot.slane %v12705_v6, 2  ;;  %v12026_v48 = vld [vmem:[%s17341_s1 + $0x38] sm:$0xff]   ;;  %v793_v49 = vrot.slane %v12681_v55, 2  ;;  %v12027_v50 = vld [vmem:[%s17341_s1 + $0xa8] sm:$0xff]  }
  0x2a   : > { %431 = vrot.lane.b32.xlu1 %v380_v44, %s12507_s12  ;;  %v624_v32 = vor.u32 %v623_v26, %v12743_v23  ;;  %10836 = vmatpush3.bf16.msra.mxu1 %v12018_v29  ;;  %v791_v40 = vor.u32 %v790_v33, %v789_v30  ;;  %v12025_v44 = vld [vmem:[%s17341_s1 + $0xe8] sm:$0xff]   ;;  %v901_v51 = vrot.slane %v12696_v2, 2  ;;  %v12030_v53 = vld [vmem:[%s17341_s1 + $0xf0] sm:$0xff]   ;;  %v858_v57 = vrot.slane %v12661_v46, 2  ;;  %v12034_v62 = vld [vmem:[%s17341_s1 + $0xf8] sm:$0xff]   ;;  %s12512_s9 = smov 48  }
  0x2b   : > { %419 = vrot.lane.b32.xlu0 %v353_v41, %s12507_s12  ;;  %10800 = vmatpush3.bf16.msra.mxu0 %v12017_v27  ;;  %v788_v41 = vor.u32 %v787_v35, %v786_v34  ;;  %v969_v59 = vrot.slane %v12663_v47, 3  ;;  %v12031_v60 = vld [vmem:[%s17341_s1 + $0xb0] sm:$0xff]   ;;  %v904_v61 = vrot.slane %v12690_v58, 2  ;;  %v905_v63 = vrot.slane %v12681_v55, 3  ;;  %s12513_s10 = smov 32   ;;  %s12514_s13 = smov 16  }
  0x2c   : > { %10801 = vmatprep.subr.bf16.mxu0 %v12019_v31  ;;  %10837 = vmatprep.subr.bf16.mxu1 %v12020_v36  ;;  %v970_v5 = vrot.slane %v12661_v46, 3  ;;  %v898_v7 = vrot.slane %v12743_v23, 2  ;;  %v968_v12 = vrot.slane %v12705_v6, 3  ;;  %vm467_vm2 = vsmask.f32 7942  ;;  %s12515_s16 = smov 8  }
  0x2d   : > { %v906_v55 = vor.u32 %v905_v63, %v904_v61  ;;  %vm466_vm3 = vcmask 715969   ;;  %vm472_vm4 = vcmask 713920   ;;  %vm473_vm6 = vsmask.f32 1280  ;;  %v478_v14 = vld [vmem:[#allocation2 + $0x20] sm:$0xe] }
  0x2e   : > { %435 = vrot.lane.b32.xlu1 %v389_v54, %s12507_s12  ;;  %10838 = vmatpush3.bf16.msra.mxu1 %v12022_v38  ;;  %v902_v54 = vrot.slane %v12684_v56, 3  ;;  %v12035_v56 = vld [vmem:[%s17341_s1 + $0xb8] sm:$0xff]   ;;  %vm12832_vm5 = vmand %vm466_vm3, %vm467_vm2  ;;  %v487_v23 = vld [vmem:[#allocation2 + $0x2c] sm:$0x3]  ;;  %vm1010_vm8 = vcmask 916480   ;;  %vm17475_vm9 = vcmask 785408  }
  0x2f   : > { %433 = vrot.lane.b32.xlu0 %v388_v45, %s12507_s12  ;;  %10802 = vmatpush3.bf16.msra.mxu0 %v12021_v37  ;;  %v792_v45 = vrot.slane %v12690_v58, 1  ;;  %vm12836_vm7 = vmand %vm472_vm4, %vm473_vm6  ;;  %v469_v15 = vld [vmem:[#allocation2 + $0x18] sm:$0xe]  ;;  %v490_v24 = vld [vmem:[#allocation2 + $0x30] sm:$0xe]  ;;  %vm1082_vm10 = vcmask 654336  }
  0x30   : > { %10803 = vmatprep.subr.bf16.mxu0 %v12024_v39  ;;  %10839 = vmatprep.subr.bf16.mxu1 %v12025_v44  ;;  %v903_v58 = vor.u32 %v902_v54, %v901_v51  ;;  %v493_v31 = vld [vmem:[#allocation2 + $0x34] sm:$0x3]  ;;  %v499_v37 = vld [vmem:[#allocation2 + $0x3c] sm:$0x3]  ;;  %v496_v38 = vld [vmem:[#allocation2 + $0x38] sm:$0xe] }
  0x31   : > { %v794_v47 = vor.u32 %v793_v49, %v792_v45  ;;  %v502_v44 = vld [vmem:[#allocation2 + $0x40] sm:$0xe]  ;;  %v12482_v54 = vld [vmem:[#allocation2 + $0x8] sm:$0xf]  ;;  %vm1111_vm11 = vcmask 523264   ;;  %vm1140_vm12 = vcmask 392192  }
  0x32   : > { %439 = vrot.lane.b32.xlu1 %v398_v1, %s12507_s12  ;;  %10840 = vmatpush3.bf16.msra.mxu1 %v12027_v50  ;;  %vm17474_vm13 = vcmask 261120   ;;  %vm1358_vm14 = vcmask 130048   ;;  %vm7345_vm15 = vcmask 1040384   ;;  %vm7346_vm0 = vcmask 258052   ;;  %s10780_s25 = sshll.u32 %s17694_s28, 6 }
  0x33   : > { %437 = vrot.lane.b32.xlu0 %v397_v52, %s12507_s12  ;;  %v344_v52 = vld [vmem:[%s12641_s11 + $0x1c] sm:$0xf]  ;;  %10804 = vmatpush3.bf16.msra.mxu0 %v12026_v48  ;;  %vm7347_vm1 = vmor %vm7346_vm0, %vm7345_vm15  ;;  %vm7341_vm2 = vcmask 1043456   ;;  %vm7342_vm3 = vcmask 261124   ;;  %vm7511_vm6 = vsmask.f32 256  ;;  %s17312_s29 = scalar_lea.vmem %s17348_s8, %s10780_s25 }
  0x34   : > { %10841 = vmatprep.subr.bf16.mxu1 %v12030_v53  ;;  %v409_v1 = vshrl.u32 %v344_v52, 16  ;;  %v412_v2 = vshll.u32 %v344_v52, 16  ;;  %vm7343_vm4 = vmor %vm7342_vm3, %vm7341_vm2  ;;  %vm7650_vm15 = vcmask 192516   ;;  %vm7651_vm0 = vsmask.f32 4352 }
  0x35   : > { %vm7641_vm3 = vcmask 195588  }
  0x36   : > { %720 = vrot.lane.b32.xlu1 %v638_v8, %s12508_s23  ;;  %10842 = vmatpush3.bf16.msra.mxu1 %v12031_v60  ;;  %v411_v3 = vrot.slane %v409_v1, 6  ;;  %v414_v4 = vrot.slane %v412_v2, 7  ;;  %v12483_v60 = vld [vmem:[#allocation2 + $0x10] sm:$0xf] }
  0x37   : > { %718 = vrot.lane.b32.xlu0 %v631_v9, %s12508_s23  ;;  %10843 = vmatprep.subr.bf16.mxu1 %v12034_v62  ;;  %v899_v9 = vrot.slane %v12731_v19, 3 }
  0x38   : > { %v415_v8 = vor.u32 %v414_v4, %v411_v3  ;;  %v508_v3 = vld [vmem:[#allocation2 + $0x48] sm:$0xe] }
  0x39   : > { %v900_v11 = vor.u32 %v899_v9, %v898_v7 }
  0x3a   : > { %762 = vrot.lane.b32.xlu1 %v746_v16, %s12509_s14  ;;  %10844 = vmatpush3.bf16.msra.mxu1 %v12035_v56  ;;  %v416_v10 = vrot.slane %v415_v8, 4 }
  0x3b   : > { %760 = vrot.lane.b32.xlu0 %v745_v17, %s12509_s14  ;;  %v481_v17 = vld [vmem:[#allocation2 + $0x24] sm:$0x3] }
  0x3e   : > { %443 = vrot.lane.b32.xlu1 %v407_v25, %s12507_s12 }
  0x3f   : > { %441 = vrot.lane.b32.xlu0 %v406_v18, %s12507_s12  ;;  %v484_v18 = vld [vmem:[#allocation2 + $0x28] sm:$0xe] }
  0x42   : > { %758 = vrot.lane.b32.xlu1 %v744_v28, %s12509_s14 }
  0x43   : > { %716 = vrot.lane.b32.xlu0 %v624_v32, %s12508_s23  ;;  %v475_v32 = vld [vmem:[#allocation2 + $0x1c] sm:$0x3] }
  0x46   : > { %830 = vrot.lane.b32.xlu1 %v791_v40, %s12510_s21 }
  0x47   : > { %828 = vrot.lane.b32.xlu0 %v788_v41, %s12510_s21 }
  0x4a   : > { %872 = vrot.lane.b32.xlu1 %v857_v42, %s12511_s30 }
  0x4b   : > { %870 = vrot.lane.b32.xlu0 %v856_v43, %s12511_s30  ;;  %v505_v43 = vld [vmem:[#allocation2 + $0x44] sm:$0x3] }
  0x4e   : > { %874 = vrot.lane.b32.xlu1 %v858_v57, %s12511_s30 }
  0x4f   : > { %832 = vrot.lane.b32.xlu0 %v794_v47, %s12510_s21 }
  0x52   : > { %944 = vrot.lane.b32.xlu1 %v906_v55, %s12512_s9  ;;  %v511_v55 = vld [vmem:[#allocation2 + $0x4c] sm:$0x3] }
  0x53   : > { %942 = vrot.lane.b32.xlu0 %v903_v58, %s12512_s9 }
  0x56   : > { %986 = vrot.lane.b32.xlu1 %v970_v5, %s12513_s10 }
  0x57   : > { %984 = vrot.lane.b32.xlu0 %v969_v59, %s12513_s10 }
  0x5a   : > { %447 = vrot.lane.b32.xlu1 %v416_v10, %s12507_s12 }
  0x5b   : > { %445 = vrot.lane.b32.xlu0 %v415_v8, %s12507_s12 }
  0x5e   : > { %982 = vrot.lane.b32.xlu1 %v968_v12, %s12513_s10 }
  0x5f   : > { %940 = vrot.lane.b32.xlu0 %v900_v11, %s12512_s9 }
  0x90   : > { %v422_v16 = vpop.permute.xlu1 %421 }
  0x91   : > { %v418_v6 = vpop.permute.xlu0 %417  ;;  %v479_v19 = vsel %vm12832_vm5, %v422_v16, %v478_v14 }
  0x92   : > { %v470_v20 = vsel %vm12832_vm5, %v418_v6, %v469_v15  ;;  %480 = vst [vmem:[#allocation2 + $0x20] sm:$0xe] %v479_v19 }
  0x93   : > { %471 = vst [vmem:[#allocation2 + $0x18] sm:$0xe] %v470_v20 }
  0x94   : > { %v424_v21 = vpop.permute.xlu1 %423 }
  0x95   : > { %v426_v22 = vpop.permute.xlu0 %425  ;;  %v482_v25 = vsel %vm12836_vm7, %v424_v21, %v481_v17 }
  0x96   : > { %v485_v26 = vsel %vm12832_vm5, %v426_v22, %v484_v18  ;;  %483 = vst [vmem:[#allocation2 + $0x24] sm:$0x3] %v482_v25  ;;  %v12484_v25 = vld [vmem:[#allocation2] sm:$0xf] }
  0x97   : > { %486 = vst [vmem:[#allocation2 + $0x28] sm:$0xe] %v485_v26 }
  0x98   : > { %v428_v27 = vpop.permute.xlu1 %427 }
  0x99   : > { %v430_v28 = vpop.permute.xlu0 %429  ;;  %v488_v29 = vsel %vm12836_vm7, %v428_v27, %v487_v23  ;;  %v528_v63 = vld [vmem:[#allocation2 + $0x20] sm:$0xf] }
  0x9a   : > { %v491_v30 = vsel %vm12832_vm5, %v430_v28, %v490_v24  ;;  %489 = vst [vmem:[#allocation2 + $0x2c] sm:$0x3] %v488_v29  ;;  %v526_v59 = vld [vmem:[#allocation2 + $0x18] sm:$0xf] }
  0x9b   : > { %492 = vst [vmem:[#allocation2 + $0x30] sm:$0xe] %v491_v30 }
  0x9c   : > { %v432_v33 = vpop.permute.xlu1 %431 }
  0x9d   : > { %v420_v34 = vpop.permute.xlu0 %419  ;;  %v494_v35 = vsel %vm12836_vm7, %v432_v33, %v493_v31  ;;  %v529_v2 = vld [vmem:[#allocation2 + $0x24] sm:$0x7] }
  0x9e   : > { %v476_v36 = vsel %vm12836_vm7, %v420_v34, %v475_v32  ;;  %495 = vst [vmem:[#allocation2 + $0x34] sm:$0x3] %v494_v35  ;;  %v530_v4 = vld [vmem:[#allocation2 + $0x28] sm:$0xf]  ;;  %v12880_v8 = vcombine.low %v528_v63, %v529_v2 }
  0x9f   : > { %477 = vst [vmem:[#allocation2 + $0x1c] sm:$0x3] %v476_v36 }
  0xa0   : > { %v436_v39 = vpop.permute.xlu1 %435  ;;  %v748_v18 = vrot.slane %v12880_v8, 1  ;;  %v860_v36 = vrot.slane %v12880_v8, 2 }
  0xa1   : > { %v434_v40 = vpop.permute.xlu0 %433  ;;  %v500_v41 = vsel %vm12836_vm7, %v436_v39, %v499_v37  ;;  %v531_v1 = vld [vmem:[#allocation2 + $0x2c] sm:$0x7] }
  0xa2   : > { %v497_v42 = vsel %vm12832_vm5, %v434_v40, %v496_v38  ;;  %501 = vst [vmem:[#allocation2 + $0x3c] sm:$0x3] %v500_v41  ;;  %v12878_v7 = vcombine.low %v530_v4, %v531_v1  ;;  %v532_v19 = vld [vmem:[#allocation2 + $0x30] sm:$0xf] }
  0xa3   : > { %498 = vst [vmem:[#allocation2 + $0x38] sm:$0xe] %v497_v42 }
  0xa4   : > { %v440_v45 = vpop.permute.xlu1 %439  ;;  %v749_v17 = vrot.slane %v12878_v7, 1  ;;  %v12911_v37 = vshll.u32 %v12878_v7, 16 }
  0xa5   : > { %v438_v48 = vpop.permute.xlu0 %437  ;;  %v506_v49 = vsel %vm12836_vm7, %v440_v45, %v505_v43  ;;  %v533_v9 = vld [vmem:[#allocation2 + $0x34] sm:$0x7] }
  0xa6   : > { %v503_v50 = vsel %vm12832_vm5, %v438_v48, %v502_v44  ;;  %507 = vst [vmem:[#allocation2 + $0x44] sm:$0x3] %v506_v49  ;;  %v527_v53 = vld [vmem:[#allocation2 + $0x1c] sm:$0x7]  ;;  %v12897_v23 = vcombine.low %v532_v19, %v533_v9  ;;  %v972_v48 = vrot.slane %v12880_v8, 3  ;;  %v12931_v49 = vshrl.u32 %v12880_v8, 16 }
  0xa7   : > { %504 = vst [vmem:[#allocation2 + $0x40] sm:$0xe] %v503_v50  ;;  %v12869_v62 = vcombine.low %v526_v59, %v527_v53  ;;  %v12941_v53 = vshrl.u32 %v12878_v7, 16  ;;  %v658_v59 = vrot.slane %v12911_v37, 1  ;;  %v514_v9 = vld [vmem:[#allocation2 + $0x50] sm:$0xe] }
  0xa8   : > { %v721_v51 = vpop.permute.xlu1 %720  ;;  %v750_v34 = vrot.slane %v12897_v23, 1 }
  0xa9   : > { %v719_v52 = vpop.permute.xlu0 %718  ;;  %v12867_v61 = vsel %vm1010_vm8, %v12483_v60, %v721_v51  ;;  %v747_v5 = vrot.slane %v12869_v62, 1  ;;  %v535_v6 = vld [vmem:[#allocation2 + $0x3c] sm:$0x7]  ;;  %v971_v42 = vrot.slane %v12869_v62, 3 }
  0xaa   : > { %v1016_v57 = vsel %vm1010_vm8, %v12482_v54, %v719_v52  ;;  %v534_v12 = vld [vmem:[#allocation2 + $0x38] sm:$0xf] }
  0xab   : > { %1246 = vrot.lane.b32.xlu0 %v1016_v57, %s12514_s13  ;;  %v12895_v22 = vcombine.low %v534_v12, %v535_v6  ;;  %v861_v12 = vrot.slane %v12878_v7, 2 }
  0xac   : > { %v12871_v56 = vpop.permute.xlu1 %762 }
  0xad   : > { %v761_v47 = vpop.permute.xlu0 %760  ;;  %v12888_v16 = vsel %vm17475_vm9, %v721_v51, %v12871_v56  ;;  %v537_v28 = vld [vmem:[#allocation2 + $0x44] sm:$0x7]  ;;  %v751_v33 = vrot.slane %v12895_v22, 1  ;;  %v973_v51 = vrot.slane %v12878_v7, 3  ;;  %v12996_v46 = vshrl.u32 %v12895_v22, 16 }
  0xae   : > { %v1057_v58 = vsel %vm17475_vm9, %v719_v52, %v761_v47  ;;  %v536_v24 = vld [vmem:[#allocation2 + $0x40] sm:$0xf]  ;;  %v12938_v52 = vshll.u32 %v12869_v62, 16 }
  0xaf   : > { %1260 = vrot.lane.b32.xlu0 %v12867_v61, %s12514_s13  ;;  %1248 = vrot.lane.b32.xlu1 %v1057_v58, %s12514_s13  ;;  %v12905_v35 = vcombine.low %v536_v24, %v537_v28  ;;  %v12039_v7 = vld [vmem:[%s17341_s1 + $0x140] sm:$0xff]   ;;  %v12044_v28 = vld [vmem:[%s17341_s1 + $0x1c8] sm:$0xff]  }
  0xb0   : > { %v444_v10 = vpop.permute.xlu1 %443  ;;  %v644_v1 = vrot.slane %v12938_v52, 1  ;;  %v12041_v24 = vld [vmem:[%s17341_s1 + $0x100] sm:$0xff]   ;;  %10869 = vmatprep.subr.bf16.mxu0 %v12039_v7 }
  0xb1   : > { %v442_v11 = vpop.permute.xlu0 %441  ;;  %v512_v14 = vsel %vm12836_vm7, %v444_v10, %v511_v55  ;;  %v752_v43 = vrot.slane %v12905_v35, 1  ;;  %v12961_v55 = vshrl.u32 %v12869_v62, 16 }
  0xb2   : > { %v509_v15 = vsel %vm12832_vm5, %v442_v11, %v508_v3  ;;  %513 = vst [vmem:[#allocation2 + $0x4c] sm:$0x3] %v512_v14  ;;  %v12964_v3 = vshll.u32 %v12895_v22, 16  ;;  %v517_v11 = vld [vmem:[#allocation2 + $0x54] sm:$0x3]  ;;  %v659_v14 = vor.u32 %v658_v59, %v12941_v53  ;;  %v908_v59 = vrot.slane %v12938_v52, 3 }
  0xb3   : > { %510 = vst [vmem:[#allocation2 + $0x48] sm:$0xe] %v509_v15  ;;  %764 = vrot.lane.b32.xlu0 %v747_v5, %s12509_s14  ;;  %1262 = vrot.lane.b32.xlu1 %v12888_v16, %s12514_s13  ;;  %v645_v4 = vor.u32 %v644_v1, %v12961_v55  ;;  %v795_v13 = vrot.slane %v12961_v55, 1 }
  0xb4   : > { %v759_v20 = vpop.permute.xlu1 %758 }
  0xb5   : > { %v717_v21 = vpop.permute.xlu0 %716 }
  0xb6   : > { %v1013_v26 = vsel %vm1010_vm8, %v12484_v25, %v717_v21  ;;  %v1055_v27 = vsel %vm17475_vm9, %v717_v21, %v759_v20  ;;  %v12040_v21 = vld [vmem:[%s17341_s1 + $0x1c0] sm:$0xff]  }
  0xb7   : > { %768 = vrot.lane.b32.xlu0 %v749_v17, %s12509_s14  ;;  %766 = vrot.lane.b32.xlu1 %v748_v18, %s12509_s14  ;;  %v10058_v29 = vcombine.low %v1055_v27, %v1057_v58  ;;  %v10057_v30 = vcombine.low %v1013_v26, %v1016_v57  ;;  %v859_v57 = vrot.slane %v12869_v62, 2  ;;  %v672_v62 = vrot.slane %v12964_v3, 1  ;;  %v12042_v25 = vld [vmem:[%s17341_s1 + $0x180] sm:$0xff]   ;;  %v12043_v27 = vld [vmem:[%s17341_s1 + $0x148] sm:$0xff]  }
  0xb8   : > { %v831_v31 = vpop.permute.xlu1 %830  ;;  %v862_v17 = vrot.slane %v12897_v23, 2  ;;  %v12978_v18 = vshll.u32 %v12880_v8, 16  ;;  %v796_v8 = vrot.slane %v12938_v52, 2  ;;  %10909 = vmatprep.subr.bf16.mxu1 %v12040_v21  ;;  %v12052_v52 = vld [vmem:[%s17341_s1 + $0x1d8] sm:$0xff]   ;;  %v12055_v21 = vld [vmem:[%s17341_s1 + $0x160] sm:$0xff]  }
  0xb9   : > { %5905 = vmatprep.mubr.bf16.mxu0 %v10058_v29  ;;  %v829_v32 = vpop.permute.xlu0 %828  ;;  %v12914_v38 = vsel %vm1082_vm10, %v761_v47, %v831_v31  ;;  %v975_v47 = vrot.slane %v12895_v22, 3  ;;  %v673_v26 = vor.u32 %v672_v62, %v12996_v46  ;;  %v12045_v29 = vld [vmem:[%s17341_s1 + $0x108] sm:$0xff]   ;;  %v12054_v62 = vld [vmem:[%s17341_s1 + $0x198] sm:$0xff]  }
  0xba   : > { %5906 = vmatmul.mubr.bf16.vlgmr.msra.gmra.mrb[0].mxu0 %v10057_v30  ;;  %v1084_v39 = vsel %vm1082_vm10, %v759_v20, %v829_v32  ;;  %v974_v30 = vrot.slane %v12897_v23, 3  ;;  %v651_v7 = vrot.slane %v12978_v18, 1 }
  0xbb   : > { %772 = vrot.lane.b32.xlu0 %v751_v33, %s12509_s14  ;;  %770 = vrot.lane.b32.xlu1 %v750_v34, %s12509_s14  ;;  %v10059_v54 = vcombine.low %v1084_v39, %v12914_v38  ;;  %v12046_v33 = vld [vmem:[%s17341_s1 + $0x188] sm:$0xff]   ;;  %v797_v34 = vor.u32 %v796_v8, %v795_v13  ;;  %v12057_v13 = vld [vmem:[%s17341_s1 + $0x120] sm:$0xff]  }
  0xbc   : > { %v12917_v40 = vpop.permute.xlu1 %872  ;;  %10870 = vmatpush3.bf16.msra.mxu0 %v12041_v24  ;;  %v12056_v24 = vld [vmem:[%s17341_s1 + $0x1e0] sm:$0xff]  }
  0xbd   : > { %v12919_v41 = vpop.permute.xlu0 %870  ;;  %v12927_v45 = vsel %vm1111_vm11, %v831_v31, %v12917_v40  ;;  %v798_v31 = vrot.slane %v12931_v49, 1  ;;  %10871 = vmatprep.subr.bf16.mxu0 %v12043_v27 }
  0xbe   : > { %v1113_v44 = vsel %vm1111_vm11, %v829_v32, %v12919_v41  ;;  %v799_v32 = vrot.slane %v12978_v18, 2 }
  0xbf   : > { %988 = vrot.lane.b32.xlu0 %v971_v42, %s12513_s10  ;;  %774 = vrot.lane.b32.xlu1 %v752_v43, %s12509_s14  ;;  %v10060_v50 = vcombine.low %v1113_v44, %v12927_v45  ;;  %v12047_v42 = vld [vmem:[%s17341_s1 + $0x150] sm:$0xff]  }
  0xc0   : > { %v12948_v63 = vpop.permute.xlu1 %874  ;;  %10872 = vmatpush3.bf16.msra.mxu0 %v12045_v29  ;;  %v12048_v44 = vld [vmem:[%s17341_s1 + $0x1d0] sm:$0xff]  }
  0xc1   : > { %5970 = vmatprep.mubr.bf16.mxu1 %v10060_v50  ;;  %v12946_v60 = vpop.permute.xlu0 %832  ;;  %v800_v50 = vor.u32 %v799_v32, %v798_v31  ;;  %10873 = vmatprep.subr.bf16.mxu0 %v12047_v42  ;;  %v12059_v31 = vld [vmem:[%s17341_s1 + $0x168] sm:$0xff]  }
  0xc2   : > { %5971 = vmatmul.mubr.bf16.vlgmr.msra.gmra.mrb[0].mxu1 %v10059_v54  ;;  %v12050_v54 = vld [vmem:[%s17341_s1 + $0x190] sm:$0xff]   ;;  %v12060_v32 = vld [vmem:[%s17341_s1 + $0x1e8] sm:$0xff]  }
  0xc3   : > { %992 = vrot.lane.b32.xlu0 %v973_v51, %s12513_s10  ;;  %876 = vrot.lane.b32.xlu1 %v859_v57, %s12511_s30  ;;  %v907_v51 = vrot.slane %v12961_v55, 2  ;;  %v863_v57 = vrot.slane %v12895_v22, 2  ;;  %v802_v55 = vrot.slane %v12911_v37, 2  ;;  %v12051_v22 = vld [vmem:[%s17341_s1 + $0x158] sm:$0xff]  }
  0xc4   : > { %v12956_v58 = vpop.permute.xlu1 %944  ;;  %10910 = vmatpush3.bf16.msra.mxu1 %v12042_v25  ;;  %v976_v25 = vrot.slane %v12905_v35, 3 }
  0xc5   : > { %v12954_v2 = vpop.permute.xlu0 %942  ;;  %10911 = vmatprep.subr.bf16.mxu1 %v12044_v28  ;;  %v12058_v28 = vld [vmem:[%s17341_s1 + $0x1a0] sm:$0xff]  }
  0xc7   : > { %996 = vrot.lane.b32.xlu0 %v975_v47, %s12513_s10  ;;  %878 = vrot.lane.b32.xlu1 %v860_v36, %s12511_s30 }
  0xc8   : > { %v12969_v10 = vpop.permute.xlu1 %986  ;;  %10912 = vmatpush3.bf16.msra.mxu1 %v12046_v33  ;;  %v12061_v33 = vld [vmem:[%s17341_s1 + $0x128] sm:$0xff]  }
  0xc9   : > { %v12967_v5 = vpop.permute.xlu0 %984  ;;  %10913 = vmatprep.subr.bf16.mxu1 %v12048_v44  ;;  %v652_v44 = vor.u32 %v651_v7, %v12931_v49 }
  0xcb   : > { %722 = vrot.lane.b32.xlu0 %v645_v4, %s12508_s23  ;;  %990 = vrot.lane.b32.xlu1 %v972_v48, %s12513_s10  ;;  %v12049_v48 = vld [vmem:[%s17341_s1 + $0x110] sm:$0xff]   ;;  %v801_v4 = vrot.slane %v12941_v53, 1 }
  0xcc   : > { %v448_v6 = vpop.permute.xlu1 %447  ;;  %10874 = vmatpush3.bf16.msra.mxu0 %v12049_v48  ;;  %10914 = vmatpush3.bf16.msra.mxu1 %v12050_v54  ;;  %v538_v48 = vld [vmem:[#allocation2 + $0x48] sm:$0xf]  ;;  %v12063_v54 = vld [vmem:[%s17341_s1 + $0x170] sm:$0xff]  }
  0xcd   : > { %v446_v15 = vpop.permute.xlu0 %445  ;;  %v518_v20 = vsel %vm12836_vm7, %v448_v6, %v517_v11  ;;  %v12053_v11 = vld [vmem:[%s17341_s1 + $0x118] sm:$0xff]   ;;  %10875 = vmatprep.subr.bf16.mxu0 %v12051_v22  ;;  %10915 = vmatprep.subr.bf16.mxu1 %v12052_v52  ;;  %v803_v29 = vor.u32 %v802_v55, %v801_v4  ;;  %v12065_v55 = vld [vmem:[%s17341_s1 + $0x130] sm:$0xff]   ;;  %vm7504_vm7 = vcmask 584768  }
  0xce   : > { %v515_v19 = vsel %vm12832_vm5, %v446_v15, %v514_v9  ;;  %519 = vst [vmem:[#allocation2 + $0x54] sm:$0x3] %v518_v20  ;;  %v13049_v9 = vshrl.u32 %v12897_v23, 16  ;;  %v909_v20 = vor.u32 %v908_v59, %v907_v51  ;;  %v539_v51 = vld [vmem:[#allocation2 + $0x4c] sm:$0x7]  ;;  %v808_v59 = vrot.slane %v12964_v3, 2 }
  0xcf   : > { %726 = vrot.lane.b32.xlu0 %v659_v14, %s12508_s23  ;;  %880 = vrot.lane.b32.xlu1 %v861_v12, %s12511_s30  ;;  %516 = vst [vmem:[#allocation2 + $0x50] sm:$0xe] %v515_v19  ;;  %v13063_v12 = vshll.u32 %v12897_v23, 16  ;;  %vm7510_vm5 = vcmask 581696  }
  0xd0   : > { %10876 = vmatpush3.bf16.msra.mxu0 %v12053_v11  ;;  %10916 = vmatpush3.bf16.msra.mxu1 %v12054_v62  ;;  %v910_v11 = vrot.slane %v12931_v49, 2  ;;  %v911_v62 = vrot.slane %v12978_v18, 3 }
  0xd1   : > { %v805_v27 = vrot.slane %v13063_v12, 2  ;;  %10877 = vmatprep.subr.bf16.mxu0 %v12055_v21  ;;  %10917 = vmatprep.subr.bf16.mxu1 %v12056_v24  ;;  %v920_v24 = vrot.slane %v12964_v3, 3 }
  0xd3   : > { %730 = vrot.lane.b32.xlu0 %v673_v26, %s12508_s23  ;;  %882 = vrot.lane.b32.xlu1 %v862_v17, %s12511_s30  ;;  %v864_v17 = vrot.slane %v12905_v35, 2  ;;  %v804_v26 = vrot.slane %v13049_v9, 1 }
  0xd4   : > { %10878 = vmatpush3.bf16.msra.mxu0 %v12057_v13  ;;  %10918 = vmatpush3.bf16.msra.mxu1 %v12058_v28  ;;  %v916_v13 = vrot.slane %v13049_v9, 2  ;;  %v912_v28 = vor.u32 %v911_v62, %v910_v11 }
  0xd5   : > { %v541_v39 = vld [vmem:[#allocation2 + $0x54] sm:$0x7]  ;;  %10879 = vmatprep.subr.bf16.mxu0 %v12059_v31  ;;  %10919 = vmatprep.subr.bf16.mxu1 %v12060_v32  ;;  %v806_v42 = vor.u32 %v805_v27, %v804_v26  ;;  %v12071_v26 = vld [vmem:[%s17341_s1 + $0x240] sm:$0xff]  }
  0xd6   : > { %v540_v36 = vld [vmem:[#allocation2 + $0x50] sm:$0xf] }
  0xd7   : > { %834 = vrot.lane.b32.xlu0 %v797_v34, %s12510_s21  ;;  %994 = vrot.lane.b32.xlu1 %v974_v30, %s12513_s10  ;;  %v13026_v43 = vcombine.low %v540_v36, %v541_v39  ;;  %v913_v30 = vrot.slane %v12941_v53, 2  ;;  %v914_v34 = vrot.slane %v12911_v37, 3  ;;  %v665_v53 = vrot.slane %v13063_v12, 1  ;;  %v12062_v39 = vld [vmem:[%s17341_s1 + $0x1a8] sm:$0xff]  }
  0xd8   : > { %v13110_v36 = vshll.u32 %v12905_v35, 16  ;;  %10880 = vmatpush3.bf16.msra.mxu0 %v12061_v33  ;;  %10920 = vmatpush3.bf16.msra.mxu1 %v12062_v39  ;;  %v807_v37 = vrot.slane %v12996_v46, 1  ;;  %v13174_v39 = vsel %vm1082_vm10, %v12871_v56, %v12946_v60 }
  0xd9   : > { %v13041_v47 = vshrl.u32 %v13026_v43, 16  ;;  %v13044_v1 = vshll.u32 %v13026_v43, 16  ;;  %v915_v22 = vor.u32 %v914_v34, %v913_v30  ;;  %v666_v52 = vor.u32 %v665_v53, %v13049_v9  ;;  %10881 = vmatprep.subr.bf16.mxu0 %v12063_v54 }
  0xda   : > { %v679_v4 = vrot.slane %v13110_v36, 1  ;;  %v811_v18 = vrot.slane %v13110_v36, 2  ;;  %v809_v7 = vor.u32 %v808_v59, %v807_v37  ;;  %v923_v30 = vrot.slane %v13110_v36, 3 }
  0xdb   : > { %836 = vrot.lane.b32.xlu0 %v800_v50, %s12510_s21  ;;  %884 = vrot.lane.b32.xlu1 %v863_v57, %s12511_s30  ;;  %v816_v14 = vrot.slane %v13041_v47, 1  ;;  %v817_v15 = vrot.slane %v13044_v1, 2  ;;  %v928_v6 = vrot.slane %v13041_v47, 2  ;;  %v929_v19 = vrot.slane %v13044_v1, 3  ;;  %v12064_v57 = vld [vmem:[%s17341_s1 + $0x1f0] sm:$0xff]  }
  0xdc   : > { %v675_v50 = vshrl.u32 %v12905_v35, 16  ;;  %v12066_v35 = vld [vmem:[%s17341_s1 + $0x1b0] sm:$0xff]   ;;  %10921 = vmatprep.subr.bf16.mxu1 %v12064_v57  ;;  %10882 = vmatpush3.bf16.msra.mxu0 %v12065_v55  ;;  %v13204_v37 = vsel %vm17474_vm13, %v12954_v2, %v12967_v5 }
  0xdd   : > { %v13073_v23 = vor.u32 %v817_v15, %v816_v14  ;;  %v13085_v8 = vor.u32 %v929_v19, %v928_v6  ;;  %10922 = vmatpush3.bf16.msra.mxu1 %v12066_v35  ;;  %v12067_v14 = vld [vmem:[%s17341_s1 + $0x178] sm:$0xff]   ;;  %v10052_v19 = vcombine.low %v538_v48, %v539_v51  ;;  %v13199_v48 = vsel %vm1140_vm12, %v12948_v63, %v12956_v58  ;;  %v13222_v51 = vpop.permute.xlu0 %940 }
  0xde   : > { %v12068_v15 = vld [vmem:[%s17341_s1 + $0x1f8] sm:$0xff]   ;;  %v810_v49 = vrot.slane %v675_v50, 1  ;;  %10883 = vmatprep.subr.bf16.mxu0 %v12067_v14  ;;  %v680_v21 = vor.u32 %v679_v4, %v675_v50  ;;  %17482 = vst [vmem:[#allocation5_spill] sm:$0xff] %v13199_v48 }
  0xdf   : > { %17481 = vst [vmem:[#allocation4_spill] sm:$0xff] %v13085_v8  ;;  %946 = vrot.lane.b32.xlu0 %v909_v20, %s12512_s9  ;;  %886 = vrot.lane.b32.xlu1 %v864_v17, %s12511_s30  ;;  %v12069_v6 = vld [vmem:[%s17341_s1 + $0x138] sm:$0xff]   ;;  %v919_v17 = vrot.slane %v12996_v46, 2  ;;  %v917_v46 = vrot.slane %v13063_v12, 3  ;;  %v682_v3 = vshrl.u32 %v10052_v19, 16  ;;  %v753_v34 = vrot.slane %v10052_v19, 1 }
  0xe0   : > { %v12070_v20 = vld [vmem:[%s17341_s1 + $0x1b8] sm:$0xff]   ;;  %10923 = vmatprep.subr.bf16.mxu1 %v12068_v15  ;;  %10884 = vmatpush3.bf16.msra.mxu0 %v12069_v6  ;;  %v812_v27 = vor.u32 %v811_v18, %v810_v49  ;;  %v865_v56 = vrot.slane %v10052_v19, 2 }
  0xe1   : > { %10924 = vmatpush3.bf16.msra.mxu1 %v12070_v20  ;;  %10949 = vmatprep.subr.bf16.mxu0 %v12071_v26  ;;  %v921_v9 = vor.u32 %v920_v24, %v919_v17  ;;  %v918_v32 = vor.u32 %v917_v46, %v916_v13  ;;  %v813_v53 = vrot.slane %v682_v3, 1 }
  0xe3   : > { %838 = vrot.lane.b32.xlu0 %v803_v29, %s12510_s21  ;;  %998 = vrot.lane.b32.xlu1 %v976_v25, %s12513_s10  ;;  %v684_v25 = vshll.u32 %v10052_v19, 16  ;;  %v922_v29 = vrot.slane %v675_v50, 2 }
  0xe5   : > { %v686_v31 = vrot.slane %v684_v25, 1  ;;  %v924_v33 = vor.u32 %v923_v30, %v922_v29  ;;  %v814_v36 = vrot.slane %v684_v25, 2 }
  0xe7   : > { %840 = vrot.lane.b32.xlu0 %v806_v42, %s12510_s21  ;;  %724 = vrot.lane.b32.xlu1 %v652_v44, %s12508_s23  ;;  %v687_v12 = vor.u32 %v686_v31, %v682_v3  ;;  %v815_v42 = vor.u32 %v814_v36, %v813_v53  ;;  %v13183_v44 = vsel %vm1111_vm11, %v12946_v60, %v12948_v63  ;;  %v926_v60 = vrot.slane %v684_v25, 3 }
  0xe8   : > { %v977_v63 = vrot.slane %v10052_v19, 3 }
  0xeb   : > { %950 = vrot.lane.b32.xlu0 %v915_v22, %s12512_s9  ;;  %728 = vrot.lane.b32.xlu1 %v666_v52, %s12508_s23 }
  0xef   : > { %842 = vrot.lane.b32.xlu0 %v809_v7, %s12510_s21  ;;  %732 = vrot.lane.b32.xlu1 %v680_v21, %s12508_s23  ;;  %v12485_v7 = vld [vmem:[#allocation2 + $0x18] sm:$0xf] }
  0xf3   : > { %844 = vrot.lane.b32.xlu0 %v812_v27, %s12510_s21  ;;  %948 = vrot.lane.b32.xlu1 %v912_v28, %s12512_s9  ;;  %v12087_v28 = vld [vmem:[%s17341_s1 + $0x2c0] sm:$0xff]  }
  0xf4   : > { %10989 = vmatprep.subr.bf16.mxu1 %v12087_v28 }
  0xf7   : > { %954 = vrot.lane.b32.xlu0 %v921_v9, %s12512_s9  ;;  %952 = vrot.lane.b32.xlu1 %v918_v32, %s12512_s9 }
  0xfb   : > { %956 = vrot.lane.b32.xlu1 %v924_v33, %s12512_s9  ;;  %734 = vrot.lane.b32.xlu0 %v687_v12, %s12508_s23 }
  0xff   : > { %776 = vrot.lane.b32.xlu1 %v753_v34, %s12509_s14  ;;  %1250 = vrot.lane.b32.xlu0 %v12914_v38, %s12514_s13  ;;  %v13191_v38 = vsel %vm1140_vm12, %v12917_v40, %v12954_v2  ;;  %v13213_v40 = vsel %vm17474_vm13, %v12956_v58, %v12969_v10  ;;  %v693_v2 = vrot.slane %v13044_v1, 1  ;;  %v13228_v58 = vpop.permute.xlu1 %982  ;;  %v754_v1 = vrot.slane %v13026_v43, 1 }
 0x100   : > { %17483 = vst [vmem:[#allocation6_spill] sm:$0xff] %v13213_v40 }
 0x101   : > { %v694_v54 = vor.u32 %v693_v2, %v13041_v47 }
 0x103   : > { %1252 = vrot.lane.b32.xlu1 %v12927_v45, %s12514_s13  ;;  %1264 = vrot.lane.b32.xlu0 %v13174_v39, %s12514_s13  ;;  %v925_v45 = vrot.slane %v682_v3, 2 }
 0x105   : > { %v927_v50 = vor.u32 %v926_v60, %v925_v45 }
 0x107   : > { %1266 = vrot.lane.b32.xlu1 %v13183_v44, %s12514_s13  ;;  %846 = vrot.lane.b32.xlu0 %v815_v42, %s12510_s21 }
 0x10b   : > { %888 = vrot.lane.b32.xlu1 %v865_v56, %s12511_s30  ;;  %1254 = vrot.lane.b32.xlu0 %v13191_v38, %s12514_s13 }
 0x10f   : > { %1268 = vrot.lane.b32.xlu0 %v13199_v48, %s12514_s13  ;;  %1256 = vrot.lane.b32.xlu1 %v13204_v37, %s12514_s13 }
 0x113   : > { %958 = vrot.lane.b32.xlu0 %v927_v50, %s12512_s9  ;;  %1270 = vrot.lane.b32.xlu1 %v13213_v40, %s12514_s13 }
 0x117   : > { %1000 = vrot.lane.b32.xlu1 %v977_v63, %s12513_s10  ;;  %1258 = vrot.lane.b32.xlu0 %v12967_v5, %s12514_s13 }
 0x11b   : > { %1272 = vrot.lane.b32.xlu1 %v12969_v10, %s12514_s13  ;;  %1413 = vrot.lane.b32.xlu0 %v12867_v61, %s12513_s10 }
 0x11d   : > { %v13231_v57 = vpop.permute.xlu0 %1246 }
 0x11f   : > { %1415 = vrot.lane.b32.xlu1 %v12888_v16, %s12513_s10  ;;  %736 = vrot.lane.b32.xlu0 %v694_v54, %s12508_s23  ;;  %v12486_v54 = vld [vmem:[#allocation2 + $0x28] sm:$0xf] }
 0x121   : > { %v13237_v59 = vpop.permute.xlu1 %1248  ;;  %v13239_v4 = vpop.permute.xlu0 %1260 }
 0x123   : > { %778 = vrot.lane.b32.xlu1 %v754_v1, %s12509_s14 }
 0x125   : > { %v13242_v55 = vpop.permute.xlu1 %1262  ;;  %v765_v35 = vpop.permute.xlu0 %764 }
 0x129   : > { %v767_v22 = vpop.permute.xlu1 %766  ;;  %v769_v47 = vpop.permute.xlu0 %768 }
 0x12d   : > { %v13244_v52 = vpop.permute.xlu1 %770  ;;  %v13246_v11 = vpop.permute.xlu0 %772 }
 0x131   : > { %v13248_v62 = vpop.permute.xlu1 %774  ;;  %v13250_v14 = vpop.permute.xlu0 %988 }
 0x135   : > { %v13252_v15 = vpop.permute.xlu1 %876  ;;  %v13254_v6 = vpop.permute.xlu0 %992 }
 0x136   : > { %17484 = vst [vmem:[#allocation7_spill] sm:$0xff] %v13254_v6 }
 0x139   : > { %v13256_v49 = vpop.permute.xlu1 %878  ;;  %v13258_v18 = vpop.permute.xlu0 %996 }
 0x13a   : > { %17485 = vst [vmem:[#allocation8_spill] sm:$0xff] %v13258_v18 }
 0x13d   : > { %v13260_v17 = vpop.permute.xlu1 %990  ;;  %v723_v19 = vpop.permute.xlu0 %722 }
 0x13e   : > { %v13263_v20 = vsel %vm17475_vm9, %v723_v19, %v765_v35  ;;  %v13266_v21 = vsel %vm1010_vm8, %v12485_v7, %v723_v19  ;;  %v12487_v19 = vld [vmem:[#allocation2 + $0x20] sm:$0xf] }
 0x13f   : > { %1276 = vrot.lane.b32.xlu1 %v13263_v20, %s12514_s13  ;;  %1274 = vrot.lane.b32.xlu0 %v13266_v21, %s12514_s13  ;;  %v10101_v24 = vcombine.low %v12888_v16, %v13263_v20  ;;  %v10100_v13 = vcombine.low %v12867_v61, %v13266_v21 }
 0x141   : > { %v13276_v46 = vpop.permute.xlu1 %880  ;;  %5913 = vmatprep.mubr.bf16.mxu0 %v10101_v24  ;;  %v727_v25 = vpop.permute.xlu0 %726 }
 0x142   : > { %5914 = vmatmul.mubr.bf16.gmra.mrb[4].mxu0 %v10100_v13  ;;  %v13323_v1 = vsel %vm1010_vm8, %v12486_v54, %v727_v25 }
 0x143   : > { %17494 = vst [vmem:[#allocation17_spill] sm:$0xff] %v13323_v1 }
 0x145   : > { %v13278_v26 = vpop.permute.xlu1 %882  ;;  %v731_v27 = vpop.permute.xlu0 %730 }
 0x149   : > { %v13283_v29 = vpop.permute.xlu1 %994  ;;  %v835_v30 = vpop.permute.xlu0 %834 }
 0x14a   : > { %17486 = vst [vmem:[#allocation9_spill] sm:$0xff] %v13283_v29  ;;  %v13286_v16 = vsel %vm1082_vm10, %v765_v35, %v835_v30  ;;  %v13290_v61 = vsel %vm1111_vm11, %v835_v30, %v13252_v15  ;;  %v13326_v35 = vsel %vm17475_vm9, %v727_v25, %v769_v47 }
 0x14b   : > { %17487 = vst [vmem:[#allocation10_spill] sm:$0xff] %v13286_v16  ;;  %17488 = vst [vmem:[#allocation11_spill] sm:$0xff] %v13290_v61  ;;  %v10103_v3 = vcombine.low %v13183_v44, %v13290_v61  ;;  %v10102_v31 = vcombine.low %v13174_v39, %v13286_v16 }
 0x14c   : > { %17495 = vst [vmem:[#allocation18_spill] sm:$0xff] %v13326_v35 }
 0x14d   : > { %v13296_v9 = vpop.permute.xlu1 %884  ;;  %5978 = vmatprep.mubr.bf16.mxu1 %v10103_v3  ;;  %v837_v32 = vpop.permute.xlu0 %836 }
 0x14e   : > { %5979 = vmatmul.mubr.bf16.gmra.mrb[4].mxu1 %v10102_v31  ;;  %v13305_v36 = vsel %vm1082_vm10, %v767_v22, %v837_v32  ;;  %v13309_v42 = vsel %vm1111_vm11, %v837_v32, %v13256_v49  ;;  %v1171_v31 = vsel %vm17474_vm13, %v13222_v51, %v13228_v58  ;;  %v12488_v32 = vld [vmem:[#allocation2 + $0x30] sm:$0xf] }
 0x14f   : > { %17490 = vst [vmem:[#allocation13_spill] sm:$0xff] %v13305_v36  ;;  %17491 = vst [vmem:[#allocation14_spill] sm:$0xff] %v13309_v42 }
 0x151   : > { %v13298_v12 = vpop.permute.xlu1 %886  ;;  %v13300_v33 = vpop.permute.xlu0 %946 }
 0x155   : > { %v13302_v34 = vpop.permute.xlu1 %998  ;;  %v839_v53 = vpop.permute.xlu0 %838 }
 0x156   : > { %17489 = vst [vmem:[#allocation12_spill] sm:$0xff] %v13302_v34  ;;  %v13312_v56 = vsel %vm1082_vm10, %v769_v47, %v839_v53  ;;  %v13316_v45 = vsel %vm1111_vm11, %v839_v53, %v13276_v46 }
 0x157   : > { %17492 = vst [vmem:[#allocation15_spill] sm:$0xff] %v13312_v56  ;;  %17493 = vst [vmem:[#allocation16_spill] sm:$0xff] %v13316_v45  ;;  %v10146_v60 = vcombine.low %v13309_v42, %v13316_v45  ;;  %v10145_v50 = vcombine.low %v13305_v36, %v13312_v56 }
 0x159   : > { %v725_v63 = vpop.permute.xlu1 %724  ;;  %5986 = vmatprep.mubr.bf16.mxu1 %v10146_v60  ;;  %v841_v2 = vpop.permute.xlu0 %840 }
 0x15a   : > { %v13329_v7 = vsel %vm1010_vm8, %v12487_v19, %v725_v63  ;;  %v13332_v24 = vsel %vm17475_vm9, %v725_v63, %v767_v22  ;;  %5987 = vmatmul.mubr.bf16.gmra.mrb[8].mxu1 %v10145_v50  ;;  %v13346_v22 = vsel %vm17475_vm9, %v731_v27, %v13246_v11  ;;  %v13366_v63 = vsel %vm1082_vm10, %v13244_v52, %v841_v2 }
 0x15b   : > { %1290 = vrot.lane.b32.xlu1 %v13332_v24, %s12514_s13  ;;  %1288 = vrot.lane.b32.xlu0 %v13329_v7, %s12514_s13  ;;  %v10144_v13 = vcombine.low %v13332_v24, %v13326_v35  ;;  %v10143_v47 = vcombine.low %v13329_v7, %v13323_v1  ;;  %17496 = vst [vmem:[#allocation19_spill] sm:$0xff] %v13346_v22  ;;  %17499 = vst [vmem:[#allocation22_spill] sm:$0xff] %v13366_v63 }
 0x15c   : > { %v13370_v54 = vsel %vm1111_vm11, %v841_v2, %v13278_v26  ;;  %v1365_v2 = vsel %vm1358_vm14, %v13239_v4, %v13242_v55 }
 0x15d   : > { %v729_v25 = vpop.permute.xlu1 %728  ;;  %5921 = vmatprep.mubr.bf16.mxu0 %v10144_v13  ;;  %v13342_v28 = vpop.permute.xlu0 %950  ;;  %17500 = vst [vmem:[#allocation23_spill] sm:$0xff] %v13370_v54 }
 0x15e   : > { %v13350_v30 = vsel %vm17475_vm9, %v729_v25, %v13244_v52  ;;  %5922 = vmatmul.mubr.bf16.gmra.mrb[8].mxu0 %v10143_v47  ;;  %v13362_v53 = vsel %vm1010_vm8, %v12488_v32, %v729_v25  ;;  %v12489_v47 = vld [vmem:[#allocation2 + $0x38] sm:$0xf]  ;;  %v1359_v32 = vsel %vm1358_vm14, %v13231_v57, %v13237_v59 }
 0x15f   : > { %17497 = vst [vmem:[#allocation20_spill] sm:$0xff] %v13350_v30  ;;  %1304 = vrot.lane.b32.xlu1 %v13326_v35, %s12514_s13  ;;  %1302 = vrot.lane.b32.xlu0 %v13323_v1, %s12514_s13  ;;  %v10187_v3 = vcombine.low %v13350_v30, %v13346_v22  ;;  %17498 = vst [vmem:[#allocation21_spill] sm:$0xff] %v13362_v53  ;;  %v13381_v25 = vsel %vm1010_vm8, %v12489_v47, %v731_v27 }
 0x160   : > { %17503 = vst [vmem:[#allocation26_spill] sm:$0xff] %v13381_v25  ;;  %v10186_v27 = vcombine.low %v13362_v53, %v13381_v25  ;;  %v10064_v47 = vcombine.low %v1359_v32, %v1365_v2  ;;  %v12490_v2 = vld [vmem:[#allocation2 + $0x40] sm:$0xf] }
 0x161   : > { %v733_v60 = vpop.permute.xlu1 %732  ;;  %5929 = vmatprep.mubr.bf16.mxu0 %v10187_v3  ;;  %v843_v50 = vpop.permute.xlu0 %842 }
 0x162   : > { %v13374_v19 = vsel %vm1082_vm10, %v13246_v11, %v843_v50  ;;  %v13378_v13 = vsel %vm1111_vm11, %v843_v50, %v13296_v9  ;;  %v10062_v50 = vcombine.low %v1171_v31, %v13204_v37  ;;  %v12072_v37 = vld [vmem:[%s17341_s1 + $0x200] sm:$0xff]   ;;  %v2246_v31 = vsel %vm1358_vm14, %v12967_v5, %v13239_v4 }
 0x163   : > { %17501 = vst [vmem:[#allocation24_spill] sm:$0xff] %v13374_v19  ;;  %17502 = vst [vmem:[#allocation25_spill] sm:$0xff] %v13378_v13  ;;  %1318 = vrot.lane.b32.xlu1 %v13350_v30, %s12514_s13  ;;  %1316 = vrot.lane.b32.xlu0 %v13362_v53, %s12514_s13  ;;  %v10189_v52 = vcombine.low %v13370_v54, %v13378_v13  ;;  %v10188_v11 = vcombine.low %v13366_v63, %v13374_v19 }
 0x164   : > { %v2244_v5 = vsel %vm1358_vm14, %v13228_v58, %v13231_v57  ;;  %v13438_v4 = vsel %vm17474_vm13, %v13300_v33, %v13250_v14  ;;  %v12089_v58 = vld [vmem:[%s17341_s1 + $0x2c8] sm:$0xff]  }
 0x165   : > { %v13396_v3 = vpop.permute.xlu1 %948  ;;  %5994 = vmatprep.mubr.bf16.mxu1 %v10189_v52  ;;  %v1142_v52 = vsel %vm1140_vm12, %v12919_v41, %v13222_v51  ;;  %v13409_v0 = vpop.permute.xlu0 %844  ;;  %v13424_v41 = vsel %vm1010_vm8, %v12490_v2, %v733_v60  ;;  %v12073_v51 = vld [vmem:[%s17341_s1 + $0x248] sm:$0xff]   ;;  %17506 = vst [vmem:[#allocation29_spill] sm:$0xff] %v13438_v4  ;;  %v10063_v32 = vcombine.low %v2244_v5, %v2246_v31  ;;  %v12076_v2 = vld [vmem:[%s17341_s1 + $0x210] sm:$0xff]  }
 0x166   : > { %5930 = vmatmul.mubr.bf16.gmra.mrb[12].mxu0 %v10186_v27  ;;  %5995 = vmatmul.mubr.bf16.gmra.mrb[12].mxu1 %v10188_v11  ;;  %v13421_v11 = vsel %vm17475_vm9, %v733_v60, %v13248_v62  ;;  %17505 = vst [vmem:[#allocation28_spill] sm:$0xff] %v13424_v41  ;;  %v10061_v27 = vcombine.low %v1142_v52, %v13191_v38  ;;  %v12088_v60 = vld [vmem:[%s17341_s1 + $0x280] sm:$0xff]   ;;  %v12074_v38 = vld [vmem:[%s17341_s1 + $0x208] sm:$0xff]   ;;  %v12075_v52 = vld [vmem:[%s17341_s1 + $0x250] sm:$0xff]  }
 0x167   : > { %1332 = vrot.lane.b32.xlu1 %v13346_v22, %s12514_s13  ;;  %1330 = vrot.lane.b32.xlu0 %v13381_v25, %s12514_s13  ;;  %17504 = vst [vmem:[#allocation27_spill] sm:$0xff] %v13421_v11  ;;  %v12090_v31 = vld [vmem:[%s17341_s1 + $0x288] sm:$0xff]  }
 0x168   : > { %6035 = vmatprep.mubr.bf16.mxu0 %v10062_v50  ;;  %6100 = vmatprep.mubr.bf16.mxu1 %v10064_v47  ;;  %v10105_v47 = vcombine.low %v13213_v40, %v13438_v4  ;;  %v12093_v40 = vld [vmem:[%s17341_s1 + $0x2d8] sm:$0xff]  }
 0x169   : > { %v13411_v8 = vpop.permute.xlu1 %952  ;;  %v13453_v57 = vpop.permute.xlu0 %954 }
 0x16b   : > { %1346 = vrot.lane.b32.xlu1 %v13421_v11, %s12514_s13  ;;  %1344 = vrot.lane.b32.xlu0 %v13424_v41, %s12514_s13 }
 0x16d   : > { %v13445_v50 = vpop.permute.xlu1 %956 }
 0x16e   : > { %6036 = vmatmul.mubr.bf16.vlgmr.msra.gmra.mrb[16].mxu0 %v10061_v27  ;;  %6101 = vmatmul.mubr.bf16.vlgmr.msra.gmra.mrb[16].mxu1 %v10063_v32  ;;  %v13478_v27 = vsel %vm17474_vm13, %v13396_v3, %v13260_v17  ;;  %v12092_v32 = vld [vmem:[%s17341_s1 + $0x290] sm:$0xff]  }
 0x16f   : > { %10950 = vmatpush3.bf16.msra.mxu0 %v12072_v37  ;;  %1280 = vrot.lane.b32.xlu1 %v13290_v61, %s12514_s13  ;;  %v13470_v37 = vsel %vm1140_vm12, %v13252_v15, %v13300_v33  ;;  %17508 = vst [vmem:[#allocation31_spill] sm:$0xff] %v13478_v27  ;;  %v12077_v15 = vld [vmem:[%s17341_s1 + $0x258] sm:$0xff]   ;;  %v12091_v33 = vld [vmem:[%s17341_s1 + $0x2d0] sm:$0xff]  }
 0x170   : > { %1278 = vrot.lane.b32.xlu0 %v13286_v16, %s12514_s13  ;;  %17507 = vst [vmem:[#allocation30_spill] sm:$0xff] %v13470_v37  ;;  %6043 = vmatprep.mubr.bf16.mxu0 %v10105_v47  ;;  %v12078_v47 = vld [vmem:[%s17341_s1 + $0x218] sm:$0xff]  }
 0x171   : > { %10951 = vmatprep.subr.bf16.mxu0 %v12073_v51  ;;  %10990 = vmatpush3.bf16.msra.mxu1 %v12088_v60  ;;  %v13480_v5 = vpop.permute.xlu1 %776  ;;  %v13491_v51 = vsel %vm17474_vm13, %v13342_v28, %v13254_v6  ;;  %v10104_v60 = vcombine.low %v13199_v48, %v13470_v37  ;;  %v12079_v48 = vld [vmem:[%s17341_s1 + $0x260] sm:$0xff]  }
 0x172   : > { %10991 = vmatprep.subr.bf16.mxu1 %v12089_v58  ;;  %v10148_v58 = vcombine.low %v13478_v27, %v13491_v51 }
 0x173   : > { %10952 = vmatpush3.bf16.msra.mxu0 %v12074_v38  ;;  %1294 = vrot.lane.b32.xlu1 %v13309_v42, %s12514_s13  ;;  %v13502_v38 = vpop.permute.xlu0 %734 }
 0x174   : > { %1292 = vrot.lane.b32.xlu0 %v13305_v36, %s12514_s13  ;;  %10953 = vmatprep.subr.bf16.mxu0 %v12075_v52  ;;  %v12094_v52 = vld [vmem:[%s17341_s1 + $0x298] sm:$0xff]  }
 0x175   : > { %10992 = vmatpush3.bf16.msra.mxu1 %v12090_v31  ;;  %v13525_v31 = vsel %vm1140_vm12, %v13256_v49, %v13396_v3  ;;  %v13545_v49 = vsel %vm1140_vm12, %v13276_v46, %v13342_v28  ;;  %v12096_v28 = vld [vmem:[%s17341_s1 + $0x2a0] sm:$0xff]  }
 0x176   : > { %6044 = vmatmul.mubr.bf16.gmra.mrb[20].mxu0 %v10104_v60  ;;  %17509 = vst [vmem:[#allocation32_spill] sm:$0xff] %v13525_v31  ;;  %v12080_v60 = vld [vmem:[%s17341_s1 + $0x220] sm:$0xff]   ;;  %10993 = vmatprep.subr.bf16.mxu1 %v12091_v33  ;;  %v10147_v46 = vcombine.low %v13525_v31, %v13545_v49 }
 0x177   : > { %10954 = vmatpush3.bf16.msra.mxu0 %v12076_v2  ;;  %6051 = vmatprep.mubr.bf16.mxu0 %v10148_v58  ;;  %v13527_v2 = vpop.permute.xlu1 %1252  ;;  %v13535_v58 = vsel %vm17474_vm13, %v13411_v8, %v13283_v29  ;;  %v1251_v3 = vpop.permute.xlu0 %1250  ;;  %v12095_v33 = vld [vmem:[%s17341_s1 + $0x2e0] sm:$0xff]  }
 0x178   : > { %1284 = vrot.lane.b32.xlu1 %v13438_v4, %s12514_s13  ;;  %1282 = vrot.lane.b32.xlu0 %v13470_v37, %s12514_s13  ;;  %17510 = vst [vmem:[#allocation33_spill] sm:$0xff] %v13535_v58  ;;  %v13540_v37 = vsel %vm17474_vm13, %v13453_v57, %v13258_v18  ;;  %v12084_v4 = vld [vmem:[%s17341_s1 + $0x230] sm:$0xff]  }
 0x179   : > { %10955 = vmatprep.subr.bf16.mxu0 %v12077_v15  ;;  %17511 = vst [vmem:[#allocation34_spill] sm:$0xff] %v13540_v37  ;;  %10994 = vmatpush3.bf16.msra.mxu1 %v12092_v32  ;;  %v12081_v15 = vld [vmem:[%s17341_s1 + $0x268] sm:$0xff]  }
 0x17a   : > { %10995 = vmatprep.subr.bf16.mxu1 %v12093_v40  ;;  %v10191_v40 = vcombine.low %v13535_v58, %v13540_v37 }
 0x17b   : > { %10956 = vmatpush3.bf16.msra.mxu0 %v12078_v47  ;;  %v13564_v32 = vpop.permute.xlu1 %1266  ;;  %v12082_v47 = vld [vmem:[%s17341_s1 + $0x228] sm:$0xff]  }
 0x17c   : > { %1298 = vrot.lane.b32.xlu1 %v13478_v27, %s12514_s13  ;;  %1296 = vrot.lane.b32.xlu0 %v13525_v31, %s12514_s13  ;;  %v12083_v31 = vld [vmem:[%s17341_s1 + $0x270] sm:$0xff]  }
 0x17d   : > { %10957 = vmatprep.subr.bf16.mxu0 %v12079_v48  ;;  %10996 = vmatpush3.bf16.msra.mxu1 %v12094_v52  ;;  %v12097_v48 = vld [vmem:[%s17341_s1 + $0x2e8] sm:$0xff]  }
 0x17e   : > { %6052 = vmatmul.mubr.bf16.gmra.mrb[24].mxu0 %v10147_v46  ;;  %v12098_v52 = vld [vmem:[%s17341_s1 + $0x2a8] sm:$0xff]   ;;  %v13590_v46 = vsel %vm1140_vm12, %v13296_v9, %v13453_v57  ;;  %10997 = vmatprep.subr.bf16.mxu1 %v12095_v33  ;;  %v1361_v9 = vsel %vm1358_vm14, %v1251_v3, %v13527_v2 }
 0x17f   : > { %10958 = vmatpush3.bf16.msra.mxu0 %v12080_v60  ;;  %6059 = vmatprep.mubr.bf16.mxu0 %v10191_v40  ;;  %v13585_v60 = vsel %vm1140_vm12, %v13278_v26, %v13411_v8  ;;  %17513 = vst [vmem:[#allocation36_spill] sm:$0xff] %v13590_v46  ;;  %v1265_v40 = vpop.permute.xlu0 %1264  ;;  %v12085_v8 = vld [vmem:[%s17341_s1 + $0x278] sm:$0xff]   ;;  %v12099_v26 = vld [vmem:[%s17341_s1 + $0x2f0] sm:$0xff]  }
 0x180   : > { %1308 = vrot.lane.b32.xlu1 %v13316_v45, %s12514_s13  ;;  %1306 = vrot.lane.b32.xlu0 %v13312_v56, %s12514_s13  ;;  %17512 = vst [vmem:[#allocation35_spill] sm:$0xff] %v13585_v60  ;;  %v1367_v27 = vsel %vm1358_vm14, %v1265_v40, %v13564_v32  ;;  %v10190_v57 = vcombine.low %v13585_v60, %v13590_v46 }
 0x181   : > { %10959 = vmatprep.subr.bf16.mxu0 %v12081_v15  ;;  %10998 = vmatpush3.bf16.msra.mxu1 %v12096_v28  ;;  %v12100_v15 = vld [vmem:[%s17341_s1 + $0x2b0] sm:$0xff]   ;;  %v10066_v33 = vcombine.low %v1361_v9, %v1367_v27  ;;  %v12086_v28 = vld [vmem:[%s17341_s1 + $0x238] sm:$0xff]   ;;  %v12108_v9 = vld [vmem:[%s17341_s1 + $0x3c0] sm:$0xff]  }
 0x182   : > { %10999 = vmatprep.subr.bf16.mxu1 %v12097_v48  ;;  %v12102_v27 = vld [vmem:[%s17341_s1 + $0x2b8] sm:$0xff]   ;;  %v1360_v48 = vsel %vm1358_vm14, %v13237_v59, %v1251_v3  ;;  %v12105_v59 = vld [vmem:[%s17341_s1 + $0x348] sm:$0xff]  }
 0x183   : > { %10960 = vmatpush3.bf16.msra.mxu0 %v12082_v47  ;;  %v12101_v47 = vld [vmem:[%s17341_s1 + $0x2f8] sm:$0xff]  }
 0x184   : > { %1322 = vrot.lane.b32.xlu1 %v13370_v54, %s12514_s13  ;;  %1320 = vrot.lane.b32.xlu0 %v13366_v63, %s12514_s13 }
 0x185   : > { %10961 = vmatprep.subr.bf16.mxu0 %v12083_v31  ;;  %11000 = vmatpush3.bf16.msra.mxu1 %v12098_v52  ;;  %v1366_v31 = vsel %vm1358_vm14, %v13242_v55, %v1265_v40  ;;  %v12104_v52 = vld [vmem:[%s17341_s1 + $0x300] sm:$0xff]  }
 0x186   : > { %6060 = vmatmul.mubr.bf16.gmra.mrb[28].mxu0 %v10190_v57  ;;  %11001 = vmatprep.subr.bf16.mxu1 %v12099_v26  ;;  %v10065_v57 = vcombine.low %v1360_v48, %v1366_v31  ;;  %v12106_v26 = vld [vmem:[%s17341_s1 + $0x308] sm:$0xff]   ;;  %v12111_v48 = vld [vmem:[%s17341_s1 + $0x358] sm:$0xff]  }
 0x187   : > { %10962 = vmatpush3.bf16.msra.mxu0 %v12084_v4  ;;  %6165 = vmatprep.mubr.bf16.mxu0 %v10066_v33  ;;  %v12103_v4 = vld [vmem:[%s17341_s1 + $0x340] sm:$0xff]   ;;  %v12107_v33 = vld [vmem:[%s17341_s1 + $0x350] sm:$0xff]  }
 0x188   : > { %1312 = vrot.lane.b32.xlu1 %v13491_v51, %s12514_s13  ;;  %1310 = vrot.lane.b32.xlu0 %v13545_v49, %s12514_s13 }
 0x189   : > { %10963 = vmatprep.subr.bf16.mxu0 %v12085_v8  ;;  %11002 = vmatpush3.bf16.msra.mxu1 %v12100_v15 }
 0x18a   : > { %11003 = vmatprep.subr.bf16.mxu1 %v12101_v47  ;;  %v12109_v47 = vld [vmem:[%s17341_s1 + $0x310] sm:$0xff]  }
 0x18b   : > { %10964 = vmatpush3.bf16.msra.mxu0 %v12086_v28 }
 0x18c   : > { %1326 = vrot.lane.b32.xlu1 %v13535_v58, %s12514_s13  ;;  %1324 = vrot.lane.b32.xlu0 %v13585_v60, %s12514_s13 }
 0x18d   : > { %v10805_v55 = vpop.f32.mrb[0].mxu0  ;;  %11029 = vmatprep.subr.bf16.mxu0 %v12103_v4  ;;  %11004 = vmatpush3.bf16.msra.mxu1 %v12102_v27  ;;  %v13663_v27 = vsel %vm1082_vm10, %v13248_v62, %v13409_v0  ;;  %v13668_v4 = vsel %vm1111_vm11, %v13409_v0, %v13298_v12  ;;  %v12113_v0 = vld [vmem:[%s17341_s1 + $0x318] sm:$0xff]  }
 0x18e   : > { %v10806_v3 = vpop.f32.mrb[1].mxu0  ;;  %6166 = vmatmul.mubr.bf16.vlgmr.msra.gmra.mrb[32].mxu0 %v10065_v57  ;;  %11069 = vmatprep.subr.bf16.mxu1 %v12108_v9  ;;  %17514 = vst [vmem:[#allocation37_spill] sm:$0xff] %v13663_v27  ;;  %17515 = vst [vmem:[#allocation38_spill] sm:$0xff] %v13668_v4 }
 0x18f   : > { %v10807_v40 = vadd.f32 %v10806_v3, %v10805_v55  ;;  %v10808_v8 = vpop.f32.mrb[2].mxu0  ;;  %11030 = vmatpush3.bf16.msra.mxu0 %v12104_v52  ;;  %v12115_v55 = vld [vmem:[%s17341_s1 + $0x360] sm:$0xff]  }
 0x190   : > { %1336 = vrot.lane.b32.xlu1 %v13378_v13, %s12514_s13  ;;  %1334 = vrot.lane.b32.xlu0 %v13374_v19, %s12514_s13  ;;  %v10809_v15 = vpop.f32.mrb[3].mxu0 }
 0x191   : > { %v10810_v28 = vadd.f32 %v10809_v15, %v10808_v8  ;;  %11031 = vmatprep.subr.bf16.mxu0 %v12105_v59  ;;  %v13692_v8 = vsel %vm1140_vm12, %v13298_v12, %v13445_v50  ;;  %v12119_v12 = vld [vmem:[%s17341_s1 + $0x368] sm:$0xff]  }
 0x192   : > { %17517 = vst [vmem:[#allocation40_spill] sm:$0xff] %v13692_v8 }
 0x193   : > { %11032 = vmatpush3.bf16.msra.mxu0 %v12106_v26  ;;  %v13697_v26 = vsel %vm17474_vm13, %v13445_v50, %v13302_v34  ;;  %v12121_v50 = vld [vmem:[%s17341_s1 + $0x328] sm:$0xff]  }
 0x194   : > { %1350 = vrot.lane.b32.xlu1 %v13668_v4, %s12514_s13  ;;  %1348 = vrot.lane.b32.xlu0 %v13663_v27, %s12514_s13  ;;  %17518 = vst [vmem:[#allocation41_spill] sm:$0xff] %v13697_v26 }
 0x195   : > { %v10845_v31 = vpop.f32.mrb[0].mxu1  ;;  %11033 = vmatprep.subr.bf16.mxu0 %v12107_v33  ;;  %v13718_v33 = vpop.permute.xlu0 %846 }
 0x196   : > { %v10846_v62 = vpop.f32.mrb[1].mxu1 }
 0x197   : > { %v10847_v52 = vadd.f32 %v10846_v62, %v10845_v31  ;;  %v10848_v9 = vpop.f32.mrb[2].mxu1  ;;  %11034 = vmatpush3.bf16.msra.mxu0 %v12109_v47  ;;  %v13723_v47 = vpop.permute.xlu1 %888  ;;  %v12125_v31 = vld [vmem:[%s17341_s1 + $0x330] sm:$0xff]  }
 0x198   : > { %1340 = vrot.lane.b32.xlu1 %v13540_v37, %s12514_s13  ;;  %1338 = vrot.lane.b32.xlu0 %v13590_v46, %s12514_s13  ;;  %v10849_v57 = vpop.f32.mrb[3].mxu1 }
 0x199   : > { %v13687_v59 = vadd.f32 %v10847_v52, %v10807_v40  ;;  %v10850_v3 = vadd.f32 %v10849_v57, %v10848_v9  ;;  %11035 = vmatprep.subr.bf16.mxu0 %v12111_v48  ;;  %v12117_v40 = vld [vmem:[%s17341_s1 + $0x320] sm:$0xff]   ;;  %v12127_v48 = vld [vmem:[%s17341_s1 + $0x378] sm:$0xff]   ;;  %v13735_v62 = vpop.permute.xlu0 %1254 }
 0x19a   : > { %v12129_v52 = vld [vmem:[%s17341_s1 + $0x338] sm:$0xff]  }
 0x19b   : > { %17516 = vst [vmem:[#allocation39_spill] sm:$0xff] %v13687_v59  ;;  %v13699_v15 = vadd.f32 %v10850_v3, %v10810_v28  ;;  %11036 = vmatpush3.bf16.msra.mxu0 %v12113_v0  ;;  %v12123_v28 = vld [vmem:[%s17341_s1 + $0x370] sm:$0xff]  }
 0x19c   : > { %1354 = vrot.lane.b32.xlu1 %v13697_v26, %s12514_s13  ;;  %1352 = vrot.lane.b32.xlu0 %v13692_v8, %s12514_s13 }
 0x19d   : > { %17519 = vst [vmem:[#allocation42_spill] sm:$0xff] %v13699_v15  ;;  %11037 = vmatprep.subr.bf16.mxu0 %v12115_v55 }
 0x19f   : > { %11038 = vmatpush3.bf16.msra.mxu0 %v12117_v40 }
 0x1a0   : > { %1429 = vrot.lane.b32.xlu1 %v13263_v20, %s12513_s10  ;;  %1427 = vrot.lane.b32.xlu0 %v13266_v21, %s12513_s10 }
 0x1a1   : > { %11039 = vmatprep.subr.bf16.mxu0 %v12119_v12 }
 0x1a3   : > { %11040 = vmatpush3.bf16.msra.mxu0 %v12121_v50 }
 0x1a4   : > { %1419 = vrot.lane.b32.xlu1 %v13183_v44, %s12513_s10  ;;  %1417 = vrot.lane.b32.xlu0 %v13174_v39, %s12513_s10  ;;  %v13744_v44 = vpop.permute.xlu1 %1256  ;;  %v13750_v39 = vpop.permute.xlu0 %1268 }
 0x1a5   : > { %11041 = vmatprep.subr.bf16.mxu0 %v12123_v28 }
 0x1a7   : > { %11042 = vmatpush3.bf16.msra.mxu0 %v12125_v31 }
 0x1a8   : > { %1433 = vrot.lane.b32.xlu1 %v13290_v61, %s12513_s10  ;;  %1431 = vrot.lane.b32.xlu0 %v13286_v16, %s12513_s10  ;;  %v13752_v9 = vpop.permute.xlu1 %1270  ;;  %v13758_v0 = vpop.permute.xlu0 %958 }
 0x1a9   : > { %11043 = vmatprep.subr.bf16.mxu0 %v12127_v48 }
 0x1ab   : > { %11044 = vmatpush3.bf16.msra.mxu0 %v12129_v52  ;;  %v12136_v52 = vld [vmem:[%s17341_s1 + $0x440] sm:$0xff]  }
 0x1ac   : > { %1300 = vrot.lane.b32.xlu1 %v13260_v17, %s12514_s13  ;;  %1286 = vrot.lane.b32.xlu0 %v13250_v14, %s12514_s13  ;;  %v13764_v57 = vpop.permute.xlu1 %1000  ;;  %v13770_v55 = vpop.permute.xlu0 %1258 }
 0x1ad   : > { %17520 = vst [vmem:[#allocation43_spill] sm:$0xff] %v13764_v57  ;;  %11109 = vmatprep.subr.bf16.mxu0 %v12136_v52 }
 0x1b0   : > { %1443 = vrot.lane.b32.xlu1 %v13332_v24, %s12513_s10  ;;  %1441 = vrot.lane.b32.xlu0 %v13329_v7, %s12513_s10  ;;  %v13772_v3 = vpop.permute.xlu1 %1272  ;;  %v13778_v40 = vpop.permute.xlu0 %1413 }
 0x1b4   : > { %1457 = vrot.lane.b32.xlu1 %v13326_v35, %s12513_s10  ;;  %1455 = vrot.lane.b32.xlu0 %v13323_v1, %s12513_s10  ;;  %v13784_v12 = vpop.permute.xlu1 %1415  ;;  %v13790_v50 = vpop.permute.xlu0 %736 }
 0x1b5   : > { %17521 = vst [vmem:[#allocation44_spill] sm:$0xff] %v13790_v50 }
 0x1b8   : > { %1447 = vrot.lane.b32.xlu1 %v13309_v42, %s12513_s10  ;;  %1445 = vrot.lane.b32.xlu0 %v13305_v36, %s12513_s10  ;;  %v13792_v28 = vpop.permute.xlu1 %778  ;;  %v1275_v48 = vpop.permute.xlu0 %1274 }
 0x1b9   : > { %17522 = vst [vmem:[#allocation45_spill] sm:$0xff] %v13792_v28  ;;  %v2248_v42 = vsel %vm1358_vm14, %v12969_v10, %v1275_v48 }
 0x1bc   : > { %1461 = vrot.lane.b32.xlu1 %v13316_v45, %s12513_s10  ;;  %1459 = vrot.lane.b32.xlu0 %v13312_v56, %s12513_s10  ;;  %v13798_v31 = vpop.permute.xlu1 %1276 }
 0x1bd   : > { %v1371_v36 = vsel %vm1358_vm14, %v1275_v48, %v13798_v31 }
 0x1c0   : > { %1328 = vrot.lane.b32.xlu1 %v13283_v29, %s12514_s13  ;;  %1314 = vrot.lane.b32.xlu0 %v13254_v6, %s12514_s13 }
 0x1c4   : > { %1471 = vrot.lane.b32.xlu1 %v13350_v30, %s12513_s10  ;;  %1469 = vrot.lane.b32.xlu0 %v13362_v53, %s12513_s10 }
 0x1c8   : > { %1485 = vrot.lane.b32.xlu1 %v13346_v22, %s12513_s10  ;;  %1483 = vrot.lane.b32.xlu0 %v13381_v25, %s12513_s10 }
 0x1cc   : > { %1475 = vrot.lane.b32.xlu1 %v13370_v54, %s12513_s10  ;;  %1473 = vrot.lane.b32.xlu0 %v13366_v63, %s12513_s10 }
 0x1cd   : > { %v13807_v56 = vpop.permute.xlu1 %1290  ;;  %v1289_v45 = vpop.permute.xlu0 %1288 }
 0x1ce   : > { %v1377_v15 = vsel %vm1358_vm14, %v1289_v45, %v13807_v56  ;;  %v2250_v59 = vsel %vm1358_vm14, %v13250_v14, %v1289_v45 }
 0x1cf   : > { %v10107_v54 = vcombine.low %v1371_v36, %v1377_v15  ;;  %v10106_v16 = vcombine.low %v2248_v42, %v2250_v59 }
 0x1d0   : > { %1489 = vrot.lane.b32.xlu1 %v13378_v13, %s12513_s10  ;;  %1487 = vrot.lane.b32.xlu0 %v13374_v19, %s12513_s10 }
 0x1d1   : > { %v13821_v52 = vpop.permute.xlu1 %1304  ;;  %6108 = vmatprep.mubr.bf16.mxu1 %v10107_v54  ;;  %v1303_v63 = vpop.permute.xlu0 %1302 }
 0x1d2   : > { %6109 = vmatmul.mubr.bf16.gmra.mrb[20].mxu1 %v10106_v16  ;;  %v1383_v42 = vsel %vm1358_vm14, %v1303_v63, %v13821_v52  ;;  %v2252_v59 = vsel %vm1358_vm14, %v13260_v17, %v1303_v63  ;;  %v12491_v63 = vld [vmem:[#allocation2 + $0x48] sm:$0xf] }
 0x1d3   : > { %v13845_v61 = vsel %vm1010_vm8, %v12491_v63, %v13502_v38 }
 0x1d4   : > { %1356 = vrot.lane.b32.xlu1 %v13302_v34, %s12514_s13  ;;  %1342 = vrot.lane.b32.xlu0 %v13258_v18, %s12514_s13  ;;  %17523 = vst [vmem:[#allocation46_spill] sm:$0xff] %v13845_v61 }
 0x1d5   : > { %v13827_v45 = vpop.permute.xlu1 %1318  ;;  %v1317_v36 = vpop.permute.xlu0 %1316 }
 0x1d6   : > { %v1389_v54 = vsel %vm1358_vm14, %v1317_v36, %v13827_v45  ;;  %v2254_v16 = vsel %vm1358_vm14, %v13254_v6, %v1317_v36  ;;  %v13850_v36 = vsel %vm17475_vm9, %v13502_v38, %v13480_v5 }
 0x1d7   : > { %v10150_v15 = vcombine.low %v1383_v42, %v1389_v54  ;;  %v10149_v48 = vcombine.low %v2252_v59, %v2254_v16  ;;  %17524 = vst [vmem:[#allocation47_spill] sm:$0xff] %v13850_v36 }
 0x1d8   : > { %1499 = vrot.lane.b32.xlu1 %v13421_v11, %s12513_s10  ;;  %1497 = vrot.lane.b32.xlu0 %v13424_v41, %s12513_s10 }
 0x1d9   : > { %v13841_v19 = vpop.permute.xlu1 %1332  ;;  %6116 = vmatprep.mubr.bf16.mxu1 %v10150_v15  ;;  %v1331_v13 = vpop.permute.xlu0 %1330 }
 0x1da   : > { %6117 = vmatmul.mubr.bf16.gmra.mrb[24].mxu1 %v10149_v48  ;;  %v1395_v54 = vsel %vm1358_vm14, %v1331_v13, %v13841_v19  ;;  %v2256_v16 = vsel %vm1358_vm14, %v13283_v29, %v1331_v13  ;;  %v1369_v48 = vsel %vm1358_vm14, %v13750_v39, %v13752_v9  ;;  %v1363_v13 = vsel %vm1358_vm14, %v13735_v62, %v13744_v44 }
 0x1dc   : > { %1513 = vrot.lane.b32.xlu1 %v13850_v36, %s12513_s10  ;;  %1511 = vrot.lane.b32.xlu0 %v13845_v61, %s12513_s10 }
 0x1dd   : > { %v13856_v42 = vpop.permute.xlu1 %1346  ;;  %v1345_v59 = vpop.permute.xlu0 %1344 }
 0x1de   : > { %v1401_v15 = vsel %vm1358_vm14, %v1345_v59, %v13856_v42  ;;  %v2258_v38 = vsel %vm1358_vm14, %v13258_v18, %v1345_v59  ;;  %v13879_v59 = vsel %vm1082_vm10, %v13480_v5, %v13718_v33 }
 0x1df   : > { %v10193_v63 = vcombine.low %v1395_v54, %v1401_v15  ;;  %v10192_v28 = vcombine.low %v2256_v16, %v2258_v38  ;;  %17525 = vst [vmem:[#allocation48_spill] sm:$0xff] %v13879_v59  ;;  %v10068_v54 = vcombine.low %v1363_v13, %v1369_v48  ;;  %v1368_v16 = vsel %vm1358_vm14, %v13564_v32, %v13750_v39 }
 0x1e0   : > { %1503 = vrot.lane.b32.xlu1 %v13668_v4, %s12513_s10  ;;  %1501 = vrot.lane.b32.xlu0 %v13663_v27, %s12513_s10  ;;  %v13884_v4 = vsel %vm1111_vm11, %v13718_v33, %v13723_v47  ;;  %v866_v38 = vrot.slane %v13026_v43, 2  ;;  %v1362_v13 = vsel %vm1358_vm14, %v13527_v2, %v13735_v62  ;;  %v12112_v2 = vld [vmem:[%s17341_s1 + $0x3c8] sm:$0xff]   ;;  %v17527_v62 = vld [vmem:[#allocation6_spill] sm:$0xff] }
 0x1e1   : > { %v1281_v50 = vpop.permute.xlu1 %1280  ;;  %6124 = vmatprep.mubr.bf16.mxu1 %v10193_v63  ;;  %17526 = vst [vmem:[#allocation49_spill] sm:$0xff] %v13884_v4 }
 0x1e2   : > { %v1279_v61 = vpop.permute.xlu0 %1278  ;;  %6125 = vmatmul.mubr.bf16.gmra.mrb[28].mxu1 %v10192_v28 }
 0x1e3   : > { %6230 = vmatprep.mubr.bf16.mxu1 %v10068_v54  ;;  %v1372_v33 = vsel %vm1358_vm14, %v13798_v31, %v1279_v61  ;;  %v1373_v28 = vsel %vm1358_vm14, %v1279_v61, %v1281_v50  ;;  %v10067_v54 = vcombine.low %v1362_v13, %v1368_v16  ;;  %v12110_v61 = vld [vmem:[%s17341_s1 + $0x380] sm:$0xff]   ;;  %v12114_v16 = vld [vmem:[%s17341_s1 + $0x388] sm:$0xff]  }
 0x1e4   : > { %1517 = vrot.lane.b32.xlu1 %v13884_v4, %s12513_s10  ;;  %1515 = vrot.lane.b32.xlu0 %v13879_v59, %s12513_s10 }
 0x1e5   : > { %v1295_v5 = vpop.permute.xlu1 %1294 }
 0x1e6   : > { %v1293_v15 = vpop.permute.xlu0 %1292 }
 0x1e7   : > { %v1378_v48 = vsel %vm1358_vm14, %v13807_v56, %v1293_v15  ;;  %v1379_v63 = vsel %vm1358_vm14, %v1293_v15, %v1295_v5 }
 0x1e8   : > { %890 = vrot.lane.b32.xlu1 %v866_v38, %s12511_s30  ;;  %848 = vrot.lane.b32.xlu0 %v13073_v23, %s12510_s21  ;;  %v10109_v32 = vcombine.low %v1373_v28, %v1379_v63  ;;  %v10108_v39 = vcombine.low %v1372_v33, %v1378_v48  ;;  %v17528_v23 = vld [vmem:[#allocation5_spill] sm:$0xff]  ;;  %v12116_v33 = vld [vmem:[%s17341_s1 + $0x3d0] sm:$0xff]  }
 0x1ea   : > { %v13909_v31 = vpop.permute.xlu1 %1284  ;;  %6173 = vmatprep.mubr.bf16.mxu0 %v10109_v32  ;;  %v1283_v56 = vpop.permute.xlu0 %1282  ;;  %6231 = vmatmul.mubr.bf16.vlgmr.msra.gmra.mrb[32].mxu1 %v10067_v54  ;;  %v17529_v32 = vld [vmem:[#allocation29_spill] sm:$0xff] }
 0x1eb   : > { %6174 = vmatmul.mubr.bf16.gmra.mrb[36].mxu0 %v10108_v39  ;;  %11070 = vmatpush3.bf16.msra.mxu1 %v12110_v61  ;;  %v1374_v28 = vsel %vm1358_vm14, %v1281_v50, %v1283_v56  ;;  %v1375_v48 = vsel %vm1358_vm14, %v1283_v56, %v13909_v31  ;;  %v17530_v39 = vld [vmem:[#allocation30_spill] sm:$0xff]  ;;  %v12118_v50 = vld [vmem:[%s17341_s1 + $0x390] sm:$0xff]  }
 0x1ec   : > { %1423 = vrot.lane.b32.xlu1 %v17527_v62, %s12513_s10  ;;  %1421 = vrot.lane.b32.xlu0 %v17528_v23, %s12513_s10  ;;  %v12120_v62 = vld [vmem:[%s17341_s1 + $0x3d8] sm:$0xff]   ;;  %v17531_v23 = vld [vmem:[#allocation4_spill] sm:$0xff] }
 0x1ed   : > { %11071 = vmatprep.subr.bf16.mxu1 %v12112_v2 }
 0x1ee   : > { %v13921_v15 = vpop.permute.xlu1 %1298  ;;  %v1297_v38 = vpop.permute.xlu0 %1296 }
 0x1ef   : > { %v1380_v63 = vsel %vm1358_vm14, %v1295_v5, %v1297_v38  ;;  %v1381_v13 = vsel %vm1358_vm14, %v1297_v38, %v13921_v15  ;;  %11072 = vmatpush3.bf16.msra.mxu1 %v12114_v16  ;;  %v978_v5 = vrot.slane %v13026_v43, 3  ;;  %v12122_v16 = vld [vmem:[%s17341_s1 + $0x398] sm:$0xff]   ;;  %v12124_v43 = vld [vmem:[%s17341_s1 + $0x3e0] sm:$0xff]  }
 0x1f0   : > { %1437 = vrot.lane.b32.xlu1 %v17529_v32, %s12513_s10  ;;  %1435 = vrot.lane.b32.xlu0 %v17530_v39, %s12513_s10  ;;  %v10111_v54 = vcombine.low %v1375_v48, %v1381_v13  ;;  %v10110_v61 = vcombine.low %v1374_v28, %v1380_v63 }
 0x1f1   : > { %11073 = vmatprep.subr.bf16.mxu1 %v12116_v33 }
 0x1f2   : > { %v1309_v2 = vpop.permute.xlu1 %1308  ;;  %6238 = vmatprep.mubr.bf16.mxu1 %v10111_v54  ;;  %v1307_v56 = vpop.permute.xlu0 %1306 }
 0x1f3   : > { %6239 = vmatmul.mubr.bf16.gmra.mrb[36].mxu1 %v10110_v61  ;;  %v1384_v33 = vsel %vm1358_vm14, %v13821_v52, %v1307_v56  ;;  %v1385_v48 = vsel %vm1358_vm14, %v1307_v56, %v1309_v2  ;;  %v12126_v52 = vld [vmem:[%s17341_s1 + $0x3a0] sm:$0xff]  }
 0x1f4   : > { %1002 = vrot.lane.b32.xlu1 %v978_v5, %s12513_s10  ;;  %960 = vrot.lane.b32.xlu0 %v17531_v23, %s12512_s9  ;;  %v12131_v23 = vld [vmem:[%s17341_s1 + $0x3f0] sm:$0xff]  }
 0x1f5   : > { %11074 = vmatpush3.bf16.msra.mxu1 %v12118_v50 }
 0x1f6   : > { %v1323_v38 = vpop.permute.xlu1 %1322  ;;  %v1321_v28 = vpop.permute.xlu0 %1320  ;;  %11075 = vmatprep.subr.bf16.mxu1 %v12120_v62 }
 0x1f7   : > { %v1390_v63 = vsel %vm1358_vm14, %v13827_v45, %v1321_v28  ;;  %v1391_v13 = vsel %vm1358_vm14, %v1321_v28, %v1323_v38  ;;  %v12128_v45 = vld [vmem:[%s17341_s1 + $0x3e8] sm:$0xff]  }
 0x1f8   : > { %1439 = vrot.lane.b32.xlu1 %v13250_v14, %s12513_s10  ;;  %1425 = vrot.lane.b32.xlu0 %v12969_v10, %s12513_s10  ;;  %v10152_v54 = vcombine.low %v1385_v48, %v1391_v13  ;;  %v10151_v61 = vcombine.low %v1384_v33, %v1390_v63  ;;  %v12130_v10 = vld [vmem:[%s17341_s1 + $0x3a8] sm:$0xff]  }
 0x1f9   : > { %11076 = vmatpush3.bf16.msra.mxu1 %v12122_v16  ;;  %v17532_v13 = vld [vmem:[#allocation31_spill] sm:$0xff] }
 0x1fa   : > { %v13965_v50 = vpop.permute.xlu1 %1312  ;;  %6181 = vmatprep.mubr.bf16.mxu0 %v10152_v54  ;;  %v1311_v56 = vpop.permute.xlu0 %1310  ;;  %11077 = vmatprep.subr.bf16.mxu1 %v12124_v43  ;;  %v17533_v54 = vld [vmem:[#allocation32_spill] sm:$0xff] }
 0x1fb   : > { %6182 = vmatmul.mubr.bf16.gmra.mrb[40].mxu0 %v10151_v61  ;;  %v1386_v16 = vsel %vm1358_vm14, %v1309_v2, %v1311_v56  ;;  %v12132_v2 = vld [vmem:[%s17341_s1 + $0x3b0] sm:$0xff]   ;;  %v12134_v61 = vld [vmem:[%s17341_s1 + $0x3b8] sm:$0xff]  }
 0x1fc   : > { %1582 = vrot.lane.b32.xlu1 %v13263_v20, %s12512_s9  ;;  %1580 = vrot.lane.b32.xlu0 %v13266_v21, %s12512_s9  ;;  %v1387_v20 = vsel %vm1358_vm14, %v1311_v56, %v13965_v50 }
 0x1fd   : > { %11078 = vmatpush3.bf16.msra.mxu1 %v12126_v52 }
 0x1fe   : > { %v13977_v5 = vpop.permute.xlu1 %1326  ;;  %v1325_v62 = vpop.permute.xlu0 %1324  ;;  %11079 = vmatprep.subr.bf16.mxu1 %v12128_v45  ;;  %v12145_v45 = vld [vmem:[%s17341_s1 + $0x4c0] sm:$0xff]  }
 0x1ff   : > { %v1392_v21 = vsel %vm1358_vm14, %v1323_v38, %v1325_v62  ;;  %v1393_v28 = vsel %vm1358_vm14, %v1325_v62, %v13977_v5  ;;  %v12133_v38 = vld [vmem:[%s17341_s1 + $0x3f8] sm:$0xff]  }
 0x200   : > { %1596 = vrot.lane.b32.xlu1 %v13332_v24, %s12512_s9  ;;  %1594 = vrot.lane.b32.xlu0 %v13329_v7, %s12512_s9  ;;  %v10154_v43 = vcombine.low %v1387_v20, %v1393_v28  ;;  %v10153_v33 = vcombine.low %v1386_v16, %v1392_v21 }
 0x201   : > { %11080 = vmatpush3.bf16.msra.mxu1 %v12130_v10 }
 0x202   : > { %v1337_v48 = vpop.permute.xlu1 %1336  ;;  %6246 = vmatprep.mubr.bf16.mxu1 %v10154_v43  ;;  %v1335_v63 = vpop.permute.xlu0 %1334  ;;  %11081 = vmatprep.subr.bf16.mxu1 %v12131_v23 }
 0x203   : > { %6247 = vmatmul.mubr.bf16.gmra.mrb[40].mxu1 %v10153_v33  ;;  %v1396_v10 = vsel %vm1358_vm14, %v13841_v19, %v1335_v63  ;;  %v1397_v62 = vsel %vm1358_vm14, %v1335_v63, %v1337_v48 }
 0x204   : > { %1451 = vrot.lane.b32.xlu1 %v17532_v13, %s12513_s10  ;;  %1449 = vrot.lane.b32.xlu0 %v17533_v54, %s12513_s10 }
 0x205   : > { %11082 = vmatpush3.bf16.msra.mxu1 %v12132_v2 }
 0x206   : > { %v1351_v52 = vpop.permute.xlu1 %1350  ;;  %v1349_v56 = vpop.permute.xlu0 %1348  ;;  %11083 = vmatprep.subr.bf16.mxu1 %v12133_v38 }
 0x207   : > { %v1402_v23 = vsel %vm1358_vm14, %v13856_v42, %v1349_v56  ;;  %v1403_v16 = vsel %vm1358_vm14, %v1349_v56, %v1351_v52 }
 0x208   : > { %1465 = vrot.lane.b32.xlu1 %v13491_v51, %s12513_s10  ;;  %1463 = vrot.lane.b32.xlu0 %v13545_v49, %s12513_s10  ;;  %v10195_v20 = vcombine.low %v1397_v62, %v1403_v16  ;;  %v10194_v21 = vcombine.low %v1396_v10, %v1402_v23 }
 0x209   : > { %11084 = vmatpush3.bf16.msra.mxu1 %v12134_v61  ;;  %v1364_v61 = vsel %vm1358_vm14, %v13744_v44, %v13770_v55  ;;  %v1526_v44 = vsel %vm17474_vm13, %v13778_v40, %v13784_v12 }
 0x20a   : > { %v14018_v28 = vpop.permute.xlu1 %1340  ;;  %6189 = vmatprep.mubr.bf16.mxu0 %v10195_v20  ;;  %v1339_v19 = vpop.permute.xlu0 %1338  ;;  %11149 = vmatprep.subr.bf16.mxu1 %v12145_v45  ;;  %v1370_v45 = vsel %vm1358_vm14, %v13752_v9, %v13772_v3  ;;  %v2261_v62 = vsel %vm17474_vm13, %v1364_v61, %v13778_v40  ;;  %v12137_v20 = vld [vmem:[%s17341_s1 + $0x400] sm:$0xff]  }
 0x20b   : > { %6190 = vmatmul.mubr.bf16.gmra.mrb[44].mxu0 %v10194_v21  ;;  %v1398_v33 = vsel %vm1358_vm14, %v1337_v48, %v1339_v19  ;;  %v1399_v2 = vsel %vm1358_vm14, %v1339_v19, %v14018_v28  ;;  %v12138_v19 = vld [vmem:[%s17341_s1 + $0x448] sm:$0xff]  }
 0x20c   : > { %1467 = vrot.lane.b32.xlu1 %v13254_v6, %s12513_s10  ;;  %1453 = vrot.lane.b32.xlu0 %v13260_v17, %s12513_s10 }
 0x20e   : > { %v14024_v42 = vpop.permute.xlu1 %1354  ;;  %v1353_v43 = vpop.permute.xlu0 %1352 }
 0x20f   : > { %v1404_v63 = vsel %vm1358_vm14, %v1351_v52, %v1353_v43  ;;  %v1405_v38 = vsel %vm1358_vm14, %v1353_v43, %v14024_v42 }
 0x210   : > { %1610 = vrot.lane.b32.xlu1 %v13326_v35, %s12512_s9  ;;  %1608 = vrot.lane.b32.xlu0 %v13323_v1, %s12512_s9  ;;  %v10197_v56 = vcombine.low %v1399_v2, %v1405_v38  ;;  %v10196_v48 = vcombine.low %v1398_v33, %v1404_v63  ;;  %v12139_v38 = vld [vmem:[%s17341_s1 + $0x408] sm:$0xff]  }
 0x212   : > { %v1430_v52 = vpop.permute.xlu1 %1429  ;;  %6254 = vmatprep.mubr.bf16.mxu1 %v10197_v56  ;;  %v1428_v10 = vpop.permute.xlu0 %1427 }
 0x213   : > { %v1532_v55 = vsel %vm17474_vm13, %v1428_v10, %v1430_v52  ;;  %v2264_v23 = vsel %vm17474_vm13, %v1370_v45, %v1428_v10  ;;  %6255 = vmatmul.mubr.bf16.gmra.mrb[44].mxu1 %v10196_v48  ;;  %v12140_v45 = vld [vmem:[%s17341_s1 + $0x450] sm:$0xff]  }
 0x214   : > { %v10069_v16 = vcombine.low %v2261_v62, %v2264_v23  ;;  %1624 = vrot.lane.b32.xlu1 %v13350_v30, %s12512_s9  ;;  %1622 = vrot.lane.b32.xlu0 %v13362_v53, %s12512_s9  ;;  %v10070_v9 = vcombine.low %v1526_v44, %v1532_v55 }
 0x215   : > { %v10811_v3 = vpop.f32.mrb[4].mxu0 }
 0x216   : > { %v14056_v21 = vpop.permute.xlu1 %1419  ;;  %6295 = vmatprep.mubr.bf16.mxu0 %v10070_v9  ;;  %v1418_v40 = vpop.permute.xlu0 %1417 }
 0x217   : > { %v10812_v43 = vpop.f32.mrb[5].mxu0  ;;  %6296 = vmatmul.mubr.bf16.vlgmr.msra.gmra.mrb[48].mxu0 %v10069_v16  ;;  %v1527_v10 = vsel %vm17474_vm13, %v13784_v12, %v1418_v40  ;;  %v1528_v62 = vsel %vm17474_vm13, %v1418_v40, %v14056_v21  ;;  %v12141_v12 = vld [vmem:[%s17341_s1 + $0x410] sm:$0xff]   ;;  %v12149_v40 = vld [vmem:[%s17341_s1 + $0x4c8] sm:$0xff]  }
 0x218   : > { %v10813_v33 = vadd.f32 %v10812_v43, %v10811_v3  ;;  %v10814_v2 = vpop.f32.mrb[6].mxu0  ;;  %1479 = vrot.lane.b32.xlu1 %v13535_v58, %s12513_s10  ;;  %1477 = vrot.lane.b32.xlu0 %v13585_v60, %s12513_s10  ;;  %v12143_v43 = vld [vmem:[%s17341_s1 + $0x418] sm:$0xff]  }
 0x219   : > { %v10815_v63 = vpop.f32.mrb[7].mxu0  ;;  %11110 = vmatpush3.bf16.msra.mxu0 %v12137_v20  ;;  %v12142_v20 = vld [vmem:[%s17341_s1 + $0x458] sm:$0xff]  }
 0x21a   : > { %v10816_v61 = vadd.f32 %v10815_v63, %v10814_v2  ;;  %v14068_v56 = vpop.permute.xlu1 %1433  ;;  %v1432_v48 = vpop.permute.xlu0 %1431  ;;  %11111 = vmatprep.subr.bf16.mxu0 %v12138_v19  ;;  %v12151_v2 = vld [vmem:[%s17341_s1 + $0x488] sm:$0xff]  }
 0x21b   : > { %v1533_v44 = vsel %vm17474_vm13, %v1430_v52, %v1432_v48  ;;  %v1534_v55 = vsel %vm17474_vm13, %v1432_v48, %v14068_v56  ;;  %v12147_v52 = vld [vmem:[%s17341_s1 + $0x480] sm:$0xff]  }
 0x21c   : > { %v10071_v23 = vcombine.low %v1527_v10, %v1533_v44  ;;  %1493 = vrot.lane.b32.xlu1 %v13540_v37, %s12513_s10  ;;  %1491 = vrot.lane.b32.xlu0 %v13590_v46, %s12513_s10  ;;  %v10072_v16 = vcombine.low %v1528_v62, %v1534_v55  ;;  %v12144_v48 = vld [vmem:[%s17341_s1 + $0x460] sm:$0xff]  }
 0x21d   : > { %11112 = vmatpush3.bf16.msra.mxu0 %v12139_v38 }
 0x21e   : > { %v1301_v9 = vpop.permute.xlu1 %1300  ;;  %6360 = vmatprep.mubr.bf16.mxu1 %v10072_v16  ;;  %v1287_v3 = vpop.permute.xlu0 %1286  ;;  %11113 = vmatprep.subr.bf16.mxu0 %v12140_v45  ;;  %v12153_v45 = vld [vmem:[%s17341_s1 + $0x4d0] sm:$0xff]   ;;  %v12146_v16 = vld [vmem:[%s17341_s1 + $0x420] sm:$0xff]  }
 0x21f   : > { %6361 = vmatmul.mubr.bf16.vlgmr.msra.gmra.mrb[48].mxu1 %v10071_v23  ;;  %v1382_v55 = vsel %vm1358_vm14, %v13921_v15, %v1301_v9  ;;  %v12148_v15 = vld [vmem:[%s17341_s1 + $0x468] sm:$0xff]  }
 0x220   : > { %1495 = vrot.lane.b32.xlu1 %v13258_v18, %s12513_s10  ;;  %1481 = vrot.lane.b32.xlu0 %v13283_v29, %s12513_s10 }
 0x221   : > { %v10851_v19 = vpop.f32.mrb[4].mxu1  ;;  %11114 = vmatpush3.bf16.msra.mxu0 %v12141_v12  ;;  %11150 = vmatpush3.bf16.msra.mxu1 %v12147_v52  ;;  %v12155_v12 = vld [vmem:[%s17341_s1 + $0x490] sm:$0xff]   ;;  %v1376_v52 = vsel %vm1358_vm14, %v13909_v31, %v1287_v3 }
 0x222   : > { %v14106_v63 = vpop.permute.xlu1 %1443  ;;  %v1442_v38 = vpop.permute.xlu0 %1441  ;;  %11115 = vmatprep.subr.bf16.mxu0 %v12142_v20  ;;  %11151 = vmatprep.subr.bf16.mxu1 %v12149_v40 }
 0x223   : > { %v10852_v10 = vpop.f32.mrb[5].mxu1  ;;  %v1538_v9 = vsel %vm17474_vm13, %v1442_v38, %v14106_v63 }
 0x224   : > { %v10853_v62 = vadd.f32 %v10852_v10, %v10851_v19  ;;  %v10854_v44 = vpop.f32.mrb[6].mxu1  ;;  %1638 = vrot.lane.b32.xlu1 %v13346_v22, %s12512_s9  ;;  %1636 = vrot.lane.b32.xlu0 %v13381_v25, %s12512_s9 }
 0x225   : > { %v10855_v23 = vpop.f32.mrb[7].mxu1  ;;  %11116 = vmatpush3.bf16.msra.mxu0 %v12143_v43  ;;  %11152 = vmatpush3.bf16.msra.mxu1 %v12151_v2  ;;  %v2267_v43 = vsel %vm17474_vm13, %v1376_v52, %v1442_v38  ;;  %v12150_v38 = vld [vmem:[%s17341_s1 + $0x428] sm:$0xff]   ;;  %v12161_v52 = vld [vmem:[%s17341_s1 + $0x4a0] sm:$0xff]  }
 0x226   : > { %v14128_v20 = vadd.f32 %v10853_v62, %v10813_v33  ;;  %v10856_v40 = vadd.f32 %v10855_v23, %v10854_v44  ;;  %v1458_v19 = vpop.permute.xlu1 %1457  ;;  %v1456_v10 = vpop.permute.xlu0 %1455  ;;  %11117 = vmatprep.subr.bf16.mxu0 %v12144_v48  ;;  %11153 = vmatprep.subr.bf16.mxu1 %v12153_v45  ;;  %v12157_v33 = vld [vmem:[%s17341_s1 + $0x4d8] sm:$0xff]   ;;  %v12160_v23 = vld [vmem:[%s17341_s1 + $0x4e0] sm:$0xff]  }
 0x227   : > { %v1544_v2 = vsel %vm17474_vm13, %v1456_v10, %v1458_v19  ;;  %v2270_v31 = vsel %vm17474_vm13, %v1382_v55, %v1456_v10  ;;  %v12159_v62 = vld [vmem:[%s17341_s1 + $0x498] sm:$0xff]   ;;  %v12152_v55 = vld [vmem:[%s17341_s1 + $0x470] sm:$0xff]  }
 0x228   : > { %v14141_v3 = vadd.f32 %v10856_v40, %v10816_v61  ;;  %1652 = vrot.lane.b32.xlu1 %v13421_v11, %s12512_s9  ;;  %1650 = vrot.lane.b32.xlu0 %v13424_v41, %s12512_s9  ;;  %v10113_v48 = vcombine.low %v1538_v9, %v1544_v2  ;;  %v10112_v45 = vcombine.low %v2267_v43, %v2270_v31  ;;  %v542_v43 = vld [vmem:[#allocation2 + $0x58] sm:$0xf]  ;;  %v543_v2 = vld [vmem:[#allocation2 + $0x5c] sm:$0x7] }
 0x229   : > { %11118 = vmatpush3.bf16.msra.mxu0 %v12146_v16  ;;  %11154 = vmatpush3.bf16.msra.mxu1 %v12155_v12  ;;  %v12154_v12 = vld [vmem:[%s17341_s1 + $0x430] sm:$0xff]   ;;  %v14174_v40 = vsel %vm1140_vm12, %v13723_v47, %v13758_v0  ;;  %v14181_v9 = vsel %vm17474_vm13, %v13758_v0, %v13764_v57  ;;  %v12156_v31 = vld [vmem:[%s17341_s1 + $0x478] sm:$0xff]   ;;  %v14200_v41 = vcombine.low %v542_v43, %v543_v2 }
 0x22a   : > { %v14153_v61 = vpop.permute.xlu1 %1447  ;;  %6303 = vmatprep.mubr.bf16.mxu0 %v10113_v48  ;;  %v1446_v44 = vpop.permute.xlu0 %1445  ;;  %11119 = vmatprep.subr.bf16.mxu0 %v12148_v15  ;;  %17534 = vst [vmem:[#allocation6_spill] sm:$0xff] %v14174_v40  ;;  %17535 = vst [vmem:[#allocation5_spill] sm:$0xff] %v14181_v9  ;;  %v12164_v43 = vld [vmem:[%s17341_s1 + $0x4f0] sm:$0xff]  }
 0x22b   : > { %6304 = vmatmul.mubr.bf16.gmra.mrb[52].mxu0 %v10112_v45  ;;  %11155 = vmatprep.subr.bf16.mxu1 %v12157_v33  ;;  %v1539_v47 = vsel %vm17474_vm13, %v14106_v63, %v1446_v44  ;;  %v1540_v33 = vsel %vm17474_vm13, %v1446_v44, %v14153_v61 }
 0x22c   : > { %1507 = vrot.lane.b32.xlu1 %v13697_v26, %s12513_s10  ;;  %1505 = vrot.lane.b32.xlu0 %v13692_v8, %s12513_s10 }
 0x22d   : > { %v10857_v16 = vpop.f32.mrb[8].mxu1  ;;  %11120 = vmatpush3.bf16.msra.mxu0 %v12150_v38  ;;  %11156 = vmatpush3.bf16.msra.mxu1 %v12159_v62  ;;  %v12162_v38 = vld [vmem:[%s17341_s1 + $0x4e8] sm:$0xff]  }
 0x22e   : > { %v14176_v10 = vpop.permute.xlu1 %1461  ;;  %v1460_v15 = vpop.permute.xlu0 %1459  ;;  %11121 = vmatprep.subr.bf16.mxu0 %v12152_v55  ;;  %11157 = vmatprep.subr.bf16.mxu1 %v12160_v23 }
 0x22f   : > { %v1545_v48 = vsel %vm17474_vm13, %v1458_v19, %v1460_v15  ;;  %v1546_v0 = vsel %vm17474_vm13, %v1460_v15, %v14176_v10  ;;  %v10858_v45 = vpop.f32.mrb[9].mxu1  ;;  %v12158_v15 = vld [vmem:[%s17341_s1 + $0x438] sm:$0xff]  }
 0x230   : > { %v10859_v62 = vadd.f32 %v10858_v45, %v10857_v16  ;;  %v10860_v55 = vpop.f32.mrb[10].mxu1  ;;  %1521 = vrot.lane.b32.xlu1 %v14181_v9, %s12513_s10  ;;  %1519 = vrot.lane.b32.xlu0 %v14174_v40, %s12513_s10  ;;  %v10115_v63 = vcombine.low %v1540_v33, %v1546_v0  ;;  %v10114_v44 = vcombine.low %v1539_v47, %v1545_v48  ;;  %v12163_v16 = vld [vmem:[%s17341_s1 + $0x4a8] sm:$0xff]   ;;  %v14219_v33 = vshll.u32 %v14200_v41, 16  ;;  %v12165_v48 = vld [vmem:[%s17341_s1 + $0x4b0] sm:$0xff]  }
 0x231   : > { %v10861_v23 = vpop.f32.mrb[11].mxu1  ;;  %v10817_v19 = vpop.f32.mrb[8].mxu0  ;;  %11122 = vmatpush3.bf16.msra.mxu0 %v12154_v12  ;;  %11158 = vmatpush3.bf16.msra.mxu1 %v12161_v52  ;;  %v12169_v12 = vld [vmem:[%s17341_s1 + $0x540] sm:$0xff]  }
 0x232   : > { %v10862_v45 = vadd.f32 %v10861_v23, %v10860_v55  ;;  %v1329_v11 = vpop.permute.xlu1 %1328  ;;  %6368 = vmatprep.mubr.bf16.mxu1 %v10115_v63  ;;  %v1315_v18 = vpop.permute.xlu0 %1314  ;;  %11123 = vmatprep.subr.bf16.mxu0 %v12156_v31 }
 0x233   : > { %v10818_v2 = vpop.f32.mrb[9].mxu0  ;;  %6369 = vmatmul.mubr.bf16.gmra.mrb[52].mxu1 %v10114_v44  ;;  %11159 = vmatprep.subr.bf16.mxu1 %v12162_v38  ;;  %v12166_v44 = vld [vmem:[%s17341_s1 + $0x4f8] sm:$0xff]  }
 0x234   : > { %v10819_v52 = vadd.f32 %v10818_v2, %v10817_v19  ;;  %v10820_v47 = vpop.f32.mrb[10].mxu0  ;;  %1523 = vrot.lane.b32.xlu1 %v13764_v57, %s12513_s10  ;;  %1509 = vrot.lane.b32.xlu0 %v13302_v34, %s12513_s10  ;;  %v17536_v19 = vld [vmem:[#allocation46_spill] sm:$0xff] }
 0x235   : > { %v10821_v31 = vpop.f32.mrb[11].mxu0  ;;  %11124 = vmatpush3.bf16.msra.mxu0 %v12158_v15  ;;  %11160 = vmatpush3.bf16.msra.mxu1 %v12163_v16  ;;  %v700_v16 = vrot.slane %v14219_v33, 1 }
 0x236   : > { %v14224_v0 = vadd.f32 %v10859_v62, %v10819_v52  ;;  %v10822_v38 = vadd.f32 %v10821_v31, %v10820_v47  ;;  %v1472_v55 = vpop.permute.xlu1 %1471  ;;  %v1470_v63 = vpop.permute.xlu0 %1469  ;;  %11161 = vmatprep.subr.bf16.mxu1 %v12164_v43  ;;  %11189 = vmatprep.subr.bf16.mxu0 %v12169_v12  ;;  %v14236_v62 = vshrl.u32 %v14200_v41, 16  ;;  %v12167_v43 = vld [vmem:[%s17341_s1 + $0x4b8] sm:$0xff]   ;;  %v12492_v52 = vld [vmem:[#allocation2 + $0x50] sm:$0xf] }
 0x237   : > { %v17537_v47 = vld [vmem:[#allocation44_spill] sm:$0xff]  ;;  %v1550_v57 = vsel %vm17474_vm13, %v1470_v63, %v1472_v55 }
 0x238   : > { %v14229_v23 = vadd.f32 %v10862_v45, %v10822_v38  ;;  %1666 = vrot.lane.b32.xlu1 %v13850_v36, %s12512_s9  ;;  %1664 = vrot.lane.b32.xlu0 %v17536_v19, %s12512_s9  ;;  %v1388_v45 = vsel %vm1358_vm14, %v13965_v50, %v1315_v18  ;;  %v14246_v31 = vsel %vm1010_vm8, %v12492_v52, %v17537_v47  ;;  %v12176_v38 = vld [vmem:[%s17341_s1 + $0x5c0] sm:$0xff]   ;;  %v17539_v36 = vld [vmem:[#allocation45_spill] sm:$0xff] }
 0x239   : > { %v10823_v15 = vpop.f32.mrb[12].mxu0  ;;  %11162 = vmatpush3.bf16.msra.mxu1 %v12165_v48  ;;  %v10863_v12 = vpop.f32.mrb[12].mxu1  ;;  %17538 = vst [vmem:[#allocation29_spill] sm:$0xff] %v14246_v31  ;;  %v1394_v48 = vsel %vm1358_vm14, %v13977_v5, %v1329_v11  ;;  %v2273_v19 = vsel %vm17474_vm13, %v1388_v45, %v1470_v63  ;;  %v14258_v34 = vsel %vm17475_vm9, %v17537_v47, %v17539_v36  ;;  %v755_v11 = vrot.slane %v14200_v41, 1 }
 0x23a   : > { %v1486_v2 = vpop.permute.xlu1 %1485  ;;  %11163 = vmatprep.subr.bf16.mxu1 %v12166_v44  ;;  %v1484_v18 = vpop.permute.xlu0 %1483  ;;  %17540 = vst [vmem:[#allocation30_spill] sm:$0xff] %v14258_v34  ;;  %v701_v6 = vor.u32 %v700_v16, %v14236_v62 }
 0x23b   : > { %v10824_v50 = vpop.f32.mrb[13].mxu0  ;;  %v1556_v44 = vsel %vm17474_vm13, %v1484_v18, %v1486_v2  ;;  %v2276_v52 = vsel %vm17474_vm13, %v1394_v48, %v1484_v18  ;;  %v10864_v22 = vpop.f32.mrb[13].mxu1 }
 0x23c   : > { %v10825_v25 = vadd.f32 %v10824_v50, %v10823_v15  ;;  %v10826_v53 = vpop.f32.mrb[14].mxu0  ;;  %1680 = vrot.lane.b32.xlu1 %v14258_v34, %s12512_s9  ;;  %1678 = vrot.lane.b32.xlu0 %v14246_v31, %s12512_s9  ;;  %v10865_v5 = vadd.f32 %v10864_v22, %v10863_v12  ;;  %v10866_v63 = vpop.f32.mrb[14].mxu1  ;;  %v10156_v47 = vcombine.low %v1550_v57, %v1556_v44 }
 0x23d   : > { %v10827_v45 = vpop.f32.mrb[15].mxu0  ;;  %v10155_v30 = vcombine.low %v2273_v19, %v2276_v52  ;;  %11164 = vmatpush3.bf16.msra.mxu1 %v12167_v43  ;;  %v10867_v15 = vpop.f32.mrb[15].mxu1 }
 0x23e   : > { %v10828_v48 = vadd.f32 %v10827_v45, %v10826_v53  ;;  %v14268_v18 = vpop.permute.xlu1 %1475  ;;  %11229 = vmatprep.subr.bf16.mxu1 %v12176_v38  ;;  %v14270_v50 = vadd.f32 %v10865_v5, %v10825_v25  ;;  %v10868_v34 = vadd.f32 %v10867_v15, %v10866_v63  ;;  %6311 = vmatprep.mubr.bf16.mxu0 %v10156_v47  ;;  %v1474_v31 = vpop.permute.xlu0 %1473  ;;  %v819_v25 = vrot.slane %v14236_v62, 1  ;;  %v17542_v63 = vld [vmem:[#allocation10_spill] sm:$0xff] }
 0x23f   : > { %6312 = vmatmul.mubr.bf16.gmra.mrb[56].mxu0 %v10155_v30  ;;  %v1551_v53 = vsel %vm17474_vm13, %v1472_v55, %v1474_v31  ;;  %v1552_v38 = vsel %vm17474_vm13, %v1474_v31, %v14268_v18  ;;  %v820_v31 = vrot.slane %v14219_v33, 2 }
 0x240   : > { %780 = vrot.lane.b32.xlu1 %v755_v11, %s12509_s14  ;;  %v14273_v22 = vadd.f32 %v10868_v34, %v10828_v48  ;;  %738 = vrot.lane.b32.xlu0 %v701_v6, %s12508_s23  ;;  %v17541_v11 = vld [vmem:[#allocation11_spill] sm:$0xff] }
 0x241   : > { %v10885_v57 = vpop.f32.mrb[16].mxu0  ;;  %v10925_v19 = vpop.f32.mrb[16].mxu1 }
 0x242   : > { %v14276_v16 = vpop.permute.xlu1 %1489  ;;  %v1488_v43 = vpop.permute.xlu0 %1487 }
 0x243   : > { %v10886_v12 = vpop.f32.mrb[17].mxu0  ;;  %v1557_v30 = vsel %vm17474_vm13, %v1486_v2, %v1488_v43  ;;  %v1558_v34 = vsel %vm17474_vm13, %v1488_v43, %v14276_v16  ;;  %v10926_v6 = vpop.f32.mrb[17].mxu1  ;;  %v17543_v2 = vld [vmem:[#allocation39_spill] sm:$0xff] }
 0x244   : > { %v10887_v44 = vadd.f32 %v10886_v12, %v10885_v57  ;;  %v10888_v52 = vpop.f32.mrb[18].mxu0  ;;  %1586 = vrot.lane.b32.xlu1 %v17541_v11, %s12512_s9  ;;  %v10927_v5 = vadd.f32 %v10926_v6, %v10925_v19  ;;  %v10928_v55 = vpop.f32.mrb[18].mxu1  ;;  %1584 = vrot.lane.b32.xlu0 %v17542_v63, %s12512_s9  ;;  %v10158_v47 = vcombine.low %v1552_v38, %v1558_v34  ;;  %v17544_v19 = vld [vmem:[#allocation42_spill] sm:$0xff]  ;;  %v17546_v38 = vld [vmem:[#allocation13_spill] sm:$0xff] }
 0x245   : > { %v10889_v45 = vpop.f32.mrb[19].mxu0  ;;  %v10157_v48 = vcombine.low %v1551_v53, %v1557_v30  ;;  %v10929_v43 = vpop.f32.mrb[19].mxu1  ;;  %v17545_v11 = vld [vmem:[#allocation14_spill] sm:$0xff]  ;;  %v867_v53 = vrot.slane %v14200_v41, 2  ;;  %v821_v34 = vor.u32 %v820_v31, %v819_v25 }
 0x246   : > { %v6038_v15 = vadd.f32 %v10887_v44, %v17543_v2  ;;  %v10890_v29 = vadd.f32 %v10889_v45, %v10888_v52  ;;  %v1357_v57 = vpop.permute.xlu1 %1356  ;;  %v10930_v12 = vadd.f32 %v10929_v43, %v10928_v55  ;;  %6376 = vmatprep.mubr.bf16.mxu1 %v10158_v47  ;;  %v1343_v1 = vpop.permute.xlu0 %1342 }
 0x247   : > { %6377 = vmatmul.mubr.bf16.gmra.mrb[56].mxu1 %v10157_v48  ;;  %v1406_v25 = vsel %vm1358_vm14, %v14024_v42, %v1357_v57  ;;  %v1400_v31 = vsel %vm1358_vm14, %v14018_v28, %v1343_v1  ;;  %vm7648_vm14 = vcmask 1041088  }
 0x248   : > { %v14291_v35 = vadd.f32 %v10927_v5, %v6038_v15  ;;  %v6041_v6 = vadd.f32 %v10890_v29, %v17544_v19  ;;  %1600 = vrot.lane.b32.xlu1 %v17545_v11, %s12512_s9  ;;  %1598 = vrot.lane.b32.xlu0 %v17546_v38, %s12512_s9  ;;  %vm7649_vm2 = vmand %vm7648_vm14, %vm7511_vm6 }
 0x249   : > { %v10891_v30 = vpop.f32.mrb[20].mxu0 }
 0x24a   : > { %v14299_v44 = vadd.f32 %v10930_v12, %v6041_v6  ;;  %v1500_v52 = vpop.permute.xlu1 %1499  ;;  %v10892_v55 = vpop.f32.mrb[21].mxu0 }
 0x24b   : > { %v1498_v63 = vpop.permute.xlu0 %1497  ;;  %v10893_v5 = vadd.f32 %v10892_v55, %v10891_v30  ;;  %v10894_v45 = vpop.f32.mrb[22].mxu0 }
 0x24c   : > { %892 = vrot.lane.b32.xlu1 %v867_v53, %s12511_s30  ;;  %v10895_v29 = vpop.f32.mrb[23].mxu0  ;;  %850 = vrot.lane.b32.xlu0 %v821_v34, %s12510_s21  ;;  %v1562_v12 = vsel %vm17474_vm13, %v1498_v63, %v1500_v52  ;;  %v2279_v19 = vsel %vm17474_vm13, %v1400_v31, %v1498_v63  ;;  %v17547_v31 = vld [vmem:[#allocation16_spill] sm:$0xff] }
 0x24d   : > { %v14303_v47 = vadd.f32 %v10893_v5, %v14128_v20  ;;  %v10896_v48 = vadd.f32 %v10895_v29, %v10894_v45 }
 0x24e   : > { %v1514_v2 = vpop.permute.xlu1 %1513 }
 0x24f   : > { %v14311_v15 = vadd.f32 %v10896_v48, %v14141_v3  ;;  %v1512_v43 = vpop.permute.xlu0 %1511 }
 0x250   : > { %v1568_v20 = vsel %vm17474_vm13, %v1512_v43, %v1514_v2  ;;  %v2282_v6 = vsel %vm17474_vm13, %v1406_v25, %v1512_v43  ;;  %1590 = vrot.lane.b32.xlu1 %v17529_v32, %s12512_s9  ;;  %1588 = vrot.lane.b32.xlu0 %v17530_v39, %s12512_s9  ;;  %v17548_v43 = vld [vmem:[#allocation15_spill] sm:$0xff] }
 0x251   : > { %v10897_v42 = vpop.f32.mrb[24].mxu0  ;;  %v10199_v1 = vcombine.low %v1562_v12, %v1568_v20  ;;  %v10198_v28 = vcombine.low %v2279_v19, %v2282_v6 }
 0x252   : > { %v14321_v3 = vpop.permute.xlu1 %1503  ;;  %v10898_v57 = vpop.f32.mrb[25].mxu0 }
 0x253   : > { %6319 = vmatprep.mubr.bf16.mxu0 %v10199_v1  ;;  %v1502_v53 = vpop.permute.xlu0 %1501  ;;  %v10899_v30 = vadd.f32 %v10898_v57, %v10897_v42  ;;  %v10900_v34 = vpop.f32.mrb[26].mxu0  ;;  %v17549_v1 = vld [vmem:[#allocation23_spill] sm:$0xff] }
 0x254   : > { %6320 = vmatmul.mubr.bf16.gmra.mrb[60].mxu0 %v10198_v28  ;;  %1604 = vrot.lane.b32.xlu1 %v17532_v13, %s12512_s9  ;;  %v10901_v55 = vpop.f32.mrb[27].mxu0  ;;  %v1563_v29 = vsel %vm17474_vm13, %v1500_v52, %v1502_v53  ;;  %v1564_v48 = vsel %vm17474_vm13, %v1502_v53, %v14321_v3  ;;  %v17550_v53 = vld [vmem:[#allocation22_spill] sm:$0xff] }
 0x255   : > { %v14326_v32 = vadd.f32 %v10899_v30, %v14224_v0  ;;  %1602 = vrot.lane.b32.xlu0 %v17533_v54, %s12512_s9  ;;  %v10902_v39 = vadd.f32 %v10901_v55, %v10900_v34 }
 0x256   : > { %v14330_v63 = vpop.permute.xlu1 %1517 }
 0x257   : > { %v14333_v5 = vadd.f32 %v10902_v39, %v14229_v23  ;;  %v1516_v45 = vpop.permute.xlu0 %1515 }
 0x258   : > { %v1569_v25 = vsel %vm17474_vm13, %v1514_v2, %v1516_v45  ;;  %v1570_v0 = vsel %vm17474_vm13, %v1516_v45, %v14330_v63  ;;  %1614 = vrot.lane.b32.xlu1 %v17547_v31, %s12512_s9 }
 0x259   : > { %1612 = vrot.lane.b32.xlu0 %v17548_v43, %s12512_s9  ;;  %v10903_v12 = vpop.f32.mrb[28].mxu0  ;;  %v10201_v23 = vcombine.low %v1564_v48, %v1570_v0  ;;  %v10200_v19 = vcombine.low %v1563_v29, %v1569_v25 }
 0x25a   : > { %v14345_v20 = vpop.permute.xlu1 %890  ;;  %v10904_v52 = vpop.f32.mrb[29].mxu0 }
 0x25b   : > { %6384 = vmatprep.mubr.bf16.mxu1 %v10201_v23  ;;  %v14347_v6 = vpop.permute.xlu0 %848  ;;  %v10905_v42 = vadd.f32 %v10904_v52, %v10903_v12  ;;  %v10906_v2 = vpop.f32.mrb[30].mxu0 }
 0x25c   : > { %6385 = vmatmul.mubr.bf16.gmra.mrb[60].mxu1 %v10200_v19  ;;  %1628 = vrot.lane.b32.xlu1 %v17549_v1, %s12512_s9  ;;  %v10907_v28 = vpop.f32.mrb[31].mxu0 }
 0x25d   : > { %v14352_v57 = vadd.f32 %v10905_v42, %v14270_v50  ;;  %1626 = vrot.lane.b32.xlu0 %v17550_v53, %s12512_s9  ;;  %v10908_v30 = vadd.f32 %v10907_v28, %v10906_v2 }
 0x25e   : > { %v1424_v34 = vpop.permute.xlu1 %1423 }
 0x25f   : > { %v14357_v55 = vadd.f32 %v10908_v30, %v14273_v22  ;;  %v1422_v39 = vpop.permute.xlu0 %1421  ;;  %v12170_v30 = vld [vmem:[%s17341_s1 + $0x500] sm:$0xff]  }
 0x260   : > { %1618 = vrot.lane.b32.xlu1 %v13491_v51, %s12512_s9  ;;  %v1529_v12 = vsel %vm17474_vm13, %v14056_v21, %v1422_v39  ;;  %v1530_v23 = vsel %vm17474_vm13, %v1422_v39, %v1424_v34  ;;  %v12171_v39 = vld [vmem:[%s17341_s1 + $0x548] sm:$0xff]  }
 0x261   : > { %1616 = vrot.lane.b32.xlu0 %v13545_v49, %s12512_s9  ;;  %v10965_v45 = vpop.f32.mrb[32].mxu0 }
 0x262   : > { %v1438_v29 = vpop.permute.xlu1 %1437  ;;  %v10966_v48 = vpop.f32.mrb[33].mxu0 }
 0x263   : > { %v1436_v50 = vpop.permute.xlu0 %1435  ;;  %v10967_v25 = vadd.f32 %v10966_v48, %v10965_v45  ;;  %v10968_v0 = vpop.f32.mrb[34].mxu0  ;;  %v17552_v48 = vld [vmem:[#allocation25_spill] sm:$0xff] }
 0x264   : > { %v1535_v22 = vsel %vm17474_vm13, %v14068_v56, %v1436_v50  ;;  %v1536_v19 = vsel %vm17474_vm13, %v1436_v50, %v1438_v29  ;;  %1632 = vrot.lane.b32.xlu1 %v13535_v58, %s12512_s9  ;;  %v10969_v52 = vpop.f32.mrb[35].mxu0  ;;  %v17553_v50 = vld [vmem:[#allocation24_spill] sm:$0xff] }
 0x265   : > { %v10073_v42 = vcombine.low %v1529_v12, %v1535_v22  ;;  %v14372_v2 = vadd.f32 %v10967_v25, %v14291_v35  ;;  %1630 = vrot.lane.b32.xlu0 %v13585_v60, %s12512_s9  ;;  %v10970_v28 = vadd.f32 %v10969_v52, %v10968_v0  ;;  %v10074_v21 = vcombine.low %v1530_v23, %v1536_v19  ;;  %v12172_v25 = vld [vmem:[%s17341_s1 + $0x508] sm:$0xff]   ;;  %v17554_v23 = vld [vmem:[#allocation38_spill] sm:$0xff]  ;;  %v12174_v22 = vld [vmem:[%s17341_s1 + $0x510] sm:$0xff]  }
 0x266   : > { %v14379_v56 = vpop.permute.xlu1 %1002  ;;  %v12175_v52 = vld [vmem:[%s17341_s1 + $0x558] sm:$0xff]  }
 0x267   : > { %17551 = vst [vmem:[#allocation4_spill] sm:$0xff] %v14379_v56  ;;  %v14385_v45 = vadd.f32 %v10970_v28, %v14299_v44  ;;  %6425 = vmatprep.mubr.bf16.mxu0 %v10074_v21  ;;  %v14387_v35 = vpop.permute.xlu0 %960  ;;  %v12173_v44 = vld [vmem:[%s17341_s1 + $0x550] sm:$0xff]   ;;  %v12177_v28 = vld [vmem:[%s17341_s1 + $0x518] sm:$0xff]  }
 0x268   : > { %6426 = vmatmul.mubr.bf16.vlgmr.msra.gmra.mrb[64].mxu0 %v10073_v42  ;;  %1642 = vrot.lane.b32.xlu1 %v17552_v48, %s12512_s9 }
 0x269   : > { %1640 = vrot.lane.b32.xlu0 %v17553_v50, %s12512_s9  ;;  %11190 = vmatpush3.bf16.msra.mxu0 %v12170_v30  ;;  %v12179_v30 = vld [vmem:[%s17341_s1 + $0x560] sm:$0xff]  }
 0x26a   : > { %v1440_v0 = vpop.permute.xlu1 %1439  ;;  %11191 = vmatprep.subr.bf16.mxu0 %v12171_v39 }
 0x26b   : > { %v1426_v12 = vpop.permute.xlu0 %1425  ;;  %v1537_v39 = vsel %vm17474_vm13, %v1438_v29, %v1440_v0 }
 0x26c   : > { %1656 = vrot.lane.b32.xlu1 %v17554_v23, %s12512_s9 }
 0x26d   : > { %1654 = vrot.lane.b32.xlu0 %v13663_v27, %s12512_s9  ;;  %11192 = vmatpush3.bf16.msra.mxu0 %v12172_v25  ;;  %v1531_v25 = vsel %vm17474_vm13, %v1424_v34, %v1426_v12  ;;  %v12178_v34 = vld [vmem:[%s17341_s1 + $0x580] sm:$0xff]   ;;  %v12180_v12 = vld [vmem:[%s17341_s1 + $0x5c8] sm:$0xff]  }
 0x26e   : > { %v14406_v19 = vpop.permute.xlu1 %1582  ;;  %11193 = vmatprep.subr.bf16.mxu0 %v12173_v44 }
 0x26f   : > { %v1581_v42 = vpop.permute.xlu0 %1580 }
 0x270   : > { %1646 = vrot.lane.b32.xlu1 %v13540_v37, %s12512_s9 }
 0x271   : > { %1644 = vrot.lane.b32.xlu0 %v13590_v46, %s12512_s9  ;;  %11194 = vmatpush3.bf16.msra.mxu0 %v12174_v22  ;;  %v1693_v46 = vsel %vm1140_vm12, %v1581_v42, %v14406_v19  ;;  %v2285_v22 = vsel %vm1140_vm12, %v1531_v25, %v1581_v42 }
 0x272   : > { %v14418_v21 = vpop.permute.xlu1 %1596  ;;  %11195 = vmatprep.subr.bf16.mxu0 %v12175_v52 }
 0x273   : > { %v1595_v44 = vpop.permute.xlu0 %1594 }
 0x274   : > { %v1699_v37 = vsel %vm1140_vm12, %v1595_v44, %v14418_v21  ;;  %v2288_v60 = vsel %vm1140_vm12, %v1537_v39, %v1595_v44  ;;  %1660 = vrot.lane.b32.xlu1 %v13697_v26, %s12512_s9  ;;  %v12185_v39 = vld [vmem:[%s17341_s1 + $0x528] sm:$0xff]   ;;  %v14465_v44 = vsel %vm1111_vm11, %v14347_v6, %v14345_v20 }
 0x275   : > { %v10075_v52 = vcombine.low %v2285_v22, %v2288_v60  ;;  %1658 = vrot.lane.b32.xlu0 %v13692_v8, %s12512_s9  ;;  %v10076_v29 = vcombine.low %v1693_v46, %v1699_v37  ;;  %11196 = vmatpush3.bf16.msra.mxu0 %v12177_v28  ;;  %v12181_v60 = vld [vmem:[%s17341_s1 + $0x520] sm:$0xff]   ;;  %v12183_v37 = vld [vmem:[%s17341_s1 + $0x568] sm:$0xff]   ;;  %v14470_v22 = vsel %vm1082_vm10, %v17539_v36, %v14347_v6 }
 0x276   : > { %v14438_v0 = vpop.permute.xlu1 %1451  ;;  %11197 = vmatprep.subr.bf16.mxu0 %v12179_v30  ;;  %v12182_v46 = vld [vmem:[%s17341_s1 + $0x588] sm:$0xff]   ;;  %v12184_v30 = vld [vmem:[%s17341_s1 + $0x5d0] sm:$0xff]  }
 0x277   : > { %6490 = vmatprep.mubr.bf16.mxu1 %v10076_v29  ;;  %v1450_v42 = vpop.permute.xlu0 %1449 }
 0x278   : > { %6491 = vmatmul.mubr.bf16.vlgmr.msra.gmra.mrb[64].mxu1 %v10075_v52  ;;  %1670 = vrot.lane.b32.xlu1 %v13884_v4, %s12512_s9  ;;  %v12187_v52 = vld [vmem:[%s17341_s1 + $0x570] sm:$0xff]   ;;  %v1541_v29 = vsel %vm17474_vm13, %v14153_v61, %v1450_v42 }
 0x279   : > { %1668 = vrot.lane.b32.xlu0 %v13879_v59, %s12512_s9  ;;  %11230 = vmatpush3.bf16.msra.mxu1 %v12178_v34  ;;  %v1542_v34 = vsel %vm17474_vm13, %v1450_v42, %v14438_v0  ;;  %v12186_v61 = vld [vmem:[%s17341_s1 + $0x590] sm:$0xff]  }
 0x27a   : > { %v1466_v28 = vpop.permute.xlu1 %1465  ;;  %11231 = vmatprep.subr.bf16.mxu1 %v12180_v12  ;;  %11198 = vmatpush3.bf16.msra.mxu0 %v12181_v60  ;;  %v12189_v42 = vld [vmem:[%s17341_s1 + $0x530] sm:$0xff]  }
 0x27b   : > { %v1464_v25 = vpop.permute.xlu0 %1463  ;;  %11199 = vmatprep.subr.bf16.mxu0 %v12183_v37 }
 0x27c   : > { %v1547_v12 = vsel %vm17474_vm13, %v14176_v10, %v1464_v25  ;;  %v1548_v60 = vsel %vm17474_vm13, %v1464_v25, %v1466_v28  ;;  %1684 = vrot.lane.b32.xlu1 %v14465_v44, %s12512_s9  ;;  %v12188_v10 = vld [vmem:[%s17341_s1 + $0x5d8] sm:$0xff]  }
 0x27d   : > { %1682 = vrot.lane.b32.xlu0 %v14470_v22, %s12512_s9  ;;  %v10117_v36 = vcombine.low %v1542_v34, %v1548_v60  ;;  %v10116_v6 = vcombine.low %v1541_v29, %v1547_v12  ;;  %11232 = vmatpush3.bf16.msra.mxu1 %v12182_v46  ;;  %v12191_v46 = vld [vmem:[%s17341_s1 + $0x578] sm:$0xff]   ;;  %v12192_v34 = vld [vmem:[%s17341_s1 + $0x5e0] sm:$0xff]  }
 0x27e   : > { %v1468_v37 = vpop.permute.xlu1 %1467  ;;  %11233 = vmatprep.subr.bf16.mxu1 %v12184_v30  ;;  %11200 = vmatpush3.bf16.msra.mxu0 %v12185_v39  ;;  %v931_v30 = vrot.slane %v14236_v62, 2  ;;  %v932_v39 = vrot.slane %v14219_v33, 3  ;;  %v12193_v12 = vld [vmem:[%s17341_s1 + $0x538] sm:$0xff]   ;;  %v14518_v33 = vsel %vm17474_vm13, %v14387_v35, %v14379_v56  ;;  %v12201_v60 = vld [vmem:[%s17341_s1 + $0x640] sm:$0xff]  }
 0x27f   : > { %6433 = vmatprep.mubr.bf16.mxu0 %v10117_v36  ;;  %v1454_v25 = vpop.permute.xlu0 %1453  ;;  %11201 = vmatprep.subr.bf16.mxu0 %v12187_v52  ;;  %v12190_v52 = vld [vmem:[%s17341_s1 + $0x598] sm:$0xff]   ;;  %17555 = vst [vmem:[#allocation31_spill] sm:$0xff] %v14518_v33  ;;  %v14528_v36 = vsel %vm1140_vm12, %v14345_v20, %v14387_v35  ;;  %v12195_v20 = vld [vmem:[%s17341_s1 + $0x5e8] sm:$0xff]  }
 0x280   : > { %6434 = vmatmul.mubr.bf16.gmra.mrb[68].mxu0 %v10116_v6  ;;  %1674 = vrot.lane.b32.xlu1 %v14181_v9, %s12512_s9  ;;  %17556 = vst [vmem:[#allocation32_spill] sm:$0xff] %v14528_v36  ;;  %v979_v6 = vrot.slane %v14200_v41, 3  ;;  %v1549_v41 = vsel %vm17474_vm13, %v1466_v28, %v1468_v37  ;;  %v1543_v35 = vsel %vm17474_vm13, %v14438_v0, %v1454_v25  ;;  %v12196_v0 = vld [vmem:[%s17341_s1 + $0x5a8] sm:$0xff]  }
 0x281   : > { %1672 = vrot.lane.b32.xlu0 %v14174_v40, %s12512_s9  ;;  %11234 = vmatpush3.bf16.msra.mxu1 %v12186_v61  ;;  %v933_v61 = vor.u32 %v932_v39, %v931_v30 }
 0x282   : > { %v14507_v29 = vpop.permute.xlu1 %1610  ;;  %11235 = vmatprep.subr.bf16.mxu1 %v12188_v10  ;;  %11202 = vmatpush3.bf16.msra.mxu0 %v12189_v42  ;;  %v12194_v10 = vld [vmem:[%s17341_s1 + $0x5a0] sm:$0xff]  }
 0x283   : > { %v1609_v62 = vpop.permute.xlu0 %1608  ;;  %11203 = vmatprep.subr.bf16.mxu0 %v12191_v46  ;;  %v544_v46 = vld [vmem:[#allocation2 + $0x60] sm:$0xf] }
 0x284   : > { %1688 = vrot.lane.b32.xlu1 %v14518_v33, %s12512_s9  ;;  %v545_v33 = vld [vmem:[#allocation2 + $0x64] sm:$0x7]  ;;  %v1705_v39 = vsel %vm1140_vm12, %v1609_v62, %v14507_v29 }
 0x285   : > { %1686 = vrot.lane.b32.xlu0 %v14528_v36, %s12512_s9  ;;  %11236 = vmatpush3.bf16.msra.mxu1 %v12190_v52  ;;  %v2291_v52 = vsel %vm1140_vm12, %v1543_v35, %v1609_v62  ;;  %v14552_v36 = vcombine.low %v544_v46, %v545_v33  ;;  %v12197_v62 = vld [vmem:[%s17341_s1 + $0x5f0] sm:$0xff]  }
 0x286   : > { %v14536_v42 = vpop.permute.xlu1 %1624  ;;  %11237 = vmatprep.subr.bf16.mxu1 %v12192_v34  ;;  %11204 = vmatpush3.bf16.msra.mxu0 %v12193_v12 }
 0x287   : > { %v1623_v30 = vpop.permute.xlu0 %1622  ;;  %11269 = vmatprep.subr.bf16.mxu0 %v12201_v60  ;;  %v14565_v33 = vshll.u32 %v14552_v36, 16 }
 0x288   : > { %v1711_v34 = vsel %vm1140_vm12, %v1623_v30, %v14536_v42  ;;  %v2294_v12 = vsel %vm1140_vm12, %v1549_v41, %v1623_v30  ;;  %1004 = vrot.lane.b32.xlu1 %v979_v6, %s12513_s10  ;;  %v12198_v6 = vld [vmem:[%s17341_s1 + $0x5b0] sm:$0xff]  }
 0x289   : > { %962 = vrot.lane.b32.xlu0 %v933_v61, %s12512_s9  ;;  %v10119_v28 = vcombine.low %v1705_v39, %v1711_v34  ;;  %v10118_v37 = vcombine.low %v2291_v52, %v2294_v12  ;;  %11238 = vmatpush3.bf16.msra.mxu1 %v12194_v10  ;;  %v12199_v10 = vld [vmem:[%s17341_s1 + $0x5f8] sm:$0xff]   ;;  %v14584_v52 = vshrl.u32 %v14552_v36, 16  ;;  %v17557_v12 = vld [vmem:[#allocation18_spill] sm:$0xff] }
 0x28a   : > { %v1480_v25 = vpop.permute.xlu1 %1479  ;;  %11239 = vmatprep.subr.bf16.mxu1 %v12195_v20 }
 0x28b   : > { %6498 = vmatprep.mubr.bf16.mxu1 %v10119_v28  ;;  %v1478_v60 = vpop.permute.xlu0 %1477  ;;  %v756_v28 = vrot.slane %v14552_v36, 1 }
 0x28c   : > { %6499 = vmatmul.mubr.bf16.gmra.mrb[68].mxu1 %v10118_v37  ;;  %1606 = vrot.lane.b32.xlu1 %v13260_v17, %s12512_s9  ;;  %v1553_v20 = vsel %vm17474_vm13, %v14268_v18, %v1478_v60  ;;  %v707_v18 = vrot.slane %v14565_v33, 1  ;;  %v17558_v37 = vld [vmem:[#allocation17_spill] sm:$0xff] }
 0x28d   : > { %1592 = vrot.lane.b32.xlu0 %v13250_v14, %s12512_s9  ;;  %11240 = vmatpush3.bf16.msra.mxu1 %v12196_v0  ;;  %v1554_v14 = vsel %vm17474_vm13, %v1478_v60, %v1480_v25 }
 0x28e   : > { %v1494_v61 = vpop.permute.xlu1 %1493  ;;  %11241 = vmatprep.subr.bf16.mxu1 %v12197_v62  ;;  %v708_v0 = vor.u32 %v707_v18, %v14584_v52 }
 0x28f   : > { %v1492_v46 = vpop.permute.xlu0 %1491 }
 0x290   : > { %v1559_v41 = vsel %vm17474_vm13, %v14276_v16, %v1492_v46  ;;  %v1560_v35 = vsel %vm17474_vm13, %v1492_v46, %v1494_v61  ;;  %1749 = vrot.lane.b32.xlu1 %v13332_v24, %s12511_s30  ;;  %v12200_v16 = vld [vmem:[%s17341_s1 + $0x5b8] sm:$0xff]   ;;  %v12208_v24 = vld [vmem:[%s17341_s1 + $0x6c0] sm:$0xff]  }
 0x291   : > { %1747 = vrot.lane.b32.xlu0 %v13329_v7, %s12511_s30  ;;  %v10160_v30 = vcombine.low %v1554_v14, %v1560_v35  ;;  %v10159_v39 = vcombine.low %v1553_v20, %v1559_v41  ;;  %11242 = vmatpush3.bf16.msra.mxu1 %v12198_v6 }
 0x292   : > { %v1496_v34 = vpop.permute.xlu1 %1495  ;;  %11243 = vmatprep.subr.bf16.mxu1 %v12199_v10 }
 0x293   : > { %6441 = vmatprep.mubr.bf16.mxu0 %v10160_v30  ;;  %v1482_v7 = vpop.permute.xlu0 %1481  ;;  %v1561_v10 = vsel %vm17474_vm13, %v1494_v61, %v1496_v34 }
 0x294   : > { %6442 = vmatmul.mubr.bf16.gmra.mrb[72].mxu0 %v10159_v39  ;;  %1763 = vrot.lane.b32.xlu1 %v17557_v12, %s12511_s30  ;;  %v1555_v46 = vsel %vm17474_vm13, %v1480_v25, %v1482_v7 }
 0x295   : > { %1761 = vrot.lane.b32.xlu0 %v17558_v37, %s12511_s30  ;;  %11244 = vmatpush3.bf16.msra.mxu1 %v12200_v16 }
 0x296   : > { %v14599_v62 = vpop.permute.xlu1 %1638  ;;  %11309 = vmatprep.subr.bf16.mxu1 %v12208_v24 }
 0x297   : > { %v1637_v60 = vpop.permute.xlu0 %1636 }
 0x298   : > { %782 = vrot.lane.b32.xlu1 %v756_v28, %s12509_s14  ;;  %v1717_v14 = vsel %vm1140_vm12, %v1637_v60, %v14599_v62  ;;  %v2297_v41 = vsel %vm1140_vm12, %v1555_v46, %v1637_v60  ;;  %v17559_v28 = vld [vmem:[#allocation9_spill] sm:$0xff] }
 0x299   : > { %740 = vrot.lane.b32.xlu0 %v708_v0, %s12508_s23  ;;  %v17560_v0 = vld [vmem:[#allocation7_spill] sm:$0xff] }
 0x29a   : > { %v14603_v6 = vpop.permute.xlu1 %1652 }
 0x29b   : > { %v1651_v20 = vpop.permute.xlu0 %1650 }
 0x29c   : > { %v1723_v35 = vsel %vm1140_vm12, %v1651_v20, %v14603_v6  ;;  %v2300_v30 = vsel %vm1140_vm12, %v1561_v10, %v1651_v20  ;;  %1753 = vrot.lane.b32.xlu1 %v17545_v11, %s12511_s30 }
 0x29d   : > { %1751 = vrot.lane.b32.xlu0 %v17546_v38, %s12511_s30  ;;  %v10162_v61 = vcombine.low %v1717_v14, %v1723_v35  ;;  %v10161_v39 = vcombine.low %v2297_v41, %v2300_v30 }
 0x29e   : > { %v1508_v25 = vpop.permute.xlu1 %1507 }
 0x29f   : > { %6506 = vmatprep.mubr.bf16.mxu1 %v10162_v61  ;;  %v1506_v18 = vpop.permute.xlu0 %1505 }
 0x2a0   : > { %6507 = vmatmul.mubr.bf16.gmra.mrb[72].mxu1 %v10161_v39  ;;  %1767 = vrot.lane.b32.xlu1 %v17547_v31, %s12511_s30  ;;  %v1565_v11 = vsel %vm17474_vm13, %v14321_v3, %v1506_v18  ;;  %v1566_v24 = vsel %vm17474_vm13, %v1506_v18, %v1508_v25  ;;  %v17562_v39 = vld [vmem:[#allocation21_spill] sm:$0xff] }
 0x2a1   : > { %1765 = vrot.lane.b32.xlu0 %v17548_v43, %s12511_s30 }
 0x2a2   : > { %v1522_v16 = vpop.permute.xlu1 %1521 }
 0x2a3   : > { %v1520_v34 = vpop.permute.xlu0 %1519 }
 0x2a4   : > { %v1571_v38 = vsel %vm17474_vm13, %v14330_v63, %v1520_v34  ;;  %v1572_v7 = vsel %vm17474_vm13, %v1520_v34, %v1522_v16  ;;  %1634 = vrot.lane.b32.xlu1 %v17559_v28, %s12512_s9  ;;  %v17561_v63 = vld [vmem:[#allocation20_spill] sm:$0xff] }
 0x2a5   : > { %1620 = vrot.lane.b32.xlu0 %v17560_v0, %s12512_s9  ;;  %v10931_v60 = vpop.f32.mrb[20].mxu1  ;;  %v10203_v10 = vcombine.low %v1566_v24, %v1572_v7  ;;  %v10202_v46 = vcombine.low %v1565_v11, %v1571_v38  ;;  %v17563_v38 = vld [vmem:[#allocation19_spill] sm:$0xff]  ;;  %v17564_v7 = vld [vmem:[#allocation26_spill] sm:$0xff] }
 0x2a6   : > { %v1524_v20 = vpop.permute.xlu1 %1523  ;;  %v10932_v14 = vpop.f32.mrb[21].mxu1 }
 0x2a7   : > { %6449 = vmatprep.mubr.bf16.mxu0 %v10203_v10  ;;  %v1510_v3 = vpop.permute.xlu0 %1509  ;;  %v10933_v41 = vadd.f32 %v10932_v14, %v10931_v60  ;;  %v10934_v35 = vpop.f32.mrb[22].mxu1 }
 0x2a8   : > { %6450 = vmatmul.mubr.bf16.gmra.mrb[76].mxu0 %v10202_v46  ;;  %1777 = vrot.lane.b32.xlu1 %v17561_v63, %s12511_s30  ;;  %v10935_v30 = vpop.f32.mrb[23].mxu1  ;;  %v1573_v46 = vsel %vm17474_vm13, %v1522_v16, %v1524_v20  ;;  %v1567_v14 = vsel %vm17474_vm13, %v1508_v25, %v1510_v3 }
 0x2a9   : > { %v14634_v61 = vadd.f32 %v10933_v41, %v14303_v47  ;;  %1775 = vrot.lane.b32.xlu0 %v17562_v39, %s12511_s30  ;;  %v10936_v18 = vadd.f32 %v10935_v30, %v10934_v35 }
 0x2aa   : > { %v14638_v34 = vpop.permute.xlu1 %1666 }
 0x2ab   : > { %v14641_v11 = vadd.f32 %v10936_v18, %v14311_v15  ;;  %v1665_v24 = vpop.permute.xlu0 %1664 }
 0x2ac   : > { %1791 = vrot.lane.b32.xlu1 %v17563_v38, %s12511_s30  ;;  %v1729_v15 = vsel %vm1140_vm12, %v1665_v24, %v14638_v34  ;;  %v2303_v18 = vsel %vm1140_vm12, %v1567_v14, %v1665_v24 }
 0x2ad   : > { %1789 = vrot.lane.b32.xlu0 %v17564_v7, %s12511_s30  ;;  %v10937_v60 = vpop.f32.mrb[24].mxu1 }
 0x2ae   : > { %v14647_v10 = vpop.permute.xlu1 %1680  ;;  %v10938_v47 = vpop.f32.mrb[25].mxu1 }
 0x2af   : > { %v1679_v41 = vpop.permute.xlu0 %1678  ;;  %v10939_v35 = vadd.f32 %v10938_v47, %v10937_v60  ;;  %v10940_v30 = vpop.f32.mrb[26].mxu1 }
 0x2b0   : > { %v1735_v43 = vsel %vm1140_vm12, %v1679_v41, %v14647_v10  ;;  %v2306_v31 = vsel %vm1140_vm12, %v1573_v46, %v1679_v41  ;;  %1781 = vrot.lane.b32.xlu1 %v17549_v1, %s12511_s30  ;;  %v10941_v40 = vpop.f32.mrb[27].mxu1  ;;  %v17565_v41 = vld [vmem:[#allocation12_spill] sm:$0xff] }
 0x2b1   : > { %v14660_v16 = vadd.f32 %v10939_v35, %v14326_v32  ;;  %1779 = vrot.lane.b32.xlu0 %v17550_v53, %s12511_s30  ;;  %v10942_v25 = vadd.f32 %v10941_v40, %v10940_v30  ;;  %v10205_v20 = vcombine.low %v1729_v15, %v1735_v43  ;;  %v10204_v3 = vcombine.low %v2303_v18, %v2306_v31 }
 0x2b2   : > { %v14664_v60 = vpop.permute.xlu1 %780 }
 0x2b3   : > { %v14667_v24 = vadd.f32 %v10942_v25, %v14333_v5  ;;  %6514 = vmatprep.mubr.bf16.mxu1 %v10205_v20  ;;  %v14669_v47 = vpop.permute.xlu0 %738  ;;  %v17566_v5 = vld [vmem:[#allocation8_spill] sm:$0xff] }
 0x2b4   : > { %6515 = vmatmul.mubr.bf16.gmra.mrb[76].mxu1 %v10204_v3  ;;  %1795 = vrot.lane.b32.xlu1 %v17552_v48, %s12511_s30  ;;  %v17567_v48 = vld [vmem:[#allocation27_spill] sm:$0xff] }
 0x2b5   : > { %1793 = vrot.lane.b32.xlu0 %v17553_v50, %s12511_s30  ;;  %v10943_v46 = vpop.f32.mrb[28].mxu1 }
 0x2b6   : > { %v1587_v32 = vpop.permute.xlu1 %1586  ;;  %v10944_v43 = vpop.f32.mrb[29].mxu1 }
 0x2b7   : > { %v1585_v40 = vpop.permute.xlu0 %1584  ;;  %v10945_v31 = vadd.f32 %v10944_v43, %v10943_v46  ;;  %v10946_v14 = vpop.f32.mrb[30].mxu1 }
 0x2b8   : > { %1662 = vrot.lane.b32.xlu1 %v17565_v41, %s12512_s9  ;;  %v10947_v35 = vpop.f32.mrb[31].mxu1  ;;  %v1694_v25 = vsel %vm1140_vm12, %v14406_v19, %v1585_v40  ;;  %v1695_v3 = vsel %vm1140_vm12, %v1585_v40, %v1587_v32  ;;  %v12202_v19 = vld [vmem:[%s17341_s1 + $0x600] sm:$0xff]  }
 0x2b9   : > { %1648 = vrot.lane.b32.xlu0 %v17566_v5, %s12512_s9  ;;  %v14680_v30 = vadd.f32 %v10945_v31, %v14352_v57  ;;  %v10948_v15 = vadd.f32 %v10947_v35, %v10946_v14  ;;  %v17568_v31 = vld [vmem:[#allocation28_spill] sm:$0xff]  ;;  %v17570_v41 = vld [vmem:[#allocation46_spill] sm:$0xff] }
 0x2ba   : > { %v1601_v18 = vpop.permute.xlu1 %1600 }
 0x2bb   : > { %v1599_v20 = vpop.permute.xlu0 %1598  ;;  %v14686_v46 = vadd.f32 %v10948_v15, %v14357_v55 }
 0x2bc   : > { %v1700_v43 = vsel %vm1140_vm12, %v14418_v21, %v1599_v20  ;;  %v1701_v50 = vsel %vm1140_vm12, %v1599_v20, %v1601_v18  ;;  %1805 = vrot.lane.b32.xlu1 %v17567_v48, %s12511_s30  ;;  %v12203_v21 = vld [vmem:[%s17341_s1 + $0x648] sm:$0xff]  }
 0x2bd   : > { %v10077_v57 = vcombine.low %v1694_v25, %v1700_v43  ;;  %1803 = vrot.lane.b32.xlu0 %v17568_v31, %s12511_s30  ;;  %v10078_v14 = vcombine.low %v1695_v3, %v1701_v50  ;;  %v11005_v35 = vpop.f32.mrb[32].mxu1  ;;  %v17569_v50 = vld [vmem:[#allocation47_spill] sm:$0xff] }
 0x2be   : > { %v14698_v40 = vpop.permute.xlu1 %892  ;;  %v10971_v55 = vpop.f32.mrb[36].mxu0 }
 0x2bf   : > { %6555 = vmatprep.mubr.bf16.mxu0 %v10078_v14  ;;  %v14703_v15 = vpop.permute.xlu0 %850  ;;  %v10972_v25 = vpop.f32.mrb[37].mxu0  ;;  %v12204_v14 = vld [vmem:[%s17341_s1 + $0x608] sm:$0xff]  }
 0x2c0   : > { %v11006_v20 = vpop.f32.mrb[33].mxu1  ;;  %6556 = vmatmul.mubr.bf16.vlgmr.msra.gmra.mrb[80].mxu0 %v10077_v57  ;;  %1819 = vrot.lane.b32.xlu1 %v17569_v50, %s12511_s30  ;;  %v10973_v3 = vadd.f32 %v10972_v25, %v10971_v55  ;;  %v10974_v53 = vpop.f32.mrb[38].mxu0  ;;  %v12205_v57 = vld [vmem:[%s17341_s1 + $0x650] sm:$0xff]  }
 0x2c1   : > { %v11007_v43 = vadd.f32 %v11006_v20, %v11005_v35  ;;  %v11008_v1 = vpop.f32.mrb[34].mxu1  ;;  %1817 = vrot.lane.b32.xlu0 %v17570_v41, %s12511_s30  ;;  %11270 = vmatpush3.bf16.msra.mxu0 %v12202_v19  ;;  %v10975_v9 = vpop.f32.mrb[39].mxu0 }
 0x2c2   : > { %v11009_v8 = vpop.f32.mrb[35].mxu1  ;;  %11271 = vmatprep.subr.bf16.mxu0 %v12203_v21  ;;  %v6176_v55 = vadd.f32 %v10973_v3, %v14634_v61  ;;  %v10976_v25 = vadd.f32 %v10975_v9, %v10974_v53  ;;  %v14719_v41 = vpop.permute.xlu1 %1590  ;;  %v12206_v9 = vld [vmem:[%s17341_s1 + $0x610] sm:$0xff]  }
 0x2c3   : > { %v14717_v35 = vadd.f32 %v11007_v43, %v14372_v2  ;;  %v11010_v20 = vadd.f32 %v11009_v8, %v11008_v1  ;;  %v1589_v19 = vpop.permute.xlu0 %1588  ;;  %v12207_v1 = vld [vmem:[%s17341_s1 + $0x658] sm:$0xff]  }
 0x2c4   : > { %1809 = vrot.lane.b32.xlu1 %v17554_v23, %s12511_s30  ;;  %v6179_v50 = vadd.f32 %v10976_v25, %v14641_v11  ;;  %v1697_v61 = vsel %vm1140_vm12, %v1589_v19, %v14719_v41 }
 0x2c5   : > { %v14725_v21 = vadd.f32 %v11010_v20, %v14385_v45  ;;  %1807 = vrot.lane.b32.xlu0 %v13663_v27, %s12511_s30  ;;  %11272 = vmatpush3.bf16.msra.mxu0 %v12204_v14  ;;  %v1696_v45 = vsel %vm1140_vm12, %v1587_v32, %v1589_v19  ;;  %v12209_v32 = vld [vmem:[%s17341_s1 + $0x618] sm:$0xff]   ;;  %v12210_v19 = vld [vmem:[%s17341_s1 + $0x680] sm:$0xff]  }
 0x2c6   : > { %v11011_v8 = vpop.f32.mrb[36].mxu1  ;;  %11273 = vmatprep.subr.bf16.mxu0 %v12205_v57  ;;  %v14735_v53 = vpop.permute.xlu1 %1604  ;;  %v17573_v27 = vld [vmem:[#allocation29_spill] sm:$0xff] }
 0x2c7   : > { %v1603_v2 = vpop.permute.xlu0 %1602  ;;  %v11012_v43 = vpop.f32.mrb[37].mxu1 }
 0x2c8   : > { %v1702_v11 = vsel %vm1140_vm12, %v1601_v18, %v1603_v2  ;;  %v1703_v3 = vsel %vm1140_vm12, %v1603_v2, %v14735_v53  ;;  %1823 = vrot.lane.b32.xlu1 %v13884_v4, %s12511_s30  ;;  %v11013_v57 = vadd.f32 %v11012_v43, %v11011_v8  ;;  %v11014_v25 = vpop.f32.mrb[38].mxu1  ;;  %v12211_v8 = vld [vmem:[%s17341_s1 + $0x660] sm:$0xff]  }
 0x2c9   : > { %v10079_v14 = vcombine.low %v1696_v45, %v1702_v11  ;;  %1821 = vrot.lane.b32.xlu0 %v13879_v59, %s12511_s30  ;;  %v10080_v20 = vcombine.low %v1697_v61, %v1703_v3  ;;  %11274 = vmatpush3.bf16.msra.mxu0 %v12206_v9  ;;  %v11015_v18 = vpop.f32.mrb[39].mxu1  ;;  %v12212_v61 = vld [vmem:[%s17341_s1 + $0x6c8] sm:$0xff]   ;;  %v17572_v59 = vld [vmem:[#allocation30_spill] sm:$0xff] }
 0x2ca   : > { %11275 = vmatprep.subr.bf16.mxu0 %v12207_v1  ;;  %v14756_v2 = vadd.f32 %v11013_v57, %v6176_v55  ;;  %v11016_v45 = vadd.f32 %v11015_v18, %v11014_v25  ;;  %v14758_v11 = vpop.permute.xlu1 %1614  ;;  %v17571_v3 = vld [vmem:[#allocation43_spill] sm:$0xff]  ;;  %v12213_v55 = vld [vmem:[%s17341_s1 + $0x620] sm:$0xff]  }
 0x2cb   : > { %6620 = vmatprep.mubr.bf16.mxu1 %v10080_v20  ;;  %v1613_v9 = vpop.permute.xlu0 %1612  ;;  %v12216_v20 = vld [vmem:[%s17341_s1 + $0x6d0] sm:$0xff]  }
 0x2cc   : > { %6621 = vmatmul.mubr.bf16.vlgmr.msra.gmra.mrb[80].mxu1 %v10079_v14  ;;  %1690 = vrot.lane.b32.xlu1 %v14379_v56, %s12512_s9  ;;  %v14765_v1 = vadd.f32 %v11016_v45, %v6179_v50  ;;  %v12214_v14 = vld [vmem:[%s17341_s1 + $0x688] sm:$0xff]   ;;  %v1707_v18 = vsel %vm1140_vm12, %v1613_v9, %v14758_v11 }
 0x2cd   : > { %1676 = vrot.lane.b32.xlu0 %v17571_v3, %s12512_s9  ;;  %11276 = vmatpush3.bf16.msra.mxu0 %v12209_v32  ;;  %v12215_v50 = vld [vmem:[%s17341_s1 + $0x668] sm:$0xff]   ;;  %v1706_v32 = vsel %vm1140_vm12, %v14507_v29, %v1613_v9 }
 0x2ce   : > { %v10977_v43 = vpop.f32.mrb[40].mxu0  ;;  %11310 = vmatpush3.bf16.msra.mxu1 %v12210_v19  ;;  %11277 = vmatprep.subr.bf16.mxu0 %v12211_v8  ;;  %v1629_v57 = vpop.permute.xlu1 %1628  ;;  %v12217_v29 = vld [vmem:[%s17341_s1 + $0x628] sm:$0xff]  }
 0x2cf   : > { %v1627_v25 = vpop.permute.xlu0 %1626  ;;  %11311 = vmatprep.subr.bf16.mxu1 %v12212_v61  ;;  %v10978_v45 = vpop.f32.mrb[41].mxu0 }
 0x2d0   : > { %v1712_v19 = vsel %vm1140_vm12, %v14536_v42, %v1627_v25  ;;  %v1713_v8 = vsel %vm1140_vm12, %v1627_v25, %v1629_v57  ;;  %1833 = vrot.lane.b32.xlu1 %v17572_v59, %s12511_s30  ;;  %v10979_v61 = vadd.f32 %v10978_v45, %v10977_v43  ;;  %v10980_v4 = vpop.f32.mrb[42].mxu0  ;;  %v12218_v42 = vld [vmem:[%s17341_s1 + $0x690] sm:$0xff]   ;;  %v822_v45 = vrot.slane %v14584_v52, 1 }
 0x2d1   : > { %1831 = vrot.lane.b32.xlu0 %v17573_v27, %s12511_s30  ;;  %v10121_v23 = vcombine.low %v1707_v18, %v1713_v8  ;;  %v10120_v56 = vcombine.low %v1706_v32, %v1712_v19  ;;  %11278 = vmatpush3.bf16.msra.mxu0 %v12213_v55  ;;  %v10981_v9 = vpop.f32.mrb[43].mxu0  ;;  %v12219_v43 = vld [vmem:[%s17341_s1 + $0x670] sm:$0xff]  }
 0x2d2   : > { %11312 = vmatpush3.bf16.msra.mxu1 %v12214_v14  ;;  %11279 = vmatprep.subr.bf16.mxu0 %v12215_v50  ;;  %v6184_v25 = vadd.f32 %v10979_v61, %v14660_v16  ;;  %v10982_v18 = vadd.f32 %v10981_v9, %v10980_v4  ;;  %v14802_v32 = vpop.permute.xlu1 %1618  ;;  %v14807_v14 = vsel %vm17475_vm9, %v14669_v47, %v14664_v60  ;;  %v12220_v50 = vld [vmem:[%s17341_s1 + $0x6d8] sm:$0xff]   ;;  %v12224_v61 = vld [vmem:[%s17341_s1 + $0x6e0] sm:$0xff]  }
 0x2d3   : > { %6563 = vmatprep.mubr.bf16.mxu0 %v10121_v23  ;;  %v1617_v55 = vpop.permute.xlu0 %1616  ;;  %17574 = vst [vmem:[#allocation44_spill] sm:$0xff] %v14807_v14  ;;  %11313 = vmatprep.subr.bf16.mxu1 %v12216_v20  ;;  %v12493_v16 = vld [vmem:[#allocation2 + $0x58] sm:$0xf]  ;;  %v12221_v20 = vld [vmem:[%s17341_s1 + $0x630] sm:$0xff]  }
 0x2d4   : > { %6564 = vmatmul.mubr.bf16.gmra.mrb[84].mxu0 %v10120_v56  ;;  %1847 = vrot.lane.b32.xlu1 %v14807_v14, %s12511_s30  ;;  %v14816_v4 = vsel %vm1010_vm8, %v12493_v16, %v14669_v47  ;;  %v6187_v23 = vadd.f32 %v10982_v18, %v14667_v24  ;;  %v12222_v56 = vld [vmem:[%s17341_s1 + $0x698] sm:$0xff]   ;;  %v1709_v9 = vsel %vm1140_vm12, %v1617_v55, %v14802_v32 }
 0x2d5   : > { %17575 = vst [vmem:[#allocation45_spill] sm:$0xff] %v14816_v4  ;;  %1845 = vrot.lane.b32.xlu0 %v14816_v4, %s12511_s30  ;;  %11280 = vmatpush3.bf16.msra.mxu0 %v12217_v29  ;;  %v12223_v47 = vld [vmem:[%s17341_s1 + $0x678] sm:$0xff]   ;;  %v1708_v29 = vsel %vm1140_vm12, %v14758_v11, %v1617_v55  ;;  %v823_v11 = vrot.slane %v14565_v33, 2 }
 0x2d6   : > { %v11017_v19 = vpop.f32.mrb[40].mxu1  ;;  %11314 = vmatpush3.bf16.msra.mxu1 %v12218_v42  ;;  %11281 = vmatprep.subr.bf16.mxu0 %v12219_v43  ;;  %v14830_v24 = vpop.permute.xlu1 %1632 }
 0x2d7   : > { %v1631_v8 = vpop.permute.xlu0 %1630  ;;  %11315 = vmatprep.subr.bf16.mxu1 %v12220_v50  ;;  %v11018_v18 = vpop.f32.mrb[41].mxu1 }
 0x2d8   : > { %v1714_v42 = vsel %vm1140_vm12, %v1629_v57, %v1631_v8  ;;  %v1715_v43 = vsel %vm1140_vm12, %v1631_v8, %v14830_v24  ;;  %1837 = vrot.lane.b32.xlu1 %v14465_v44, %s12511_s30  ;;  %v11019_v50 = vadd.f32 %v11018_v18, %v11017_v19  ;;  %v11020_v16 = vpop.f32.mrb[42].mxu1  ;;  %v12225_v57 = vld [vmem:[%s17341_s1 + $0x638] sm:$0xff]   ;;  %v12226_v19 = vld [vmem:[%s17341_s1 + $0x6a0] sm:$0xff]  }
 0x2d9   : > { %1835 = vrot.lane.b32.xlu0 %v14470_v22, %s12511_s30  ;;  %v10123_v4 = vcombine.low %v1709_v9, %v1715_v43  ;;  %v10122_v14 = vcombine.low %v1708_v29, %v1714_v42  ;;  %11282 = vmatpush3.bf16.msra.mxu0 %v12221_v20  ;;  %v11021_v55 = vpop.f32.mrb[43].mxu1  ;;  %v12234_v8 = vld [vmem:[%s17341_s1 + $0x740] sm:$0xff]   ;;  %v14862_v43 = vsel %vm1111_vm11, %v14703_v15, %v14698_v40 }
 0x2da   : > { %11316 = vmatpush3.bf16.msra.mxu1 %v12222_v56  ;;  %11283 = vmatprep.subr.bf16.mxu0 %v12223_v47  ;;  %v14857_v9 = vadd.f32 %v11019_v50, %v6184_v25  ;;  %v11022_v29 = vadd.f32 %v11021_v55, %v11020_v16  ;;  %v1643_v42 = vpop.permute.xlu1 %1642  ;;  %v12227_v56 = vld [vmem:[%s17341_s1 + $0x6e8] sm:$0xff]   ;;  %v14872_v25 = vsel %vm1082_vm10, %v14664_v60, %v14703_v15  ;;  %v12229_v60 = vld [vmem:[%s17341_s1 + $0x6f0] sm:$0xff]  }
 0x2db   : > { %6628 = vmatprep.mubr.bf16.mxu1 %v10123_v4  ;;  %v1641_v20 = vpop.permute.xlu0 %1640  ;;  %11317 = vmatprep.subr.bf16.mxu1 %v12224_v61  ;;  %17576 = vst [vmem:[#allocation11_spill] sm:$0xff] %v14872_v25  ;;  %v868_v4 = vrot.slane %v14552_v36, 2  ;;  %v824_v61 = vor.u32 %v823_v11, %v822_v45 }
 0x2dc   : > { %6629 = vmatmul.mubr.bf16.gmra.mrb[84].mxu1 %v10122_v14  ;;  %1851 = vrot.lane.b32.xlu1 %v14862_v43, %s12511_s30  ;;  %v14875_v47 = vadd.f32 %v11022_v29, %v6187_v23  ;;  %v12228_v14 = vld [vmem:[%s17341_s1 + $0x6a8] sm:$0xff]   ;;  %v1718_v15 = vsel %vm1140_vm12, %v14599_v62, %v1641_v20  ;;  %v1719_v23 = vsel %vm1140_vm12, %v1641_v20, %v1643_v42  ;;  %v12230_v62 = vld [vmem:[%s17341_s1 + $0x6b0] sm:$0xff]  }
 0x2dd   : > { %1849 = vrot.lane.b32.xlu0 %v14872_v25, %s12511_s30  ;;  %11284 = vmatpush3.bf16.msra.mxu0 %v12225_v57 }
 0x2de   : > { %v10983_v18 = vpop.f32.mrb[44].mxu0  ;;  %11318 = vmatpush3.bf16.msra.mxu1 %v12226_v19  ;;  %11349 = vmatprep.subr.bf16.mxu0 %v12234_v8  ;;  %v1657_v50 = vpop.permute.xlu1 %1656 }
 0x2df   : > { %v1655_v16 = vpop.permute.xlu0 %1654  ;;  %11319 = vmatprep.subr.bf16.mxu1 %v12227_v56  ;;  %v10984_v57 = vpop.f32.mrb[45].mxu0 }
 0x2e0   : > { %v1724_v45 = vsel %vm1140_vm12, %v14603_v6, %v1655_v16  ;;  %v1725_v11 = vsel %vm1140_vm12, %v1655_v16, %v1657_v50  ;;  %894 = vrot.lane.b32.xlu1 %v868_v4, %s12511_s30  ;;  %v10985_v55 = vadd.f32 %v10984_v57, %v10983_v18  ;;  %v10986_v19 = vpop.f32.mrb[46].mxu0  ;;  %v12231_v4 = vld [vmem:[%s17341_s1 + $0x6f8] sm:$0xff]   ;;  %v935_v18 = vrot.slane %v14565_v33, 3 }
 0x2e1   : > { %852 = vrot.lane.b32.xlu0 %v824_v61, %s12510_s21  ;;  %v10164_v8 = vcombine.low %v1719_v23, %v1725_v11  ;;  %v10163_v29 = vcombine.low %v1718_v15, %v1724_v45  ;;  %v10987_v56 = vpop.f32.mrb[47].mxu0 }
 0x2e2   : > { %11320 = vmatpush3.bf16.msra.mxu1 %v12228_v14  ;;  %v6192_v20 = vadd.f32 %v10985_v55, %v14680_v30  ;;  %v10988_v6 = vadd.f32 %v10987_v56, %v10986_v19  ;;  %v14897_v25 = vpop.permute.xlu1 %1646  ;;  %v934_v30 = vrot.slane %v14584_v52, 2 }
 0x2e3   : > { %6571 = vmatprep.mubr.bf16.mxu0 %v10164_v8  ;;  %v1645_v16 = vpop.permute.xlu0 %1644  ;;  %11321 = vmatprep.subr.bf16.mxu1 %v12229_v60  ;;  %v12232_v60 = vld [vmem:[%s17341_s1 + $0x6b8] sm:$0xff]  }
 0x2e4   : > { %6572 = vmatmul.mubr.bf16.gmra.mrb[88].mxu0 %v10163_v29  ;;  %1757 = vrot.lane.b32.xlu1 %v17532_v13, %s12511_s30  ;;  %v6195_v61 = vadd.f32 %v10988_v6, %v14686_v46  ;;  %v980_v13 = vrot.slane %v14552_v36, 3  ;;  %v1720_v52 = vsel %vm1140_vm12, %v1643_v42, %v1645_v16  ;;  %v1721_v33 = vsel %vm1140_vm12, %v1645_v16, %v14897_v25 }
 0x2e5   : > { %1755 = vrot.lane.b32.xlu0 %v17533_v54, %s12511_s30  ;;  %v12243_v54 = vld [vmem:[%s17341_s1 + $0x7c0] sm:$0xff]   ;;  %v936_v42 = vor.u32 %v935_v18, %v934_v30 }
 0x2e6   : > { %v11023_v14 = vpop.f32.mrb[44].mxu1  ;;  %11322 = vmatpush3.bf16.msra.mxu1 %v12230_v62  ;;  %v14912_v15 = vpop.permute.xlu1 %1660 }
 0x2e7   : > { %v1659_v23 = vpop.permute.xlu0 %1658  ;;  %11323 = vmatprep.subr.bf16.mxu1 %v12231_v4  ;;  %v11024_v11 = vpop.f32.mrb[45].mxu1 }
 0x2e8   : > { %v1726_v46 = vsel %vm1140_vm12, %v1657_v50, %v1659_v23  ;;  %v1727_v45 = vsel %vm1140_vm12, %v1659_v23, %v14912_v15  ;;  %1771 = vrot.lane.b32.xlu1 %v13491_v51, %s12511_s30  ;;  %v11025_v36 = vadd.f32 %v11024_v11, %v11023_v14  ;;  %v11026_v57 = vpop.f32.mrb[46].mxu1 }
 0x2e9   : > { %1769 = vrot.lane.b32.xlu0 %v13545_v49, %s12511_s30  ;;  %v10166_v55 = vcombine.low %v1721_v33, %v1727_v45  ;;  %v10165_v19 = vcombine.low %v1720_v52, %v1726_v46  ;;  %v11027_v8 = vpop.f32.mrb[47].mxu1 }
 0x2ea   : > { %v11045_v29 = vpop.f32.mrb[48].mxu0  ;;  %11324 = vmatpush3.bf16.msra.mxu1 %v12232_v60  ;;  %v14928_v56 = vadd.f32 %v11025_v36, %v6192_v20  ;;  %v11028_v50 = vadd.f32 %v11027_v8, %v11026_v57  ;;  %v1671_v62 = vpop.permute.xlu1 %1670 }
 0x2eb   : > { %6636 = vmatprep.mubr.bf16.mxu1 %v10166_v55  ;;  %v1669_v6 = vpop.permute.xlu0 %1668  ;;  %11389 = vmatprep.subr.bf16.mxu1 %v12243_v54  ;;  %v11046_v16 = vpop.f32.mrb[49].mxu0 }
 0x2ec   : > { %6637 = vmatmul.mubr.bf16.gmra.mrb[88].mxu1 %v10165_v19  ;;  %1006 = vrot.lane.b32.xlu1 %v980_v13, %s12513_s10  ;;  %v14931_v4 = vadd.f32 %v11028_v50, %v6195_v61  ;;  %v11047_v14 = vadd.f32 %v11046_v16, %v11045_v29  ;;  %v11048_v23 = vpop.f32.mrb[50].mxu0  ;;  %v1730_v33 = vsel %vm1140_vm12, %v14638_v34, %v1669_v6 }
 0x2ed   : > { %964 = vrot.lane.b32.xlu0 %v936_v42, %s12512_s9  ;;  %v11049_v30 = vpop.f32.mrb[51].mxu0  ;;  %v1731_v54 = vsel %vm1140_vm12, %v1669_v6, %v1671_v62 }
 0x2ee   : > { %v6298_v18 = vadd.f32 %v11047_v14, %v14717_v35  ;;  %v11050_v20 = vadd.f32 %v11049_v30, %v11048_v23  ;;  %v1685_v60 = vpop.permute.xlu1 %1684  ;;  %v17578_v30 = vld [vmem:[#allocation35_spill] sm:$0xff] }
 0x2ef   : > { %v1683_v52 = vpop.permute.xlu0 %1682 }
 0x2f0   : > { %v1736_v13 = vsel %vm1140_vm12, %v14647_v10, %v1683_v52  ;;  %v1737_v61 = vsel %vm1140_vm12, %v1683_v52, %v1685_v60  ;;  %1773 = vrot.lane.b32.xlu1 %v17560_v0, %s12511_s30  ;;  %v6301_v46 = vadd.f32 %v11050_v20, %v14725_v21 }
 0x2f1   : > { %1759 = vrot.lane.b32.xlu0 %v13260_v17, %s12511_s30  ;;  %v10207_v35 = vcombine.low %v1731_v54, %v1737_v61  ;;  %v10206_v45 = vcombine.low %v1730_v33, %v1736_v13  ;;  %v17579_v33 = vld [vmem:[#allocation34_spill] sm:$0xff]  ;;  %v17580_v61 = vld [vmem:[#allocation36_spill] sm:$0xff] }
 0x2f2   : > { %v11085_v11 = vpop.f32.mrb[48].mxu1  ;;  %v14946_v36 = vpop.permute.xlu1 %1674 }
 0x2f3   : > { %6579 = vmatprep.mubr.bf16.mxu0 %v10207_v35  ;;  %v1673_v34 = vpop.permute.xlu0 %1672  ;;  %v11086_v57 = vpop.f32.mrb[49].mxu1 }
 0x2f4   : > { %6580 = vmatmul.mubr.bf16.gmra.mrb[92].mxu0 %v10206_v45  ;;  %1916 = vrot.lane.b32.xlu1 %v17557_v12, %s12510_s21  ;;  %v11087_v10 = vadd.f32 %v11086_v57, %v11085_v11  ;;  %v11088_v55 = vpop.f32.mrb[50].mxu1  ;;  %v1732_v29 = vsel %vm1140_vm12, %v1671_v62, %v1673_v34  ;;  %v1733_v50 = vsel %vm1140_vm12, %v1673_v34, %v14946_v36 }
 0x2f5   : > { %1914 = vrot.lane.b32.xlu0 %v17558_v37, %s12510_s21  ;;  %v11089_v21 = vpop.f32.mrb[51].mxu1 }
 0x2f6   : > { %v14952_v19 = vadd.f32 %v11087_v10, %v6298_v18  ;;  %v11090_v17 = vadd.f32 %v11089_v21, %v11088_v55  ;;  %v14954_v42 = vpop.permute.xlu1 %1688 }
 0x2f7   : > { %v1687_v8 = vpop.permute.xlu0 %1686 }
 0x2f8   : > { %v1738_v6 = vsel %vm1140_vm12, %v1685_v60, %v1687_v8  ;;  %v1739_v12 = vsel %vm1140_vm12, %v1687_v8, %v14954_v42  ;;  %1930 = vrot.lane.b32.xlu1 %v17561_v63, %s12510_s21  ;;  %v14964_v37 = vadd.f32 %v11090_v17, %v6301_v46 }
 0x2f9   : > { %1928 = vrot.lane.b32.xlu0 %v17562_v39, %s12510_s21  ;;  %v10209_v16 = vcombine.low %v1733_v50, %v1739_v12  ;;  %v10208_v14 = vcombine.low %v1732_v29, %v1738_v6 }
 0x2fa   : > { %v14968_v23 = vpop.permute.xlu1 %1004 }
 0x2fb   : > { %17577 = vst [vmem:[#allocation10_spill] sm:$0xff] %v14968_v23  ;;  %6644 = vmatprep.mubr.bf16.mxu1 %v10209_v16  ;;  %v14970_v62 = vpop.permute.xlu0 %962 }
 0x2fc   : > { %6645 = vmatmul.mubr.bf16.gmra.mrb[92].mxu1 %v10208_v14  ;;  %1785 = vrot.lane.b32.xlu1 %v13535_v58, %s12511_s30  ;;  %v12235_v14 = vld [vmem:[%s17341_s1 + $0x700] sm:$0xff]  }
 0x2fd   : > { %1783 = vrot.lane.b32.xlu0 %v17578_v30, %s12511_s30 }
 0x2fe   : > { %v11051_v18 = vpop.f32.mrb[52].mxu0  ;;  %v1607_v20 = vpop.permute.xlu1 %1606 }
 0x2ff   : > { %v1593_v60 = vpop.permute.xlu0 %1592  ;;  %v11052_v52 = vpop.f32.mrb[53].mxu0  ;;  %v1704_v55 = vsel %vm1140_vm12, %v14735_v53, %v1607_v20  ;;  %v12236_v20 = vld [vmem:[%s17341_s1 + $0x748] sm:$0xff]  }
 0x300   : > { %1799 = vrot.lane.b32.xlu1 %v17579_v33, %s12511_s30  ;;  %v11053_v54 = vadd.f32 %v11052_v52, %v11051_v18  ;;  %v11054_v13 = vpop.f32.mrb[54].mxu0  ;;  %v1698_v21 = vsel %vm1140_vm12, %v14719_v41, %v1593_v60 }
 0x301   : > { %1797 = vrot.lane.b32.xlu0 %v17580_v61, %s12511_s30  ;;  %v11055_v46 = vpop.f32.mrb[55].mxu0 }
 0x302   : > { %v6306_v35 = vadd.f32 %v11053_v54, %v14756_v2  ;;  %v11056_v45 = vadd.f32 %v11055_v46, %v11054_v13  ;;  %v1750_v11 = vpop.permute.xlu1 %1749 }
 0x303   : > { %v1748_v34 = vpop.permute.xlu0 %1747 }
 0x304   : > { %1801 = vrot.lane.b32.xlu1 %v17566_v5, %s12511_s30  ;;  %v6309_v57 = vadd.f32 %v11056_v45, %v14765_v1  ;;  %v1860_v8 = vsel %vm1111_vm11, %v1748_v34, %v1750_v11  ;;  %v2309_v29 = vsel %vm1111_vm11, %v1698_v21, %v1748_v34  ;;  %v12238_v45 = vld [vmem:[%s17341_s1 + $0x750] sm:$0xff]   ;;  %v12240_v21 = vld [vmem:[%s17341_s1 + $0x758] sm:$0xff]  }
 0x305   : > { %1787 = vrot.lane.b32.xlu0 %v17559_v28, %s12511_s30 }
 0x306   : > { %v11091_v10 = vpop.f32.mrb[52].mxu1  ;;  %v1764_v17 = vpop.permute.xlu1 %1763 }
 0x307   : > { %v1762_v2 = vpop.permute.xlu0 %1761  ;;  %v11092_v6 = vpop.f32.mrb[53].mxu1 }
 0x308   : > { %v1866_v50 = vsel %vm1111_vm11, %v1762_v2, %v1764_v17  ;;  %v2312_v1 = vsel %vm1111_vm11, %v1704_v55, %v1762_v2  ;;  %1944 = vrot.lane.b32.xlu1 %v17563_v38, %s12510_s21  ;;  %v11093_v16 = vadd.f32 %v11092_v6, %v11091_v10  ;;  %v11094_v53 = vpop.f32.mrb[54].mxu1  ;;  %v12239_v55 = vld [vmem:[%s17341_s1 + $0x710] sm:$0xff]  }
 0x309   : > { %v10081_v12 = vcombine.low %v2309_v29, %v2312_v1  ;;  %1942 = vrot.lane.b32.xlu0 %v17564_v7, %s12510_s21  ;;  %v10082_v41 = vcombine.low %v1860_v8, %v1866_v50  ;;  %v11095_v18 = vpop.f32.mrb[55].mxu1 }
 0x30a   : > { %v15004_v60 = vadd.f32 %v11093_v16, %v6306_v35  ;;  %v11096_v52 = vadd.f32 %v11095_v18, %v11094_v53  ;;  %v15006_v54 = vpop.permute.xlu1 %782  ;;  %v12237_v35 = vld [vmem:[%s17341_s1 + $0x708] sm:$0xff]   ;;  %v17583_v18 = vld [vmem:[#allocation6_spill] sm:$0xff] }
 0x30b   : > { %6685 = vmatprep.mubr.bf16.mxu0 %v10082_v41  ;;  %v15008_v13 = vpop.permute.xlu0 %740 }
 0x30c   : > { %6686 = vmatmul.mubr.bf16.vlgmr.msra.gmra.mrb[96].mxu0 %v10081_v12  ;;  %1958 = vrot.lane.b32.xlu1 %v17567_v48, %s12510_s21  ;;  %v15012_v46 = vadd.f32 %v11096_v52, %v6309_v57  ;;  %v17581_v57 = vld [vmem:[#allocation40_spill] sm:$0xff]  ;;  %v17582_v12 = vld [vmem:[#allocation5_spill] sm:$0xff] }
 0x30d   : > { %1956 = vrot.lane.b32.xlu0 %v17568_v31, %s12510_s21  ;;  %11350 = vmatpush3.bf16.msra.mxu0 %v12235_v14 }
 0x30e   : > { %11351 = vmatprep.subr.bf16.mxu0 %v12236_v20  ;;  %v15022_v34 = vpop.permute.xlu1 %1753 }
 0x30f   : > { %v1752_v10 = vpop.permute.xlu0 %1751 }
 0x310   : > { %1813 = vrot.lane.b32.xlu1 %v13697_v26, %s12511_s30  ;;  %v1861_v29 = vsel %vm1111_vm11, %v1750_v11, %v1752_v10  ;;  %v1862_v50 = vsel %vm1111_vm11, %v1752_v10, %v15022_v34 }
 0x311   : > { %1811 = vrot.lane.b32.xlu0 %v17581_v57, %s12511_s30  ;;  %11352 = vmatpush3.bf16.msra.mxu0 %v12237_v35  ;;  %v12241_v35 = vld [vmem:[%s17341_s1 + $0x718] sm:$0xff]  }
 0x312   : > { %11353 = vmatprep.subr.bf16.mxu0 %v12238_v45  ;;  %v11057_v2 = vpop.f32.mrb[56].mxu0  ;;  %v15034_v8 = vpop.permute.xlu1 %1767 }
 0x313   : > { %v1766_v1 = vpop.permute.xlu0 %1765  ;;  %v11058_v6 = vpop.f32.mrb[57].mxu0 }
 0x314   : > { %1827 = vrot.lane.b32.xlu1 %v17582_v12, %s12511_s30  ;;  %v1867_v16 = vsel %vm1111_vm11, %v1764_v17, %v1766_v1  ;;  %v1868_v53 = vsel %vm1111_vm11, %v1766_v1, %v15034_v8  ;;  %v11059_v41 = vadd.f32 %v11058_v6, %v11057_v2  ;;  %v11060_v14 = vpop.f32.mrb[58].mxu0  ;;  %v12245_v17 = vld [vmem:[%s17341_s1 + $0x780] sm:$0xff]   ;;  %v12249_v6 = vld [vmem:[%s17341_s1 + $0x788] sm:$0xff]  }
 0x315   : > { %1825 = vrot.lane.b32.xlu0 %v17583_v18, %s12511_s30  ;;  %11354 = vmatpush3.bf16.msra.mxu0 %v12239_v55  ;;  %v10083_v11 = vcombine.low %v1861_v29, %v1867_v16  ;;  %v11061_v20 = vpop.f32.mrb[59].mxu0  ;;  %v10084_v52 = vcombine.low %v1862_v50, %v1868_v53  ;;  %v12242_v55 = vld [vmem:[%s17341_s1 + $0x760] sm:$0xff]  }
 0x316   : > { %11355 = vmatprep.subr.bf16.mxu0 %v12240_v21  ;;  %v6314_v45 = vadd.f32 %v11059_v41, %v14857_v9  ;;  %v11062_v10 = vadd.f32 %v11061_v20, %v11060_v14  ;;  %v1635_v2 = vpop.permute.xlu1 %1634  ;;  %v12247_v21 = vld [vmem:[%s17341_s1 + $0x7c8] sm:$0xff]   ;;  %v17584_v9 = vld [vmem:[#allocation12_spill] sm:$0xff]  ;;  %v12244_v1 = vld [vmem:[%s17341_s1 + $0x720] sm:$0xff]  }
 0x317   : > { %6750 = vmatprep.mubr.bf16.mxu1 %v10084_v52  ;;  %v1621_v29 = vpop.permute.xlu0 %1620  ;;  %v12251_v41 = vld [vmem:[%s17341_s1 + $0x7d0] sm:$0xff]   ;;  %v17585_v20 = vld [vmem:[#allocation47_spill] sm:$0xff] }
 0x318   : > { %1829 = vrot.lane.b32.xlu1 %v17571_v3, %s12511_s30  ;;  %v6317_v50 = vadd.f32 %v11062_v10, %v14875_v47  ;;  %6751 = vmatmul.mubr.bf16.vlgmr.msra.gmra.mrb[96].mxu1 %v10083_v11  ;;  %v12246_v47 = vld [vmem:[%s17341_s1 + $0x768] sm:$0xff]  }
 0x319   : > { %1815 = vrot.lane.b32.xlu0 %v17584_v9, %s12511_s30  ;;  %11356 = vmatpush3.bf16.msra.mxu0 %v12241_v35 }
 0x31a   : > { %11390 = vmatpush3.bf16.msra.mxu1 %v12245_v17  ;;  %v11097_v16 = vpop.f32.mrb[56].mxu1  ;;  %v15070_v53 = vpop.permute.xlu1 %1777  ;;  %11357 = vmatprep.subr.bf16.mxu0 %v12242_v55  ;;  %v17586_v17 = vld [vmem:[#allocation46_spill] sm:$0xff]  ;;  %v12248_v55 = vld [vmem:[%s17341_s1 + $0x728] sm:$0xff]  }
 0x31b   : > { %11391 = vmatprep.subr.bf16.mxu1 %v12247_v21  ;;  %v1776_v14 = vpop.permute.xlu0 %1775  ;;  %v11098_v11 = vpop.f32.mrb[57].mxu1  ;;  %v12253_v21 = vld [vmem:[%s17341_s1 + $0x790] sm:$0xff]  }
 0x31c   : > { %1972 = vrot.lane.b32.xlu1 %v17585_v20, %s12510_s21  ;;  %v11099_v52 = vadd.f32 %v11098_v11, %v11097_v16  ;;  %v11100_v35 = vpop.f32.mrb[58].mxu1  ;;  %v12250_v16 = vld [vmem:[%s17341_s1 + $0x770] sm:$0xff]   ;;  %v1710_v11 = vsel %vm1140_vm12, %v14802_v32, %v1621_v29 }
 0x31d   : > { %1970 = vrot.lane.b32.xlu0 %v17586_v17, %s12510_s21  ;;  %v11101_v10 = vpop.f32.mrb[59].mxu1  ;;  %11358 = vmatpush3.bf16.msra.mxu0 %v12244_v1  ;;  %v12255_v1 = vld [vmem:[%s17341_s1 + $0x7d8] sm:$0xff]  }
 0x31e   : > { %11392 = vmatpush3.bf16.msra.mxu1 %v12249_v6  ;;  %v15088_v3 = vadd.f32 %v11099_v52, %v6314_v45  ;;  %v11102_v31 = vadd.f32 %v11101_v10, %v11100_v35  ;;  %v1792_v20 = vpop.permute.xlu1 %1791  ;;  %11359 = vmatprep.subr.bf16.mxu0 %v12246_v47  ;;  %v1716_v6 = vsel %vm1140_vm12, %v14830_v24, %v1635_v2  ;;  %v12252_v2 = vld [vmem:[%s17341_s1 + $0x730] sm:$0xff]  }
 0x31f   : > { %11393 = vmatprep.subr.bf16.mxu1 %v12251_v41  ;;  %v1872_v45 = vsel %vm1111_vm11, %v1776_v14, %v15070_v53  ;;  %v1790_v52 = vpop.permute.xlu0 %1789  ;;  %v2315_v47 = vsel %vm1111_vm11, %v1710_v11, %v1776_v14  ;;  %v12258_v14 = vld [vmem:[%s17341_s1 + $0x7e0] sm:$0xff]   ;;  %v547_v11 = vld [vmem:[#allocation2 + $0x6c] sm:$0x7] }
 0x320   : > { %1986 = vrot.lane.b32.xlu1 %v17572_v59, %s12510_s21  ;;  %v15105_v41 = vadd.f32 %v11102_v31, %v6317_v50  ;;  %v1878_v35 = vsel %vm1111_vm11, %v1790_v52, %v1792_v20  ;;  %v2318_v10 = vsel %vm1111_vm11, %v1716_v6, %v1790_v52  ;;  %v12257_v31 = vld [vmem:[%s17341_s1 + $0x798] sm:$0xff]   ;;  %v546_v6 = vld [vmem:[#allocation2 + $0x68] sm:$0xf] }
 0x321   : > { %1984 = vrot.lane.b32.xlu0 %v17573_v27, %s12510_s21  ;;  %v10125_v24 = vcombine.low %v1872_v45, %v1878_v35  ;;  %v10124_v32 = vcombine.low %v2315_v47, %v2318_v10  ;;  %11360 = vmatpush3.bf16.msra.mxu0 %v12248_v55  ;;  %v12254_v50 = vld [vmem:[%s17341_s1 + $0x778] sm:$0xff]   ;;  %v17588_v45 = vld [vmem:[#allocation32_spill] sm:$0xff]  ;;  %v15140_v35 = vsel %vm17474_vm13, %v14970_v62, %v14968_v23 }
 0x322   : > { %11394 = vmatpush3.bf16.msra.mxu1 %v12253_v21  ;;  %v15117_v29 = vpop.permute.xlu1 %1781  ;;  %11361 = vmatprep.subr.bf16.mxu0 %v12250_v16  ;;  %v17587_v21 = vld [vmem:[#allocation31_spill] sm:$0xff]  ;;  %v12256_v16 = vld [vmem:[%s17341_s1 + $0x738] sm:$0xff]   ;;  %v15142_v10 = vcombine.low %v546_v6, %v547_v11 }
 0x323   : > { %11395 = vmatprep.subr.bf16.mxu1 %v12255_v1  ;;  %6693 = vmatprep.mubr.bf16.mxu0 %v10125_v24  ;;  %v1780_v55 = vpop.permute.xlu0 %1779  ;;  %v12259_v1 = vld [vmem:[%s17341_s1 + $0x7a0] sm:$0xff]   ;;  %v12260_v24 = vld [vmem:[%s17341_s1 + $0x7e8] sm:$0xff]  }
 0x324   : > { %1841 = vrot.lane.b32.xlu1 %v17587_v21, %s12511_s30  ;;  %6694 = vmatmul.mubr.bf16.gmra.mrb[100].mxu0 %v10124_v32  ;;  %v12266_v32 = vld [vmem:[%s17341_s1 + $0x840] sm:$0xff]  }
 0x325   : > { %1839 = vrot.lane.b32.xlu0 %v17588_v45, %s12511_s30  ;;  %11362 = vmatpush3.bf16.msra.mxu0 %v12252_v2  ;;  %v1873_v2 = vsel %vm1111_vm11, %v15070_v53, %v1780_v55 }
 0x326   : > { %11396 = vmatpush3.bf16.msra.mxu1 %v12257_v31  ;;  %v15135_v47 = vpop.permute.xlu1 %1795  ;;  %11363 = vmatprep.subr.bf16.mxu0 %v12254_v50  ;;  %v15157_v50 = vsel %vm1140_vm12, %v14698_v40, %v14970_v62  ;;  %v12261_v40 = vld [vmem:[%s17341_s1 + $0x7a8] sm:$0xff]  }
 0x327   : > { %v11063_v52 = vpop.f32.mrb[60].mxu0  ;;  %11397 = vmatprep.subr.bf16.mxu1 %v12258_v14  ;;  %v1794_v31 = vpop.permute.xlu0 %1793  ;;  %v1874_v14 = vsel %vm1111_vm11, %v1780_v55, %v15117_v29 }
 0x328   : > { %v11064_v27 = vpop.f32.mrb[61].mxu0  ;;  %1855 = vrot.lane.b32.xlu1 %v15140_v35, %s12511_s30  ;;  %v1879_v6 = vsel %vm1111_vm11, %v1792_v20, %v1794_v31  ;;  %v1880_v11 = vsel %vm1111_vm11, %v1794_v31, %v15135_v47  ;;  %v15171_v31 = vshll.u32 %v15142_v10, 16 }
 0x329   : > { %v11065_v59 = vadd.f32 %v11064_v27, %v11063_v52  ;;  %v11066_v53 = vpop.f32.mrb[62].mxu0  ;;  %1853 = vrot.lane.b32.xlu0 %v15157_v50, %s12511_s30  ;;  %v10127_v48 = vcombine.low %v1874_v14, %v1880_v11  ;;  %v10126_v5 = vcombine.low %v1873_v2, %v1879_v6  ;;  %11364 = vmatpush3.bf16.msra.mxu0 %v12256_v16  ;;  %v12262_v27 = vld [vmem:[%s17341_s1 + $0x7f0] sm:$0xff]   ;;  %v17591_v11 = vld [vmem:[#allocation45_spill] sm:$0xff] }
 0x32a   : > { %v11067_v17 = vpop.f32.mrb[63].mxu0  ;;  %11398 = vmatpush3.bf16.msra.mxu1 %v12259_v1  ;;  %v1663_v55 = vpop.permute.xlu1 %1662  ;;  %11429 = vmatprep.subr.bf16.mxu0 %v12266_v32  ;;  %v17590_v2 = vld [vmem:[#allocation44_spill] sm:$0xff] }
 0x32b   : > { %v6322_v62 = vadd.f32 %v11065_v59, %v14928_v56  ;;  %v11068_v20 = vadd.f32 %v11067_v17, %v11066_v53  ;;  %11399 = vmatprep.subr.bf16.mxu1 %v12260_v24  ;;  %6758 = vmatprep.mubr.bf16.mxu1 %v10127_v48  ;;  %v1649_v16 = vpop.permute.xlu0 %1648  ;;  %v17589_v59 = vld [vmem:[#allocation4_spill] sm:$0xff]  ;;  %v15185_v24 = vshrl.u32 %v15142_v10, 16  ;;  %v714_v48 = vrot.slane %v15171_v31, 1 }
 0x32c   : > { %1857 = vrot.lane.b32.xlu1 %v14968_v23, %s12511_s30  ;;  %6759 = vmatmul.mubr.bf16.gmra.mrb[100].mxu1 %v10126_v5  ;;  %v12263_v56 = vld [vmem:[%s17341_s1 + $0x7b0] sm:$0xff]   ;;  %v12264_v5 = vld [vmem:[%s17341_s1 + $0x7f8] sm:$0xff]  }
 0x32d   : > { %v6325_v1 = vadd.f32 %v11068_v20, %v14931_v4  ;;  %1843 = vrot.lane.b32.xlu0 %v17589_v59, %s12511_s30  ;;  %v12265_v20 = vld [vmem:[%s17341_s1 + $0x7b8] sm:$0xff]  }
 0x32e   : > { %11400 = vmatpush3.bf16.msra.mxu1 %v12261_v40  ;;  %v1806_v52 = vpop.permute.xlu1 %1805  ;;  %v757_v40 = vrot.slane %v15142_v10, 1 }
 0x32f   : > { %v11103_v17 = vpop.f32.mrb[60].mxu1  ;;  %11401 = vmatprep.subr.bf16.mxu1 %v12262_v27  ;;  %v1804_v4 = vpop.permute.xlu0 %1803 }
 0x330   : > { %v11104_v32 = vpop.f32.mrb[61].mxu1  ;;  %2000 = vrot.lane.b32.xlu1 %v17590_v2, %s12510_s21 }
 0x331   : > { %v11105_v14 = vadd.f32 %v11104_v32, %v11103_v17  ;;  %v11106_v6 = vpop.f32.mrb[62].mxu1  ;;  %1998 = vrot.lane.b32.xlu0 %v17591_v11, %s12510_s21  ;;  %v15204_v17 = vsel %vm17475_vm9, %v15008_v13, %v15006_v54  ;;  %v715_v32 = vor.u32 %v714_v48, %v15185_v24  ;;  %v1728_v11 = vsel %vm1140_vm12, %v14912_v15, %v1663_v55 }
 0x332   : > { %v11107_v53 = vpop.f32.mrb[63].mxu1  ;;  %11402 = vmatpush3.bf16.msra.mxu1 %v12263_v56  ;;  %v1820_v59 = vpop.permute.xlu1 %1819  ;;  %17592 = vst [vmem:[#allocation39_spill] sm:$0xff] %v15204_v17  ;;  %v12273_v56 = vld [vmem:[%s17341_s1 + $0x8c0] sm:$0xff]  }
 0x333   : > { %v15199_v27 = vadd.f32 %v11105_v14, %v6322_v62  ;;  %v11108_v23 = vadd.f32 %v11107_v53, %v11106_v6  ;;  %11403 = vmatprep.subr.bf16.mxu1 %v12264_v5  ;;  %v1722_v62 = vsel %vm1140_vm12, %v14897_v25, %v1649_v16  ;;  %v1884_v14 = vsel %vm1111_vm11, %v1804_v4, %v1806_v52  ;;  %v1818_v6 = vpop.permute.xlu0 %1817  ;;  %v12494_v53 = vld [vmem:[#allocation2 + $0x60] sm:$0xf] }
 0x334   : > { %2014 = vrot.lane.b32.xlu1 %v15204_v17, %s12510_s21  ;;  %v15219_v48 = vsel %vm1010_vm8, %v12494_v53, %v15008_v13  ;;  %v2321_v5 = vsel %vm1111_vm11, %v1722_v62, %v1804_v4  ;;  %v1890_v15 = vsel %vm1111_vm11, %v1818_v6, %v1820_v59  ;;  %v2324_v55 = vsel %vm1111_vm11, %v1728_v11, %v1818_v6 }
 0x335   : > { %17593 = vst [vmem:[#allocation42_spill] sm:$0xff] %v15219_v48  ;;  %v15222_v2 = vadd.f32 %v11108_v23, %v6325_v1  ;;  %2012 = vrot.lane.b32.xlu0 %v15219_v48, %s12510_s21  ;;  %v10168_v25 = vcombine.low %v1884_v14, %v1890_v15  ;;  %v10167_v16 = vcombine.low %v2321_v5, %v2324_v55  ;;  %v17594_v14 = vld [vmem:[#allocation16_spill] sm:$0xff] }
 0x336   : > { %11404 = vmatpush3.bf16.msra.mxu1 %v12265_v20  ;;  %v15228_v17 = vpop.permute.xlu1 %1809  ;;  %v825_v20 = vrot.slane %v15185_v24, 1 }
 0x337   : > { %11469 = vmatprep.subr.bf16.mxu1 %v12273_v56  ;;  %6701 = vmatprep.mubr.bf16.mxu0 %v10168_v25  ;;  %v1808_v13 = vpop.permute.xlu0 %1807  ;;  %v826_v56 = vrot.slane %v15171_v31, 2 }
 0x338   : > { %784 = vrot.lane.b32.xlu1 %v757_v40, %s12509_s14  ;;  %6702 = vmatmul.mubr.bf16.gmra.mrb[104].mxu0 %v10167_v16  ;;  %v1885_v4 = vsel %vm1111_vm11, %v1806_v52, %v1808_v13  ;;  %v1886_v40 = vsel %vm1111_vm11, %v1808_v13, %v15228_v17  ;;  %v17595_v52 = vld [vmem:[#allocation15_spill] sm:$0xff] }
 0x339   : > { %742 = vrot.lane.b32.xlu0 %v715_v32, %s12508_s23  ;;  %v17596_v13 = vld [vmem:[#allocation23_spill] sm:$0xff] }
 0x33a   : > { %v15232_v1 = vpop.permute.xlu1 %1823 }
 0x33b   : > { %v11125_v23 = vpop.f32.mrb[64].mxu0  ;;  %v1822_v11 = vpop.permute.xlu0 %1821 }
 0x33c   : > { %v11126_v62 = vpop.f32.mrb[65].mxu0  ;;  %1920 = vrot.lane.b32.xlu1 %v17594_v14, %s12510_s21  ;;  %v1891_v6 = vsel %vm1111_vm11, %v1820_v59, %v1822_v11  ;;  %v1892_v32 = vsel %vm1111_vm11, %v1822_v11, %v15232_v1  ;;  %v869_v59 = vrot.slane %v15142_v10, 2  ;;  %v17597_v11 = vld [vmem:[#allocation22_spill] sm:$0xff] }
 0x33d   : > { %v11127_v53 = vadd.f32 %v11126_v62, %v11125_v23  ;;  %v11128_v5 = vpop.f32.mrb[66].mxu0  ;;  %1918 = vrot.lane.b32.xlu0 %v17595_v52, %s12510_s21  ;;  %v10170_v55 = vcombine.low %v1886_v40, %v1892_v32  ;;  %v10169_v25 = vcombine.low %v1885_v4, %v1891_v6  ;;  %v827_v62 = vor.u32 %v826_v56, %v825_v20 }
 0x33e   : > { %v11129_v15 = vpop.f32.mrb[67].mxu0  ;;  %v1691_v48 = vpop.permute.xlu1 %1690 }
 0x33f   : > { %v6428_v16 = vadd.f32 %v11127_v53, %v14952_v19  ;;  %v11130_v14 = vadd.f32 %v11129_v15, %v11128_v5  ;;  %6766 = vmatprep.mubr.bf16.mxu1 %v10170_v55  ;;  %v1677_v9 = vpop.permute.xlu0 %1676  ;;  %v1740_v6 = vsel %vm1140_vm12, %v14954_v42, %v1691_v48 }
 0x340   : > { %1934 = vrot.lane.b32.xlu1 %v17596_v13, %s12510_s21  ;;  %6767 = vmatmul.mubr.bf16.gmra.mrb[104].mxu1 %v10169_v25  ;;  %v1734_v32 = vsel %vm1140_vm12, %v14946_v36, %v1677_v9 }
 0x341   : > { %v6431_v23 = vadd.f32 %v11130_v14, %v14964_v37  ;;  %1932 = vrot.lane.b32.xlu0 %v17597_v11, %s12510_s21 }
 0x342   : > { %v1834_v40 = vpop.permute.xlu1 %1833 }
 0x343   : > { %v1832_v4 = vpop.permute.xlu0 %1831 }
 0x344   : > { %896 = vrot.lane.b32.xlu1 %v869_v59, %s12511_s30  ;;  %v1896_v37 = vsel %vm1111_vm11, %v1832_v4, %v1834_v40  ;;  %v2327_v20 = vsel %vm1111_vm11, %v1734_v32, %v1832_v4 }
 0x345   : > { %854 = vrot.lane.b32.xlu0 %v827_v62, %s12510_s21 }
 0x346   : > { %v1848_v19 = vpop.permute.xlu1 %1847 }
 0x347   : > { %v1846_v53 = vpop.permute.xlu0 %1845 }
 0x348   : > { %1924 = vrot.lane.b32.xlu1 %v13491_v51, %s12510_s21  ;;  %v1902_v56 = vsel %vm1111_vm11, %v1846_v53, %v1848_v19  ;;  %v2330_v5 = vsel %vm1111_vm11, %v1740_v6, %v1846_v53  ;;  %v17598_v6 = vld [vmem:[#allocation25_spill] sm:$0xff] }
 0x349   : > { %1922 = vrot.lane.b32.xlu0 %v13545_v49, %s12510_s21  ;;  %v10211_v52 = vcombine.low %v1896_v37, %v1902_v56  ;;  %v10210_v42 = vcombine.low %v2327_v20, %v2330_v5  ;;  %v17599_v20 = vld [vmem:[#allocation24_spill] sm:$0xff] }
 0x34a   : > { %v15267_v15 = vpop.permute.xlu1 %1837 }
 0x34b   : > { %v11165_v48 = vpop.f32.mrb[64].mxu1  ;;  %6709 = vmatprep.mubr.bf16.mxu0 %v10211_v52  ;;  %v1836_v36 = vpop.permute.xlu0 %1835 }
 0x34c   : > { %v11166_v9 = vpop.f32.mrb[65].mxu1  ;;  %1938 = vrot.lane.b32.xlu1 %v13535_v58, %s12510_s21  ;;  %6710 = vmatmul.mubr.bf16.gmra.mrb[108].mxu0 %v10210_v42  ;;  %v1897_v62 = vsel %vm1111_vm11, %v1834_v40, %v1836_v36  ;;  %v1898_v32 = vsel %vm1111_vm11, %v1836_v36, %v15267_v15 }
 0x34d   : > { %v11167_v51 = vadd.f32 %v11166_v9, %v11165_v48  ;;  %v11168_v55 = vpop.f32.mrb[66].mxu1  ;;  %1936 = vrot.lane.b32.xlu0 %v17578_v30, %s12510_s21  ;;  %v17601_v9 = vld [vmem:[#allocation37_spill] sm:$0xff] }
 0x34e   : > { %v11169_v25 = vpop.f32.mrb[67].mxu1  ;;  %v15275_v59 = vpop.permute.xlu1 %1851 }
 0x34f   : > { %v15273_v14 = vadd.f32 %v11167_v51, %v6428_v16  ;;  %v11170_v49 = vadd.f32 %v11169_v25, %v11168_v55  ;;  %v1850_v4 = vpop.permute.xlu0 %1849 }
 0x350   : > { %1948 = vrot.lane.b32.xlu1 %v17598_v6, %s12510_s21  ;;  %v1903_v37 = vsel %vm1111_vm11, %v1848_v19, %v1850_v4  ;;  %v1904_v16 = vsel %vm1111_vm11, %v1850_v4, %v15275_v59 }
 0x351   : > { %v15282_v53 = vadd.f32 %v11170_v49, %v6431_v23  ;;  %1946 = vrot.lane.b32.xlu0 %v17599_v20, %s12510_s21  ;;  %v10213_v56 = vcombine.low %v1898_v32, %v1904_v16  ;;  %v10212_v5 = vcombine.low %v1897_v62, %v1903_v37  ;;  %v17600_v23 = vld [vmem:[#allocation38_spill] sm:$0xff] }
 0x352   : > { %v15289_v52 = vpop.permute.xlu1 %894 }
 0x353   : > { %v11131_v40 = vpop.f32.mrb[68].mxu0  ;;  %6774 = vmatprep.mubr.bf16.mxu1 %v10213_v56  ;;  %v15291_v42 = vpop.permute.xlu0 %852 }
 0x354   : > { %v11132_v48 = vpop.f32.mrb[69].mxu0  ;;  %1962 = vrot.lane.b32.xlu1 %v17600_v23, %s12510_s21  ;;  %6775 = vmatmul.mubr.bf16.gmra.mrb[108].mxu1 %v10212_v5 }
 0x355   : > { %v11133_v36 = vadd.f32 %v11132_v48, %v11131_v40  ;;  %v11134_v19 = vpop.f32.mrb[70].mxu0  ;;  %1960 = vrot.lane.b32.xlu0 %v17601_v9, %s12510_s21  ;;  %v12267_v48 = vld [vmem:[%s17341_s1 + $0x800] sm:$0xff]  }
 0x356   : > { %v11135_v51 = vpop.f32.mrb[71].mxu0  ;;  %v1758_v49 = vpop.permute.xlu1 %1757 }
 0x357   : > { %v6436_v55 = vadd.f32 %v11133_v36, %v15004_v60  ;;  %v11136_v25 = vadd.f32 %v11135_v51, %v11134_v19  ;;  %v1756_v62 = vpop.permute.xlu0 %1755 }
 0x358   : > { %1952 = vrot.lane.b32.xlu1 %v17579_v33, %s12510_s21  ;;  %v1863_v16 = vsel %vm1111_vm11, %v15022_v34, %v1756_v62  ;;  %v1864_v60 = vsel %vm1111_vm11, %v1756_v62, %v1758_v49  ;;  %v12268_v34 = vld [vmem:[%s17341_s1 + $0x848] sm:$0xff]  }
 0x359   : > { %v6439_v4 = vadd.f32 %v11136_v25, %v15012_v46  ;;  %1950 = vrot.lane.b32.xlu0 %v17580_v61, %s12510_s21  ;;  %v17602_v25 = vld [vmem:[#allocation49_spill] sm:$0xff] }
 0x35a   : > { %v1772_v32 = vpop.permute.xlu1 %1771 }
 0x35b   : > { %v1770_v37 = vpop.permute.xlu0 %1769 }
 0x35c   : > { %1966 = vrot.lane.b32.xlu1 %v13697_v26, %s12510_s21  ;;  %v1869_v56 = vsel %vm1111_vm11, %v15034_v8, %v1770_v37  ;;  %v1870_v5 = vsel %vm1111_vm11, %v1770_v37, %v1772_v32 }
 0x35d   : > { %1964 = vrot.lane.b32.xlu0 %v17581_v57, %s12510_s21  ;;  %v10085_v46 = vcombine.low %v1863_v16, %v1869_v56  ;;  %v10086_v40 = vcombine.low %v1864_v60, %v1870_v5  ;;  %v17603_v16 = vld [vmem:[#allocation48_spill] sm:$0xff]  ;;  %v12269_v56 = vld [vmem:[%s17341_s1 + $0x808] sm:$0xff]  }
 0x35e   : > { %v15316_v19 = vpop.permute.xlu1 %1006 }
 0x35f   : > { %v11171_v36 = vpop.f32.mrb[68].mxu1  ;;  %6815 = vmatprep.mubr.bf16.mxu0 %v10086_v40  ;;  %v15321_v8 = vpop.permute.xlu0 %964 }
 0x360   : > { %v11172_v51 = vpop.f32.mrb[69].mxu1  ;;  %1976 = vrot.lane.b32.xlu1 %v17602_v25, %s12510_s21  ;;  %6816 = vmatmul.mubr.bf16.vlgmr.msra.gmra.mrb[112].mxu0 %v10085_v46 }
 0x361   : > { %v11173_v62 = vadd.f32 %v11172_v51, %v11171_v36  ;;  %v11174_v37 = vpop.f32.mrb[70].mxu1  ;;  %1974 = vrot.lane.b32.xlu0 %v17603_v16, %s12510_s21  ;;  %11430 = vmatpush3.bf16.msra.mxu0 %v12267_v48  ;;  %v12270_v36 = vld [vmem:[%s17341_s1 + $0x850] sm:$0xff]  }
 0x362   : > { %v11175_v60 = vpop.f32.mrb[71].mxu1  ;;  %v1774_v57 = vpop.permute.xlu1 %1773  ;;  %11431 = vmatprep.subr.bf16.mxu0 %v12268_v34 }
 0x363   : > { %v15330_v5 = vadd.f32 %v11173_v62, %v6436_v55  ;;  %v11176_v40 = vadd.f32 %v11175_v60, %v11174_v37  ;;  %v1760_v46 = vpop.permute.xlu0 %1759  ;;  %v12271_v55 = vld [vmem:[%s17341_s1 + $0x810] sm:$0xff]   ;;  %v12272_v62 = vld [vmem:[%s17341_s1 + $0x858] sm:$0xff]  }
 0x364   : > { %1990 = vrot.lane.b32.xlu1 %v14465_v44, %s12510_s21 }
 0x365   : > { %v15337_v51 = vadd.f32 %v11176_v40, %v6439_v4  ;;  %1988 = vrot.lane.b32.xlu0 %v14470_v22, %s12510_s21  ;;  %11432 = vmatpush3.bf16.msra.mxu0 %v12269_v56 }
 0x366   : > { %v15344_v34 = vpop.permute.xlu1 %1916  ;;  %11433 = vmatprep.subr.bf16.mxu0 %v12270_v36  ;;  %v12274_v36 = vld [vmem:[%s17341_s1 + $0x818] sm:$0xff]  }
 0x367   : > { %v11137_v48 = vpop.f32.mrb[72].mxu0  ;;  %v1915_v37 = vpop.permute.xlu0 %1914 }
 0x368   : > { %v11138_v60 = vpop.f32.mrb[73].mxu0  ;;  %1980 = vrot.lane.b32.xlu1 %v17582_v12, %s12510_s21 }
 0x369   : > { %v11139_v4 = vadd.f32 %v11138_v60, %v11137_v48  ;;  %v11140_v40 = vpop.f32.mrb[74].mxu0  ;;  %1978 = vrot.lane.b32.xlu0 %v17583_v18, %s12510_s21  ;;  %11434 = vmatpush3.bf16.msra.mxu0 %v12271_v55  ;;  %v12276_v48 = vld [vmem:[%s17341_s1 + $0x860] sm:$0xff]   ;;  %v1871_v60 = vsel %vm1111_vm11, %v1772_v32, %v1774_v57  ;;  %v1865_v18 = vsel %vm1111_vm11, %v1758_v49, %v1760_v46 }
 0x36a   : > { %v11141_v56 = vpop.f32.mrb[75].mxu0  ;;  %v15357_v33 = vpop.permute.xlu1 %1930  ;;  %11435 = vmatprep.subr.bf16.mxu0 %v12272_v62  ;;  %v2027_v55 = vsel %vm1082_vm10, %v1915_v37, %v15344_v34  ;;  %v12275_v32 = vld [vmem:[%s17341_s1 + $0x880] sm:$0xff]  }
 0x36b   : > { %v6444_v26 = vadd.f32 %v11139_v4, %v15088_v3  ;;  %v11142_v61 = vadd.f32 %v11141_v56, %v11140_v40  ;;  %v1929_v12 = vpop.permute.xlu0 %1928  ;;  %v2333_v3 = vsel %vm1082_vm10, %v1865_v18, %v1915_v37  ;;  %v12278_v18 = vld [vmem:[%s17341_s1 + $0x820] sm:$0xff]   ;;  %v937_v37 = vrot.slane %v15185_v24, 2  ;;  %v12281_v24 = vld [vmem:[%s17341_s1 + $0x8d0] sm:$0xff]  }
 0x36c   : > { %1994 = vrot.lane.b32.xlu1 %v17587_v21, %s12510_s21  ;;  %v2033_v62 = vsel %vm1082_vm10, %v1929_v12, %v15357_v33  ;;  %v2336_v40 = vsel %vm1082_vm10, %v1871_v60, %v1929_v12  ;;  %v12277_v12 = vld [vmem:[%s17341_s1 + $0x8c8] sm:$0xff]   ;;  %v938_v56 = vrot.slane %v15171_v31, 3  ;;  %v15406_v31 = vsel %vm1111_vm11, %v15291_v42, %v15289_v52 }
 0x36d   : > { %v6447_v4 = vadd.f32 %v11142_v61, %v15105_v41  ;;  %1992 = vrot.lane.b32.xlu0 %v17588_v45, %s12510_s21  ;;  %v10087_v57 = vcombine.low %v2333_v3, %v2336_v40  ;;  %v10088_v49 = vcombine.low %v2027_v55, %v2033_v62  ;;  %11436 = vmatpush3.bf16.msra.mxu0 %v12274_v36  ;;  %v12280_v41 = vld [vmem:[%s17341_s1 + $0x868] sm:$0xff]   ;;  %v12284_v62 = vld [vmem:[%s17341_s1 + $0x870] sm:$0xff]  }
 0x36e   : > { %v15381_v61 = vpop.permute.xlu1 %1785  ;;  %11437 = vmatprep.subr.bf16.mxu0 %v12276_v48  ;;  %v17604_v36 = vld [vmem:[#allocation11_spill] sm:$0xff] }
 0x36f   : > { %6880 = vmatprep.mubr.bf16.mxu1 %v10088_v49  ;;  %v1784_v46 = vpop.permute.xlu0 %1783  ;;  %v12279_v48 = vld [vmem:[%s17341_s1 + $0x888] sm:$0xff]  }
 0x370   : > { %2004 = vrot.lane.b32.xlu1 %v14862_v43, %s12510_s21  ;;  %6881 = vmatmul.mubr.bf16.vlgmr.msra.gmra.mrb[112].mxu1 %v10087_v57  ;;  %v12282_v60 = vld [vmem:[%s17341_s1 + $0x828] sm:$0xff]   ;;  %v1875_v40 = vsel %vm1111_vm11, %v15117_v29, %v1784_v46 }
 0x371   : > { %2002 = vrot.lane.b32.xlu0 %v17604_v36, %s12510_s21  ;;  %11470 = vmatpush3.bf16.msra.mxu1 %v12275_v32  ;;  %v15421_v32 = vsel %vm1082_vm10, %v15006_v54, %v15291_v42 }
 0x372   : > { %11438 = vmatpush3.bf16.msra.mxu0 %v12278_v18  ;;  %v15401_v3 = vpop.permute.xlu1 %1799  ;;  %11471 = vmatprep.subr.bf16.mxu1 %v12277_v12  ;;  %v981_v18 = vrot.slane %v15142_v10, 3  ;;  %v939_v12 = vor.u32 %v938_v56, %v937_v37  ;;  %v12283_v10 = vld [vmem:[%s17341_s1 + $0x890] sm:$0xff]  }
 0x373   : > { %v11177_v55 = vpop.f32.mrb[72].mxu1  ;;  %11439 = vmatprep.subr.bf16.mxu0 %v12280_v41  ;;  %v1798_v57 = vpop.permute.xlu0 %1797  ;;  %v1876_v41 = vsel %vm1111_vm11, %v1784_v46, %v15381_v61 }
 0x374   : > { %v11178_v49 = vpop.f32.mrb[73].mxu1  ;;  %2018 = vrot.lane.b32.xlu1 %v15406_v31, %s12510_s21  ;;  %v1881_v45 = vsel %vm1111_vm11, %v15135_v47, %v1798_v57  ;;  %v1882_v29 = vsel %vm1111_vm11, %v1798_v57, %v15401_v3  ;;  %v12286_v47 = vld [vmem:[%s17341_s1 + $0x830] sm:$0xff]  }
 0x375   : > { %v11179_v21 = vadd.f32 %v11178_v49, %v11177_v55  ;;  %v11180_v30 = vpop.f32.mrb[74].mxu1  ;;  %2016 = vrot.lane.b32.xlu0 %v15421_v32, %s12510_s21  ;;  %v10129_v54 = vcombine.low %v1876_v41, %v1882_v29  ;;  %v10128_v42 = vcombine.low %v1875_v40, %v1881_v45  ;;  %11472 = vmatpush3.bf16.msra.mxu1 %v12279_v48  ;;  %v12285_v45 = vld [vmem:[%s17341_s1 + $0x8d8] sm:$0xff]  }
 0x376   : > { %v11181_v58 = vpop.f32.mrb[75].mxu1  ;;  %11440 = vmatpush3.bf16.msra.mxu0 %v12282_v60  ;;  %v1802_v56 = vpop.permute.xlu1 %1801  ;;  %11473 = vmatprep.subr.bf16.mxu1 %v12281_v24  ;;  %v12288_v48 = vld [vmem:[%s17341_s1 + $0x878] sm:$0xff]   ;;  %v12298_v24 = vld [vmem:[%s17341_s1 + $0x940] sm:$0xff]  }
 0x377   : > { %v15438_v46 = vadd.f32 %v11179_v21, %v6444_v26  ;;  %v11182_v37 = vadd.f32 %v11181_v58, %v11180_v30  ;;  %11441 = vmatprep.subr.bf16.mxu0 %v12284_v62  ;;  %6823 = vmatprep.mubr.bf16.mxu0 %v10129_v54  ;;  %v1788_v60 = vpop.permute.xlu0 %1787  ;;  %v12287_v58 = vld [vmem:[%s17341_s1 + $0x898] sm:$0xff]  }
 0x378   : > { %1008 = vrot.lane.b32.xlu1 %v981_v18, %s12513_s10  ;;  %6824 = vmatmul.mubr.bf16.gmra.mrb[116].mxu0 %v10128_v42  ;;  %v12290_v26 = vld [vmem:[%s17341_s1 + $0x838] sm:$0xff]   ;;  %v15477_v42 = vsel %vm17474_vm13, %v15321_v8, %v15316_v19 }
 0x379   : > { %v15447_v55 = vadd.f32 %v11182_v37, %v6447_v4  ;;  %966 = vrot.lane.b32.xlu0 %v939_v12, %s12512_s9  ;;  %11474 = vmatpush3.bf16.msra.mxu1 %v12283_v10  ;;  %v12289_v4 = vld [vmem:[%s17341_s1 + $0x8e0] sm:$0xff]   ;;  %v12292_v10 = vld [vmem:[%s17341_s1 + $0x8e8] sm:$0xff]  }
 0x37a   : > { %11442 = vmatpush3.bf16.msra.mxu0 %v12286_v47  ;;  %v15456_v21 = vpop.permute.xlu1 %1944  ;;  %11475 = vmatprep.subr.bf16.mxu1 %v12285_v45  ;;  %v12291_v12 = vld [vmem:[%s17341_s1 + $0x8a0] sm:$0xff]   ;;  %v1883_v47 = vsel %vm1111_vm11, %v15401_v3, %v1802_v56 }
 0x37b   : > { %v11143_v30 = vpop.f32.mrb[76].mxu0  ;;  %11443 = vmatprep.subr.bf16.mxu0 %v12288_v48  ;;  %v1943_v62 = vpop.permute.xlu0 %1942  ;;  %v15493_v48 = vsel %vm1140_vm12, %v15289_v52, %v15321_v8  ;;  %v12293_v52 = vld [vmem:[%s17341_s1 + $0x8a8] sm:$0xff]  }
 0x37c   : > { %v11144_v40 = vpop.f32.mrb[77].mxu0  ;;  %2008 = vrot.lane.b32.xlu1 %v15140_v35, %s12510_s21  ;;  %v2039_v37 = vsel %vm1082_vm10, %v1943_v62, %v15456_v21 }
 0x37d   : > { %v11145_v57 = vadd.f32 %v11144_v40, %v11143_v30  ;;  %v11146_v49 = vpop.f32.mrb[78].mxu0  ;;  %2006 = vrot.lane.b32.xlu0 %v15157_v50, %s12510_s21  ;;  %11476 = vmatpush3.bf16.msra.mxu1 %v12287_v58  ;;  %v12296_v40 = vld [vmem:[%s17341_s1 + $0x8f8] sm:$0xff]  }
 0x37e   : > { %v11147_v18 = vpop.f32.mrb[79].mxu0  ;;  %11444 = vmatpush3.bf16.msra.mxu0 %v12290_v26  ;;  %v15472_v54 = vpop.permute.xlu1 %1958  ;;  %11477 = vmatprep.subr.bf16.mxu1 %v12289_v4  ;;  %v12295_v4 = vld [vmem:[%s17341_s1 + $0x8b0] sm:$0xff]  }
 0x37f   : > { %v6452_v41 = vadd.f32 %v11145_v57, %v15199_v27  ;;  %v11148_v29 = vadd.f32 %v11147_v18, %v11146_v49  ;;  %11509 = vmatprep.subr.bf16.mxu0 %v12298_v24  ;;  %v1877_v27 = vsel %vm1111_vm11, %v15381_v61, %v1788_v60  ;;  %v1957_v45 = vpop.permute.xlu0 %1956 }
 0x380   : > { %2022 = vrot.lane.b32.xlu1 %v15477_v42, %s12510_s21  ;;  %v2339_v58 = vsel %vm1082_vm10, %v1877_v27, %v1943_v62  ;;  %v2045_v3 = vsel %vm1082_vm10, %v1957_v45, %v15472_v54  ;;  %v2342_v61 = vsel %vm1082_vm10, %v1883_v47, %v1957_v45 }
 0x381   : > { %v6455_v26 = vadd.f32 %v11148_v29, %v15222_v2  ;;  %2020 = vrot.lane.b32.xlu0 %v15493_v48, %s12510_s21  ;;  %v10131_v56 = vcombine.low %v2039_v37, %v2045_v3  ;;  %v10130_v60 = vcombine.low %v2339_v58, %v2342_v61  ;;  %11478 = vmatpush3.bf16.msra.mxu1 %v12291_v12  ;;  %v12294_v2 = vld [vmem:[%s17341_s1 + $0x8f0] sm:$0xff]  }
 0x382   : > { %v1814_v8 = vpop.permute.xlu1 %1813  ;;  %11479 = vmatprep.subr.bf16.mxu1 %v12292_v10 }
 0x383   : > { %6888 = vmatprep.mubr.bf16.mxu1 %v10131_v56  ;;  %v1812_v30 = vpop.permute.xlu0 %1811 }
 0x384   : > { %1940 = vrot.lane.b32.xlu1 %v17559_v28, %s12510_s21  ;;  %6889 = vmatmul.mubr.bf16.gmra.mrb[116].mxu1 %v10130_v60  ;;  %v1887_v57 = vsel %vm1111_vm11, %v15228_v17, %v1812_v30 }
 0x385   : > { %1926 = vrot.lane.b32.xlu0 %v17560_v0, %s12510_s21  ;;  %11480 = vmatpush3.bf16.msra.mxu1 %v12293_v52  ;;  %v1888_v0 = vsel %vm1111_vm11, %v1812_v30, %v1814_v8 }
 0x386   : > { %v1828_v62 = vpop.permute.xlu1 %1827  ;;  %11481 = vmatprep.subr.bf16.mxu1 %v12294_v2 }
 0x387   : > { %v11183_v24 = vpop.f32.mrb[76].mxu1  ;;  %v1826_v49 = vpop.permute.xlu0 %1825 }
 0x388   : > { %v11184_v18 = vpop.f32.mrb[77].mxu1  ;;  %2083 = vrot.lane.b32.xlu1 %v17561_v63, %s12509_s14  ;;  %v1893_v12 = vsel %vm1111_vm11, %v15232_v1, %v1826_v49  ;;  %v1894_v29 = vsel %vm1111_vm11, %v1826_v49, %v1828_v62  ;;  %v12297_v63 = vld [vmem:[%s17341_s1 + $0x8b8] sm:$0xff]   ;;  %v12303_v1 = vld [vmem:[%s17341_s1 + $0x9c0] sm:$0xff]  }
 0x389   : > { %v11185_v10 = vadd.f32 %v11184_v18, %v11183_v24  ;;  %v11186_v47 = vpop.f32.mrb[78].mxu1  ;;  %2081 = vrot.lane.b32.xlu0 %v17562_v39, %s12509_s14  ;;  %v10172_v37 = vcombine.low %v1888_v0, %v1894_v29  ;;  %v10171_v17 = vcombine.low %v1887_v57, %v1893_v12  ;;  %11482 = vmatpush3.bf16.msra.mxu1 %v12295_v4  ;;  %v17605_v12 = vld [vmem:[#allocation12_spill] sm:$0xff] }
 0x38a   : > { %v11187_v27 = vpop.f32.mrb[79].mxu1  ;;  %v1830_v3 = vpop.permute.xlu1 %1829  ;;  %11483 = vmatprep.subr.bf16.mxu1 %v12296_v40 }
 0x38b   : > { %v15531_v45 = vadd.f32 %v11185_v10, %v6452_v41  ;;  %v11188_v58 = vadd.f32 %v11187_v27, %v11186_v47  ;;  %6831 = vmatprep.mubr.bf16.mxu0 %v10172_v37  ;;  %v1816_v61 = vpop.permute.xlu0 %1815  ;;  %v17606_v10 = vld [vmem:[#allocation8_spill] sm:$0xff]  ;;  %v17607_v27 = vld [vmem:[#allocation27_spill] sm:$0xff] }
 0x38c   : > { %2097 = vrot.lane.b32.xlu1 %v17563_v38, %s12509_s14  ;;  %6832 = vmatmul.mubr.bf16.gmra.mrb[120].mxu0 %v10171_v17  ;;  %v1895_v38 = vsel %vm1111_vm11, %v1828_v62, %v1830_v3 }
 0x38d   : > { %v15538_v39 = vadd.f32 %v11188_v58, %v6455_v26  ;;  %2095 = vrot.lane.b32.xlu0 %v17564_v7, %s12509_s14  ;;  %11484 = vmatpush3.bf16.msra.mxu1 %v12297_v63  ;;  %v1889_v26 = vsel %vm1111_vm11, %v1814_v8, %v1816_v61 }
 0x38e   : > { %v15542_v41 = vpop.permute.xlu1 %1972  ;;  %11549 = vmatprep.subr.bf16.mxu1 %v12303_v1 }
 0x38f   : > { %v1971_v56 = vpop.permute.xlu0 %1970 }
 0x390   : > { %2087 = vrot.lane.b32.xlu1 %v17596_v13, %s12509_s14  ;;  %v2051_v7 = vsel %vm1082_vm10, %v1971_v56, %v15542_v41  ;;  %v2345_v13 = vsel %vm1082_vm10, %v1889_v26, %v1971_v56 }
 0x391   : > { %2085 = vrot.lane.b32.xlu0 %v17597_v11, %s12509_s14 }
 0x392   : > { %v15548_v52 = vpop.permute.xlu1 %1986 }
 0x393   : > { %v11205_v60 = vpop.f32.mrb[80].mxu0  ;;  %v1985_v2 = vpop.permute.xlu0 %1984 }
 0x394   : > { %v11206_v30 = vpop.f32.mrb[81].mxu0  ;;  %2101 = vrot.lane.b32.xlu1 %v17598_v6, %s12509_s14  ;;  %v2057_v11 = vsel %vm1082_vm10, %v1985_v2, %v15548_v52  ;;  %v2348_v4 = vsel %vm1082_vm10, %v1895_v38, %v1985_v2  ;;  %v17609_v38 = vld [vmem:[#allocation47_spill] sm:$0xff] }
 0x395   : > { %v11207_v24 = vadd.f32 %v11206_v30, %v11205_v60  ;;  %v11208_v40 = vpop.f32.mrb[82].mxu0  ;;  %2099 = vrot.lane.b32.xlu0 %v17599_v20, %s12509_s14  ;;  %v10174_v62 = vcombine.low %v2051_v7, %v2057_v11  ;;  %v10173_v57 = vcombine.low %v2345_v13, %v2348_v4 }
 0x396   : > { %v11209_v8 = vpop.f32.mrb[83].mxu0  ;;  %v1842_v0 = vpop.permute.xlu1 %1841 }
 0x397   : > { %v6558_v49 = vadd.f32 %v11207_v24, %v15273_v14  ;;  %v11210_v18 = vadd.f32 %v11209_v8, %v11208_v40  ;;  %6896 = vmatprep.mubr.bf16.mxu1 %v10174_v62  ;;  %v1840_v6 = vpop.permute.xlu0 %1839 }
 0x398   : > { %1968 = vrot.lane.b32.xlu1 %v17605_v12, %s12510_s21  ;;  %6897 = vmatmul.mubr.bf16.gmra.mrb[120].mxu1 %v10173_v57  ;;  %v1899_v14 = vsel %vm1111_vm11, %v15267_v15, %v1840_v6  ;;  %v1900_v37 = vsel %vm1111_vm11, %v1840_v6, %v1842_v0 }
 0x399   : > { %v6561_v29 = vadd.f32 %v11210_v18, %v15282_v53  ;;  %1954 = vrot.lane.b32.xlu0 %v17606_v10, %s12510_s21  ;;  %v17608_v53 = vld [vmem:[#allocation28_spill] sm:$0xff] }
 0x39a   : > { %v1856_v47 = vpop.permute.xlu1 %1855 }
 0x39b   : > { %v1854_v20 = vpop.permute.xlu0 %1853 }
 0x39c   : > { %2111 = vrot.lane.b32.xlu1 %v17607_v27, %s12509_s14  ;;  %v1905_v17 = vsel %vm1111_vm11, %v15275_v59, %v1854_v20  ;;  %v1906_v63 = vsel %vm1111_vm11, %v1854_v20, %v1856_v47  ;;  %v17610_v59 = vld [vmem:[#allocation46_spill] sm:$0xff] }
 0x39d   : > { %2109 = vrot.lane.b32.xlu0 %v17608_v53, %s12509_s14  ;;  %v10215_v58 = vcombine.low %v1900_v37, %v1906_v63  ;;  %v10214_v3 = vcombine.low %v1899_v14, %v1905_v17  ;;  %v17611_v63 = vld [vmem:[#allocation4_spill] sm:$0xff] }
 0x39e   : > { %v1858_v61 = vpop.permute.xlu1 %1857 }
 0x39f   : > { %v11245_v1 = vpop.f32.mrb[80].mxu1  ;;  %6839 = vmatprep.mubr.bf16.mxu0 %v10215_v58  ;;  %v1844_v56 = vpop.permute.xlu0 %1843  ;;  %v1907_v8 = vsel %vm1111_vm11, %v1856_v47, %v1858_v61  ;;  %v17612_v58 = vld [vmem:[#allocation43_spill] sm:$0xff] }
 0x3a0   : > { %v11246_v60 = vpop.f32.mrb[81].mxu1  ;;  %2125 = vrot.lane.b32.xlu1 %v17609_v38, %s12509_s14  ;;  %6840 = vmatmul.mubr.bf16.gmra.mrb[124].mxu0 %v10214_v3  ;;  %v1901_v62 = vsel %vm1111_vm11, %v1842_v0, %v1844_v56  ;;  %v17614_v38 = vld [vmem:[#allocation29_spill] sm:$0xff] }
 0x3a1   : > { %v11247_v15 = vadd.f32 %v11246_v60, %v11245_v1  ;;  %v11248_v26 = vpop.f32.mrb[82].mxu1  ;;  %2123 = vrot.lane.b32.xlu0 %v17610_v59, %s12509_s14 }
 0x3a2   : > { %v11249_v7 = vpop.f32.mrb[83].mxu1  ;;  %v15584_v13 = vpop.permute.xlu1 %2000 }
 0x3a3   : > { %v15582_v2 = vadd.f32 %v11247_v15, %v6558_v49  ;;  %v11250_v30 = vadd.f32 %v11249_v7, %v11248_v26  ;;  %v1999_v11 = vpop.permute.xlu0 %1998 }
 0x3a4   : > { %2115 = vrot.lane.b32.xlu1 %v17600_v23, %s12509_s14  ;;  %v2063_v57 = vsel %vm1082_vm10, %v1999_v11, %v15584_v13  ;;  %v2351_v23 = vsel %vm1082_vm10, %v1901_v62, %v1999_v11  ;;  %v17615_v11 = vld [vmem:[#allocation44_spill] sm:$0xff] }
 0x3a5   : > { %v15588_v4 = vadd.f32 %v11250_v30, %v6561_v29  ;;  %2113 = vrot.lane.b32.xlu0 %v17601_v9, %s12509_s14 }
 0x3a6   : > { %v15592_v40 = vpop.permute.xlu1 %2014 }
 0x3a7   : > { %v11211_v24 = vpop.f32.mrb[84].mxu0  ;;  %v2013_v49 = vpop.permute.xlu0 %2012 }
 0x3a8   : > { %v11212_v18 = vpop.f32.mrb[85].mxu0  ;;  %2129 = vrot.lane.b32.xlu1 %v17602_v25, %s12509_s14  ;;  %v2069_v9 = vsel %vm1082_vm10, %v2013_v49, %v15592_v40  ;;  %v2354_v6 = vsel %vm1082_vm10, %v1907_v8, %v2013_v49  ;;  %v17616_v49 = vld [vmem:[#allocation45_spill] sm:$0xff] }
 0x3a9   : > { %v11213_v29 = vadd.f32 %v11212_v18, %v11211_v24  ;;  %v11214_v20 = vpop.f32.mrb[86].mxu0  ;;  %2127 = vrot.lane.b32.xlu0 %v17603_v16, %s12509_s14  ;;  %v10217_v47 = vcombine.low %v2063_v57, %v2069_v9  ;;  %v10216_v27 = vcombine.low %v2351_v23, %v2354_v6 }
 0x3aa   : > { %v11215_v0 = vpop.f32.mrb[87].mxu0  ;;  %v15607_v17 = vpop.permute.xlu1 %784 }
 0x3ab   : > { %v6566_v14 = vadd.f32 %v11213_v29, %v15330_v5  ;;  %v11216_v37 = vadd.f32 %v11215_v0, %v11214_v20  ;;  %6904 = vmatprep.mubr.bf16.mxu1 %v10217_v47  ;;  %v15609_v25 = vpop.permute.xlu0 %742  ;;  %v17613_v5 = vld [vmem:[#allocation30_spill] sm:$0xff]  ;;  %v12300_v29 = vld [vmem:[%s17341_s1 + $0x948] sm:$0xff]  }
 0x3ac   : > { %1996 = vrot.lane.b32.xlu1 %v17611_v63, %s12510_s21  ;;  %6905 = vmatmul.mubr.bf16.gmra.mrb[124].mxu1 %v10216_v27 }
 0x3ad   : > { %v6569_v53 = vadd.f32 %v11216_v37, %v15337_v51  ;;  %1982 = vrot.lane.b32.xlu0 %v17612_v58, %s12510_s21 }
 0x3ae   : > { %v1921_v3 = vpop.permute.xlu1 %1920 }
 0x3af   : > { %v11251_v16 = vpop.f32.mrb[84].mxu1  ;;  %v1919_v1 = vpop.permute.xlu0 %1918 }
 0x3b0   : > { %v11252_v61 = vpop.f32.mrb[85].mxu1  ;;  %2139 = vrot.lane.b32.xlu1 %v17613_v5, %s12509_s14  ;;  %v2028_v7 = vsel %vm1082_vm10, %v15344_v34, %v1919_v1  ;;  %v2029_v24 = vsel %vm1082_vm10, %v1919_v1, %v1921_v3  ;;  %v12299_v34 = vld [vmem:[%s17341_s1 + $0x900] sm:$0xff]  }
 0x3b1   : > { %v11253_v56 = vadd.f32 %v11252_v61, %v11251_v16  ;;  %v11254_v60 = vpop.f32.mrb[86].mxu1  ;;  %2137 = vrot.lane.b32.xlu0 %v17614_v38, %s12509_s14 }
 0x3b2   : > { %v11255_v15 = vpop.f32.mrb[87].mxu1  ;;  %v1935_v59 = vpop.permute.xlu1 %1934 }
 0x3b3   : > { %v15620_v26 = vadd.f32 %v11253_v56, %v6566_v14  ;;  %v11256_v51 = vadd.f32 %v11255_v15, %v11254_v60  ;;  %v1933_v30 = vpop.permute.xlu0 %1932  ;;  %v12301_v14 = vld [vmem:[%s17341_s1 + $0x908] sm:$0xff]   ;;  %v12306_v56 = vld [vmem:[%s17341_s1 + $0x958] sm:$0xff]  }
 0x3b4   : > { %2153 = vrot.lane.b32.xlu1 %v17615_v11, %s12509_s14  ;;  %v2034_v62 = vsel %vm1082_vm10, %v15357_v33, %v1933_v30  ;;  %v2035_v57 = vsel %vm1082_vm10, %v1933_v30, %v1935_v59  ;;  %v17617_v30 = vld [vmem:[#allocation10_spill] sm:$0xff] }
 0x3b5   : > { %v15627_v8 = vadd.f32 %v11256_v51, %v6569_v53  ;;  %2151 = vrot.lane.b32.xlu0 %v17616_v49, %s12509_s14  ;;  %v10089_v18 = vcombine.low %v2028_v7, %v2034_v62  ;;  %v10090_v23 = vcombine.low %v2029_v24, %v2035_v57  ;;  %v12305_v62 = vld [vmem:[%s17341_s1 + $0x980] sm:$0xff]  }
 0x3b6   : > { %v15637_v6 = vpop.permute.xlu1 %896 }
 0x3b7   : > { %v11217_v9 = vpop.f32.mrb[88].mxu0  ;;  %6945 = vmatprep.mubr.bf16.mxu0 %v10090_v23  ;;  %v15642_v33 = vpop.permute.xlu0 %854  ;;  %v12307_v23 = vld [vmem:[%s17341_s1 + $0x9c8] sm:$0xff]  }
 0x3b8   : > { %v11218_v20 = vpop.f32.mrb[89].mxu0  ;;  %2143 = vrot.lane.b32.xlu1 %v14465_v44, %s12509_s14  ;;  %6946 = vmatmul.mubr.bf16.vlgmr.msra.gmra.mrb[128].mxu0 %v10089_v18  ;;  %v12302_v44 = vld [vmem:[%s17341_s1 + $0x950] sm:$0xff]  }
 0x3b9   : > { %v11219_v0 = vadd.f32 %v11218_v20, %v11217_v9  ;;  %v11220_v47 = vpop.f32.mrb[90].mxu0  ;;  %2141 = vrot.lane.b32.xlu0 %v14470_v22, %s12509_s14  ;;  %11510 = vmatpush3.bf16.msra.mxu0 %v12299_v34  ;;  %v12310_v34 = vld [vmem:[%s17341_s1 + $0x960] sm:$0xff]  }
 0x3ba   : > { %v11221_v27 = vpop.f32.mrb[91].mxu0  ;;  %v15652_v16 = vpop.permute.xlu1 %1924  ;;  %11511 = vmatprep.subr.bf16.mxu0 %v12300_v29  ;;  %v17618_v29 = vld [vmem:[#allocation39_spill] sm:$0xff] }
 0x3bb   : > { %v6574_v37 = vadd.f32 %v11219_v0, %v15438_v46  ;;  %v11222_v53 = vadd.f32 %v11221_v27, %v11220_v47  ;;  %v1923_v1 = vpop.permute.xlu0 %1922  ;;  %v12304_v46 = vld [vmem:[%s17341_s1 + $0x910] sm:$0xff]   ;;  %v17619_v0 = vld [vmem:[#allocation42_spill] sm:$0xff]  ;;  %v12309_v47 = vld [vmem:[%s17341_s1 + $0x988] sm:$0xff]  }
 0x3bc   : > { %2157 = vrot.lane.b32.xlu1 %v14862_v43, %s12509_s14  ;;  %v2030_v43 = vsel %vm1082_vm10, %v1921_v3, %v1923_v1  ;;  %v12312_v27 = vld [vmem:[%s17341_s1 + $0x920] sm:$0xff]  }
 0x3bd   : > { %v6577_v22 = vadd.f32 %v11222_v53, %v15447_v55  ;;  %2155 = vrot.lane.b32.xlu0 %v17604_v36, %s12509_s14  ;;  %11512 = vmatpush3.bf16.msra.mxu0 %v12301_v14  ;;  %v2031_v36 = vsel %vm1082_vm10, %v1923_v1, %v15652_v16  ;;  %v1081_v53 = vsel %vm17475_vm9, %v15609_v25, %v15607_v17  ;;  %v12314_v1 = vld [vmem:[%s17341_s1 + $0x968] sm:$0xff]  }
 0x3be   : > { %v15665_v5 = vpop.permute.xlu1 %1938  ;;  %11513 = vmatprep.subr.bf16.mxu0 %v12302_v44  ;;  %v12311_v44 = vld [vmem:[%s17341_s1 + $0x9d0] sm:$0xff]  }
 0x3bf   : > { %v11257_v61 = vpop.f32.mrb[88].mxu1  ;;  %v1937_v60 = vpop.permute.xlu0 %1936 }
 0x3c0   : > { %v11258_v55 = vpop.f32.mrb[89].mxu1  ;;  %2024 = vrot.lane.b32.xlu1 %v15316_v19, %s12510_s21  ;;  %v2036_v38 = vsel %vm1082_vm10, %v1935_v59, %v1937_v60  ;;  %v2037_v15 = vsel %vm1082_vm10, %v1937_v60, %v15665_v5  ;;  %v12308_v59 = vld [vmem:[%s17341_s1 + $0x918] sm:$0xff]  }
 0x3c1   : > { %v11259_v51 = vadd.f32 %v11258_v55, %v11257_v61  ;;  %v11260_v7 = vpop.f32.mrb[90].mxu1  ;;  %2010 = vrot.lane.b32.xlu0 %v17617_v30, %s12510_s21  ;;  %v10091_v11 = vcombine.low %v2030_v43, %v2036_v38  ;;  %v10092_v24 = vcombine.low %v2031_v36, %v2037_v15  ;;  %11514 = vmatpush3.bf16.msra.mxu0 %v12304_v46 }
 0x3c2   : > { %v11261_v3 = vpop.f32.mrb[91].mxu1  ;;  %v15688_v18 = vpop.permute.xlu1 %1948  ;;  %11515 = vmatprep.subr.bf16.mxu0 %v12306_v56  ;;  %v12495_v56 = vld [vmem:[#allocation2 + $0x68] sm:$0xf] }
 0x3c3   : > { %v15686_v57 = vadd.f32 %v11259_v51, %v6574_v37  ;;  %v11262_v49 = vadd.f32 %v11261_v3, %v11260_v7  ;;  %7010 = vmatprep.mubr.bf16.mxu1 %v10092_v24  ;;  %v1947_v9 = vpop.permute.xlu0 %1946  ;;  %v1052_v43 = vsel %vm1010_vm8, %v12495_v56, %v15609_v25  ;;  %v12313_v25 = vld [vmem:[%s17341_s1 + $0x990] sm:$0xff]  }
 0x3c4   : > { %2167 = vrot.lane.b32.xlu1 %v17618_v29, %s12509_s14  ;;  %7011 = vmatmul.mubr.bf16.vlgmr.msra.gmra.mrb[128].mxu1 %v10091_v11  ;;  %v2041_v60 = vsel %vm1082_vm10, %v1947_v9, %v15688_v18  ;;  %v12316_v11 = vld [vmem:[%s17341_s1 + $0x928] sm:$0xff]  }
 0x3c5   : > { %v15698_v20 = vadd.f32 %v11262_v49, %v6577_v22  ;;  %2165 = vrot.lane.b32.xlu0 %v17619_v0, %s12509_s14  ;;  %11550 = vmatpush3.bf16.msra.mxu1 %v12305_v62  ;;  %v2040_v22 = vsel %vm1082_vm10, %v15456_v21, %v1947_v9  ;;  %v12315_v62 = vld [vmem:[%s17341_s1 + $0x9d8] sm:$0xff]  }
 0x3c6   : > { %11516 = vmatpush3.bf16.msra.mxu0 %v12308_v59  ;;  %v1963_v37 = vpop.permute.xlu1 %1962  ;;  %11551 = vmatprep.subr.bf16.mxu1 %v12307_v23  ;;  %v12318_v59 = vld [vmem:[%s17341_s1 + $0x970] sm:$0xff]   ;;  %v12317_v23 = vld [vmem:[%s17341_s1 + $0x998] sm:$0xff]  }
 0x3c7   : > { %v11223_v14 = vpop.f32.mrb[92].mxu0  ;;  %11517 = vmatprep.subr.bf16.mxu0 %v12310_v34  ;;  %v1961_v46 = vpop.permute.xlu0 %1960  ;;  %v12320_v34 = vld [vmem:[%s17341_s1 + $0x930] sm:$0xff]  }
 0x3c8   : > { %v11224_v61 = vpop.f32.mrb[93].mxu0  ;;  %2181 = vrot.lane.b32.xlu1 %v1081_v53, %s12509_s14  ;;  %v2046_v55 = vsel %vm1082_vm10, %v15472_v54, %v1961_v46  ;;  %v2047_v36 = vsel %vm1082_vm10, %v1961_v46, %v1963_v37 }
 0x3c9   : > { %v11225_v38 = vadd.f32 %v11224_v61, %v11223_v14  ;;  %v11226_v15 = vpop.f32.mrb[94].mxu0  ;;  %2179 = vrot.lane.b32.xlu0 %v1052_v43, %s12509_s14  ;;  %v10133_v51 = vcombine.low %v2041_v60, %v2047_v36  ;;  %v10132_v7 = vcombine.low %v2040_v22, %v2046_v55  ;;  %11552 = vmatpush3.bf16.msra.mxu1 %v12309_v47  ;;  %v12323_v55 = vld [vmem:[%s17341_s1 + $0x9e8] sm:$0xff]   ;;  %v12330_v36 = vld [vmem:[%s17341_s1 + $0xa40] sm:$0xff]  }
 0x3ca   : > { %v11227_v21 = vpop.f32.mrb[95].mxu0  ;;  %11518 = vmatpush3.bf16.msra.mxu0 %v12312_v27  ;;  %v15735_v24 = vpop.permute.xlu1 %1952  ;;  %11553 = vmatprep.subr.bf16.mxu1 %v12311_v44  ;;  %v1110_v14 = vsel %vm1082_vm10, %v15607_v17, %v15642_v33  ;;  %v12321_v17 = vld [vmem:[%s17341_s1 + $0x9a0] sm:$0xff]  }
 0x3cb   : > { %v6582_v54 = vadd.f32 %v11225_v38, %v15531_v45  ;;  %v11228_v3 = vadd.f32 %v11227_v21, %v11226_v15  ;;  %11519 = vmatprep.subr.bf16.mxu0 %v12314_v1  ;;  %6953 = vmatprep.mubr.bf16.mxu0 %v10133_v51  ;;  %v1951_v49 = vpop.permute.xlu0 %1950  ;;  %v17620_v15 = vld [vmem:[#allocation33_spill] sm:$0xff]  ;;  %v17621_v51 = vld [vmem:[#allocation35_spill] sm:$0xff] }
 0x3cc   : > { %2171 = vrot.lane.b32.xlu1 %v15406_v31, %s12509_s14  ;;  %6954 = vmatmul.mubr.bf16.gmra.mrb[132].mxu0 %v10132_v7  ;;  %v1139_v31 = vsel %vm1111_vm11, %v15642_v33, %v15637_v6  ;;  %v2042_v0 = vsel %vm1082_vm10, %v15688_v18, %v1951_v49  ;;  %v2043_v53 = vsel %vm1082_vm10, %v1951_v49, %v15735_v24  ;;  %v12324_v33 = vld [vmem:[%s17341_s1 + $0x938] sm:$0xff]   ;;  %v12325_v7 = vld [vmem:[%s17341_s1 + $0x9a8] sm:$0xff]  }
 0x3cd   : > { %v6585_v45 = vadd.f32 %v11228_v3, %v15538_v39  ;;  %2169 = vrot.lane.b32.xlu0 %v15421_v32, %s12509_s14  ;;  %11554 = vmatpush3.bf16.msra.mxu1 %v12313_v25  ;;  %v12319_v32 = vld [vmem:[%s17341_s1 + $0x9e0] sm:$0xff]   ;;  %v12322_v39 = vld [vmem:[%s17341_s1 + $0x978] sm:$0xff]  }
 0x3ce   : > { %11520 = vmatpush3.bf16.msra.mxu0 %v12316_v11  ;;  %v15754_v29 = vpop.permute.xlu1 %1966  ;;  %11555 = vmatprep.subr.bf16.mxu1 %v12315_v62  ;;  %v12326_v11 = vld [vmem:[%s17341_s1 + $0x9f0] sm:$0xff]   ;;  %v17622_v3 = vld [vmem:[#allocation34_spill] sm:$0xff] }
 0x3cf   : > { %v11263_v9 = vpop.f32.mrb[92].mxu1  ;;  %11521 = vmatprep.subr.bf16.mxu0 %v12318_v59  ;;  %v1965_v47 = vpop.permute.xlu0 %1964 }
 0x3d0   : > { %v11264_v27 = vpop.f32.mrb[93].mxu1  ;;  %2185 = vrot.lane.b32.xlu1 %v1139_v31, %s12509_s14  ;;  %v2048_v44 = vsel %vm1082_vm10, %v1963_v37, %v1965_v47  ;;  %v2049_v1 = vsel %vm1082_vm10, %v1965_v47, %v15754_v29  ;;  %v12327_v31 = vld [vmem:[%s17341_s1 + $0x9b0] sm:$0xff]  }
 0x3d1   : > { %v11265_v22 = vadd.f32 %v11264_v27, %v11263_v9  ;;  %v11266_v46 = vpop.f32.mrb[94].mxu1  ;;  %2183 = vrot.lane.b32.xlu0 %v1110_v14, %s12509_s14  ;;  %v10135_v61 = vcombine.low %v2043_v53, %v2049_v1  ;;  %v10134_v56 = vcombine.low %v2042_v0, %v2048_v44  ;;  %11556 = vmatpush3.bf16.msra.mxu1 %v12317_v23  ;;  %v17623_v23 = vld [vmem:[#allocation36_spill] sm:$0xff]  ;;  %v15833_v27 = vld [vmem:[%s17341_s1 + $0xa80] sm:$0xff]  }
 0x3d2   : > { %v11267_v18 = vpop.f32.mrb[95].mxu1  ;;  %11522 = vmatpush3.bf16.msra.mxu0 %v12320_v34  ;;  %v1977_v60 = vpop.permute.xlu1 %1976  ;;  %11557 = vmatprep.subr.bf16.mxu1 %v12319_v32 }
 0x3d3   : > { %v15783_v37 = vadd.f32 %v11265_v22, %v6582_v54  ;;  %v11268_v43 = vadd.f32 %v11267_v18, %v11266_v46  ;;  %11523 = vmatprep.subr.bf16.mxu0 %v12322_v39  ;;  %7018 = vmatprep.mubr.bf16.mxu1 %v10135_v61  ;;  %v1975_v38 = vpop.permute.xlu0 %1974  ;;  %v12329_v39 = vld [vmem:[%s17341_s1 + $0x9b8] sm:$0xff]  }
 0x3d4   : > { %2091 = vrot.lane.b32.xlu1 %v17620_v15, %s12509_s14  ;;  %7019 = vmatmul.mubr.bf16.gmra.mrb[132].mxu1 %v10134_v56  ;;  %v2052_v62 = vsel %vm1082_vm10, %v15542_v41, %v1975_v38  ;;  %v2053_v59 = vsel %vm1082_vm10, %v1975_v38, %v1977_v60  ;;  %v12328_v41 = vld [vmem:[%s17341_s1 + $0x9f8] sm:$0xff]  }
 0x3d5   : > { %v15793_v21 = vadd.f32 %v11268_v43, %v6585_v45  ;;  %2089 = vrot.lane.b32.xlu0 %v17621_v51, %s12509_s14  ;;  %11558 = vmatpush3.bf16.msra.mxu1 %v12321_v17  ;;  %v17624_v18 = vld [vmem:[#allocation41_spill] sm:$0xff]  ;;  %v17626_v51 = vld [vmem:[#allocation6_spill] sm:$0xff] }
 0x3d6   : > { %11524 = vmatpush3.bf16.msra.mxu0 %v12324_v33  ;;  %v1991_v25 = vpop.permute.xlu1 %1990  ;;  %11559 = vmatprep.subr.bf16.mxu1 %v12323_v55 }
 0x3d7   : > { %11589 = vmatprep.subr.bf16.mxu0 %v12330_v36  ;;  %v1989_v54 = vpop.permute.xlu0 %1988  ;;  %v17625_v36 = vld [vmem:[#allocation5_spill] sm:$0xff] }
 0x3d8   : > { %2105 = vrot.lane.b32.xlu1 %v17622_v3, %s12509_s14  ;;  %v2058_v49 = vsel %vm1082_vm10, %v15548_v52, %v1989_v54  ;;  %v2059_v45 = vsel %vm1082_vm10, %v1989_v54, %v1991_v25 }
 0x3d9   : > { %2103 = vrot.lane.b32.xlu0 %v17623_v23, %s12509_s14  ;;  %v10176_v34 = vcombine.low %v2053_v59, %v2059_v45  ;;  %v10175_v9 = vcombine.low %v2052_v62, %v2058_v49  ;;  %11560 = vmatpush3.bf16.msra.mxu1 %v12325_v7  ;;  %v17628_v49 = vld [vmem:[#allocation31_spill] sm:$0xff]  ;;  %v17629_v45 = vld [vmem:[#allocation32_spill] sm:$0xff] }
 0x3da   : > { %v15816_v32 = vpop.permute.xlu1 %1980  ;;  %11561 = vmatprep.subr.bf16.mxu1 %v12326_v11 }
 0x3db   : > { %6961 = vmatprep.mubr.bf16.mxu0 %v10176_v34  ;;  %v1979_v52 = vpop.permute.xlu0 %1978 }
 0x3dc   : > { %2107 = vrot.lane.b32.xlu1 %v17606_v10, %s12509_s14  ;;  %6962 = vmatmul.mubr.bf16.gmra.mrb[136].mxu0 %v10175_v9  ;;  %v2054_v10 = vsel %vm1082_vm10, %v1977_v60, %v1979_v52 }
 0x3dd   : > { %2093 = vrot.lane.b32.xlu0 %v17559_v28, %s12509_s14  ;;  %11562 = vmatpush3.bf16.msra.mxu1 %v12327_v31  ;;  %v2055_v28 = vsel %vm1082_vm10, %v1979_v52, %v15816_v32 }
 0x3de   : > { %v15828_v47 = vpop.permute.xlu1 %1994  ;;  %11563 = vmatprep.subr.bf16.mxu1 %v12328_v41 }
 0x3df   : > { %v11285_v0 = vpop.f32.mrb[96].mxu0  ;;  %v1993_v14 = vpop.permute.xlu0 %1992 }
 0x3e0   : > { %v11286_v53 = vpop.f32.mrb[97].mxu0  ;;  %2121 = vrot.lane.b32.xlu1 %v17605_v12, %s12509_s14  ;;  %v2060_v44 = vsel %vm1082_vm10, %v1991_v25, %v1993_v14  ;;  %v2061_v1 = vsel %vm1082_vm10, %v1993_v14, %v15828_v47 }
 0x3e1   : > { %v11287_v22 = vadd.f32 %v11286_v53, %v11285_v0  ;;  %v11288_v46 = vpop.f32.mrb[98].mxu0  ;;  %2119 = vrot.lane.b32.xlu0 %v17624_v18, %s12509_s14  ;;  %v10178_v56 = vcombine.low %v2055_v28, %v2061_v1  ;;  %v10177_v17 = vcombine.low %v2054_v10, %v2060_v44  ;;  %11564 = vmatpush3.bf16.msra.mxu1 %v12329_v39 }
 0x3e2   : > { %v11289_v61 = vpop.f32.mrb[99].mxu0  ;;  %v2005_v43 = vpop.permute.xlu1 %2004  ;;  %11864 = vmatprep.subr.bf16.mxu1 %v15833_v27 }
 0x3e3   : > { %v6688_v33 = vadd.f32 %v11287_v22, %v15582_v2  ;;  %v11290_v12 = vadd.f32 %v11289_v61, %v11288_v46  ;;  %7026 = vmatprep.mubr.bf16.mxu1 %v10178_v56  ;;  %v2003_v60 = vpop.permute.xlu0 %2002 }
 0x3e4   : > { %2135 = vrot.lane.b32.xlu1 %v17612_v58, %s12509_s14  ;;  %7027 = vmatmul.mubr.bf16.gmra.mrb[136].mxu1 %v10177_v17  ;;  %v2064_v2 = vsel %vm1082_vm10, %v15584_v13, %v2003_v60  ;;  %v2065_v7 = vsel %vm1082_vm10, %v2003_v60, %v2005_v43 }
 0x3e5   : > { %v6691_v55 = vadd.f32 %v11290_v12, %v15588_v4  ;;  %2133 = vrot.lane.b32.xlu0 %v17625_v36, %s12509_s14  ;;  %v17627_v4 = vld [vmem:[#allocation40_spill] sm:$0xff] }
 0x3e6   : > { %v2019_v38 = vpop.permute.xlu1 %2018 }
 0x3e7   : > { %v2017_v15 = vpop.permute.xlu0 %2016 }
 0x3e8   : > { %2131 = vrot.lane.b32.xlu1 %v17626_v51, %s12509_s14  ;;  %v2070_v25 = vsel %vm1082_vm10, %v15592_v40, %v2017_v15  ;;  %v2071_v58 = vsel %vm1082_vm10, %v2017_v15, %v2019_v38 }
 0x3e9   : > { %2117 = vrot.lane.b32.xlu0 %v17627_v4, %s12509_s14  ;;  %v10219_v11 = vcombine.low %v2065_v7, %v2071_v58  ;;  %v10218_v54 = vcombine.low %v2064_v2, %v2070_v25  ;;  %v12331_v58 = vld [vmem:[%s17341_s1 + $0xa00] sm:$0xff]  }
 0x3ea   : > { %v1009_v3 = vpop.permute.xlu1 %1008 }
 0x3eb   : > { %v11325_v62 = vpop.f32.mrb[96].mxu1  ;;  %6969 = vmatprep.mubr.bf16.mxu0 %v10219_v11  ;;  %v967_v59 = vpop.permute.xlu0 %966 }
 0x3ec   : > { %2147 = vrot.lane.b32.xlu1 %v17628_v49, %s12509_s14  ;;  %v11326_v13 = vpop.f32.mrb[97].mxu1  ;;  %6970 = vmatmul.mubr.bf16.gmra.mrb[140].mxu0 %v10218_v54  ;;  %v12332_v54 = vld [vmem:[%s17341_s1 + $0xa48] sm:$0xff]  }
 0x3ed   : > { %2145 = vrot.lane.b32.xlu0 %v17629_v45, %s12509_s14  ;;  %v11327_v40 = vadd.f32 %v11326_v13, %v11325_v62  ;;  %v11328_v23 = vpop.f32.mrb[98].mxu1  ;;  %v12333_v49 = vld [vmem:[%s17341_s1 + $0xa08] sm:$0xff]   ;;  %v12334_v45 = vld [vmem:[%s17341_s1 + $0xa50] sm:$0xff]  }
 0x3ee   : > { %v11329_v34 = vpop.f32.mrb[99].mxu1  ;;  %v15866_v9 = vpop.permute.xlu1 %2008 }
 0x3ef   : > { %v15868_v31 = vadd.f32 %v11327_v40, %v6688_v33  ;;  %v11330_v41 = vadd.f32 %v11329_v34, %v11328_v23  ;;  %v2007_v52 = vpop.permute.xlu0 %2006 }
 0x3f0   : > { %2161 = vrot.lane.b32.xlu1 %v15140_v35, %s12509_s14  ;;  %v2066_v14 = vsel %vm1082_vm10, %v2005_v43, %v2007_v52  ;;  %v2067_v53 = vsel %vm1082_vm10, %v2007_v52, %v15866_v9  ;;  %v1197_v43 = vsel %vm17474_vm13, %v967_v59, %v1009_v3 }
 0x3f1   : > { %2159 = vrot.lane.b32.xlu0 %v15157_v50, %s12509_s14  ;;  %v15874_v39 = vadd.f32 %v11330_v41, %v6691_v55 }
 0x3f2   : > { %v15876_v0 = vpop.permute.xlu1 %2022 }
 0x3f3   : > { %v2021_v10 = vpop.permute.xlu0 %2020 }
 0x3f4   : > { %2163 = vrot.lane.b32.xlu1 %v17617_v30, %s12509_s14  ;;  %v2072_v28 = vsel %vm1082_vm10, %v2019_v38, %v2021_v10  ;;  %v2073_v35 = vsel %vm1082_vm10, %v2021_v10, %v15876_v0 }
 0x3f5   : > { %2149 = vrot.lane.b32.xlu0 %v17611_v63, %s12509_s14  ;;  %v10221_v50 = vcombine.low %v2067_v53, %v2073_v35  ;;  %v10220_v44 = vcombine.low %v2066_v14, %v2072_v28  ;;  %v12335_v53 = vld [vmem:[%s17341_s1 + $0xa10] sm:$0xff]   ;;  %v12336_v35 = vld [vmem:[%s17341_s1 + $0xa58] sm:$0xff]  }
 0x3f6   : > { %v1941_v1 = vpop.permute.xlu1 %1940 }
 0x3f7   : > { %v11291_v22 = vpop.f32.mrb[100].mxu0  ;;  %7034 = vmatprep.mubr.bf16.mxu1 %v10221_v50  ;;  %v1927_v46 = vpop.permute.xlu0 %1926  ;;  %v2038_v55 = vsel %vm1082_vm10, %v15665_v5, %v1941_v1  ;;  %v12341_v50 = vld [vmem:[%s17341_s1 + $0xa88] sm:$0xff]  }
 0x3f8   : > { %2177 = vrot.lane.b32.xlu1 %v15316_v19, %s12509_s14  ;;  %v11292_v30 = vpop.f32.mrb[101].mxu0  ;;  %7035 = vmatmul.mubr.bf16.gmra.mrb[140].mxu1 %v10220_v44 }
 0x3f9   : > { %2175 = vrot.lane.b32.xlu0 %v15477_v42, %s12509_s14  ;;  %v11293_v18 = vadd.f32 %v11292_v30, %v11291_v22  ;;  %v11294_v61 = vpop.f32.mrb[102].mxu0  ;;  %v1168_v42 = vsel %vm1140_vm12, %v15637_v6, %v967_v59 }
 0x3fa   : > { %v11295_v56 = vpop.f32.mrb[103].mxu0  ;;  %v2084_v17 = vpop.permute.xlu1 %2083 }
 0x3fb   : > { %v6696_v63 = vadd.f32 %v11293_v18, %v15620_v26  ;;  %v11296_v33 = vadd.f32 %v11295_v56, %v11294_v61  ;;  %v2082_v12 = vpop.permute.xlu0 %2081  ;;  %v2032_v26 = vsel %vm1082_vm10, %v15652_v16, %v1927_v46  ;;  %v12337_v18 = vld [vmem:[%s17341_s1 + $0xa18] sm:$0xff]  }
 0x3fc   : > { %2191 = vrot.lane.b32.xlu1 %v1009_v3, %s12509_s14  ;;  %v2194_v15 = vsel %vm17475_vm9, %v2082_v12, %v2084_v17  ;;  %v2357_v51 = vsel %vm17475_vm9, %v2032_v26, %v2082_v12 }
 0x3fd   : > { %2189 = vrot.lane.b32.xlu0 %v1197_v43, %s12509_s14  ;;  %v6699_v19 = vadd.f32 %v11296_v33, %v15627_v8 }
 0x3fe   : > { %v2098_v60 = vpop.permute.xlu1 %2097 }
 0x3ff   : > { %v11331_v36 = vpop.f32.mrb[100].mxu1  ;;  %v2096_v38 = vpop.permute.xlu0 %2095 }
 0x400   : > { %2187 = vrot.lane.b32.xlu1 %v1168_v42, %s12509_s14  ;;  %v2200_v8 = vsel %vm17475_vm9, %v2096_v38, %v2098_v60  ;;  %v2360_v2 = vsel %vm17475_vm9, %v2038_v55, %v2096_v38  ;;  %v11332_v7 = vpop.f32.mrb[101].mxu1  ;;  %v12342_v42 = vld [vmem:[%s17341_s1 + $0xa68] sm:$0xff]  }
 0x401   : > { %2173 = vrot.lane.b32.xlu0 %v15493_v48, %s12509_s14  ;;  %v10093_v6 = vcombine.low %v2357_v51, %v2360_v2  ;;  %v11333_v5 = vadd.f32 %v11332_v7, %v11331_v36  ;;  %v11334_v25 = vpop.f32.mrb[102].mxu1  ;;  %v10094_v16 = vcombine.low %v2194_v15, %v2200_v8 }
 0x402   : > { %v11335_v4 = vpop.f32.mrb[103].mxu1  ;;  %v15913_v11 = vpop.permute.xlu1 %2087 }
 0x403   : > { %v15918_v3 = vadd.f32 %v11333_v5, %v6696_v63  ;;  %v11336_v62 = vadd.f32 %v11335_v4, %v11334_v25  ;;  %7075 = vmatprep.mubr.bf16.mxu0 %v10094_v16  ;;  %v2086_v48 = vpop.permute.xlu0 %2085  ;;  %v12344_v63 = vld [vmem:[%s17341_s1 + $0xa90] sm:$0xff]   ;;  %v12350_v4 = vld [vmem:[%s17341_s1 + $0xaa0] sm:$0xff]  }
 0x404   : > { %7076 = vmatmul.mubr.bf16.vlgmr.msra.gmra.mrb[144].mxu0 %v10093_v6  ;;  %v2195_v23 = vsel %vm17475_vm9, %v2084_v17, %v2086_v48  ;;  %v2196_v34 = vsel %vm17475_vm9, %v2086_v48, %v15913_v11  ;;  %v12339_v17 = vld [vmem:[%s17341_s1 + $0xa60] sm:$0xff]  }
 0x405   : > { %v15920_v59 = vadd.f32 %v11336_v62, %v6699_v19  ;;  %11590 = vmatpush3.bf16.msra.mxu0 %v12331_v58  ;;  %v12345_v58 = vld [vmem:[%s17341_s1 + $0xa70] sm:$0xff]  }
 0x406   : > { %v15925_v13 = vpop.permute.xlu1 %2101  ;;  %11591 = vmatprep.subr.bf16.mxu0 %v12332_v54 }
 0x407   : > { %v2100_v40 = vpop.permute.xlu0 %2099 }
 0x408   : > { %v2201_v41 = vsel %vm17475_vm9, %v2098_v60, %v2100_v40  ;;  %v2202_v52 = vsel %vm17475_vm9, %v2100_v40, %v15925_v13 }
 0x409   : > { %v10095_v10 = vcombine.low %v2195_v23, %v2201_v41  ;;  %v10096_v14 = vcombine.low %v2196_v34, %v2202_v52  ;;  %11592 = vmatpush3.bf16.msra.mxu0 %v12333_v49  ;;  %v12348_v23 = vld [vmem:[%s17341_s1 + $0xa78] sm:$0xff]   ;;  %v12351_v34 = vld [vmem:[%s17341_s1 + $0xaa8] sm:$0xff]  }
 0x40a   : > { %v1969_v28 = vpop.permute.xlu1 %1968  ;;  %11593 = vmatprep.subr.bf16.mxu0 %v12334_v45  ;;  %v12346_v45 = vld [vmem:[%s17341_s1 + $0xa30] sm:$0xff]  }
 0x40b   : > { %v11297_v44 = vpop.f32.mrb[104].mxu0  ;;  %7140 = vmatprep.mubr.bf16.mxu1 %v10096_v14  ;;  %v1955_v1 = vpop.permute.xlu0 %1954 }
 0x40c   : > { %v11298_v22 = vpop.f32.mrb[105].mxu0  ;;  %7141 = vmatmul.mubr.bf16.vlgmr.msra.gmra.mrb[144].mxu1 %v10095_v10  ;;  %v2044_v55 = vsel %vm1082_vm10, %v15735_v24, %v1955_v1  ;;  %v12343_v24 = vld [vmem:[%s17341_s1 + $0xa28] sm:$0xff]   ;;  %v12352_v1 = vld [vmem:[%s17341_s1 + $0xab0] sm:$0xff]  }
 0x40d   : > { %v11299_v46 = vadd.f32 %v11298_v22, %v11297_v44  ;;  %v11300_v30 = vpop.f32.mrb[106].mxu0  ;;  %11594 = vmatpush3.bf16.msra.mxu0 %v12335_v53  ;;  %11865 = vmatpush3.bf16.msra.mxu1 %v15833_v27  ;;  %v12340_v27 = vld [vmem:[%s17341_s1 + $0xa20] sm:$0xff]  }
 0x40e   : > { %v11301_v61 = vpop.f32.mrb[107].mxu0  ;;  %v2112_v56 = vpop.permute.xlu1 %2111  ;;  %11595 = vmatprep.subr.bf16.mxu0 %v12336_v35  ;;  %11866 = vmatprep.subr.bf16.mxu1 %v12341_v50 }
 0x40f   : > { %v6704_v33 = vadd.f32 %v11299_v46, %v15686_v57  ;;  %v11302_v12 = vadd.f32 %v11301_v61, %v11300_v30  ;;  %v2110_v43 = vpop.permute.xlu0 %2109  ;;  %v12347_v57 = vld [vmem:[%s17341_s1 + $0xa98] sm:$0xff]  }
 0x410   : > { %v2206_v38 = vsel %vm17475_vm9, %v2110_v43, %v2112_v56  ;;  %v2363_v15 = vsel %vm17475_vm9, %v2044_v55, %v2110_v43 }
 0x411   : > { %v6707_v19 = vadd.f32 %v11302_v12, %v15698_v20  ;;  %11596 = vmatpush3.bf16.msra.mxu0 %v12337_v18  ;;  %11867 = vmatpush3.bf16.msra.mxu1 %v12341_v50  ;;  %v2050_v20 = vsel %vm1082_vm10, %v15754_v29, %v1969_v28  ;;  %v12349_v50 = vld [vmem:[%s17341_s1 + $0xa38] sm:$0xff]  }
 0x412   : > { %v2126_v60 = vpop.permute.xlu1 %2125  ;;  %11597 = vmatprep.subr.bf16.mxu0 %v12339_v17  ;;  %11868 = vmatprep.subr.bf16.mxu1 %v12344_v63 }
 0x413   : > { %v11337_v26 = vpop.f32.mrb[104].mxu1  ;;  %v2124_v36 = vpop.permute.xlu0 %2123 }
 0x414   : > { %v2212_v51 = vsel %vm17475_vm9, %v2124_v36, %v2126_v60  ;;  %v2366_v8 = vsel %vm17475_vm9, %v2050_v20, %v2124_v36  ;;  %v11338_v2 = vpop.f32.mrb[105].mxu1 }
 0x415   : > { %v11339_v7 = vadd.f32 %v11338_v2, %v11337_v26  ;;  %v11340_v6 = vpop.f32.mrb[106].mxu1  ;;  %v10137_v5 = vcombine.low %v2206_v38, %v2212_v51  ;;  %v10136_v25 = vcombine.low %v2363_v15, %v2366_v8  ;;  %11598 = vmatpush3.bf16.msra.mxu0 %v12340_v27  ;;  %11869 = vmatpush3.bf16.msra.mxu1 %v12344_v63 }
 0x416   : > { %v11341_v29 = vpop.f32.mrb[107].mxu1  ;;  %v15977_v16 = vpop.permute.xlu1 %2115  ;;  %11599 = vmatprep.subr.bf16.mxu0 %v12342_v42  ;;  %11870 = vmatprep.subr.bf16.mxu1 %v12347_v57 }
 0x417   : > { %v15985_v54 = vadd.f32 %v11339_v7, %v6704_v33  ;;  %v11342_v62 = vadd.f32 %v11341_v29, %v11340_v6  ;;  %7083 = vmatprep.mubr.bf16.mxu0 %v10137_v5  ;;  %v2114_v48 = vpop.permute.xlu0 %2113 }
 0x418   : > { %7084 = vmatmul.mubr.bf16.gmra.mrb[148].mxu0 %v10136_v25  ;;  %v2207_v52 = vsel %vm17475_vm9, %v2112_v56, %v2114_v48  ;;  %v2208_v10 = vsel %vm17475_vm9, %v2114_v48, %v15977_v16 }
 0x419   : > { %v15987_v49 = vadd.f32 %v11342_v62, %v6707_v19  ;;  %11600 = vmatpush3.bf16.msra.mxu0 %v12343_v24  ;;  %11871 = vmatpush3.bf16.msra.mxu1 %v12347_v57 }
 0x41a   : > { %v15992_v40 = vpop.permute.xlu1 %2129  ;;  %11601 = vmatprep.subr.bf16.mxu0 %v12345_v58  ;;  %11872 = vmatprep.subr.bf16.mxu1 %v12350_v4 }
 0x41b   : > { %v2128_v41 = vpop.permute.xlu0 %2127 }
 0x41c   : > { %v2213_v14 = vsel %vm17475_vm9, %v2126_v60, %v2128_v41  ;;  %v2214_v53 = vsel %vm17475_vm9, %v2128_v41, %v15992_v40 }
 0x41d   : > { %v10139_v28 = vcombine.low %v2208_v10, %v2214_v53  ;;  %v10138_v35 = vcombine.low %v2207_v52, %v2213_v14  ;;  %11602 = vmatpush3.bf16.msra.mxu0 %v12346_v45  ;;  %11873 = vmatpush3.bf16.msra.mxu1 %v12350_v4 }
 0x41e   : > { %v1997_v44 = vpop.permute.xlu1 %1996  ;;  %11603 = vmatprep.subr.bf16.mxu0 %v12348_v23  ;;  %11874 = vmatprep.subr.bf16.mxu1 %v12351_v34 }
 0x41f   : > { %v11303_v22 = vpop.f32.mrb[108].mxu0  ;;  %7148 = vmatprep.mubr.bf16.mxu1 %v10139_v28  ;;  %v1983_v46 = vpop.permute.xlu0 %1982  ;;  %v2062_v27 = vsel %vm1082_vm10, %v15828_v47, %v1997_v44 }
 0x420   : > { %v11304_v30 = vpop.f32.mrb[109].mxu0  ;;  %7149 = vmatmul.mubr.bf16.gmra.mrb[148].mxu1 %v10138_v35  ;;  %v2056_v60 = vsel %vm1082_vm10, %v15816_v32, %v1983_v46 }
 0x421   : > { %v11305_v18 = vadd.f32 %v11304_v30, %v11303_v22  ;;  %v11306_v61 = vpop.f32.mrb[110].mxu0  ;;  %11604 = vmatpush3.bf16.msra.mxu0 %v12349_v50  ;;  %11875 = vmatpush3.bf16.msra.mxu1 %v12351_v34 }
 0x422   : > { %v11307_v56 = vpop.f32.mrb[111].mxu0  ;;  %v2140_v17 = vpop.permute.xlu1 %2139  ;;  %11876 = vmatprep.subr.bf16.mxu1 %v12352_v1 }
 0x423   : > { %v6712_v63 = vadd.f32 %v11305_v18, %v15783_v37  ;;  %v11308_v33 = vadd.f32 %v11307_v56, %v11306_v61  ;;  %v2138_v12 = vpop.permute.xlu0 %2137 }
 0x424   : > { %v2218_v20 = vsel %vm17475_vm9, %v2138_v12, %v2140_v17  ;;  %v2369_v55 = vsel %vm17475_vm9, %v2056_v60, %v2138_v12 }
 0x425   : > { %v6715_v43 = vadd.f32 %v11308_v33, %v15793_v21  ;;  %11877 = vmatpush3.bf16.msra.mxu1 %v12352_v1 }
 0x426   : > { %v2154_v19 = vpop.permute.xlu1 %2153 }
 0x427   : > { %v11343_v42 = vpop.f32.mrb[108].mxu1  ;;  %v2152_v57 = vpop.permute.xlu0 %2151 }
 0x428   : > { %v2224_v37 = vsel %vm17475_vm9, %v2152_v57, %v2154_v19  ;;  %v2372_v26 = vsel %vm17475_vm9, %v2062_v27, %v2152_v57  ;;  %v11344_v36 = vpop.f32.mrb[109].mxu1 }
 0x429   : > { %v11345_v21 = vadd.f32 %v11344_v36, %v11343_v42  ;;  %v11346_v38 = vpop.f32.mrb[110].mxu1  ;;  %v10180_v15 = vcombine.low %v2218_v20, %v2224_v37  ;;  %v10179_v51 = vcombine.low %v2369_v55, %v2372_v26 }
 0x42a   : > { %v11347_v8 = vpop.f32.mrb[111].mxu1  ;;  %v16022_v47 = vpop.permute.xlu1 %2143 }
 0x42b   : > { %v16024_v2 = vadd.f32 %v11345_v21, %v6712_v63  ;;  %v11348_v32 = vadd.f32 %v11347_v8, %v11346_v38  ;;  %7091 = vmatprep.mubr.bf16.mxu0 %v10180_v15  ;;  %v2142_v7 = vpop.permute.xlu0 %2141 }
 0x42c   : > { %7092 = vmatmul.mubr.bf16.gmra.mrb[152].mxu0 %v10179_v51  ;;  %v2219_v24 = vsel %vm17475_vm9, %v2140_v17, %v2142_v7  ;;  %v2220_v29 = vsel %vm17475_vm9, %v2142_v7, %v16022_v47 }
 0x42d   : > { %v16026_v6 = vadd.f32 %v11348_v32, %v6715_v43 }
 0x42e   : > { %v16028_v5 = vpop.permute.xlu1 %2157 }
 0x42f   : > { %v2156_v25 = vpop.permute.xlu0 %2155 }
 0x430   : > { %v2225_v58 = vsel %vm17475_vm9, %v2154_v19, %v2156_v25  ;;  %v2226_v4 = vsel %vm17475_vm9, %v2156_v25, %v16028_v5 }
 0x431   : > { %v10182_v62 = vcombine.low %v2220_v29, %v2226_v4  ;;  %v10181_v48 = vcombine.low %v2219_v24, %v2225_v58 }
 0x432   : > { %v2025_v45 = vpop.permute.xlu1 %2024 }
 0x433   : > { %v11365_v23 = vpop.f32.mrb[112].mxu0  ;;  %7156 = vmatprep.mubr.bf16.mxu1 %v10182_v62  ;;  %v2011_v34 = vpop.permute.xlu0 %2010  ;;  %v2074_v22 = vsel %vm1082_vm10, %v15876_v0, %v2025_v45 }
 0x434   : > { %v11366_v41 = vpop.f32.mrb[113].mxu0  ;;  %7157 = vmatmul.mubr.bf16.gmra.mrb[152].mxu1 %v10181_v48  ;;  %v2068_v46 = vsel %vm1082_vm10, %v15866_v9, %v2011_v34  ;;  %vm16273_vm10 = vmand %vm7510_vm5, %vm7511_vm6  ;;  %vm7606_vm6 = vcmask 195584  }
 0x435   : > { %v11367_v52 = vadd.f32 %v11366_v41, %v11365_v23  ;;  %v11368_v10 = vpop.f32.mrb[114].mxu0  ;;  %vm7652_vm5 = vmand %vm7650_vm15, %vm7651_vm0 }
 0x436   : > { %v11369_v14 = vpop.f32.mrb[115].mxu0  ;;  %v2168_v53 = vpop.permute.xlu1 %2167 }
 0x437   : > { %v6818_v28 = vadd.f32 %v11367_v52, %v15868_v31  ;;  %v11370_v35 = vadd.f32 %v11369_v14, %v11368_v10  ;;  %v2166_v50 = vpop.permute.xlu0 %2165 }
 0x438   : > { %v2230_v18 = vsel %vm17475_vm9, %v2166_v50, %v2168_v53  ;;  %v2375_v61 = vsel %vm17475_vm9, %v2068_v46, %v2166_v50 }
 0x439   : > { %v6821_v44 = vadd.f32 %v11370_v35, %v15874_v39 }
 0x43a   : > { %v2182_v1 = vpop.permute.xlu1 %2181 }
 0x43b   : > { %v2180_v30 = vpop.permute.xlu0 %2179 }
 0x43c   : > { %v2236_v56 = vsel %vm17475_vm9, %v2180_v30, %v2182_v1  ;;  %v2378_v31 = vsel %vm17475_vm9, %v2074_v22, %v2180_v30 }
 0x43d   : > { %v10223_v17 = vcombine.low %v2230_v18, %v2236_v56  ;;  %v10222_v63 = vcombine.low %v2375_v61, %v2378_v31 }
 0x43e   : > { %v16046_v33 = vpop.permute.xlu1 %2171 }
 0x43f   : > { %7099 = vmatprep.mubr.bf16.mxu0 %v10223_v17  ;;  %v2170_v39 = vpop.permute.xlu0 %2169 }
 0x440   : > { %7100 = vmatmul.mubr.bf16.gmra.mrb[156].mxu0 %v10222_v63  ;;  %v2231_v43 = vsel %vm17475_vm9, %v2168_v53, %v2170_v39  ;;  %v2232_v19 = vsel %vm17475_vm9, %v2170_v39, %v16046_v33 }
 0x442   : > { %v16048_v0 = vpop.permute.xlu1 %2185 }
 0x443   : > { %v11405_v12 = vpop.f32.mrb[112].mxu1  ;;  %v2184_v9 = vpop.permute.xlu0 %2183 }
 0x444   : > { %v2237_v27 = vsel %vm17475_vm9, %v2182_v1, %v2184_v9  ;;  %v2238_v60 = vsel %vm17475_vm9, %v2184_v9, %v16048_v0  ;;  %v11406_v42 = vpop.f32.mrb[113].mxu1 }
 0x445   : > { %v11407_v57 = vadd.f32 %v11406_v42, %v11405_v12  ;;  %v11408_v20 = vpop.f32.mrb[114].mxu1  ;;  %v10225_v55 = vcombine.low %v2232_v19, %v2238_v60  ;;  %v10224_v37 = vcombine.low %v2231_v43, %v2237_v27 }
 0x446   : > { %v11409_v26 = vpop.f32.mrb[115].mxu1  ;;  %v2092_v36 = vpop.permute.xlu1 %2091 }
 0x447   : > { %v16056_v21 = vadd.f32 %v11407_v57, %v6818_v28  ;;  %v11410_v38 = vadd.f32 %v11409_v26, %v11408_v20  ;;  %7164 = vmatprep.mubr.bf16.mxu1 %v10225_v55  ;;  %v2090_v15 = vpop.permute.xlu0 %2089 }
 0x448   : > { %7165 = vmatmul.mubr.bf16.gmra.mrb[156].mxu1 %v10224_v37  ;;  %v2197_v25 = vsel %vm17475_vm9, %v15913_v11, %v2090_v15  ;;  %v2198_v24 = vsel %vm17475_vm9, %v2090_v15, %v2092_v36 }
 0x449   : > { %v16058_v51 = vadd.f32 %v11410_v38, %v6821_v44 }
 0x44a   : > { %v2106_v8 = vpop.permute.xlu1 %2105 }
 0x44b   : > { %v11371_v32 = vpop.f32.mrb[116].mxu0  ;;  %v2104_v7 = vpop.permute.xlu0 %2103 }
 0x44c   : > { %v2203_v29 = vsel %vm17475_vm9, %v15925_v13, %v2104_v7  ;;  %v2204_v58 = vsel %vm17475_vm9, %v2104_v7, %v2106_v8  ;;  %v11372_v4 = vpop.f32.mrb[117].mxu0 }
 0x44d   : > { %v10097_v62 = vcombine.low %v2197_v25, %v2203_v29  ;;  %v11373_v48 = vadd.f32 %v11372_v4, %v11371_v32  ;;  %v11374_v45 = vpop.f32.mrb[118].mxu0  ;;  %v10098_v23 = vcombine.low %v2198_v24, %v2204_v58 }
 0x44e   : > { %v11375_v34 = vpop.f32.mrb[119].mxu0  ;;  %v2108_v41 = vpop.permute.xlu1 %2107 }
 0x44f   : > { %v6826_v52 = vadd.f32 %v11373_v48, %v15918_v3  ;;  %v11376_v10 = vadd.f32 %v11375_v34, %v11374_v45  ;;  %v2205_v14 = vsel %vm17475_vm9, %v2106_v8, %v2108_v41  ;;  %7205 = vmatprep.mubr.bf16.mxu0 %v10098_v23  ;;  %v2094_v11 = vpop.permute.xlu0 %2093 }
 0x450   : > { %v2199_v53 = vsel %vm17475_vm9, %v2092_v36, %v2094_v11  ;;  %7206 = vmatmul.mubr.bf16.vlgmr.msra.gmra.mrb[160].mxu0 %v10097_v62 }
 0x451   : > { %v6829_v13 = vadd.f32 %v11376_v10, %v15920_v59  ;;  %v10099_v28 = vcombine.low %v2199_v53, %v2205_v14 }
 0x452   : > { %v2122_v35 = vpop.permute.xlu1 %2121 }
 0x453   : > { %11878 = vmatprep.mubr.msk.bf16.mxu1 %vm1010_vm8, %v10099_v28  ;;  %v2120_v50 = vpop.permute.xlu0 %2119 }
 0x454   : > { %v2211_v3 = vsel %vm17475_vm9, %v2120_v50, %v2122_v35 }
 0x456   : > { %v2136_v44 = vpop.permute.xlu1 %2135 }
 0x457   : > { %v11411_v1 = vpop.f32.mrb[116].mxu1  ;;  %v2134_v22 = vpop.permute.xlu0 %2133 }
 0x458   : > { %v2217_v46 = vsel %vm17475_vm9, %v2134_v22, %v2136_v44  ;;  %v11412_v30 = vpop.f32.mrb[117].mxu1 }
 0x459   : > { %v10142_v18 = vcombine.low %v2211_v3, %v2217_v46  ;;  %v11413_v61 = vadd.f32 %v11412_v30, %v11411_v1  ;;  %v11414_v56 = vpop.f32.mrb[118].mxu1 }
 0x45a   : > { %v11415_v31 = vpop.f32.mrb[119].mxu1  ;;  %v2132_v17 = vpop.permute.xlu1 %2131 }
 0x45b   : > { %v16073_v63 = vadd.f32 %v11413_v61, %v6826_v52  ;;  %v11416_v59 = vadd.f32 %v11415_v31, %v11414_v56  ;;  %v2215_v39 = vsel %vm17475_vm9, %v15992_v40, %v2132_v17  ;;  %v2216_v12 = vsel %vm17475_vm9, %v2132_v17, %v2134_v22  ;;  %11879 = vmatmul.mubr.msk.bf16.vlgmr.msra.gmra.mrb[160].mxu1 %vm1010_vm8, %v10142_v18  ;;  %v2118_v9 = vpop.permute.xlu0 %2117 }
 0x45c   : > { %v2209_v43 = vsel %vm17475_vm9, %v15977_v16, %v2118_v9  ;;  %v2210_v19 = vsel %vm17475_vm9, %v2118_v9, %v2120_v50 }
 0x45d   : > { %v16082_v27 = vadd.f32 %v11416_v59, %v6829_v13  ;;  %v10141_v60 = vcombine.low %v2210_v19, %v2216_v12  ;;  %v10140_v42 = vcombine.low %v2209_v43, %v2215_v39 }
 0x45e   : > { %v2148_v57 = vpop.permute.xlu1 %2147 }
 0x45f   : > { %v11377_v20 = vpop.f32.mrb[120].mxu0  ;;  %7213 = vmatprep.mubr.bf16.mxu0 %v10141_v60  ;;  %v2146_v55 = vpop.permute.xlu0 %2145 }
 0x460   : > { %v11378_v37 = vpop.f32.mrb[121].mxu0  ;;  %7214 = vmatmul.mubr.bf16.gmra.mrb[164].mxu0 %v10140_v42  ;;  %v2221_v32 = vsel %vm17475_vm9, %v16022_v47, %v2146_v55  ;;  %v2222_v7 = vsel %vm17475_vm9, %v2146_v55, %v2148_v57 }
 0x461   : > { %v11379_v40 = vadd.f32 %v11378_v37, %v11377_v20  ;;  %v11380_v26 = vpop.f32.mrb[122].mxu0 }
 0x462   : > { %v11381_v36 = vpop.f32.mrb[123].mxu0  ;;  %v2162_v38 = vpop.permute.xlu1 %2161 }
 0x463   : > { %v6834_v15 = vadd.f32 %v11379_v40, %v15985_v54  ;;  %v11382_v8 = vadd.f32 %v11381_v36, %v11380_v26  ;;  %v2160_v16 = vpop.permute.xlu0 %2159 }
 0x464   : > { %v2227_v25 = vsel %vm17475_vm9, %v16028_v5, %v2160_v16  ;;  %v2228_v24 = vsel %vm17475_vm9, %v2160_v16, %v2162_v38 }
 0x465   : > { %v6837_v29 = vadd.f32 %v11382_v8, %v15987_v49  ;;  %v10184_v58 = vcombine.low %v2222_v7, %v2228_v24  ;;  %v10183_v4 = vcombine.low %v2221_v32, %v2227_v25 }
 0x466   : > { %v2164_v62 = vpop.permute.xlu1 %2163 }
 0x467   : > { %v2229_v48 = vsel %vm17475_vm9, %v2162_v38, %v2164_v62  ;;  %7221 = vmatprep.mubr.bf16.mxu0 %v10184_v58  ;;  %v2150_v54 = vpop.permute.xlu0 %2149 }
 0x468   : > { %v2223_v45 = vsel %vm17475_vm9, %v2148_v57, %v2150_v54  ;;  %7222 = vmatmul.mubr.bf16.gmra.mrb[168].mxu0 %v10183_v4 }
 0x469   : > { %v10185_v47 = vcombine.low %v2223_v45, %v2229_v48 }
 0x46a   : > { %v2178_v23 = vpop.permute.xlu1 %2177 }
 0x46b   : > { %v11417_v34 = vpop.f32.mrb[120].mxu1  ;;  %11882 = vmatprep.mubr.msk.bf16.mxu1 %vm1010_vm8, %v10185_v47  ;;  %v2176_v5 = vpop.permute.xlu0 %2175 }
 0x46c   : > { %v11418_v41 = vpop.f32.mrb[121].mxu1  ;;  %v2235_v28 = vsel %vm17475_vm9, %v2176_v5, %v2178_v23 }
 0x46d   : > { %v11419_v52 = vadd.f32 %v11418_v41, %v11417_v34  ;;  %v11420_v10 = vpop.f32.mrb[122].mxu1 }
 0x46e   : > { %v11421_v49 = vpop.f32.mrb[123].mxu1  ;;  %v2192_v14 = vpop.permute.xlu1 %2191 }
 0x46f   : > { %v16095_v11 = vadd.f32 %v11419_v52, %v6834_v15  ;;  %v11422_v53 = vadd.f32 %v11421_v49, %v11420_v10  ;;  %v2190_v13 = vpop.permute.xlu0 %2189 }
 0x470   : > { %v2241_v35 = vsel %vm17475_vm9, %v2190_v13, %v2192_v14 }
 0x471   : > { %v16099_v50 = vadd.f32 %v11422_v53, %v6837_v29  ;;  %v10228_v44 = vcombine.low %v2235_v28, %v2241_v35 }
 0x472   : > { %v2188_v1 = vpop.permute.xlu1 %2187 }
 0x473   : > { %v11383_v22 = vpop.f32.mrb[124].mxu0  ;;  %v2239_v3 = vsel %vm17475_vm9, %v16048_v0, %v2188_v1  ;;  %v2240_v46 = vsel %vm17475_vm9, %v2188_v1, %v2190_v13  ;;  %11883 = vmatmul.mubr.msk.bf16.gmra.mrb[164].mxu1 %vm1010_vm8, %v10228_v44  ;;  %v2174_v30 = vpop.permute.xlu0 %2173  ;;  %vm7505_vm8 = vsmask.f32 7938 }
 0x474   : > { %v2233_v18 = vsel %vm17475_vm9, %v16046_v33, %v2174_v30  ;;  %v2234_v61 = vsel %vm17475_vm9, %v2174_v30, %v2176_v5  ;;  %v11384_v56 = vpop.f32.mrb[125].mxu0  ;;  %vm16278_vm12 = vmand %vm7504_vm7, %vm7505_vm8 }
 0x475   : > { %v11385_v31 = vadd.f32 %v11384_v56, %v11383_v22  ;;  %v11386_v17 = vpop.f32.mrb[126].mxu0  ;;  %v10227_v59 = vcombine.low %v2234_v61, %v2240_v46  ;;  %v10226_v39 = vcombine.low %v2233_v18, %v2239_v3  ;;  %vm16292_vm9 = vmor %vm7652_vm5, %vm7649_vm2 }
 0x476   : > { %v11387_v12 = vpop.f32.mrb[127].mxu0 }
 0x477   : > { %v6842_v9 = vadd.f32 %v11385_v31, %v16024_v2  ;;  %v11388_v43 = vadd.f32 %v11387_v12, %v11386_v17  ;;  %7229 = vmatprep.mubr.bf16.mxu0 %v10227_v59 }
 0x478   : > { %7230 = vmatmul.mubr.bf16.gmra.mrb[172].mxu0 %v10226_v39 }
 0x479   : > { %v6845_v0 = vadd.f32 %v11388_v43, %v16026_v6 }
 0x47f   : > { %v11423_v19 = vpop.f32.mrb[124].mxu1 }
 0x480   : > { %v11424_v60 = vpop.f32.mrb[125].mxu1 }
 0x481   : > { %v11425_v42 = vadd.f32 %v11424_v60, %v11423_v19  ;;  %v11426_v57 = vpop.f32.mrb[126].mxu1 }
 0x482   : > { %v11427_v33 = vpop.f32.mrb[127].mxu1 }
 0x483   : > { %v6907_v20 = vadd.f32 %v11425_v42, %v6842_v9  ;;  %v11428_v55 = vadd.f32 %v11427_v33, %v11426_v57 }
 0x485   : > { %v6910_v37 = vadd.f32 %v11428_v55, %v6845_v0 }
 0x48b   : > { %v11445_v40 = vpop.f32.mrb[128].mxu0 }
 0x48c   : > { %v11446_v26 = vpop.f32.mrb[129].mxu0 }
 0x48d   : > { %v11447_v36 = vadd.f32 %v11446_v26, %v11445_v40  ;;  %v11448_v38 = vpop.f32.mrb[130].mxu0 }
 0x48e   : > { %v11449_v15 = vpop.f32.mrb[131].mxu0 }
 0x48f   : > { %v6948_v2 = vadd.f32 %v11447_v36, %v16056_v21  ;;  %v11450_v8 = vadd.f32 %v11449_v15, %v11448_v38 }
 0x491   : > { %v6951_v16 = vadd.f32 %v11450_v8, %v16058_v51 }
 0x497   : > { %v11485_v32 = vpop.f32.mrb[128].mxu1 }
 0x498   : > { %v11486_v6 = vpop.f32.mrb[129].mxu1 }
 0x499   : > { %v11487_v7 = vadd.f32 %v11486_v6, %v11485_v32  ;;  %v11488_v25 = vpop.f32.mrb[130].mxu1 }
 0x49a   : > { %v11489_v24 = vpop.f32.mrb[131].mxu1 }
 0x49b   : > { %v7013_v29 = vadd.f32 %v11487_v7, %v6948_v2  ;;  %v11490_v58 = vadd.f32 %v11489_v24, %v11488_v25 }
 0x49d   : > { %v7016_v4 = vadd.f32 %v11490_v58, %v6951_v16 }
 0x49f   : > { %v11451_v62 = vpop.f32.mrb[132].mxu0 }
 0x4a0   : > { %v11452_v48 = vpop.f32.mrb[133].mxu0 }
 0x4a1   : > { %v11453_v54 = vadd.f32 %v11452_v48, %v11451_v62  ;;  %v11454_v45 = vpop.f32.mrb[134].mxu0 }
 0x4a2   : > { %v11455_v47 = vpop.f32.mrb[135].mxu0 }
 0x4a3   : > { %v6956_v23 = vadd.f32 %v11453_v54, %v16073_v63  ;;  %v11456_v34 = vadd.f32 %v11455_v47, %v11454_v45 }
 0x4a5   : > { %v6959_v21 = vadd.f32 %v11456_v34, %v16082_v27 }
 0x4a7   : > { %v11491_v5 = vpop.f32.mrb[132].mxu1 }
 0x4a8   : > { %v11492_v51 = vpop.f32.mrb[133].mxu1 }
 0x4a9   : > { %v11493_v41 = vadd.f32 %v11492_v51, %v11491_v5  ;;  %v11494_v52 = vpop.f32.mrb[134].mxu1 }
 0x4aa   : > { %v11495_v10 = vpop.f32.mrb[135].mxu1 }
 0x4ab   : > { %v7021_v49 = vadd.f32 %v11493_v41, %v6956_v23  ;;  %v11496_v14 = vadd.f32 %v11495_v10, %v11494_v52 }
 0x4ad   : > { %v7024_v53 = vadd.f32 %v11496_v14, %v6959_v21 }
 0x4af   : > { %v11457_v13 = vpop.f32.mrb[136].mxu0 }
 0x4b0   : > { %v11458_v28 = vpop.f32.mrb[137].mxu0 }
 0x4b1   : > { %v11459_v35 = vadd.f32 %v11458_v28, %v11457_v13  ;;  %v11460_v44 = vpop.f32.mrb[138].mxu0 }
 0x4b2   : > { %v11461_v1 = vpop.f32.mrb[139].mxu0 }
 0x4b3   : > { %v6964_v22 = vadd.f32 %v11459_v35, %v16095_v11  ;;  %v11462_v3 = vadd.f32 %v11461_v1, %v11460_v44 }
 0x4b5   : > { %v6967_v63 = vadd.f32 %v11462_v3, %v16099_v50 }
 0x4b7   : > { %v11497_v46 = vpop.f32.mrb[136].mxu1 }
 0x4b8   : > { %v11498_v27 = vpop.f32.mrb[137].mxu1 }
 0x4b9   : > { %v11499_v30 = vadd.f32 %v11498_v27, %v11497_v46  ;;  %v11500_v18 = vpop.f32.mrb[138].mxu1  ;;  %v17630_v27 = vmov 0  }
 0x4ba   : > { %v11501_v61 = vpop.f32.mrb[139].mxu1  ;;  %7354 = vst.msk [vmem:[#allocation3 + $0x38] sm:$0x11] %vm7347_vm1, %v17630_v27  ;;  %7348 = vst.msk [vmem:[#allocation3 + $0x8] sm:$0x11] %vm7347_vm1, %v17630_v27 }
 0x4bb   : > { %v7029_v56 = vadd.f32 %v11499_v30, %v6964_v22  ;;  %v11502_v31 = vadd.f32 %v11501_v61, %v11500_v18  ;;  %7350 = vst.msk [vmem:[#allocation3 + $0x18] sm:$0x11] %vm7347_vm1, %v17630_v27  ;;  %7352 = vst.msk [vmem:[#allocation3 + $0x28] sm:$0x11] %vm7347_vm1, %v17630_v27 }
 0x4bc   : > { %7356 = vst.msk [vmem:[#allocation3 + $0x48] sm:$0x11] %vm7347_vm1, %v17630_v27  ;;  %7358 = vst.msk [vmem:[#allocation3 + $0x58] sm:$0x11] %vm7347_vm1, %v17630_v27 }
 0x4bd   : > { %v7032_v17 = vadd.f32 %v11502_v31, %v6967_v63  ;;  %7360 = vst.msk [vmem:[#allocation3 + $0x68] sm:$0x11] %vm7347_vm1, %v17630_v27  ;;  %7362 = vst.msk [vmem:[#allocation3 + $0x78] sm:$0x11] %vm7347_vm1, %v17630_v27 }
 0x4be   : > { %7364 = vst.msk [vmem:[#allocation3 + $0x88] sm:$0x11] %vm7347_vm1, %v17630_v27  ;;  %7366 = vst.msk [vmem:[#allocation3 + $0x98] sm:$0x11] %vm7347_vm1, %v17630_v27  ;;  %vm7639_vm1 = vcmask 1044160  }
 0x4bf   : > { %v11463_v59 = vpop.f32.mrb[140].mxu0  ;;  %7353 = vst.msk [vmem:[#allocation3 + $0x30] sm:$0xff] %vm7343_vm4, %v17630_v27  ;;  %7344 = vst.msk [vmem:[#allocation3] sm:$0xff] %vm7343_vm4, %v17630_v27 }
 0x4c0   : > { %v11464_v39 = vpop.f32.mrb[141].mxu0  ;;  %7349 = vst.msk [vmem:[#allocation3 + $0x10] sm:$0xff] %vm7343_vm4, %v17630_v27  ;;  %7351 = vst.msk [vmem:[#allocation3 + $0x20] sm:$0xff] %vm7343_vm4, %v17630_v27 }
 0x4c1   : > { %v11465_v12 = vadd.f32 %v11464_v39, %v11463_v59  ;;  %v11466_v9 = vpop.f32.mrb[142].mxu0  ;;  %7355 = vst.msk [vmem:[#allocation3 + $0x40] sm:$0xff] %vm7343_vm4, %v17630_v27  ;;  %7357 = vst.msk [vmem:[#allocation3 + $0x50] sm:$0xff] %vm7343_vm4, %v17630_v27 }
 0x4c2   : > { %v11467_v43 = vpop.f32.mrb[143].mxu0  ;;  %7359 = vst.msk [vmem:[#allocation3 + $0x60] sm:$0xff] %vm7343_vm4, %v17630_v27  ;;  %7361 = vst.msk [vmem:[#allocation3 + $0x70] sm:$0xff] %vm7343_vm4, %v17630_v27 }
 0x4c3   : > { %v6972_v0 = vadd.f32 %v11465_v12, %v6907_v20  ;;  %v11468_v19 = vadd.f32 %v11467_v43, %v11466_v9  ;;  %7363 = vst.msk [vmem:[#allocation3 + $0x80] sm:$0xff] %vm7343_vm4, %v17630_v27  ;;  %7365 = vst.msk [vmem:[#allocation3 + $0x90] sm:$0xff] %vm7343_vm4, %v17630_v27  ;;  %vm7642_vm4 = vsmask.f32 7954 }
 0x4c4   : > { %vm7640_vm7 = vmand %vm7639_vm1, %vm7505_vm8  ;;  %vm17641_vm8 = vcmask 261120  }
 0x4c5   : > { %v6975_v60 = vadd.f32 %v11468_v19, %v6910_v37  ;;  %vm7643_vm13 = vmand %vm7641_vm3, %vm7642_vm4 }
 0x4c6   : > { %vm16296_vm14 = vmor %vm7643_vm13, %vm7640_vm7 }
 0x4c7   : > { %vm17645_vm0 = vmmov %vm17641_vm8 }
 0x4c8   : > { %vm17646_vm1 = vmmov %vm17645_vm0 }
 0x4c9   : > { %vm17647_vm2 = vmmov %vm17645_vm0 }
 0x4ca   : > { %vm17649_vm4 = vmmov %vm17645_vm0 }
 0x4cb   : > { %v11503_v11 = vpop.f32.mrb[140].mxu1  ;;  %vm17650_vm5 = vmmov %vm17645_vm0 }
 0x4cc   : > { %v11504_v42 = vpop.f32.mrb[141].mxu1  ;;  %vm17651_vm7 = vmmov %vm17645_vm0 }
 0x4cd   : > { %v11505_v57 = vadd.f32 %v11504_v42, %v11503_v11  ;;  %v11506_v50 = vpop.f32.mrb[142].mxu1 }
 0x4ce   : > { %v11507_v33 = vpop.f32.mrb[143].mxu1 }
 0x4cf   : > { %v16116_v55 = vadd.f32 %v11505_v57, %v6972_v0  ;;  %v11508_v40 = vadd.f32 %v11507_v33, %v11506_v50 }
 0x4d1   : > { %v16118_v26 = vadd.f32 %v11508_v40, %v6975_v60 }
 0x4d7   : > { %v11525_v36 = vpop.f32.mrb[144].mxu0 }
 0x4d8   : > { %v11526_v38 = vpop.f32.mrb[145].mxu0 }
 0x4d9   : > { %v11527_v15 = vadd.f32 %v11526_v38, %v11525_v36  ;;  %v11528_v2 = vpop.f32.mrb[146].mxu0 }
 0x4da   : > { %v11529_v8 = vpop.f32.mrb[147].mxu0 }
 0x4db   : > { %v7078_v16 = vadd.f32 %v11527_v15, %v7013_v29  ;;  %v11530_v32 = vadd.f32 %v11529_v8, %v11528_v2 }
 0x4dd   : > { %v7081_v20 = vadd.f32 %v11530_v32, %v7016_v4 }
 0x4df   : > { %v11565_v6 = vpop.f32.mrb[144].mxu1 }
 0x4e0   : > { %v11566_v37 = vpop.f32.mrb[145].mxu1 }
 0x4e1   : > { %v11567_v7 = vadd.f32 %v11566_v37, %v11565_v6  ;;  %v11568_v25 = vpop.f32.mrb[146].mxu1 }
 0x4e2   : > { %v11569_v24 = vpop.f32.mrb[147].mxu1 }
 0x4e3   : > { %v16120_v58 = vadd.f32 %v11567_v7, %v7078_v16  ;;  %v11570_v62 = vadd.f32 %v11569_v24, %v11568_v25  ;;  %v16153_v25 = vld [vmem:[%s17342_s2] ss:$0 sm:$0xff] }
 0x4e5   : > { %v16122_v48 = vadd.f32 %v11570_v62, %v7081_v20 }
 0x4eb   : > { %v11531_v54 = vpop.f32.mrb[148].mxu0 }
 0x4ec   : > { %v11532_v45 = vpop.f32.mrb[149].mxu0 }
 0x4ed   : > { %v11533_v47 = vadd.f32 %v11532_v45, %v11531_v54  ;;  %v11534_v23 = vpop.f32.mrb[150].mxu0 }
 0x4ee   : > { %v11535_v34 = vpop.f32.mrb[151].mxu0 }
 0x4ef   : > { %v7086_v21 = vadd.f32 %v11533_v47, %v7021_v49  ;;  %v11536_v5 = vadd.f32 %v11535_v34, %v11534_v23  ;;  %v16159_v23 = vld [vmem:[%s17343_s3] ss:$0 sm:$0xff] }
 0x4f1   : > { %v7089_v29 = vadd.f32 %v11536_v5, %v7024_v53 }
 0x4f3   : > { %v11571_v51 = vpop.f32.mrb[148].mxu1 }
 0x4f4   : > { %v11572_v4 = vpop.f32.mrb[149].mxu1 }
 0x4f5   : > { %v11573_v41 = vadd.f32 %v11572_v4, %v11571_v51  ;;  %v11574_v52 = vpop.f32.mrb[150].mxu1 }
 0x4f6   : > { %v11575_v10 = vpop.f32.mrb[151].mxu1 }
 0x4f7   : > { %v16124_v14 = vadd.f32 %v11573_v41, %v7086_v21  ;;  %v11576_v13 = vadd.f32 %v11575_v10, %v11574_v52 }
 0x4f9   : > { %v16126_v28 = vadd.f32 %v11576_v13, %v7089_v29 }
 0x4ff   : > { %v11537_v35 = vpop.f32.mrb[152].mxu0 }
 0x500   : > { %v11538_v44 = vpop.f32.mrb[153].mxu0 }
 0x501   : > { %v11539_v1 = vadd.f32 %v11538_v44, %v11537_v35  ;;  %v11540_v22 = vpop.f32.mrb[154].mxu0 }
 0x502   : > { %v11541_v3 = vpop.f32.mrb[155].mxu0 }
 0x503   : > { %v7094_v63 = vadd.f32 %v11539_v1, %v7029_v56  ;;  %v11542_v46 = vadd.f32 %v11541_v3, %v11540_v22 }
 0x505   : > { %v7097_v49 = vadd.f32 %v11542_v46, %v7032_v17 }
 0x507   : > { %v11577_v53 = vpop.f32.mrb[152].mxu1 }
 0x508   : > { %v11578_v30 = vpop.f32.mrb[153].mxu1 }
 0x509   : > { %v11579_v18 = vadd.f32 %v11578_v30, %v11577_v53  ;;  %v11580_v61 = vpop.f32.mrb[154].mxu1 }
 0x50a   : > { %v11581_v56 = vpop.f32.mrb[155].mxu1 }
 0x50b   : > { %v16138_v31 = vadd.f32 %v11579_v18, %v7094_v63  ;;  %v11582_v17 = vadd.f32 %v11581_v56, %v11580_v61 }
 0x50d   : > { %v16140_v59 = vadd.f32 %v11582_v17, %v7097_v49 }
 0x513   : > { %v11543_v39 = vpop.f32.mrb[156].mxu0 }
 0x514   : > { %v11544_v12 = vpop.f32.mrb[157].mxu0 }
 0x515   : > { %v11545_v9 = vadd.f32 %v11544_v12, %v11543_v39  ;;  %v11546_v43 = vpop.f32.mrb[158].mxu0 }
 0x516   : > { %v11547_v0 = vpop.f32.mrb[159].mxu0 }
 0x517   : > { %v7102_v19 = vadd.f32 %v11545_v9, %v16116_v55  ;;  %v11548_v60 = vadd.f32 %v11547_v0, %v11546_v43 }
 0x519   : > { %v7105_v11 = vadd.f32 %v11548_v60, %v16118_v26 }
 0x51b   : > { %v11583_v42 = vpop.f32.mrb[156].mxu1 }
 0x51c   : > { %v11584_v57 = vpop.f32.mrb[157].mxu1 }
 0x51d   : > { %v11585_v50 = vadd.f32 %v11584_v57, %v11583_v42  ;;  %v11586_v33 = vpop.f32.mrb[158].mxu1 }
 0x51e   : > { %v11587_v40 = vpop.f32.mrb[159].mxu1 }
 0x51f   : > { %v16144_v36 = vadd.f32 %v11585_v50, %v7102_v19  ;;  %v11588_v38 = vadd.f32 %v11587_v40, %v11586_v33 }
 0x521   : > { %v16146_v15 = vadd.f32 %v11588_v38, %v7105_v11 }
 0x523   : > { %v11605_v2 = vpop.f32.mrb[160].mxu0 }
 0x524   : > { %v11606_v8 = vpop.f32.mrb[161].mxu0 }
 0x525   : > { %v11607_v16 = vadd.f32 %v11606_v8, %v11605_v2  ;;  %v11608_v32 = vpop.f32.mrb[162].mxu0 }
 0x526   : > { %v11609_v20 = vpop.f32.mrb[163].mxu0 }
 0x527   : > { %v11610_v6 = vadd.f32 %v11609_v20, %v11608_v32  ;;  %v7208_v55 = vadd.f32 %v11607_v16, %v16120_v58 }
 0x529   : > { %v7211_v26 = vadd.f32 %v11610_v6, %v16122_v48 }
 0x52e   : > { %v11880_v37 = vpop.f32.mrb[160].mxu1 }
 0x52f   : > { %v7272_v7 = vpop.f32.mrb[161].mxu1 }
 0x530   : > { %v7273_v24 = vadd.f32 %v7272_v7, %v7208_v55  ;;  %v11881_v62 = vpop.f32.mrb[162].mxu1 }
 0x531   : > { %v7275_v54 = vpop.f32.mrb[163].mxu1 }
 0x532   : > { %v7310_v45 = vmul.f32 %v16153_v25, %v7273_v24  ;;  %v7276_v47 = vadd.f32 %v7275_v54, %v7211_v26 }
 0x533   : > { %v11611_v58 = vpop.f32.mrb[164].mxu0 }
 0x534   : > { %v11612_v48 = vpop.f32.mrb[165].mxu0  ;;  %v7325_v5 = vadd.f32 %v16159_v23, %v7310_v45  ;;  %v7311_v49 = vmul.f32 %v16153_v25, %v7276_v47 }
 0x535   : > { %v11613_v34 = vadd.f32 %v11612_v48, %v11611_v58  ;;  %v11614_v21 = vpop.f32.mrb[166].mxu0 }
 0x536   : > { %v11615_v29 = vpop.f32.mrb[167].mxu0  ;;  %v16164_v10 = vmax.f32 %v7325_v5, 0.0  ;;  %v7326_v17 = vadd.f32 %v16159_v23, %v7311_v49 }
 0x537   : > { %v7216_v51 = vadd.f32 %v11613_v34, %v16124_v14  ;;  %v11616_v4 = vadd.f32 %v11615_v29, %v11614_v21 }
 0x538   : > { %v10781_v14 = vpack.c.bf16 %v16164_v10, %v16164_v10  ;;  %v16192_v19 = vmax.f32 %v7326_v17, 0.0 }
 0x539   : > { %v7281_v41 = vadd.f32 %v11880_v37, %v7216_v51  ;;  %v7219_v52 = vadd.f32 %v11616_v4, %v16126_v28 }
 0x53a   : > { %v7392_v9 = vshrl.u32 %v10781_v14, 16  ;;  %v7395_v2 = vshll.u32 %v10781_v14, 16  ;;  %v10782_v8 = vpack.c.bf16 %v16192_v19, %v16192_v19 }
 0x53b   : > { %v7312_v13 = vmul.f32 %v16153_v25, %v7281_v41  ;;  %v7284_v35 = vadd.f32 %v11881_v62, %v7219_v52  ;;  %v11617_v44 = vpop.f32.mrb[168].mxu0 }
 0x53c   : > { %v11618_v1 = vpop.f32.mrb[169].mxu0  ;;  %v7394_v50 = vrot.slane %v7392_v9, 7  ;;  %v7400_v54 = vshrl.u32 %v10782_v8, 16 }
 0x53d   : > { %v7327_v22 = vadd.f32 %v16159_v23, %v7312_v13  ;;  %v7313_v3 = vmul.f32 %v16153_v25, %v7284_v35  ;;  %v11619_v63 = vadd.f32 %v11618_v1, %v11617_v44  ;;  %v11620_v46 = vpop.f32.mrb[170].mxu0 }
 0x53e   : > { %v11621_v28 = vpop.f32.mrb[171].mxu0  ;;  %v7398_v20 = vrot.slane %v7394_v50, 4  ;;  %v7397_v6 = vor.u32 %v7395_v2, %v7394_v50  ;;  %v7402_v29 = vrot.slane %v7400_v54, 7  ;;  %v16250_v2 = vld [vmem:[#allocation3] sm:$0xff] }
 0x53f   : > { %v16172_v53 = vmax.f32 %v7327_v22, 0.0  ;;  %v7328_v30 = vadd.f32 %v16159_v23, %v7313_v3  ;;  %v11622_v18 = vadd.f32 %v11621_v28, %v11620_v46  ;;  %v7224_v61 = vadd.f32 %v11619_v63, %v16138_v31 }
 0x540   : > { %v7406_v35 = vrot.slane %v7402_v29, 4 }
 0x541   : > { %v10783_v56 = vpack.c.bf16 %v16172_v53, %v16172_v53  ;;  %v7227_v31 = vadd.f32 %v11622_v18, %v16140_v59  ;;  %v16190_v39 = vmax.f32 %v7328_v30, 0.0 }
 0x543   : > { %v7408_v12 = vshrl.u32 %v10783_v56, 16  ;;  %v7411_v0 = vshll.u32 %v10783_v56, 16  ;;  %v10784_v33 = vpack.c.bf16 %v16190_v39, %v16190_v39 }
 0x545   : > { %v7410_v43 = vrot.slane %v7408_v12, 7  ;;  %v7416_v55 = vshrl.u32 %v10784_v33, 16  ;;  %v7419_v21 = vshll.u32 %v10784_v33, 16 }
 0x546   : > { %v11884_v60 = vpop.f32.mrb[164].mxu1 }
 0x547   : > { %v7288_v11 = vpop.f32.mrb[165].mxu1  ;;  %v7414_v42 = vrot.slane %v7410_v43, 4  ;;  %v7413_v57 = vor.u32 %v7411_v0, %v7410_v43  ;;  %v7418_v58 = vrot.slane %v7416_v55, 7  ;;  %v16256_v55 = vld [vmem:[#allocation3 + $0x90] sm:$0xff] }
 0x548   : > { %v7289_v40 = vadd.f32 %v7288_v11, %v7224_v61  ;;  %v11885_v59 = vpop.f32.mrb[166].mxu1 }
 0x549   : > { %7465 = vrot.lane.b32.xlu1 %v7414_v42, %s12515_s16  ;;  %7463 = vrot.lane.b32.xlu0 %v7413_v57, %s12515_s16  ;;  %v7291_v38 = vpop.f32.mrb[167].mxu1  ;;  %v7422_v41 = vrot.slane %v7418_v58, 4  ;;  %v7421_v52 = vor.u32 %v7419_v21, %v7418_v58 }
 0x54a   : > { %v7292_v16 = vadd.f32 %v7291_v38, %v7227_v31  ;;  %v7314_v24 = vmul.f32 %v16153_v25, %v7289_v40 }
 0x54b   : > { %v11623_v32 = vpop.f32.mrb[172].mxu0 }
 0x54c   : > { %v11624_v26 = vpop.f32.mrb[173].mxu0  ;;  %v7329_v5 = vadd.f32 %v16159_v23, %v7314_v24  ;;  %v7315_v51 = vmul.f32 %v16153_v25, %v7292_v16 }
 0x54d   : > { %v11625_v37 = vadd.f32 %v11624_v26, %v11623_v32  ;;  %7457 = vrot.lane.b32.xlu1 %v7398_v20, %s12515_s16  ;;  %7455 = vrot.lane.b32.xlu0 %v7397_v6, %s12515_s16  ;;  %v11626_v7 = vpop.f32.mrb[174].mxu0  ;;  %v7718_v26 = vld [vmem:[#allocation3 + $0x98] sm:$0x11] }
 0x54e   : > { %v11627_v62 = vpop.f32.mrb[175].mxu0  ;;  %v16211_v13 = vmax.f32 %v7329_v5, 0.0  ;;  %v10623_v24 = vcombine.low %v16256_v55, %v7718_v26 }
 0x54f   : > { %v7232_v45 = vadd.f32 %v11625_v37, %v16144_v36  ;;  %v11628_v47 = vadd.f32 %v11627_v62, %v11626_v7  ;;  %v7403_v36 = vshll.u32 %v10782_v8, 16  ;;  %v7700_v8 = vld [vmem:[#allocation3 + $0x8] sm:$0x11]  ;;  %v10624_v62 = vcombine.high %v16256_v55, %v7718_v26 }
 0x550   : > { %v10785_v1 = vpack.c.bf16 %v16211_v13, %v16211_v13  ;;  %v7947_v21 = vshll.u32 %v10623_v24, 16 }
 0x551   : > { %v7297_v48 = vadd.f32 %v11884_v60, %v7232_v45  ;;  %v7235_v34 = vadd.f32 %v11628_v47, %v16146_v15  ;;  %7560 = vrot.lane.b32.xlu1 %v7398_v20, %s12507_s12  ;;  %7558 = vrot.lane.b32.xlu0 %v7397_v6, %s12507_s12  ;;  %v7330_v15 = vadd.f32 %v16159_v23, %v7315_v51  ;;  %v7954_v5 = vshll.u32 %v10624_v62, 16 }
 0x552   : > { %v7405_v44 = vor.u32 %v7403_v36, %v7402_v29  ;;  %v7424_v3 = vshrl.u32 %v10785_v1, 16  ;;  %v7427_v18 = vshll.u32 %v10785_v1, 16  ;;  %v10606_v20 = vcombine.high %v16250_v2, %v7700_v8 }
 0x553   : > { %v7300_v4 = vadd.f32 %v11885_v59, %v7235_v34  ;;  %v16218_v22 = vmax.f32 %v7330_v15, 0.0  ;;  %v7316_v46 = vmul.f32 %v16153_v25, %v7297_v48  ;;  %v10605_v6 = vcombine.low %v16250_v2, %v7700_v8 }
 0x554   : > { %v7426_v14 = vrot.slane %v7424_v3, 7  ;;  %v7828_v37 = vshll.u32 %v10606_v20, 16  ;;  %v8009_v54 = vrot.slane %v10606_v20, 1  ;;  %v7826_v47 = vshrl.u32 %v10606_v20, 16 }
 0x555   : > { %7469 = vrot.lane.b32.xlu1 %v7422_v41, %s12515_s16  ;;  %7467 = vrot.lane.b32.xlu0 %v7421_v52, %s12515_s16  ;;  %v10786_v63 = vpack.c.bf16 %v16218_v22, %v16218_v22  ;;  %v7331_v49 = vadd.f32 %v16159_v23, %v7316_v46  ;;  %v7317_v28 = vmul.f32 %v16153_v25, %v7300_v4  ;;  %v7821_v7 = vshll.u32 %v10605_v6, 16 }
 0x556   : > { %v7430_v61 = vrot.slane %v7426_v14, 4  ;;  %v7429_v17 = vor.u32 %v7427_v18, %v7426_v14  ;;  %v8008_v45 = vrot.slane %v10605_v6, 1  ;;  %v7830_v58 = vrot.slane %v7828_v37, 1  ;;  %v7522_v14 = vld [vmem:[#allocation3 + $0x30] sm:$0xf] }
 0x557   : > { %v7432_v30 = vshrl.u32 %v10786_v63, 16  ;;  %v16231_v56 = vmax.f32 %v7331_v49, 0.0  ;;  %v7332_v31 = vadd.f32 %v16159_v23, %v7317_v28  ;;  %v7435_v9 = vshll.u32 %v10786_v63, 16  ;;  %v7525_v63 = vld [vmem:[#allocation3 + $0x38] sm:$0x1] }
 0x558   : > { %v7819_v48 = vshrl.u32 %v10605_v6, 16  ;;  %v7823_v34 = vrot.slane %v7821_v7, 1  ;;  %v7831_v29 = vor.u32 %v7830_v58, %v7826_v47  ;;  %v7945_v51 = vshrl.u32 %v10623_v24, 16  ;;  %v7519_v7 = vld [vmem:[#allocation3 + $0x28] sm:$0x1] }
 0x559   : > { %7461 = vrot.lane.b32.xlu1 %v7406_v35, %s12515_s16  ;;  %7459 = vrot.lane.b32.xlu0 %v7405_v44, %s12515_s16  ;;  %v7434_v12 = vrot.slane %v7432_v30, 7  ;;  %v16236_v43 = vmax.f32 %v7332_v31, 0.0  ;;  %v10787_v60 = vpack.c.bf16 %v16231_v56, %v16231_v56  ;;  %v7956_v36 = vrot.slane %v7954_v5, 1  ;;  %v7507_v31 = vld [vmem:[#allocation3 + $0x10] sm:$0xf] }
 0x55a   : > { %v7824_v4 = vor.u32 %v7823_v34, %v7819_v48  ;;  %v8027_v1 = vrot.slane %v10624_v62, 1 }
 0x55b   : > { %v7438_v25 = vrot.slane %v7434_v12, 4  ;;  %v7437_v0 = vor.u32 %v7435_v9, %v7434_v12  ;;  %v7440_v11 = vshrl.u32 %v10787_v60, 16  ;;  %v10788_v23 = vpack.c.bf16 %v16236_v43, %v16236_v43 }
 0x55c   : > { %v7443_v50 = vshll.u32 %v10787_v60, 16 }
 0x55d   : > { %7564 = vrot.lane.b32.xlu1 %v7406_v35, %s12507_s12  ;;  %7562 = vrot.lane.b32.xlu0 %v7405_v44, %s12507_s12  ;;  %v7451_v38 = vshll.u32 %v10788_v23, 16  ;;  %v8026_v44 = vrot.slane %v10623_v24, 1  ;;  %v7516_v24 = vld [vmem:[#allocation3 + $0x20] sm:$0xf] }
 0x561   : > { %7568 = vrot.lane.b32.xlu1 %v7414_v42, %s12507_s12  ;;  %7566 = vrot.lane.b32.xlu0 %v7413_v57, %s12507_s12  ;;  %v7442_v42 = vrot.slane %v7440_v11, 7  ;;  %v7448_v57 = vshrl.u32 %v10788_v23, 16 }
 0x563   : > { %v7446_v33 = vrot.slane %v7442_v42, 4  ;;  %v7445_v40 = vor.u32 %v7443_v50, %v7442_v42  ;;  %v7450_v59 = vrot.slane %v7448_v57, 7  ;;  %v7531_v57 = vld [vmem:[#allocation3 + $0x48] sm:$0x1]  ;;  %v7528_v50 = vld [vmem:[#allocation3 + $0x40] sm:$0xf] }
 0x565   : > { %7572 = vrot.lane.b32.xlu1 %v7422_v41, %s12507_s12  ;;  %7570 = vrot.lane.b32.xlu0 %v7421_v52, %s12507_s12  ;;  %v7454_v16 = vrot.slane %v7450_v59, 4  ;;  %v7453_v32 = vor.u32 %v7451_v38, %v7450_v59  ;;  %v7949_v41 = vrot.slane %v7947_v21, 1  ;;  %v7952_v52 = vshrl.u32 %v10624_v62, 16 }
 0x567   : > { %v7950_v15 = vor.u32 %v7949_v41, %v7945_v51  ;;  %v7957_v35 = vor.u32 %v7956_v36, %v7952_v52 }
 0x569   : > { %7473 = vrot.lane.b32.xlu1 %v7430_v61, %s12515_s16  ;;  %7471 = vrot.lane.b32.xlu0 %v7429_v17, %s12515_s16 }
 0x56d   : > { %7477 = vrot.lane.b32.xlu1 %v7438_v25, %s12515_s16  ;;  %7475 = vrot.lane.b32.xlu0 %v7437_v0, %s12515_s16 }
 0x571   : > { %7576 = vrot.lane.b32.xlu1 %v7430_v61, %s12507_s12  ;;  %7574 = vrot.lane.b32.xlu0 %v7429_v17, %s12507_s12  ;;  %v7513_v61 = vld [vmem:[#allocation3 + $0x18] sm:$0x1] }
 0x575   : > { %7580 = vrot.lane.b32.xlu1 %v7438_v25, %s12507_s12  ;;  %7578 = vrot.lane.b32.xlu0 %v7437_v0, %s12507_s12 }
 0x579   : > { %7481 = vrot.lane.b32.xlu1 %v7446_v33, %s12515_s16  ;;  %7479 = vrot.lane.b32.xlu0 %v7445_v40, %s12515_s16 }
 0x57d   : > { %7485 = vrot.lane.b32.xlu1 %v7454_v16, %s12515_s16  ;;  %7483 = vrot.lane.b32.xlu0 %v7453_v32, %s12515_s16 }
 0x581   : > { %7584 = vrot.lane.b32.xlu1 %v7446_v33, %s12507_s12  ;;  %7582 = vrot.lane.b32.xlu0 %v7445_v40, %s12507_s12 }
 0x585   : > { %7588 = vrot.lane.b32.xlu1 %v7454_v16, %s12507_s12  ;;  %7586 = vrot.lane.b32.xlu0 %v7453_v32, %s12507_s12 }
 0x589   : > { %8030 = vrot.lane.b32.xlu1 %v8009_v54, %s12511_s30  ;;  %8028 = vrot.lane.b32.xlu0 %v8008_v45, %s12511_s30 }
 0x58d   : > { %7960 = vrot.lane.b32.xlu1 %v7831_v29, %s12513_s10  ;;  %7958 = vrot.lane.b32.xlu0 %v7824_v4, %s12513_s10 }
 0x591   : > { %7994 = vrot.lane.b32.xlu0 %v7950_v15, %s12513_s10  ;;  %7996 = vrot.lane.b32.xlu1 %v7957_v35, %s12513_s10 }
 0x595   : > { %8064 = vrot.lane.b32.xlu0 %v8026_v44, %s12511_s30  ;;  %8066 = vrot.lane.b32.xlu1 %v8027_v1, %s12511_s30  ;;  %v12358_v1 = vld [vmem:[%s17344_s4 + $0x40] sm:$0xff]  }
 0x596   : > { %11640 = vmatprep.subr.bf16.mxu0 %v12358_v1 }
 0x5bb   : > { %v7466_v49 = vpop.permute.xlu1 %7465  ;;  %v7464_v28 = vpop.permute.xlu0 %7463 }
 0x5bc   : > { %v7526_v30 = vsel %vm16273_vm10, %v7466_v49, %v7525_v63  ;;  %v7523_v18 = vsel %vm16278_vm12, %v7464_v28, %v7522_v14  ;;  %v12359_v63 = vld [vmem:[%s17344_s4 + $0xc0] sm:$0xff]  }
 0x5bd   : > { %7527 = vst [vmem:[#allocation3 + $0x38] sm:$0x1] %v7526_v30  ;;  %7524 = vst [vmem:[#allocation3 + $0x30] sm:$0xf] %v7523_v18  ;;  %v12360_v14 = vld [vmem:[%s17344_s4] sm:$0xff]   ;;  %11680 = vmatprep.subr.bf16.mxu1 %v12359_v63 }
 0x5be   : > { %11641 = vmatpush3.bf16.msra.mxu0 %v12360_v14  ;;  %v12370_v14 = vld [vmem:[%s17344_s4 + $0x58] sm:$0xff]  }
 0x5bf   : > { %v7458_v17 = vpop.permute.xlu1 %7457  ;;  %v7456_v12 = vpop.permute.xlu0 %7455 }
 0x5c0   : > { %v7514_v9 = vsel %vm16273_vm10, %v7458_v17, %v7513_v61  ;;  %v7508_v25 = vsel %vm16278_vm12, %v7456_v12, %v7507_v31  ;;  %v12361_v61 = vld [vmem:[%s17344_s4 + $0x80] sm:$0xff]  }
 0x5c1   : > { %7515 = vst [vmem:[#allocation3 + $0x18] sm:$0x1] %v7514_v9  ;;  %7509 = vst [vmem:[#allocation3 + $0x10] sm:$0xf] %v7508_v25  ;;  %11681 = vmatpush3.bf16.msra.mxu1 %v12361_v61 }
 0x5c3   : > { %v7561_v0 = vpop.permute.xlu1 %7560  ;;  %v7559_v60 = vpop.permute.xlu0 %7558 }
 0x5c4   : > { %v7591_v11 = vrot.slane %v7561_v0, 4  ;;  %v7590_v23 = vrot.slane %v7559_v60, 4  ;;  %v7666_v49 = vld [vmem:[#allocation3 + $0x38] sm:$0x11]  ;;  %v7663_v30 = vld [vmem:[#allocation3 + $0x30] sm:$0xff] }
 0x5c6   : > { %v7608_v8 = vsel %vm7606_vm6, %v7591_v11, %v7561_v0  ;;  %v7607_v32 = vsel %vm7606_vm6, %v7590_v23, %v7559_v60  ;;  %v12362_v23 = vld [vmem:[%s17344_s4 + $0x48] sm:$0xff]  }
 0x5c7   : > { %v7470_v40 = vpop.permute.xlu1 %7469  ;;  %v7468_v59 = vpop.permute.xlu0 %7467  ;;  %11642 = vmatprep.subr.bf16.mxu0 %v12362_v23 }
 0x5c8   : > { %v7654_v38 = vld [vmem:[#allocation3 + $0x18] sm:$0x11]  ;;  %v7645_v16 = vld [vmem:[#allocation3 + $0x10] sm:$0xff]  ;;  %v7532_v20 = vsel %vm16273_vm10, %v7470_v40, %v7531_v57  ;;  %v7529_v6 = vsel %vm16278_vm12, %v7468_v59, %v7528_v50 }
 0x5c9   : > { %v7655_v26 = vsel %vm16292_vm9, %v7608_v8, %v7654_v38  ;;  %v16310_v37 = vsel %vm16296_vm14, %v7607_v32, %v7645_v16  ;;  %7533 = vst [vmem:[#allocation3 + $0x48] sm:$0x1] %v7532_v20  ;;  %7530 = vst [vmem:[#allocation3 + $0x40] sm:$0xf] %v7529_v6  ;;  %v12363_v57 = vld [vmem:[%s17344_s4 + $0xc8] sm:$0xff]  }
 0x5ca   : > { %7656 = vst [vmem:[#allocation3 + $0x18] sm:$0x11] %v7655_v26  ;;  %7647 = vst [vmem:[#allocation3 + $0x10] sm:$0xff] %v16310_v37  ;;  %v12364_v50 = vld [vmem:[%s17344_s4 + $0x8] sm:$0xff]   ;;  %v7534_v59 = vld [vmem:[#allocation3 + $0x50] sm:$0xf]  ;;  %11682 = vmatprep.subr.bf16.mxu1 %v12363_v57 }
 0x5cb   : > { %v7462_v62 = vpop.permute.xlu1 %7461  ;;  %v7460_v54 = vpop.permute.xlu0 %7459  ;;  %v7537_v40 = vld [vmem:[#allocation3 + $0x58] sm:$0x1]  ;;  %11643 = vmatpush3.bf16.msra.mxu0 %v12364_v50 }
 0x5cc   : > { %v7520_v45 = vsel %vm16273_vm10, %v7462_v62, %v7519_v7  ;;  %v7517_v47 = vsel %vm16278_vm12, %v7460_v54, %v7516_v24  ;;  %v12365_v38 = vld [vmem:[%s17344_s4 + $0x88] sm:$0xff]  }
 0x5cd   : > { %7521 = vst [vmem:[#allocation3 + $0x28] sm:$0x1] %v7520_v45  ;;  %7518 = vst [vmem:[#allocation3 + $0x20] sm:$0xf] %v7517_v47  ;;  %11683 = vmatpush3.bf16.msra.mxu1 %v12365_v38  ;;  %v12376_v38 = vld [vmem:[%s17344_s4 + $0xe0] sm:$0xff]  }
 0x5cf   : > { %v7565_v58 = vpop.permute.xlu1 %7564  ;;  %v7563_v48 = vpop.permute.xlu0 %7562 }
 0x5d0   : > { %v7593_v34 = vrot.slane %v7565_v58, 4  ;;  %v7592_v21 = vrot.slane %v7563_v48, 4  ;;  %v7672_v16 = vld [vmem:[#allocation3 + $0x48] sm:$0x11]  ;;  %v7669_v20 = vld [vmem:[#allocation3 + $0x40] sm:$0xff] }
 0x5d1   : > { %v16346_v25 = vld [vmem:[#allocation3 + $0x18] sm:$0x11] }
 0x5d2   : > { %v7610_v4 = vsel %vm7606_vm6, %v7593_v34, %v7565_v58  ;;  %v7609_v52 = vsel %vm7606_vm6, %v7592_v21, %v7563_v48  ;;  %v16376_v54 = vcombine.high %v16310_v37, %v16346_v25  ;;  %v7543_v48 = vld [vmem:[#allocation3 + $0x68] sm:$0x1]  ;;  %v7540_v34 = vld [vmem:[#allocation3 + $0x60] sm:$0xf] }
 0x5d3   : > { %v7569_v5 = vpop.permute.xlu1 %7568  ;;  %v7567_v29 = vpop.permute.xlu0 %7566  ;;  %v12366_v21 = vld [vmem:[%s17344_s4 + $0x50] sm:$0xff]  }
 0x5d4   : > { %v7660_v51 = vld [vmem:[#allocation3 + $0x28] sm:$0x11]  ;;  %v7657_v41 = vld [vmem:[#allocation3 + $0x20] sm:$0xff]  ;;  %v7595_v36 = vrot.slane %v7569_v5, 4  ;;  %v7594_v15 = vrot.slane %v7567_v29, 4  ;;  %v8011_v1 = vrot.slane %v16376_v54, 1  ;;  %11644 = vmatprep.subr.bf16.mxu0 %v12366_v21 }
 0x5d5   : > { %v7661_v35 = vsel %vm16292_vm9, %v7610_v4, %v7660_v51  ;;  %v16323_v44 = vsel %vm16296_vm14, %v7609_v52, %v7657_v41  ;;  %v10587_v4 = vcombine.low %v16310_v37, %v16310_v37  ;;  %v12368_v52 = vld [vmem:[%s17344_s4 + $0x10] sm:$0xff]   ;;  %v7549_v21 = vld [vmem:[#allocation3 + $0x78] sm:$0x1]  ;;  %v7842_v3 = vshll.u32 %v16376_v54, 16 }
 0x5d6   : > { %7662 = vst [vmem:[#allocation3 + $0x28] sm:$0x11] %v7661_v35  ;;  %7659 = vst [vmem:[#allocation3 + $0x20] sm:$0xff] %v16323_v44  ;;  %v7612_v28 = vsel %vm7606_vm6, %v7595_v36, %v7569_v5  ;;  %v7611_v18 = vsel %vm7606_vm6, %v7594_v15, %v7567_v29  ;;  %v12367_v5 = vld [vmem:[%s17344_s4 + $0xd0] sm:$0xff]   ;;  %11645 = vmatpush3.bf16.msra.mxu0 %v12368_v52  ;;  %v10589_v61 = vcombine.low %v16323_v44, %v16323_v44  ;;  %v12380_v52 = vld [vmem:[%s17344_s4 + $0xe8] sm:$0xff]  }
 0x5d7   : > { %v7667_v31 = vsel %vm16292_vm9, %v7612_v28, %v7666_v49  ;;  %v16344_v17 = vsel %vm16296_vm14, %v7611_v18, %v7663_v30  ;;  %v7573_v12 = vpop.permute.xlu1 %7572  ;;  %v7571_v9 = vpop.permute.xlu0 %7570  ;;  %v12369_v36 = vld [vmem:[%s17344_s4 + $0x90] sm:$0xff]   ;;  %v12371_v49 = vld [vmem:[%s17344_s4 + $0xd8] sm:$0xff]   ;;  %11684 = vmatprep.subr.bf16.mxu1 %v12367_v5  ;;  %11646 = vmatprep.subr.bf16.mxu0 %v12370_v14  ;;  %v7546_v5 = vld [vmem:[#allocation3 + $0x70] sm:$0xf] }
 0x5d8   : > { %7668 = vst [vmem:[#allocation3 + $0x38] sm:$0x11] %v7667_v31  ;;  %7665 = vst [vmem:[#allocation3 + $0x30] sm:$0xff] %v16344_v17  ;;  %v7597_v0 = vrot.slane %v7573_v12, 4  ;;  %v7596_v60 = vrot.slane %v7571_v9, 4  ;;  %v10591_v11 = vcombine.low %v16344_v17, %v16344_v17  ;;  %v10637_v8 = vcombine.low %v16323_v44, %v16344_v17  ;;  %v12372_v28 = vld [vmem:[%s17344_s4 + $0x18] sm:$0xff]   ;;  %11685 = vmatpush3.bf16.msra.mxu1 %v12369_v36 }
 0x5d9   : > { %v12373_v31 = vld [vmem:[%s17344_s4 + $0x98] sm:$0xff]   ;;  %11686 = vmatprep.subr.bf16.mxu1 %v12371_v49  ;;  %v16477_v49 = vcombine.low %v16310_v37, %v16346_v25  ;;  %v7552_v25 = vld [vmem:[#allocation3 + $0x80] sm:$0xf] }
 0x5da   : > { %v7614_v32 = vsel %vm7606_vm6, %v7597_v0, %v7573_v12  ;;  %v7613_v6 = vsel %vm7606_vm6, %v7596_v60, %v7571_v9  ;;  %8170 = vrot.lane.b32.xlu0 %v10591_v11, %s12509_s14  ;;  %11647 = vmatpush3.bf16.msra.mxu0 %v12372_v28  ;;  %v7555_v14 = vld [vmem:[#allocation3 + $0x88] sm:$0x1]  ;;  %v12381_v28 = vld [vmem:[%s17344_s4 + $0x28] sm:$0xff]  }
 0x5db   : > { %v7673_v26 = vsel %vm16292_vm9, %v7614_v32, %v7672_v16  ;;  %v16372_v7 = vsel %vm16296_vm14, %v7613_v6, %v7669_v20  ;;  %v7474_v24 = vpop.permute.xlu1 %7473  ;;  %v7472_v62 = vpop.permute.xlu0 %7471 }
 0x5dc   : > { %7674 = vst [vmem:[#allocation3 + $0x48] sm:$0x11] %v7673_v26  ;;  %7671 = vst [vmem:[#allocation3 + $0x40] sm:$0xff] %v16372_v7  ;;  %v7538_v45 = vsel %vm16273_vm10, %v7474_v24, %v7537_v40  ;;  %v7535_v47 = vsel %vm16278_vm12, %v7472_v62, %v7534_v59  ;;  %v16385_v58 = vcombine.low %v16372_v7, %v16372_v7  ;;  %v12375_v59 = vld [vmem:[%s17344_s4 + $0x60] sm:$0xff]   ;;  %11687 = vmatpush3.bf16.msra.mxu1 %v12373_v31 }
 0x5dd   : > { %7539 = vst [vmem:[#allocation3 + $0x58] sm:$0x1] %v7538_v45  ;;  %7536 = vst [vmem:[#allocation3 + $0x50] sm:$0xf] %v7535_v47  ;;  %v12377_v26 = vld [vmem:[%s17344_s4 + $0x20] sm:$0xff]   ;;  %11648 = vmatprep.subr.bf16.mxu0 %v12375_v59  ;;  %11688 = vmatprep.subr.bf16.mxu1 %v12376_v38  ;;  %v8010_v59 = vrot.slane %v16477_v49, 1 }
 0x5de   : > { %8252 = vrot.lane.b32.xlu0 %v10591_v11, %s12511_s30  ;;  %8178 = vrot.lane.b32.xlu1 %v16385_v58, %s12509_s14  ;;  %v12378_v24 = vld [vmem:[%s17344_s4 + $0xa0] sm:$0xff]  }
 0x5df   : > { %v7478_v29 = vpop.permute.xlu1 %7477  ;;  %v7476_v51 = vpop.permute.xlu0 %7475  ;;  %v7706_v41 = vld [vmem:[#allocation3 + $0x38] sm:$0x11]  ;;  %11649 = vmatpush3.bf16.msra.mxu0 %v12377_v26 }
 0x5e0   : > { %v7544_v15 = vsel %vm16273_vm10, %v7478_v29, %v7543_v48  ;;  %v7541_v35 = vsel %vm16278_vm12, %v7476_v51, %v7540_v34  ;;  %v16410_v63 = vcombine.low %v16344_v17, %v7706_v41  ;;  %v16430_v60 = vcombine.high %v16344_v17, %v7706_v41  ;;  %v12379_v41 = vld [vmem:[%s17344_s4 + $0x68] sm:$0xff]   ;;  %11689 = vmatpush3.bf16.msra.mxu1 %v12378_v24 }
 0x5e1   : > { %7545 = vst [vmem:[#allocation3 + $0x68] sm:$0x1] %v7544_v15  ;;  %7542 = vst [vmem:[#allocation3 + $0x60] sm:$0xf] %v7541_v35  ;;  %11650 = vmatprep.subr.bf16.mxu0 %v12379_v41  ;;  %11690 = vmatprep.subr.bf16.mxu1 %v12380_v52 }
 0x5e2   : > { %8154 = vrot.lane.b32.xlu0 %v10587_v4, %s12509_s14  ;;  %8034 = vrot.lane.b32.xlu1 %v8011_v1, %s12511_s30  ;;  %v8014_v0 = vrot.slane %v16410_v63, 1  ;;  %v8015_v47 = vrot.slane %v16430_v60, 1 }
 0x5e3   : > { %v7577_v30 = vpop.permute.xlu1 %7576  ;;  %v7575_v18 = vpop.permute.xlu0 %7574  ;;  %v7708_v23 = vld [vmem:[#allocation3 + $0x48] sm:$0x11]  ;;  %11651 = vmatpush3.bf16.msra.mxu0 %v12381_v28 }
 0x5e4   : > { %v7599_v12 = vrot.slane %v7577_v30, 4  ;;  %v7598_v9 = vrot.slane %v7575_v18, 4  ;;  %v7678_v11 = vld [vmem:[#allocation3 + $0x58] sm:$0x11]  ;;  %v7675_v50 = vld [vmem:[#allocation3 + $0x50] sm:$0xff]  ;;  %v16457_v48 = vcombine.low %v16372_v7, %v7708_v23 }
 0x5e6   : > { %v7616_v57 = vsel %vm7606_vm6, %v7599_v12, %v7577_v30  ;;  %v7615_v40 = vsel %vm7606_vm6, %v7598_v9, %v7575_v18  ;;  %8040 = vrot.lane.b32.xlu0 %v8014_v0, %s12511_s30  ;;  %8162 = vrot.lane.b32.xlu1 %v10589_v61, %s12509_s14  ;;  %v12382_v30 = vld [vmem:[%s17344_s4 + $0xa8] sm:$0xff]   ;;  %v8016_v31 = vrot.slane %v16457_v48, 1  ;;  %v16492_v12 = vcombine.high %v16372_v7, %v7708_v23  ;;  %v7704_v9 = vld [vmem:[#allocation3 + $0x28] sm:$0x11]  ;;  %v12383_v0 = vld [vmem:[%s17344_s4 + $0x70] sm:$0xff]  }
 0x5e7   : > { %v7679_v16 = vsel %vm16292_vm9, %v7616_v57, %v7678_v11  ;;  %v16446_v32 = vsel %vm16296_vm14, %v7615_v40, %v7675_v50  ;;  %v7581_v20 = vpop.permute.xlu1 %7580  ;;  %v7579_v6 = vpop.permute.xlu0 %7578  ;;  %v12384_v11 = vld [vmem:[%s17344_s4 + $0xf0] sm:$0xff]   ;;  %v16510_v38 = vcombine.low %v16323_v44, %v7704_v9  ;;  %11691 = vmatpush3.bf16.msra.mxu1 %v12382_v30  ;;  %11652 = vmatprep.subr.bf16.mxu0 %v12383_v0  ;;  %v7875_v42 = vshrl.u32 %v16457_v48, 16 }
 0x5e8   : > { %7680 = vst [vmem:[#allocation3 + $0x58] sm:$0x11] %v7679_v16  ;;  %7677 = vst [vmem:[#allocation3 + $0x50] sm:$0xff] %v16446_v32  ;;  %v7601_v62 = vrot.slane %v7581_v20, 4  ;;  %v7600_v45 = vrot.slane %v7579_v6, 4  ;;  %v7681_v51 = vld [vmem:[#allocation3 + $0x60] sm:$0xff]  ;;  %v10649_v23 = vcombine.low %v16372_v7, %v16446_v32  ;;  %11692 = vmatprep.subr.bf16.mxu1 %v12384_v11 }
 0x5e9   : > { %v7684_v34 = vld [vmem:[#allocation3 + $0x68] sm:$0x11]  ;;  %v12385_v57 = vld [vmem:[%s17344_s4 + $0x30] sm:$0xff]   ;;  %v7863_v16 = vshll.u32 %v16410_v63, 16  ;;  %v8017_v24 = vrot.slane %v16492_v12, 1  ;;  %v8012_v41 = vrot.slane %v16510_v38, 1 }
 0x5ea   : > { %v7618_v29 = vsel %vm7606_vm6, %v7601_v62, %v7581_v20  ;;  %v7617_v4 = vsel %vm7606_vm6, %v7600_v45, %v7579_v6  ;;  %8042 = vrot.lane.b32.xlu0 %v8015_v47, %s12511_s30  ;;  %8244 = vrot.lane.b32.xlu1 %v10589_v61, %s12511_s30  ;;  %v7870_v20 = vshll.u32 %v16430_v60, 16  ;;  %v16523_v62 = vcombine.high %v16323_v44, %v7704_v9 }
 0x5eb   : > { %v7685_v36 = vsel %vm16292_vm9, %v7618_v29, %v7684_v34  ;;  %v16473_v15 = vsel %vm16296_vm14, %v7617_v4, %v7681_v51  ;;  %v7482_v35 = vpop.permute.xlu1 %7481  ;;  %v7480_v1 = vpop.permute.xlu0 %7479  ;;  %11653 = vmatpush3.bf16.msra.mxu0 %v12385_v57  ;;  %v7835_v45 = vshll.u32 %v16477_v49, 16  ;;  %v7865_v34 = vrot.slane %v7863_v16, 1  ;;  %v12388_v29 = vld [vmem:[%s17344_s4 + $0xf8] sm:$0xff]  }
 0x5ec   : > { %7686 = vst [vmem:[#allocation3 + $0x68] sm:$0x11] %v7685_v36  ;;  %7683 = vst [vmem:[#allocation3 + $0x60] sm:$0xff] %v16473_v15  ;;  %v7550_v18 = vsel %vm16273_vm10, %v7482_v35, %v7549_v21  ;;  %v7547_v61 = vsel %vm16278_vm12, %v7480_v1, %v7546_v5  ;;  %v7872_v21 = vrot.slane %v7870_v20, 1  ;;  %v12387_v5 = vld [vmem:[%s17344_s4 + $0x78] sm:$0xff]   ;;  %v8013_v52 = vrot.slane %v16523_v62, 1 }
 0x5ed   : > { %7551 = vst [vmem:[#allocation3 + $0x78] sm:$0x1] %v7550_v18  ;;  %7548 = vst [vmem:[#allocation3 + $0x70] sm:$0xf] %v7547_v61  ;;  %v12389_v36 = vld [vmem:[%s17344_s4 + $0x38] sm:$0xff]   ;;  %v7861_v35 = vshrl.u32 %v16410_v63, 16  ;;  %11654 = vmatprep.subr.bf16.mxu0 %v12387_v5 }
 0x5ee   : > { %8260 = vrot.lane.b32.xlu0 %v16385_v58, %s12511_s30  ;;  %8044 = vrot.lane.b32.xlu1 %v8016_v31, %s12511_s30  ;;  %v12386_v58 = vld [vmem:[%s17344_s4 + $0xb0] sm:$0xff]   ;;  %v7868_v1 = vshrl.u32 %v16430_v60, 16  ;;  %v7844_v63 = vrot.slane %v7842_v3, 1  ;;  %v7884_v16 = vshll.u32 %v16492_v12, 16  ;;  %v7833_v20 = vshrl.u32 %v16477_v49, 16 }
 0x5ef   : > { %v7486_v50 = vpop.permute.xlu1 %7485  ;;  %v7484_v40 = vpop.permute.xlu0 %7483  ;;  %11693 = vmatpush3.bf16.msra.mxu1 %v12386_v58  ;;  %v7866_v11 = vor.u32 %v7865_v34, %v7861_v35  ;;  %11655 = vmatpush3.bf16.msra.mxu0 %v12389_v36 }
 0x5f0   : > { %v7556_v6 = vsel %vm16273_vm10, %v7486_v50, %v7555_v14  ;;  %v7553_v26 = vsel %vm16278_vm12, %v7484_v40, %v7552_v25  ;;  %11694 = vmatprep.subr.bf16.mxu1 %v12388_v29  ;;  %v12390_v14 = vld [vmem:[%s17344_s4 + $0xb8] sm:$0xff]   ;;  %v7837_v25 = vrot.slane %v7835_v45, 1  ;;  %v7873_v57 = vor.u32 %v7872_v21, %v7868_v1  ;;  %vm17642_vm10 = vmmov %vm17641_vm8 }
 0x5f1   : > { %7557 = vst [vmem:[#allocation3 + $0x88] sm:$0x1] %v7556_v6  ;;  %7554 = vst [vmem:[#allocation3 + $0x80] sm:$0xf] %v7553_v26  ;;  %v7840_v45 = vshrl.u32 %v16376_v54, 16  ;;  %v7886_v5 = vrot.slane %v7884_v16, 1 }
 0x5f2   : > { %8032 = vrot.lane.b32.xlu0 %v8010_v59, %s12511_s30  ;;  %8046 = vrot.lane.b32.xlu1 %v8017_v24, %s12511_s30  ;;  %v7877_v59 = vshll.u32 %v16457_v48, 16  ;;  %v7856_v29 = vshll.u32 %v16523_v62, 16  ;;  %v7882_v54 = vshrl.u32 %v16492_v12, 16  ;;  %v7847_v48 = vshrl.u32 %v16510_v38, 16  ;;  %vm17643_vm12 = vmmov %vm17641_vm8 }
 0x5f3   : > { %v7585_v47 = vpop.permute.xlu1 %7584  ;;  %v7583_v46 = vpop.permute.xlu0 %7582  ;;  %11695 = vmatpush3.bf16.msra.mxu1 %v12390_v14  ;;  %v7845_v34 = vor.u32 %v7844_v63, %v7840_v45  ;;  %v10595_v12 = vcombine.low %v16446_v32, %v16446_v32 }
 0x5f4   : > { %v7603_v51 = vrot.slane %v7585_v47, 4  ;;  %v7602_v4 = vrot.slane %v7583_v46, 4  ;;  %v7690_v28 = vld [vmem:[#allocation3 + $0x78] sm:$0x11]  ;;  %v7687_v18 = vld [vmem:[#allocation3 + $0x70] sm:$0xff]  ;;  %v7879_v21 = vrot.slane %v7877_v59, 1 }
 0x5f6   : > { %v7620_v30 = vsel %vm7606_vm6, %v7603_v51, %v7585_v47  ;;  %v7619_v61 = vsel %vm7606_vm6, %v7602_v4, %v7583_v46  ;;  %8036 = vrot.lane.b32.xlu0 %v8012_v41, %s12511_s30  ;;  %8038 = vrot.lane.b32.xlu1 %v8013_v52, %s12511_s30  ;;  %v7838_v46 = vor.u32 %v7837_v25, %v7833_v20  ;;  %v7858_v4 = vrot.slane %v7856_v29, 1 }
 0x5f7   : > { %v7691_v60 = vsel %vm16292_vm9, %v7620_v30, %v7690_v28  ;;  %v16553_v31 = vsel %vm16296_vm14, %v7619_v61, %v7687_v18  ;;  %v7589_v9 = vpop.permute.xlu1 %7588  ;;  %v7587_v0 = vpop.permute.xlu0 %7586  ;;  %v7880_v33 = vor.u32 %v7879_v21, %v7875_v42  ;;  %v7887_v51 = vor.u32 %v7886_v5, %v7882_v54 }
 0x5f8   : > { %7692 = vst [vmem:[#allocation3 + $0x78] sm:$0x11] %v7691_v60  ;;  %7689 = vst [vmem:[#allocation3 + $0x70] sm:$0xff] %v16553_v31  ;;  %v7605_v50 = vrot.slane %v7589_v9, 4  ;;  %v7604_v40 = vrot.slane %v7587_v0, 4  ;;  %v7693_v26 = vld [vmem:[#allocation3 + $0x80] sm:$0xff]  ;;  %v10661_v3 = vcombine.low %v16473_v15, %v16553_v31  ;;  %v16584_v35 = vcombine.low %v16553_v31, %v16553_v31 }
 0x5f9   : > { %v7696_v58 = vld [vmem:[#allocation3 + $0x88] sm:$0x11]  ;;  %v7849_v41 = vshll.u32 %v16510_v38, 16  ;;  %v7854_v52 = vshrl.u32 %v16523_v62, 16  ;;  %v16604_v61 = vcombine.low %v16473_v15, %v16473_v15  ;;  %v7710_v60 = vld [vmem:[#allocation3 + $0x58] sm:$0x11] }
 0x5fa   : > { %v7622_v6 = vsel %vm7606_vm6, %v7605_v50, %v7589_v9  ;;  %v7621_v24 = vsel %vm7606_vm6, %v7604_v40, %v7587_v0  ;;  %7970 = vrot.lane.b32.xlu0 %v7866_v11, %s12513_s10  ;;  %7972 = vrot.lane.b32.xlu1 %v7873_v57, %s12513_s10  ;;  %v10615_v11 = vcombine.low %v16446_v32, %v7710_v60  ;;  %v7712_v50 = vld [vmem:[#allocation3 + $0x68] sm:$0x11]  ;;  %vm17652_vm6 = vmmov %vm17645_vm0 }
 0x5fb   : > { %v7697_v47 = vsel %vm16292_vm9, %v7622_v6, %v7696_v58  ;;  %v16570_v49 = vsel %vm16296_vm14, %v7621_v24, %v7693_v26  ;;  %v7859_v36 = vor.u32 %v7858_v4, %v7854_v52  ;;  %v7851_v1 = vrot.slane %v7849_v41, 1 }
 0x5fc   : > { %7698 = vst [vmem:[#allocation3 + $0x88] sm:$0x11] %v7697_v47  ;;  %7695 = vst [vmem:[#allocation3 + $0x80] sm:$0xff] %v16570_v49  ;;  %v16596_v62 = vcombine.low %v16570_v49, %v16570_v49  ;;  %v10616_v40 = vcombine.high %v16446_v32, %v7710_v60  ;;  %v8018_v59 = vrot.slane %v10615_v11, 1  ;;  %v10617_v20 = vcombine.low %v16473_v15, %v7712_v50 }
 0x5fd   : > { %v7852_v14 = vor.u32 %v7851_v1, %v7847_v48  ;;  %v7891_v26 = vshll.u32 %v10615_v11, 16  ;;  %v10618_v47 = vcombine.high %v16473_v15, %v7712_v50  ;;  %vm17639_vm9 = vcmask 785408  }
 0x5fe   : > { %7962 = vrot.lane.b32.xlu0 %v7838_v46, %s12513_s10  ;;  %7964 = vrot.lane.b32.xlu1 %v7845_v34, %s12513_s10  ;;  %v8019_v6 = vrot.slane %v10616_v40, 1  ;;  %v8020_v24 = vrot.slane %v10617_v20, 1  ;;  %v7898_v5 = vshll.u32 %v10616_v40, 16  ;;  %v7905_v48 = vshll.u32 %v10617_v20, 16  ;;  %vm17640_vm13 = vmmov %vm17639_vm9 }
 0x5ff   : > { %v7714_v28 = vld [vmem:[#allocation3 + $0x78] sm:$0x11]  ;;  %v7893_v21 = vrot.slane %v7891_v26, 1  ;;  %v8021_v42 = vrot.slane %v10618_v47, 1  ;;  %vm17644_vm15 = vmmov %vm17639_vm9 }
 0x600   : > { %v10619_v30 = vcombine.low %v16553_v31, %v7714_v28  ;;  %v10620_v25 = vcombine.high %v16553_v31, %v7714_v28  ;;  %v7900_v52 = vrot.slane %v7898_v5, 1  ;;  %v12392_v5 = vld [vmem:[%s17344_s4 + $0x1c0] sm:$0xff]   ;;  %vm17648_vm3 = vmmov %vm17639_vm9 }
 0x601   : > { %11760 = vmatprep.subr.bf16.mxu1 %v12392_v5  ;;  %vm17653_vm14 = vmmov %vm17648_vm3 }
 0x602   : > { %7974 = vrot.lane.b32.xlu0 %v7880_v33, %s12513_s10  ;;  %7976 = vrot.lane.b32.xlu1 %v7887_v51, %s12513_s10  ;;  %v8022_v38 = vrot.slane %v10619_v30, 1  ;;  %v8023_v9 = vrot.slane %v10620_v25, 1  ;;  %v7919_v58 = vshll.u32 %v10619_v30, 16  ;;  %v7926_v46 = vshll.u32 %v10620_v25, 16 }
 0x603   : > { %v7716_v18 = vld [vmem:[#allocation3 + $0x88] sm:$0x11]  ;;  %v7917_v34 = vshrl.u32 %v10619_v30, 16  ;;  %v7889_v51 = vshrl.u32 %v10615_v11, 16  ;;  %v7924_v4 = vshrl.u32 %v10620_v25, 16  ;;  %v7903_v25 = vshrl.u32 %v10617_v20, 16  ;;  %v8031_v20 = vpop.permute.xlu1 %8030 }
 0x604   : > { %v10621_v63 = vcombine.low %v16570_v49, %v7716_v18  ;;  %v10622_v57 = vcombine.high %v16570_v49, %v7716_v18  ;;  %v7921_v45 = vrot.slane %v7919_v58, 1  ;;  %v7928_v54 = vrot.slane %v7926_v46, 1 }
 0x605   : > { %v7894_v41 = vor.u32 %v7893_v21, %v7889_v51 }
 0x606   : > { %7968 = vrot.lane.b32.xlu1 %v7859_v36, %s12513_s10  ;;  %8202 = vrot.lane.b32.xlu0 %v16584_v35, %s12509_s14  ;;  %v8024_v0 = vrot.slane %v10621_v63, 1  ;;  %v8025_v16 = vrot.slane %v10622_v57, 1  ;;  %v7922_v29 = vor.u32 %v7921_v45, %v7917_v34  ;;  %v7933_v33 = vshll.u32 %v10621_v63, 16 }
 0x607   : > { %v7929_v36 = vor.u32 %v7928_v54, %v7924_v4  ;;  %v7931_v28 = vshrl.u32 %v10621_v63, 16 }
 0x608   : > { %v7935_v1 = vrot.slane %v7933_v33, 1  ;;  %v12393_v33 = vld [vmem:[%s17344_s4 + $0x140] sm:$0xff]  }
 0x609   : > { %11720 = vmatprep.subr.bf16.mxu0 %v12393_v33 }
 0x60a   : > { %8268 = vrot.lane.b32.xlu1 %v10595_v12, %s12511_s30  ;;  %7966 = vrot.lane.b32.xlu0 %v7852_v14, %s12513_s10  ;;  %v7896_v14 = vshrl.u32 %v10616_v40, 16  ;;  %v7936_v18 = vor.u32 %v7935_v1, %v7931_v28  ;;  %v7910_v40 = vshrl.u32 %v10618_v47, 16 }
 0x60c   : > { %v7901_v30 = vor.u32 %v7900_v52, %v7896_v14 }
 0x60e   : > { %8186 = vrot.lane.b32.xlu0 %v10595_v12, %s12509_s14  ;;  %8210 = vrot.lane.b32.xlu1 %v16596_v62, %s12509_s14  ;;  %v7940_v12 = vshll.u32 %v10622_v57, 16 }
 0x610   : > { %v7942_v60 = vrot.slane %v7940_v12, 1 }
 0x612   : > { %8056 = vrot.lane.b32.xlu0 %v8022_v38, %s12511_s30  ;;  %8194 = vrot.lane.b32.xlu1 %v16604_v61, %s12509_s14  ;;  %v7907_v38 = vrot.slane %v7905_v48, 1 }
 0x614   : > { %v7908_v11 = vor.u32 %v7907_v38, %v7903_v25 }
 0x616   : > { %8058 = vrot.lane.b32.xlu0 %v8023_v9, %s12511_s30  ;;  %8060 = vrot.lane.b32.xlu1 %v8024_v0, %s12511_s30  ;;  %v7912_v9 = vshll.u32 %v10618_v47, 16  ;;  %v7938_v0 = vshrl.u32 %v10622_v57, 16  ;;  %v10603_v57 = vcombine.low %v16256_v55, %v16256_v55 }
 0x618   : > { %v7943_v50 = vor.u32 %v7942_v60, %v7938_v0  ;;  %v10592_v60 = vcombine.high %v16344_v17, %v16344_v17  ;;  %v10586_v0 = vcombine.high %v16250_v2, %v16250_v2  ;;  %v12411_v17 = vld [vmem:[%s17344_s4 + $0x120] sm:$0xff]  }
 0x61a   : > { %8048 = vrot.lane.b32.xlu0 %v8018_v59, %s12511_s30  ;;  %8062 = vrot.lane.b32.xlu1 %v8025_v16, %s12511_s30  ;;  %v7914_v59 = vrot.slane %v7912_v9, 1  ;;  %v8029_v16 = vpop.permute.xlu0 %8028 }
 0x61c   : > { %v7915_v63 = vor.u32 %v7914_v59, %v7910_v40  ;;  %v10588_v59 = vcombine.high %v16310_v37, %v16310_v37 }
 0x61e   : > { %8050 = vrot.lane.b32.xlu0 %v8019_v6, %s12511_s30  ;;  %8052 = vrot.lane.b32.xlu1 %v8020_v24, %s12511_s30  ;;  %v7959_v58 = vpop.permute.xlu0 %7958  ;;  %v7961_v6 = vpop.permute.xlu1 %7960 }
 0x622   : > { %7986 = vrot.lane.b32.xlu0 %v7922_v29, %s12513_s10  ;;  %8054 = vrot.lane.b32.xlu1 %v8021_v42, %s12511_s30  ;;  %v16640_v26 = vpop.permute.xlu0 %7994 }
 0x626   : > { %7978 = vrot.lane.b32.xlu0 %v7894_v41, %s12513_s10  ;;  %7988 = vrot.lane.b32.xlu1 %v7929_v36, %s12513_s10  ;;  %v16644_v24 = vpop.permute.xlu0 %8064  ;;  %v8068_v36 = vsel %vm1111_vm11, %v8029_v16, %v8031_v20 }
 0x62a   : > { %7990 = vrot.lane.b32.xlu0 %v7936_v18, %s12513_s10  ;;  %7980 = vrot.lane.b32.xlu1 %v7901_v30, %s12513_s10 }
 0x62e   : > { %7982 = vrot.lane.b32.xlu0 %v7908_v11, %s12513_s10  ;;  %7992 = vrot.lane.b32.xlu1 %v7943_v50, %s12513_s10  ;;  %v7998_v50 = vsel %vm17642_vm10, %v7959_v58, %v7961_v6  ;;  %vm17657_vm10 = vmmov %vm17645_vm0 }
 0x62f   : > { %v8110_v5 = vsel %vm1111_vm11, %v7998_v50, %v8029_v16  ;;  %v12394_v16 = vld [vmem:[%s17344_s4 + $0x180] sm:$0xff]  }
 0x632   : > { %8276 = vrot.lane.b32.xlu0 %v16604_v61, %s12511_s30  ;;  %7984 = vrot.lane.b32.xlu1 %v7915_v63, %s12513_s10  ;;  %v16642_v61 = vpop.permute.xlu1 %7996 }
 0x636   : > { %8292 = vrot.lane.b32.xlu0 %v16596_v62, %s12511_s30  ;;  %8284 = vrot.lane.b32.xlu1 %v16584_v35, %s12511_s30  ;;  %v16646_v45 = vpop.permute.xlu1 %8066 }
 0x63a   : > { %8300 = vrot.lane.b32.xlu1 %v10603_v57, %s12511_s30  ;;  %v8080_v57 = vsel %vm17643_vm12, %v10586_v0, %v7959_v58  ;;  %v12398_v0 = vld [vmem:[%s17344_s4 + $0x188] sm:$0xff]   ;;  %vm17658_vm12 = vmmov %vm17648_vm3 }
 0x64c   : > { %v16648_v62 = vpop.permute.xlu0 %8170 }
 0x650   : > { %v16650_v47 = vpop.permute.xlu1 %8178  ;;  %v16652_v35 = vpop.permute.xlu0 %8252 }
 0x654   : > { %v8035_v55 = vpop.permute.xlu1 %8034  ;;  %v16654_v46 = vpop.permute.xlu0 %8154 }
 0x655   : > { %v8334_v48 = vsel %vm17639_vm9, %v8068_v36, %v16654_v46  ;;  %v10594_v36 = vcombine.high %v16372_v7, %v16372_v7  ;;  %vm17654_vm9 = vmmov %vm17648_vm3 }
 0x658   : > { %v16656_v34 = vpop.permute.xlu1 %8162  ;;  %v8041_v21 = vpop.permute.xlu0 %8040 }
 0x65c   : > { %v16661_v29 = vpop.permute.xlu1 %8244  ;;  %v8043_v42 = vpop.permute.xlu0 %8042 }
 0x65d   : > { %v16664_v54 = vsel %vm1111_vm11, %v8041_v21, %v8043_v42 }
 0x65e   : > { %8176 = vrot.lane.b32.xlu0 %v16664_v54, %s12509_s14  ;;  %v8343_v58 = vsel %vm17648_vm3, %v16664_v54, %v16650_v47 }
 0x660   : > { %v16671_v51 = vpop.permute.xlu1 %8044  ;;  %v16673_v4 = vpop.permute.xlu0 %8260 }
 0x664   : > { %v8047_v41 = vpop.permute.xlu1 %8046  ;;  %v8033_v52 = vpop.permute.xlu0 %8032 }
 0x665   : > { %v8069_v1 = vsel %vm1111_vm11, %v8033_v52, %v8035_v55  ;;  %v16686_v18 = vsel %vm1111_vm11, %v16671_v51, %v8047_v41 }
 0x666   : > { %v8337_v12 = vsel %vm17640_vm13, %v8069_v1, %v16656_v34  ;;  %8160 = vrot.lane.b32.xlu1 %v8069_v1, %s12509_s14  ;;  %v12496_v1 = vld [vmem:[#allocation3] sm:$0xff]  ;;  %vm17655_vm13 = vmmov %vm17645_vm0 }
 0x667   : > { %v10628_v14 = vcombine.low %v8334_v48, %v8337_v12  ;;  %v10625_v48 = vcombine.low %v12496_v1, %v16310_v37 }
 0x668   : > { %v8039_v28 = vpop.permute.xlu1 %8038  ;;  %v16682_v30 = vpop.permute.xlu0 %8036 }
 0x669   : > { %v16690_v38 = vsel %vm1111_vm11, %v16682_v30, %v8039_v28  ;;  %9407 = vmatprep.mubr.bf16.mxu1 %v10628_v14  ;;  %v12395_v28 = vld [vmem:[%s17344_s4 + $0x100] sm:$0xff]  }
 0x66a   : > { %8184 = vrot.lane.b32.xlu1 %v16686_v18, %s12509_s14  ;;  %8168 = vrot.lane.b32.xlu0 %v16690_v38, %s12509_s14  ;;  %v8340_v20 = vsel %vm17644_vm15, %v16690_v38, %v16648_v62  ;;  %vm17659_vm15 = vmmov %vm17645_vm0 }
 0x66b   : > { %v10640_v14 = vcombine.low %v8340_v20, %v8343_v58  ;;  %v10590_v20 = vcombine.high %v16323_v44, %v16323_v44  ;;  %v12410_v44 = vld [vmem:[%s17344_s4 + $0x1a0] sm:$0xff]  }
 0x66c   : > { %v7973_v9 = vpop.permute.xlu1 %7972  ;;  %v7971_v25 = vpop.permute.xlu0 %7970 }
 0x66d   : > { %v16701_v11 = vsel %vm17641_vm8, %v10592_v60, %v7971_v25  ;;  %v8001_v42 = vsel %vm17647_vm2, %v7971_v25, %v7973_v9  ;;  %v12396_v60 = vld [vmem:[%s17344_s4 + $0x1c8] sm:$0xff]   ;;  %vm17656_vm8 = vmmov %vm17645_vm0 }
 0x66e   : > { %8172 = vrot.lane.b32.xlu0 %v16701_v11, %s12509_s14  ;;  %v16737_v37 = vsel %vm1111_vm11, %v8001_v42, %v8041_v21  ;;  %v12397_v25 = vld [vmem:[%s17344_s4 + $0x148] sm:$0xff]   ;;  %v12403_v42 = vld [vmem:[%s17344_s4 + $0x110] sm:$0xff]   ;;  %vm17661_vm2 = vmmov %vm17645_vm0 }
 0x66f   : > { %v12399_v21 = vld [vmem:[%s17344_s4 + $0x108] sm:$0xff]  }
 0x670   : > { %v7965_v40 = vpop.permute.xlu1 %7964  ;;  %v7963_v63 = vpop.permute.xlu0 %7962 }
 0x671   : > { %v7999_v2 = vsel %vm17645_vm0, %v7963_v63, %v7965_v40  ;;  %v8083_v55 = vsel %vm17646_vm1, %v10588_v59, %v7963_v63  ;;  %v12400_v40 = vld [vmem:[%s17344_s4 + $0x1d0] sm:$0xff]   ;;  %vm17660_vm1 = vmmov %vm17648_vm3 }
 0x672   : > { %v8113_v6 = vsel %vm1111_vm11, %v7999_v2, %v8033_v52  ;;  %v10626_v33 = vcombine.low %v8080_v57, %v8083_v55  ;;  %8156 = vrot.lane.b32.xlu1 %v8083_v55, %s12509_s14  ;;  %v12401_v63 = vld [vmem:[%s17344_s4 + $0x150] sm:$0xff]   ;;  %vm17662_vm3 = vmmov %vm17645_vm0 }
 0x673   : > { %v10627_v41 = vcombine.low %v8110_v5, %v8113_v6  ;;  %v12402_v2 = vld [vmem:[%s17344_s4 + $0x190] sm:$0xff]  }
 0x674   : > { %v7977_v12 = vpop.permute.xlu1 %7976  ;;  %9342 = vmatprep.mubr.bf16.mxu0 %v10626_v33  ;;  %v7975_v52 = vpop.permute.xlu0 %7974 }
 0x675   : > { %v16734_v9 = vsel %vm17649_vm4, %v10594_v36, %v7975_v52  ;;  %9343 = vmatmul.mubr.bf16.vlgmr.msra.gmra.mrb[176].mxu0 %v10625_v48  ;;  %9408 = vmatmul.mubr.bf16.vlgmr.msra.gmra.mrb[168].mxu1 %v10627_v41  ;;  %v8002_v57 = vsel %vm17650_vm5, %v7975_v52, %v7977_v12  ;;  %v12404_v48 = vld [vmem:[%s17344_s4 + $0x1d8] sm:$0xff]   ;;  %vm17663_vm4 = vmmov %vm17645_vm0 }
 0x676   : > { %8174 = vrot.lane.b32.xlu1 %v16737_v37, %s12509_s14  ;;  %9415 = vmatprep.mubr.bf16.mxu1 %v10640_v14  ;;  %v16776_v58 = vsel %vm1111_vm11, %v8002_v57, %v16671_v51  ;;  %v12405_v51 = vld [vmem:[%s17344_s4 + $0x158] sm:$0xff]   ;;  %v12408_v14 = vld [vmem:[%s17344_s4 + $0x1e0] sm:$0xff]   ;;  %vm17664_vm5 = vmmov %vm17645_vm0 }
 0x677   : > { %8180 = vrot.lane.b32.xlu0 %v16734_v9, %s12509_s14  ;;  %11761 = vmatpush3.bf16.msra.mxu1 %v12394_v16  ;;  %v12406_v12 = vld [vmem:[%s17344_s4 + $0x198] sm:$0xff]  }
 0x678   : > { %v7969_v50 = vpop.permute.xlu1 %7968  ;;  %v16749_v59 = vpop.permute.xlu0 %8202  ;;  %11721 = vmatpush3.bf16.msra.mxu0 %v12395_v28  ;;  %11762 = vmatprep.subr.bf16.mxu1 %v12396_v60  ;;  %v12407_v52 = vld [vmem:[%s17344_s4 + $0x118] sm:$0xff]   ;;  %v12409_v28 = vld [vmem:[%s17344_s4 + $0x160] sm:$0xff]  }
 0x679   : > { %11722 = vmatprep.subr.bf16.mxu0 %v12397_v25 }
 0x67a   : > { %8158 = vrot.lane.b32.xlu1 %v8113_v6, %s12509_s14 }
 0x67b   : > { %11763 = vmatpush3.bf16.msra.mxu1 %v12398_v0  ;;  %v12413_v0 = vld [vmem:[%s17344_s4 + $0x168] sm:$0xff]  }
 0x67c   : > { %v16767_v55 = vpop.permute.xlu1 %8268  ;;  %v7967_v5 = vpop.permute.xlu0 %7966  ;;  %11723 = vmatpush3.bf16.msra.mxu0 %v12399_v21  ;;  %11764 = vmatprep.subr.bf16.mxu1 %v12400_v40  ;;  %v12414_v40 = vld [vmem:[%s17344_s4 + $0x1a8] sm:$0xff]  }
 0x67d   : > { %v8000_v33 = vsel %vm17651_vm7, %v7967_v5, %v7969_v50  ;;  %v8086_v6 = vsel %vm17652_vm6, %v10590_v20, %v7967_v5  ;;  %11724 = vmatprep.subr.bf16.mxu0 %v12401_v63  ;;  %v12415_v63 = vld [vmem:[%s17344_s4 + $0x128] sm:$0xff]   ;;  %v12416_v20 = vld [vmem:[%s17344_s4 + $0x1f0] sm:$0xff]   ;;  %vm17665_vm7 = vmmov %vm17645_vm0 }
 0x67e   : > { %v8116_v41 = vsel %vm1111_vm11, %v8000_v33, %v16682_v30  ;;  %8182 = vrot.lane.b32.xlu1 %v16776_v58, %s12509_s14  ;;  %8164 = vrot.lane.b32.xlu0 %v8086_v6, %s12509_s14  ;;  %v10638_v36 = vcombine.low %v8086_v6, %v16701_v11  ;;  %v12418_v33 = vld [vmem:[%s17344_s4 + $0x1b0] sm:$0xff]   ;;  %vm17666_vm6 = vmmov %vm17660_vm1 }
 0x67f   : > { %v10639_v1 = vcombine.low %v8116_v41, %v16737_v37  ;;  %11765 = vmatpush3.bf16.msra.mxu1 %v12402_v2  ;;  %v12417_v2 = vld [vmem:[%s17344_s4 + $0x170] sm:$0xff]  }
 0x680   : > { %v16791_v16 = vpop.permute.xlu1 %8210  ;;  %9350 = vmatprep.mubr.bf16.mxu0 %v10638_v36  ;;  %v16793_v30 = vpop.permute.xlu0 %8186  ;;  %11725 = vmatpush3.bf16.msra.mxu0 %v12403_v42  ;;  %v12420_v36 = vld [vmem:[%s17344_s4 + $0x1f8] sm:$0xff]  }
 0x681   : > { %9351 = vmatmul.mubr.bf16.gmra.mrb[180].mxu0 %v10637_v8  ;;  %9416 = vmatmul.mubr.bf16.gmra.mrb[172].mxu1 %v10639_v1  ;;  %v12412_v8 = vld [vmem:[%s17344_s4 + $0x1e8] sm:$0xff]   ;;  %v12421_v1 = vld [vmem:[%s17344_s4 + $0x178] sm:$0xff]  }
 0x682   : > { %8246 = vrot.lane.b32.xlu0 %v8086_v6, %s12511_s30  ;;  %8248 = vrot.lane.b32.xlu1 %v8116_v41, %s12511_s30  ;;  %v12419_v6 = vld [vmem:[%s17344_s4 + $0x130] sm:$0xff]  }
 0x683   : > { %11766 = vmatprep.subr.bf16.mxu1 %v12404_v48  ;;  %11726 = vmatprep.subr.bf16.mxu0 %v12405_v51 }
 0x684   : > { %v16812_v60 = vpop.permute.xlu1 %8194  ;;  %v16814_v25 = vpop.permute.xlu0 %8056  ;;  %11767 = vmatpush3.bf16.msra.mxu1 %v12406_v12  ;;  %11727 = vmatpush3.bf16.msra.mxu0 %v12407_v52  ;;  %v12422_v12 = vld [vmem:[%s17344_s4 + $0x1b8] sm:$0xff]  }
 0x685   : > { %11768 = vmatprep.subr.bf16.mxu1 %v12408_v14  ;;  %11728 = vmatprep.subr.bf16.mxu0 %v12409_v28  ;;  %v12423_v52 = vld [vmem:[%s17344_s4 + $0x138] sm:$0xff]   ;;  %v8346_v28 = vsel %vm17653_vm14, %v16686_v18, %v16793_v30  ;;  %vm17667_vm14 = vmmov %vm17660_vm1 }
 0x686   : > { %8166 = vrot.lane.b32.xlu0 %v8116_v41, %s12509_s14 }
 0x688   : > { %v16829_v50 = vpop.permute.xlu1 %8060  ;;  %v8059_v21 = vpop.permute.xlu0 %8058  ;;  %11769 = vmatpush3.bf16.msra.mxu1 %v12410_v44  ;;  %11729 = vmatpush3.bf16.msra.mxu0 %v12411_v17  ;;  %v10600_v17 = vcombine.high %v16553_v31, %v16553_v31 }
 0x689   : > { %v16839_v57 = vsel %vm1111_vm11, %v16814_v25, %v8059_v21  ;;  %11770 = vmatprep.subr.bf16.mxu1 %v12412_v8  ;;  %11730 = vmatprep.subr.bf16.mxu0 %v12413_v0  ;;  %v12426_v0 = vld [vmem:[%s17344_s4 + $0x240] sm:$0xff]  }
 0x68a   : > { %8208 = vrot.lane.b32.xlu0 %v16839_v57, %s12509_s14 }
 0x68c   : > { %v8063_v5 = vpop.permute.xlu1 %8062  ;;  %v8049_v42 = vpop.permute.xlu0 %8048  ;;  %11771 = vmatpush3.bf16.msra.mxu1 %v12414_v40  ;;  %11731 = vmatpush3.bf16.msra.mxu0 %v12415_v63 }
 0x68d   : > { %v16857_v41 = vsel %vm1111_vm11, %v16829_v50, %v8063_v5  ;;  %11772 = vmatprep.subr.bf16.mxu1 %v12416_v20  ;;  %11732 = vmatprep.subr.bf16.mxu0 %v12417_v2  ;;  %v10596_v2 = vcombine.high %v16446_v32, %v16446_v32 }
 0x68e   : > { %8216 = vrot.lane.b32.xlu1 %v16857_v41, %s12509_s14 }
 0x690   : > { %v16867_v48 = vpop.permute.xlu1 %8052  ;;  %v8051_v51 = vpop.permute.xlu0 %8050  ;;  %11773 = vmatpush3.bf16.msra.mxu1 %v12418_v33  ;;  %11733 = vmatpush3.bf16.msra.mxu0 %v12419_v6 }
 0x691   : > { %v16876_v14 = vsel %vm1111_vm11, %v8049_v42, %v8051_v51  ;;  %11774 = vmatprep.subr.bf16.mxu1 %v12420_v36  ;;  %11734 = vmatprep.subr.bf16.mxu0 %v12421_v1 }
 0x692   : > { %v8349_v44 = vsel %vm17654_vm9, %v16876_v14, %v16812_v60  ;;  %8192 = vrot.lane.b32.xlu0 %v16876_v14, %s12509_s14  ;;  %vm17668_vm9 = vmmov %vm17660_vm1 }
 0x693   : > { %v10652_v8 = vcombine.low %v8346_v28, %v8349_v44 }
 0x694   : > { %v8055_v21 = vpop.permute.xlu1 %8054  ;;  %v7987_v40 = vpop.permute.xlu0 %7986  ;;  %11775 = vmatpush3.bf16.msra.mxu1 %v12422_v12  ;;  %11735 = vmatpush3.bf16.msra.mxu0 %v12423_v52  ;;  %v10602_v12 = vcombine.high %v16570_v49, %v16570_v49  ;;  %v8355_v49 = vsel %vm17660_vm1, %v16839_v57, %v16791_v16 }
 0x695   : > { %v8074_v63 = vsel %vm1111_vm11, %v16867_v48, %v8055_v21  ;;  %v8101_v20 = vsel %vm17655_vm13, %v10600_v17, %v7987_v40  ;;  %9423 = vmatprep.mubr.bf16.mxu1 %v10652_v8  ;;  %9635 = vmatprep.subr.bf16.mxu1 %v17630_v27  ;;  %vm17669_vm13 = vmmov %vm17660_vm1 }
 0x696   : > { %8200 = vrot.lane.b32.xlu1 %v8074_v63, %s12509_s14  ;;  %8204 = vrot.lane.b32.xlu0 %v8101_v20, %s12509_s14  ;;  %v8352_v44 = vsel %vm17658_vm12, %v8074_v63, %v16749_v59  ;;  %vm17672_vm12 = vmmov %vm17660_vm1 }
 0x697   : > { %11800 = vmatprep.subr.bf16.mxu0 %v12426_v0  ;;  %v10598_v0 = vcombine.high %v16473_v15, %v16473_v15  ;;  %v12497_v15 = vld [vmem:[#allocation3 + $0x90] sm:$0xff] }
 0x698   : > { %v7989_v5 = vpop.permute.xlu1 %7988  ;;  %v7979_v33 = vpop.permute.xlu0 %7978  ;;  %v10604_v31 = vcombine.high %v12497_v15, %v12497_v15 }
 0x699   : > { %v8005_v6 = vsel %vm17656_vm8, %v7987_v40, %v7989_v5  ;;  %v8095_v36 = vsel %vm17657_vm10, %v10596_v2, %v7979_v33  ;;  %v10664_v5 = vcombine.low %v8352_v44, %v8355_v49  ;;  %vm17670_vm8 = vmmov %vm17660_vm1 }
 0x69a   : > { %8188 = vrot.lane.b32.xlu0 %v8095_v36, %s12509_s14  ;;  %v8131_v1 = vsel %vm1111_vm11, %v8005_v6, %v16814_v25  ;;  %v10650_v51 = vcombine.low %v16734_v9, %v8095_v36  ;;  %vm17671_vm10 = vmmov %vm17660_vm1 }
 0x69b   : > { %8206 = vrot.lane.b32.xlu1 %v8131_v1, %s12509_s14 }
 0x69c   : > { %v7981_v52 = vpop.permute.xlu1 %7980  ;;  %9358 = vmatprep.mubr.bf16.mxu0 %v10650_v51  ;;  %v7991_v28 = vpop.permute.xlu0 %7990 }
 0x69d   : > { %v8003_v17 = vsel %vm17659_vm15, %v7979_v33, %v7981_v52  ;;  %v8104_v8 = vsel %vm17645_vm0, %v10602_v12, %v7991_v28  ;;  %9359 = vmatmul.mubr.bf16.gmra.mrb[184].mxu0 %v10649_v23  ;;  %vm17673_vm15 = vmmov %vm17660_vm1 }
 0x69e   : > { %8212 = vrot.lane.b32.xlu0 %v8104_v8, %s12509_s14  ;;  %v8125_v25 = vsel %vm1111_vm11, %v8003_v17, %v8049_v42  ;;  %vm17674_vm0 = vmmov %vm17660_vm1 }
 0x69f   : > { %8190 = vrot.lane.b32.xlu1 %v8125_v25, %s12509_s14  ;;  %v10651_v21 = vcombine.low %v16776_v58, %v8125_v25  ;;  %vm17675_vm1 = vmmov %vm17674_vm0 }
 0x6a0   : > { %v7993_v40 = vpop.permute.xlu1 %7992  ;;  %v7983_v2 = vpop.permute.xlu0 %7982 }
 0x6a1   : > { %v8006_v7 = vsel %vm17661_vm2, %v7991_v28, %v7993_v40  ;;  %v8098_v32 = vsel %vm17662_vm3, %v10598_v0, %v7983_v2  ;;  %9424 = vmatmul.mubr.bf16.gmra.mrb[176].mxu1 %v10651_v21  ;;  %vm17676_vm2 = vmmov %vm17674_vm0 }
 0x6a2   : > { %9431 = vmatprep.mubr.bf16.mxu1 %v10664_v5  ;;  %8196 = vrot.lane.b32.xlu0 %v8098_v32, %s12509_s14  ;;  %v8134_v23 = vsel %vm1111_vm11, %v8006_v7, %v16829_v50  ;;  %v10662_v42 = vcombine.low %v8098_v32, %v8101_v20  ;;  %vm17677_vm3 = vmmov %vm17674_vm0 }
 0x6a3   : > { %8214 = vrot.lane.b32.xlu1 %v8134_v23, %s12509_s14 }
 0x6a4   : > { %v7985_v33 = vpop.permute.xlu1 %7984  ;;  %9366 = vmatprep.mubr.bf16.mxu0 %v10662_v42 }
 0x6a5   : > { %v8004_v6 = vsel %vm17663_vm4, %v7983_v2, %v7985_v33  ;;  %9367 = vmatmul.mubr.bf16.gmra.mrb[188].mxu0 %v10661_v3  ;;  %v8107_v3 = vsel %vm17664_vm5, %v10604_v31, %v16640_v26  ;;  %v12430_v31 = vld [vmem:[%s17344_s4 + $0x208] sm:$0xff]   ;;  %vm17678_vm4 = vmmov %vm17674_vm0 }
 0x6a6   : > { %8254 = vrot.lane.b32.xlu0 %v16701_v11, %s12511_s30  ;;  %v8128_v51 = vsel %vm1111_vm11, %v8004_v6, %v16867_v48  ;;  %v12427_v6 = vld [vmem:[%s17344_s4 + $0x200] sm:$0xff]   ;;  %vm17679_vm5 = vmmov %vm17674_vm0 }
 0x6a7   : > { %8198 = vrot.lane.b32.xlu1 %v8128_v51, %s12509_s14  ;;  %v10663_v50 = vcombine.low %v8128_v51, %v8131_v1 }
 0x6a8   : > { %v16977_v11 = vpop.permute.xlu1 %8284 }
 0x6a9   : > { %9432 = vmatmul.mubr.bf16.gmra.mrb[180].mxu1 %v10663_v50  ;;  %v12425_v50 = vld [vmem:[%s17344_s4 + $0x288] sm:$0xff]  }
 0x6aa   : > { %8250 = vrot.lane.b32.xlu0 %v16690_v38, %s12511_s30 }
 0x6ab   : > { %8256 = vrot.lane.b32.xlu1 %v16737_v37, %s12511_s30 }
 0x6ae   : > { %8262 = vrot.lane.b32.xlu0 %v16734_v9, %s12511_s30  ;;  %v8077_v9 = vsel %vm1111_vm11, %v16644_v24, %v16646_v45 }
 0x6af   : > { %8258 = vrot.lane.b32.xlu1 %v16664_v54, %s12511_s30  ;;  %v8007_v54 = vsel %vm17665_vm7, %v16640_v26, %v16642_v61  ;;  %v16987_v61 = vpop.permute.xlu1 %8300  ;;  %vm17680_vm7 = vmmov %vm17674_vm0 }
 0x6b0   : > { %v8137_v38 = vsel %vm1111_vm11, %v8007_v54, %v16644_v24 }
 0x6b2   : > { %8270 = vrot.lane.b32.xlu0 %v8095_v36, %s12511_s30 }
 0x6b3   : > { %8264 = vrot.lane.b32.xlu1 %v16776_v58, %s12511_s30 }
 0x6b6   : > { %8266 = vrot.lane.b32.xlu0 %v16686_v18, %s12511_s30  ;;  %v16970_v18 = vpop.permute.xlu0 %8276 }
 0x6b7   : > { %8272 = vrot.lane.b32.xlu1 %v8125_v25, %s12511_s30 }
 0x6ba   : > { %8278 = vrot.lane.b32.xlu0 %v8098_v32, %s12511_s30  ;;  %v16985_v26 = vpop.permute.xlu0 %8292 }
 0x6bb   : > { %8274 = vrot.lane.b32.xlu1 %v16876_v14, %s12511_s30 }
 0x6be   : > { %8286 = vrot.lane.b32.xlu0 %v8101_v20, %s12511_s30 }
 0x6bf   : > { %8288 = vrot.lane.b32.xlu1 %v8131_v1, %s12511_s30 }
 0x6c2   : > { %8282 = vrot.lane.b32.xlu0 %v8074_v63, %s12511_s30 }
 0x6c3   : > { %8290 = vrot.lane.b32.xlu1 %v16839_v57, %s12511_s30 }
 0x6c6   : > { %8294 = vrot.lane.b32.xlu0 %v8104_v8, %s12511_s30 }
 0x6c7   : > { %8280 = vrot.lane.b32.xlu1 %v8128_v51, %s12511_s30 }
 0x6ca   : > { %8302 = vrot.lane.b32.xlu0 %v8107_v3, %s12511_s30 }
 0x6cb   : > { %8296 = vrot.lane.b32.xlu1 %v8134_v23, %s12511_s30 }
 0x6ce   : > { %8298 = vrot.lane.b32.xlu0 %v16857_v41, %s12511_s30 }
 0x6cf   : > { %8304 = vrot.lane.b32.xlu1 %v8137_v38, %s12511_s30 }
 0x6d0   : > { %v8177_v37 = vpop.permute.xlu0 %8176 }
 0x6d1   : > { %v8364_v2 = vsel %vm1111_vm11, %v8177_v37, %v16673_v4 }
 0x6d2   : > { %9931 = vrot.lane.b32.xlu0 %v16164_v10, %s12511_s30 }
 0x6d3   : > { %8306 = vrot.lane.b32.xlu1 %v8077_v9, %s12511_s30  ;;  %v12432_v9 = vld [vmem:[%s17344_s4 + $0x250] sm:$0xff]  }
 0x6d6   : > { %9935 = vrot.lane.b32.xlu0 %v16172_v53, %s12511_s30 }
 0x6d7   : > { %9933 = vrot.lane.b32.xlu1 %v16192_v19, %s12511_s30 }
 0x6d8   : > { %v8161_v58 = vpop.permute.xlu1 %8160 }
 0x6d9   : > { %v8358_v45 = vsel %vm1111_vm11, %v8161_v58, %v16661_v29 }
 0x6da   : > { %9939 = vrot.lane.b32.xlu0 %v16211_v13, %s12511_s30 }
 0x6db   : > { %9937 = vrot.lane.b32.xlu1 %v16190_v39, %s12511_s30 }
 0x6dc   : > { %v8169_v24 = vpop.permute.xlu0 %8168  ;;  %v8185_v48 = vpop.permute.xlu1 %8184 }
 0x6dd   : > { %v8361_v57 = vsel %vm1111_vm11, %v8169_v24, %v16652_v35  ;;  %v8367_v44 = vsel %vm1111_vm11, %v8185_v48, %v16767_v55 }
 0x6de   : > { %v10632_v41 = vcombine.low %v8358_v45, %v8361_v57  ;;  %9943 = vrot.lane.b32.xlu0 %v16231_v56, %s12511_s30  ;;  %v10644_v23 = vcombine.low %v8364_v2, %v8367_v44 }
 0x6df   : > { %9941 = vrot.lane.b32.xlu1 %v16218_v22, %s12511_s30 }
 0x6e0   : > { %9537 = vmatprep.mubr.bf16.mxu1 %v10632_v41  ;;  %v8173_v63 = vpop.permute.xlu0 %8172  ;;  %v12433_v41 = vld [vmem:[%s17344_s4 + $0x210] sm:$0xff]  }
 0x6e3   : > { %9945 = vrot.lane.b32.xlu1 %v16236_v43, %s12511_s30 }
 0x6e4   : > { %v8157_v14 = vpop.permute.xlu1 %8156 }
 0x6e5   : > { %v8218_v5 = vsel %vm17672_vm12, %v16654_v46, %v8157_v14  ;;  %v12429_v46 = vld [vmem:[%s17344_s4 + $0x248] sm:$0xff]   ;;  %vm17687_vm12 = vmmov %vm17674_vm0 }
 0x6e8   : > { %v8175_v20 = vpop.permute.xlu1 %8174 }
 0x6e9   : > { %v8181_v36 = vpop.permute.xlu0 %8180  ;;  %v8225_v42 = vsel %vm17673_vm15, %v8173_v63, %v8175_v20  ;;  %vm17688_vm15 = vmmov %vm17674_vm0 }
 0x6ea   : > { %v8227_v3 = vsel %vm17675_vm1, %v16650_v47, %v8181_v36  ;;  %v12428_v47 = vld [vmem:[%s17344_s4 + $0x290] sm:$0xff]   ;;  %vm17689_vm1 = vcmask 261120  }
 0x6ec   : > { %v8159_v1 = vpop.permute.xlu1 %8158 }
 0x6ed   : > { %v8219_v17 = vsel %vm17666_vm6, %v8157_v14, %v8159_v1  ;;  %v8220_v49 = vsel %vm17668_vm9, %v8159_v1, %v8161_v58  ;;  %v8226_v58 = vsel %vm17676_vm2, %v8175_v20, %v8177_v37  ;;  %v12431_v14 = vld [vmem:[%s17344_s4 + $0x298] sm:$0xff]   ;;  %v12438_v1 = vld [vmem:[%s17344_s4 + $0x260] sm:$0xff]   ;;  %vm17681_vm6 = vmmov %vm17674_vm0 }
 0x6ee   : > { %vm17683_vm9 = vmmov %vm17674_vm0 }
 0x6ef   : > { %vm17690_vm2 = vmmov %vm17689_vm1 }
 0x6f0   : > { %v8165_v12 = vpop.permute.xlu0 %8164  ;;  %v8183_v28 = vpop.permute.xlu1 %8182 }
 0x6f1   : > { %v8221_v8 = vsel %vm17667_vm14, %v16656_v34, %v8165_v12  ;;  %v8228_v0 = vsel %vm17669_vm13, %v8181_v36, %v8183_v28  ;;  %v12424_v34 = vld [vmem:[%s17344_s4 + $0x280] sm:$0xff]   ;;  %v8229_v15 = vsel %vm17674_vm0, %v8183_v28, %v8185_v48  ;;  %vm17682_vm14 = vmmov %vm17674_vm0 }
 0x6f2   : > { %v10629_v33 = vcombine.low %v8218_v5, %v8221_v8  ;;  %v10642_v51 = vcombine.low %v8225_v42, %v8228_v0  ;;  %v10643_v45 = vcombine.low %v8226_v58, %v8229_v15  ;;  %v12439_v8 = vld [vmem:[%s17344_s4 + $0x220] sm:$0xff]   ;;  %v12444_v5 = vld [vmem:[%s17344_s4 + $0x270] sm:$0xff]   ;;  %v12447_v42 = vld [vmem:[%s17344_s4 + $0x278] sm:$0xff]  }
 0x6f3   : > { %vm17684_vm13 = vmmov %vm17674_vm0 }
 0x6f4   : > { %v17007_v52 = vpop.permute.xlu0 %8246  ;;  %v17042_v54 = vpop.permute.xlu1 %8248 }
 0x6f8   : > { %v8167_v25 = vpop.permute.xlu0 %8166 }
 0x6f9   : > { %v8222_v21 = vsel %vm17670_vm8, %v8165_v12, %v8167_v25  ;;  %v8223_v40 = vsel %vm17671_vm10, %v8167_v25, %v8169_v24  ;;  %v8224_v24 = vsel %vm17677_vm3, %v16648_v62, %v8173_v63  ;;  %v12435_v62 = vld [vmem:[%s17344_s4 + $0x258] sm:$0xff]   ;;  %vm17685_vm8 = vmmov %vm17674_vm0 }
 0x6fa   : > { %v10630_v7 = vcombine.low %v8219_v17, %v8222_v21  ;;  %v10631_v32 = vcombine.low %v8220_v49, %v8223_v40  ;;  %v10641_v57 = vcombine.low %v8224_v24, %v8227_v3  ;;  %v12436_v63 = vld [vmem:[%s17344_s4 + $0x218] sm:$0xff]   ;;  %v12434_v17 = vld [vmem:[%s17344_s4 + $0x2a0] sm:$0xff]   ;;  %v12441_v49 = vld [vmem:[%s17344_s4 + $0x268] sm:$0xff]  }
 0x6fb   : > { %v12437_v21 = vld [vmem:[%s17344_s4 + $0x2a8] sm:$0xff]   ;;  %vm17686_vm10 = vmmov %vm17674_vm0 }
 0x6fc   : > { %9472 = vmatprep.mubr.bf16.mxu0 %v10630_v7  ;;  %9538 = vmatmul.mubr.bf16.vlgmr.msra.gmra.mrb[184].mxu1 %v10631_v32  ;;  %v17044_v38 = vpop.permute.xlu0 %8208  ;;  %v12442_v40 = vld [vmem:[%s17344_s4 + $0x228] sm:$0xff]   ;;  %v12440_v32 = vld [vmem:[%s17344_s4 + $0x2b0] sm:$0xff]   ;;  %vm17691_vm3 = vmmov %vm17689_vm1 }
 0x6fd   : > { %9473 = vmatmul.mubr.bf16.vlgmr.msra.gmra.mrb[192].mxu0 %v10629_v33  ;;  %9545 = vmatprep.mubr.bf16.mxu1 %v10644_v23 }
 0x6fe   : > { %9480 = vmatprep.mubr.bf16.mxu0 %v10642_v51  ;;  %9636 = vmatpush1.bf16.msra.mxu1 %v12424_v34  ;;  %v12445_v34 = vld [vmem:[%s17344_s4 + $0x230] sm:$0xff]   ;;  %v12448_v51 = vld [vmem:[%s17344_s4 + $0x238] sm:$0xff]  }
 0x6ff   : > { %9637 = vmatprep.subr.bf16.mxu1 %v17630_v27  ;;  %11801 = vmatpush3.bf16.msra.mxu0 %v12427_v6  ;;  %v12443_v6 = vld [vmem:[%s17344_s4 + $0x2b8] sm:$0xff]  }
 0x700   : > { %11802 = vmatprep.subr.bf16.mxu0 %v12429_v46  ;;  %v17059_v48 = vpop.permute.xlu1 %8216 }
 0x701   : > { %v8379_v15 = vsel %vm1111_vm11, %v17059_v48, %v16987_v61 }
 0x702   : > { %9638 = vmatpush1.bf16.msra.mxu1 %v12425_v50  ;;  %v8376_v50 = vsel %vm1111_vm11, %v17044_v38, %v16985_v26 }
 0x703   : > { %9639 = vmatprep.subr.bf16.mxu1 %v17630_v27  ;;  %11803 = vmatpush3.bf16.msra.mxu0 %v12430_v31 }
 0x704   : > { %9546 = vmatmul.mubr.bf16.gmra.mrb[188].mxu1 %v10643_v45  ;;  %v8193_v37 = vpop.permute.xlu0 %8192  ;;  %11804 = vmatprep.subr.bf16.mxu0 %v12432_v9 }
 0x705   : > { %9481 = vmatmul.mubr.bf16.gmra.mrb[196].mxu0 %v10641_v57  ;;  %v8370_v12 = vsel %vm1111_vm11, %v8193_v37, %v16970_v18 }
 0x706   : > { %9640 = vmatpush1.bf16.msra.mxu1 %v12428_v47 }
 0x707   : > { %9641 = vmatprep.subr.bf16.mxu1 %v17630_v27  ;;  %11805 = vmatpush3.bf16.msra.mxu0 %v12433_v41 }
 0x708   : > { %v8201_v20 = vpop.permute.xlu1 %8200  ;;  %v17071_v36 = vpop.permute.xlu0 %8204  ;;  %11806 = vmatprep.subr.bf16.mxu0 %v12435_v62 }
 0x709   : > { %v8373_v28 = vsel %vm1111_vm11, %v8201_v20, %v16977_v11 }
 0x70a   : > { %v10656_v44 = vcombine.low %v8370_v12, %v8373_v28  ;;  %9642 = vmatpush1.bf16.msra.mxu1 %v12431_v14 }
 0x70b   : > { %9643 = vmatprep.subr.bf16.mxu1 %v17630_v27  ;;  %11807 = vmatpush3.bf16.msra.mxu0 %v12436_v63 }
 0x70c   : > { %9553 = vmatprep.mubr.bf16.mxu1 %v10656_v44  ;;  %v8189_v25 = vpop.permute.xlu0 %8188  ;;  %11808 = vmatprep.subr.bf16.mxu0 %v12438_v1 }
 0x70d   : > { %v8207_v0 = vpop.permute.xlu1 %8206  ;;  %v8230_v57 = vsel %vm17684_vm13, %v16793_v30, %v8189_v25  ;;  %v12449_v30 = vld [vmem:[%s17344_s4 + $0x2c8] sm:$0xff]  }
 0x70e   : > { %9644 = vmatpush1.bf16.msra.mxu1 %v12434_v17  ;;  %v8237_v14 = vsel %vm17685_vm8, %v17071_v36, %v8207_v0 }
 0x70f   : > { %9645 = vmatprep.subr.bf16.mxu1 %v17630_v27  ;;  %11809 = vmatpush3.bf16.msra.mxu0 %v12439_v8 }
 0x710   : > { %v8213_v2 = vpop.permute.xlu0 %8212  ;;  %11810 = vmatprep.subr.bf16.mxu0 %v12441_v49 }
 0x711   : > { %v8191_v7 = vpop.permute.xlu1 %8190  ;;  %v8239_v17 = vsel %vm17687_vm12, %v16791_v16, %v8213_v2 }
 0x712   : > { %9646 = vmatpush1.bf16.msra.mxu1 %v12437_v21  ;;  %v8231_v31 = vsel %vm17678_vm4, %v8189_v25, %v8191_v7  ;;  %v8232_v58 = vsel %vm17680_vm7, %v8191_v7, %v8193_v37  ;;  %v10668_v37 = vcombine.low %v8376_v50, %v8379_v15  ;;  %v8238_v25 = vsel %vm17688_vm15, %v8207_v0, %v17044_v38  ;;  %vm17692_vm4 = vmmov %vm17689_vm1 }
 0x713   : > { %9647 = vmatprep.subr.bf16.mxu1 %v17630_v27  ;;  %11811 = vmatpush3.bf16.msra.mxu0 %v12442_v40  ;;  %v8236_v21 = vsel %vm17674_vm0, %v16749_v59, %v17071_v36 }
 0x714   : > { %v8197_v23 = vpop.permute.xlu0 %8196  ;;  %11812 = vmatprep.subr.bf16.mxu0 %v12444_v5 }
 0x715   : > { %v8215_v33 = vpop.permute.xlu1 %8214  ;;  %v8233_v3 = vsel %vm17679_vm5, %v16812_v60, %v8197_v23  ;;  %v12446_v60 = vld [vmem:[%s17344_s4 + $0x2c0] sm:$0xff]  }
 0x716   : > { %9648 = vmatpush1.bf16.msra.mxu1 %v12440_v32  ;;  %v8240_v24 = vsel %vm17681_vm6, %v8213_v2, %v8215_v33  ;;  %v10653_v63 = vcombine.low %v8230_v57, %v8233_v3  ;;  %v8241_v28 = vsel %vm17686_vm10, %v8215_v33, %v17059_v48  ;;  %v8309_v48 = vsel %vm1111_vm11, %v17007_v52, %v17042_v54 }
 0x717   : > { %9649 = vmatprep.subr.bf16.mxu1 %v17630_v27  ;;  %11813 = vmatpush3.bf16.msra.mxu0 %v12445_v34  ;;  %v10667_v40 = vcombine.low %v8238_v25, %v8241_v28 }
 0x718   : > { %v8255_v46 = vpop.permute.xlu0 %8254  ;;  %11814 = vmatprep.subr.bf16.mxu0 %v12447_v42 }
 0x719   : > { %v8199_v9 = vpop.permute.xlu1 %8198  ;;  %v8311_v59 = vsel %vm1111_vm11, %v16652_v35, %v8255_v46 }
 0x71a   : > { %v8234_v45 = vsel %vm17682_vm14, %v8197_v23, %v8199_v9  ;;  %v8235_v47 = vsel %vm17683_vm9, %v8199_v9, %v8201_v20  ;;  %9650 = vmatpush1.bf16.msra.mxu1 %v12443_v6  ;;  %v10666_v20 = vcombine.low %v8237_v14, %v8240_v24  ;;  %v8308_v23 = vsel %vm1111_vm11, %v16661_v29, %v17007_v52 }
 0x71b   : > { %v10654_v41 = vcombine.low %v8231_v31, %v8234_v45  ;;  %v10655_v62 = vcombine.low %v8232_v58, %v8235_v47  ;;  %9651 = vmatprep.subr.bf16.mxu1 %v17630_v27  ;;  %11815 = vmatpush3.bf16.msra.mxu0 %v12448_v51  ;;  %v10633_v33 = vcombine.low %v8308_v23, %v8311_v59 }
 0x71c   : > { %v8251_v1 = vpop.permute.xlu0 %8250 }
 0x71d   : > { %v8257_v12 = vpop.permute.xlu1 %8256  ;;  %9488 = vmatprep.mubr.bf16.mxu0 %v10654_v41  ;;  %9554 = vmatmul.mubr.bf16.gmra.mrb[192].mxu1 %v10655_v62  ;;  %v8310_v32 = vsel %vm1111_vm11, %v17042_v54, %v8251_v1 }
 0x71e   : > { %9489 = vmatmul.mubr.bf16.gmra.mrb[200].mxu0 %v10653_v63  ;;  %9561 = vmatprep.mubr.bf16.mxu1 %v10668_v37  ;;  %v8312_v49 = vsel %vm1111_vm11, %v8255_v46, %v8257_v12 }
 0x71f   : > { %9496 = vmatprep.mubr.bf16.mxu0 %v10666_v20  ;;  %9652 = vmatpush1.bf16.msra.mxu1 %v12446_v60  ;;  %v10634_v16 = vcombine.low %v8309_v48, %v8312_v49 }
 0x720   : > { %v8263_v44 = vpop.permute.xlu0 %8262  ;;  %9653 = vmatprep.subr.bf16.mxu1 %v17630_v27  ;;  %v10665_v27 = vcombine.low %v8236_v21, %v8239_v17 }
 0x721   : > { %v8259_v8 = vpop.permute.xlu1 %8258  ;;  %v8314_v3 = vsel %vm1111_vm11, %v16673_v4, %v8263_v44 }
 0x722   : > { %v10636_v5 = vcombine.low %v8251_v1, %v8259_v8  ;;  %v8313_v38 = vsel %vm1111_vm11, %v8257_v12, %v8259_v8 }
 0x723   : > { %9654 = vmatpush1.bf16.msra.mxu1 %v12449_v30  ;;  %v10635_v42 = vcombine.low %v8310_v32, %v8313_v38 }
 0x724   : > { %v8271_v7 = vpop.permute.xlu0 %8270 }
 0x725   : > { %v8265_v2 = vpop.permute.xlu1 %8264  ;;  %9562 = vmatmul.mubr.bf16.gmra.mrb[196].mxu1 %v10667_v40  ;;  %v8317_v46 = vsel %vm1111_vm11, %v16767_v55, %v8271_v7 }
 0x726   : > { %9497 = vmatmul.mubr.bf16.gmra.mrb[204].mxu0 %v10665_v27  ;;  %10763 = vmatprep.mubr.msk.bf16.mxu1 %vm17689_vm1, %v10636_v5  ;;  %v8315_v6 = vsel %vm1111_vm11, %v8263_v44, %v8265_v2  ;;  %v10645_v58 = vcombine.low %v8314_v3, %v8317_v46 }
 0x727   : > { %9602 = vmatprep.mubr.bf16.mxu0 %v10634_v16 }
 0x728   : > { %v8267_v0 = vpop.permute.xlu0 %8266 }
 0x729   : > { %v8273_v36 = vpop.permute.xlu1 %8272  ;;  %v8316_v52 = vsel %vm1111_vm11, %v8265_v2, %v8267_v0 }
 0x72a   : > { %v8318_v34 = vsel %vm1111_vm11, %v8271_v7, %v8273_v36 }
 0x72b   : > { %v10646_v50 = vcombine.low %v8315_v6, %v8318_v34 }
 0x72c   : > { %v8279_v51 = vpop.permute.xlu0 %8278 }
 0x72d   : > { %v8275_v15 = vpop.permute.xlu1 %8274  ;;  %9668 = vmatmul.mubr.bf16.vlgmr.msra.gmra.mrb[200].mxu1 %v10635_v42  ;;  %v8320_v14 = vsel %vm1111_vm11, %v16970_v18, %v8279_v51 }
 0x72e   : > { %v10648_v31 = vcombine.low %v8267_v0, %v8275_v15  ;;  %9603 = vmatmul.mubr.bf16.vlgmr.msra.gmra.mrb[208].mxu0 %v10633_v33  ;;  %v8319_v35 = vsel %vm1111_vm11, %v8273_v36, %v8275_v15 }
 0x72f   : > { %9610 = vmatprep.mubr.bf16.mxu0 %v10646_v50  ;;  %v10647_v9 = vcombine.low %v8316_v52, %v8319_v35 }
 0x730   : > { %10764 = vmatprep.mubr.msk.bf16.mxu1 %vm17690_vm2, %v10648_v31  ;;  %v8287_v54 = vpop.permute.xlu0 %8286 }
 0x731   : > { %v8289_v29 = vpop.permute.xlu1 %8288  ;;  %v8323_v41 = vsel %vm1111_vm11, %v16977_v11, %v8287_v54 }
 0x732   : > { %v8324_v62 = vsel %vm1111_vm11, %v8287_v54, %v8289_v29  ;;  %v10657_v20 = vcombine.low %v8320_v14, %v8323_v41 }
 0x734   : > { %v8283_v24 = vpop.permute.xlu0 %8282 }
 0x735   : > { %v8291_v45 = vpop.permute.xlu1 %8290  ;;  %9676 = vmatmul.mubr.bf16.gmra.mrb[204].mxu1 %v10647_v9 }
 0x736   : > { %v10660_v47 = vcombine.low %v8283_v24, %v8291_v45  ;;  %9611 = vmatmul.mubr.bf16.gmra.mrb[212].mxu0 %v10645_v58  ;;  %v8325_v60 = vsel %vm1111_vm11, %v8289_v29, %v8291_v45 }
 0x738   : > { %10765 = vmatprep.mubr.msk.bf16.mxu1 %vm17691_vm3, %v10660_v47  ;;  %v8295_v57 = vpop.permute.xlu0 %8294 }
 0x739   : > { %v8281_v55 = vpop.permute.xlu1 %8280  ;;  %v8326_v8 = vsel %vm1111_vm11, %v16985_v26, %v8295_v57 }
 0x73a   : > { %v8321_v4 = vsel %vm1111_vm11, %v8279_v51, %v8281_v55  ;;  %v8322_v37 = vsel %vm1111_vm11, %v8281_v55, %v8283_v24  ;;  %v9738_v55 = vld [vmem:[%s17347_s7] sm:$0xff] }
 0x73b   : > { %v10658_v63 = vcombine.low %v8321_v4, %v8324_v62  ;;  %v10659_v1 = vcombine.low %v8322_v37, %v8325_v60  ;;  %v9739_v62 = vld [vmem:[%s17347_s7 + $0x8] sm:$0xff] }
 0x73c   : > { %v8303_v12 = vpop.permute.xlu0 %8302  ;;  %v11930_v4 = vpack.c.bf16 %v9739_v62, %v9738_v55 }
 0x73d   : > { %v8297_v30 = vpop.permute.xlu1 %8296  ;;  %9618 = vmatprep.mubr.bf16.mxu0 %v10658_v63  ;;  %9684 = vmatmul.mubr.bf16.gmra.mrb[208].mxu1 %v10659_v1  ;;  %v8329_v11 = vsel %vm1111_vm11, %v16987_v61, %v8303_v12 }
 0x73e   : > { %9619 = vmatmul.mubr.bf16.gmra.mrb[216].mxu0 %v10657_v20  ;;  %v8327_v44 = vsel %vm1111_vm11, %v8295_v57, %v8297_v30  ;;  %v10669_v49 = vcombine.low %v8326_v8, %v8329_v11  ;;  %11931 = vmatprep.subr.bf16.mxu0 %v11930_v4  ;;  %v9741_v11 = vld [vmem:[%s17347_s7 + $0x18] sm:$0xff] }
 0x73f   : > { %11962 = vmatprep.subr.bf16.mxu1 %v11930_v4  ;;  %11933 = vmatpush3.bf16.msra.mxu0 %v11930_v4 }
 0x740   : > { %v8299_v18 = vpop.permute.xlu0 %8298  ;;  %11970 = vmatpush3.bf16.msra.mxu1 %v11930_v4 }
 0x741   : > { %v8305_v28 = vpop.permute.xlu1 %8304  ;;  %v8328_v40 = vsel %vm1111_vm11, %v8297_v30, %v8299_v18  ;;  %v9740_v30 = vld [vmem:[%s17347_s7 + $0x10] sm:$0xff] }
 0x742   : > { %v8330_v17 = vsel %vm1111_vm11, %v8303_v12, %v8305_v28  ;;  %v11934_v8 = vpack.c.bf16 %v9741_v11, %v9740_v30 }
 0x743   : > { %v10670_v25 = vcombine.low %v8327_v44, %v8330_v17 }
 0x744   : > { %11935 = vmatprep.subr.bf16.mxu0 %v11934_v8  ;;  %11963 = vmatprep.subr.bf16.mxu1 %v11934_v8 }
 0x745   : > { %v8307_v21 = vpop.permute.xlu1 %8306  ;;  %9626 = vmatprep.mubr.bf16.mxu0 %v10670_v25  ;;  %11937 = vmatpush3.bf16.msra.mxu0 %v11934_v8 }
 0x746   : > { %v8331_v48 = vsel %vm1111_vm11, %v8305_v28, %v8307_v21  ;;  %v10672_v27 = vcombine.low %v8299_v18, %v8307_v21  ;;  %9627 = vmatmul.mubr.bf16.gmra.mrb[220].mxu0 %v10669_v49  ;;  %11971 = vmatpush3.bf16.msra.mxu1 %v11934_v8 }
 0x747   : > { %v10671_v61 = vcombine.low %v8328_v40, %v8331_v48  ;;  %v9742_v40 = vld [vmem:[%s17347_s7 + $0x20] sm:$0xff]  ;;  %v9743_v48 = vld [vmem:[%s17347_s7 + $0x28] sm:$0xff] }
 0x748   : > { %v11656_v5 = vpop.f32.mrb[176].mxu0  ;;  %v11696_v7 = vpop.f32.mrb[168].mxu1  ;;  %10766 = vmatprep.mubr.msk.bf16.mxu1 %vm17692_vm4, %v10672_v27 }
 0x749   : > { %v11657_v16 = vpop.f32.mrb[177].mxu0  ;;  %9692 = vmatmul.mubr.bf16.gmra.mrb[212].mxu1 %v10671_v61  ;;  %v11697_v26 = vpop.f32.mrb[169].mxu1  ;;  %v11938_v61 = vpack.c.bf16 %v9743_v48, %v9742_v40 }
 0x74a   : > { %v11658_v2 = vadd.f32 %v11657_v16, %v11656_v5  ;;  %v11698_v38 = vadd.f32 %v11697_v26, %v11696_v7  ;;  %v11659_v0 = vpop.f32.mrb[178].mxu0  ;;  %v11699_v59 = vpop.f32.mrb[170].mxu1 }
 0x74b   : > { %v11660_v36 = vpop.f32.mrb[179].mxu0  ;;  %v11700_v32 = vpop.f32.mrb[171].mxu1  ;;  %11939 = vmatprep.subr.bf16.mxu0 %v11938_v61  ;;  %11964 = vmatprep.subr.bf16.mxu1 %v11938_v61 }
 0x74c   : > { %v17191_v34 = vadd.f32 %v11698_v38, %v11658_v2  ;;  %v11661_v23 = vadd.f32 %v11660_v36, %v11659_v0  ;;  %v11701_v42 = vadd.f32 %v11700_v32, %v11699_v59  ;;  %11941 = vmatpush3.bf16.msra.mxu0 %v11938_v61  ;;  %v9744_v0 = vld [vmem:[%s17347_s7 + $0x30] sm:$0xff]  ;;  %v9745_v59 = vld [vmem:[%s17347_s7 + $0x38] sm:$0xff]  ;;  %11972 = vmatpush3.bf16.msra.mxu1 %v11938_v61 }
 0x74e   : > { %v17193_v33 = vadd.f32 %v11701_v42, %v11661_v23  ;;  %v11942_v23 = vpack.c.bf16 %v9745_v59, %v9744_v0  ;;  %v9746_v42 = vld [vmem:[%s17347_s7 + $0x40] sm:$0xff] }
 0x750   : > { %11943 = vmatprep.subr.bf16.mxu0 %v11942_v23  ;;  %11965 = vmatprep.subr.bf16.mxu1 %v11942_v23 }
 0x751   : > { %11945 = vmatpush3.bf16.msra.mxu0 %v11942_v23  ;;  %11973 = vmatpush3.bf16.msra.mxu1 %v11942_v23 }
 0x754   : > { %v11662_v6 = vpop.f32.mrb[180].mxu0  ;;  %v11702_v51 = vpop.f32.mrb[172].mxu1 }
 0x755   : > { %v11663_v50 = vpop.f32.mrb[181].mxu0  ;;  %v11703_v15 = vpop.f32.mrb[173].mxu1 }
 0x756   : > { %v11664_v31 = vadd.f32 %v11663_v50, %v11662_v6  ;;  %v11704_v35 = vadd.f32 %v11703_v15, %v11702_v51  ;;  %v11665_v54 = vpop.f32.mrb[182].mxu0  ;;  %v11705_v46 = vpop.f32.mrb[174].mxu1  ;;  %v9747_v6 = vld [vmem:[%s17347_s7 + $0x48] sm:$0xff]  ;;  %v9748_v15 = vld [vmem:[%s17347_s7 + $0x50] sm:$0xff] }
 0x757   : > { %v11666_v29 = vpop.f32.mrb[183].mxu0  ;;  %v11706_v9 = vpop.f32.mrb[175].mxu1  ;;  %v11946_v50 = vpack.c.bf16 %v9747_v6, %v9746_v42 }
 0x758   : > { %v17195_v52 = vadd.f32 %v11704_v35, %v11664_v31  ;;  %v11667_v3 = vadd.f32 %v11666_v29, %v11665_v54  ;;  %v11707_v58 = vadd.f32 %v11706_v9, %v11705_v46  ;;  %v9749_v31 = vld [vmem:[%s17347_s7 + $0x58] sm:$0xff]  ;;  %v9750_v54 = vld [vmem:[%s17347_s7 + $0x60] sm:$0xff]  ;;  %v9751_v46 = vld [vmem:[%s17347_s7 + $0x68] sm:$0xff] }
 0x759   : > { %11947 = vmatprep.subr.bf16.mxu0 %v11946_v50  ;;  %11966 = vmatprep.subr.bf16.mxu1 %v11946_v50  ;;  %v11950_v35 = vpack.c.bf16 %v9749_v31, %v9748_v15  ;;  %v11954_v29 = vpack.c.bf16 %v9751_v46, %v9750_v54  ;;  %v9753_v9 = vld [vmem:[%s17347_s7 + $0x78] sm:$0xff] }
 0x75a   : > { %v17197_v24 = vadd.f32 %v11707_v58, %v11667_v3  ;;  %11949 = vmatpush3.bf16.msra.mxu0 %v11946_v50  ;;  %11974 = vmatpush3.bf16.msra.mxu1 %v11946_v50  ;;  %v9752_v3 = vld [vmem:[%s17347_s7 + $0x70] sm:$0xff] }
 0x75b   : > { %11951 = vmatprep.subr.bf16.mxu0 %v11950_v35  ;;  %11967 = vmatprep.subr.bf16.mxu1 %v11950_v35  ;;  %v11958_v58 = vpack.c.bf16 %v9753_v9, %v9752_v3 }
 0x75e   : > { %11953 = vmatpush3.bf16.msra.mxu0 %v11950_v35  ;;  %11975 = vmatpush3.bf16.msra.mxu1 %v11950_v35 }
 0x75f   : > { %11955 = vmatprep.subr.bf16.mxu0 %v11954_v29  ;;  %11968 = vmatprep.subr.bf16.mxu1 %v11954_v29 }
 0x762   : > { %11957 = vmatpush3.bf16.msra.mxu0 %v11954_v29  ;;  %11976 = vmatpush3.bf16.msra.mxu1 %v11954_v29 }
 0x763   : > { %11959 = vmatprep.subr.bf16.mxu0 %v11958_v58  ;;  %11969 = vmatprep.subr.bf16.mxu1 %v11958_v58 }
 0x766   : > { %11961 = vmatpush3.bf16.msra.mxu0 %v11958_v58  ;;  %11977 = vmatpush3.bf16.msra.mxu1 %v11958_v58 }
 0x770   : > { %v11668_v45 = vpop.f32.mrb[184].mxu0 }
 0x771   : > { %v11669_v47 = vpop.f32.mrb[185].mxu0 }
 0x772   : > { %v11670_v57 = vadd.f32 %v11669_v47, %v11668_v45  ;;  %v11671_v41 = vpop.f32.mrb[186].mxu0 }
 0x773   : > { %v11672_v60 = vpop.f32.mrb[187].mxu0 }
 0x774   : > { %v11673_v37 = vadd.f32 %v11672_v60, %v11671_v41  ;;  %v11708_v14 = vpop.f32.mrb[176].mxu1 }
 0x775   : > { %v11709_v63 = vpop.f32.mrb[177].mxu1 }
 0x776   : > { %v11710_v1 = vadd.f32 %v11709_v63, %v11708_v14  ;;  %v11711_v20 = vpop.f32.mrb[178].mxu1 }
 0x777   : > { %v11712_v12 = vpop.f32.mrb[179].mxu1 }
 0x778   : > { %v17211_v28 = vadd.f32 %v11710_v1, %v11670_v57  ;;  %v11713_v44 = vadd.f32 %v11712_v12, %v11711_v20  ;;  %v11674_v17 = vpop.f32.mrb[188].mxu0 }
 0x779   : > { %v11675_v18 = vpop.f32.mrb[189].mxu0 }
 0x77a   : > { %v17213_v25 = vadd.f32 %v11713_v44, %v11673_v37  ;;  %v11676_v49 = vadd.f32 %v11675_v18, %v11674_v17  ;;  %v11677_v21 = vpop.f32.mrb[190].mxu0 }
 0x77b   : > { %v11678_v27 = vpop.f32.mrb[191].mxu0 }
 0x77c   : > { %v11679_v5 = vadd.f32 %v11678_v27, %v11677_v21  ;;  %v11714_v7 = vpop.f32.mrb[180].mxu1 }
 0x77d   : > { %v11715_v16 = vpop.f32.mrb[181].mxu1 }
 0x77e   : > { %v11716_v2 = vadd.f32 %v11715_v16, %v11714_v7  ;;  %v11717_v26 = vpop.f32.mrb[182].mxu1 }
 0x77f   : > { %v11718_v38 = vpop.f32.mrb[183].mxu1 }
 0x780   : > { %v17227_v36 = vadd.f32 %v11716_v2, %v11676_v49  ;;  %v11719_v32 = vadd.f32 %v11718_v38, %v11717_v26 }
 0x782   : > { %v17235_v51 = vadd.f32 %v11719_v32, %v11679_v5 }
 0x7cf   : > { %v11776_v45 = vpop.f32.mrb[184].mxu1 }
 0x7d0   : > { %v11736_v47 = vpop.f32.mrb[192].mxu0  ;;  %v11777_v57 = vpop.f32.mrb[185].mxu1 }
 0x7d1   : > { %v11778_v41 = vadd.f32 %v11777_v57, %v11776_v45  ;;  %v11737_v55 = vpop.f32.mrb[193].mxu0  ;;  %v11779_v62 = vpop.f32.mrb[186].mxu1 }
 0x7d2   : > { %v11738_v60 = vadd.f32 %v11737_v55, %v11736_v47  ;;  %v11739_v4 = vpop.f32.mrb[194].mxu0  ;;  %v11780_v37 = vpop.f32.mrb[187].mxu1 }
 0x7d3   : > { %v11781_v14 = vadd.f32 %v11780_v37, %v11779_v62  ;;  %v11740_v63 = vpop.f32.mrb[195].mxu0 }
 0x7d4   : > { %v9475_v1 = vadd.f32 %v11738_v60, %v17191_v34  ;;  %v11741_v20 = vadd.f32 %v11740_v63, %v11739_v4 }
 0x7d6   : > { %v9478_v12 = vadd.f32 %v11741_v20, %v17193_v33  ;;  %v9540_v30 = vadd.f32 %v11778_v41, %v9475_v1 }
 0x7d7   : > { %v11782_v11 = vpop.f32.mrb[188].mxu1 }
 0x7d8   : > { %v11742_v44 = vpop.f32.mrb[196].mxu0  ;;  %v11783_v17 = vpop.f32.mrb[189].mxu1  ;;  %v9543_v8 = vadd.f32 %v11781_v14, %v9478_v12 }
 0x7d9   : > { %v11784_v18 = vadd.f32 %v11783_v17, %v11782_v11  ;;  %v11743_v49 = vpop.f32.mrb[197].mxu0  ;;  %v11785_v21 = vpop.f32.mrb[190].mxu1 }
 0x7da   : > { %v11744_v40 = vadd.f32 %v11743_v49, %v11742_v44  ;;  %v11745_v48 = vpop.f32.mrb[198].mxu0  ;;  %v11786_v27 = vpop.f32.mrb[191].mxu1 }
 0x7db   : > { %v11787_v61 = vadd.f32 %v11786_v27, %v11785_v21  ;;  %v11746_v5 = vpop.f32.mrb[199].mxu0  ;;  %v17283_v27 = vld [vmem:[%s17346_s6] ss:$0 sm:$0xff] }
 0x7dc   : > { %v9483_v7 = vadd.f32 %v11744_v40, %v17195_v52  ;;  %v11747_v16 = vadd.f32 %v11746_v5, %v11745_v48 }
 0x7de   : > { %v9486_v34 = vadd.f32 %v11747_v16, %v17197_v24  ;;  %v17259_v2 = vadd.f32 %v11784_v18, %v9483_v7 }
 0x7e0   : > { %v17261_v33 = vadd.f32 %v11787_v61, %v9486_v34 }
 0x7f0   : > { %v11788_v26 = vpop.f32.mrb[192].mxu1 }
 0x7f1   : > { %v11748_v38 = vpop.f32.mrb[200].mxu0  ;;  %v11789_v0 = vpop.f32.mrb[193].mxu1 }
 0x7f2   : > { %v11790_v59 = vadd.f32 %v11789_v0, %v11788_v26  ;;  %v11749_v32 = vpop.f32.mrb[201].mxu0  ;;  %v11791_v23 = vpop.f32.mrb[194].mxu1 }
 0x7f3   : > { %v11750_v42 = vadd.f32 %v11749_v32, %v11748_v38  ;;  %v11751_v6 = vpop.f32.mrb[202].mxu0  ;;  %v11792_v50 = vpop.f32.mrb[195].mxu1 }
 0x7f4   : > { %v11793_v15 = vadd.f32 %v11792_v50, %v11791_v23  ;;  %v11752_v31 = vpop.f32.mrb[203].mxu0 }
 0x7f5   : > { %v9491_v52 = vadd.f32 %v11750_v42, %v17211_v28  ;;  %v11753_v35 = vadd.f32 %v11752_v31, %v11751_v6 }
 0x7f7   : > { %v9494_v24 = vadd.f32 %v11753_v35, %v17213_v25  ;;  %v17265_v54 = vadd.f32 %v11790_v59, %v9491_v52 }
 0x7f8   : > { %v11794_v46 = vpop.f32.mrb[196].mxu1 }
 0x7f9   : > { %v11754_v29 = vpop.f32.mrb[204].mxu0  ;;  %v11795_v3 = vpop.f32.mrb[197].mxu1  ;;  %v17267_v9 = vadd.f32 %v11793_v15, %v9494_v24 }
 0x7fa   : > { %v11796_v58 = vadd.f32 %v11795_v3, %v11794_v46  ;;  %v11755_v45 = vpop.f32.mrb[205].mxu0  ;;  %v11797_v47 = vpop.f32.mrb[198].mxu1 }
 0x7fb   : > { %v11756_v57 = vadd.f32 %v11755_v45, %v11754_v29  ;;  %v11757_v41 = vpop.f32.mrb[206].mxu0  ;;  %v11798_v55 = vpop.f32.mrb[199].mxu1 }
 0x7fc   : > { %v11799_v62 = vadd.f32 %v11798_v55, %v11797_v47  ;;  %v11758_v60 = vpop.f32.mrb[207].mxu0 }
 0x7fd   : > { %v9499_v28 = vadd.f32 %v11756_v57, %v17227_v36  ;;  %v11759_v4 = vadd.f32 %v11758_v60, %v11757_v41  ;;  %v17278_v36 = vld [vmem:[%s17345_s5] ss:$0 sm:$0xff] }
 0x7ff   : > { %v9502_v25 = vadd.f32 %v11759_v4, %v17235_v51  ;;  %v17271_v37 = vadd.f32 %v11796_v58, %v9499_v28 }
 0x800   : > { %v9669_v14 = vpop.f32.mrb[200].mxu1 }
 0x801   : > { %v11816_v63 = vpop.f32.mrb[208].mxu0  ;;  %v9671_v1 = vpop.f32.mrb[201].mxu1  ;;  %v17273_v20 = vadd.f32 %v11799_v62, %v9502_v25 }
 0x802   : > { %v11817_v12 = vpop.f32.mrb[209].mxu0  ;;  %v9672_v11 = vpop.f32.mrb[202].mxu1 }
 0x803   : > { %v11818_v44 = vadd.f32 %v11817_v12, %v11816_v63  ;;  %v11819_v17 = vpop.f32.mrb[210].mxu0  ;;  %v9674_v18 = vpop.f32.mrb[203].mxu1 }
 0x804   : > { %v11820_v49 = vpop.f32.mrb[211].mxu0 }
 0x805   : > { %v9605_v21 = vadd.f32 %v11818_v44, %v9540_v30  ;;  %v11821_v40 = vadd.f32 %v11820_v49, %v11819_v17 }
 0x807   : > { %v9670_v51 = vadd.f32 %v9669_v14, %v9605_v21  ;;  %v9608_v48 = vadd.f32 %v11821_v40, %v9543_v8 }
 0x808   : > { %v9677_v61 = vpop.f32.mrb[204].mxu1 }
 0x809   : > { %v9673_v5 = vadd.f32 %v9672_v11, %v9608_v48  ;;  %v11822_v7 = vpop.f32.mrb[212].mxu0  ;;  %v9679_v16 = vpop.f32.mrb[205].mxu1  ;;  %v9707_v34 = vmul.f32 %v17278_v36, %v9670_v51 }
 0x80a   : > { %v11823_v30 = vpop.f32.mrb[213].mxu0  ;;  %v9680_v26 = vpop.f32.mrb[206].mxu1 }
 0x80b   : > { %v9708_v38 = vmul.f32 %v17278_v36, %v9673_v5  ;;  %v11824_v0 = vadd.f32 %v11823_v30, %v11822_v7  ;;  %v11825_v59 = vpop.f32.mrb[214].mxu0  ;;  %v9682_v32 = vpop.f32.mrb[207].mxu1  ;;  %v9722_v8 = vadd.f32 %v17283_v27, %v9707_v34 }
 0x80c   : > { %v11826_v23 = vpop.f32.mrb[215].mxu0 }
 0x80d   : > { %v9723_v42 = vadd.f32 %v17283_v27, %v9708_v38  ;;  %v9613_v6 = vadd.f32 %v11824_v0, %v17259_v2  ;;  %v11827_v50 = vadd.f32 %v11826_v23, %v11825_v59  ;;  %v9730_v15 = vmax.f32 %v9722_v8, 0.0 }
 0x80f   : > { %v9731_v31 = vmax.f32 %v9723_v42, 0.0  ;;  %v9678_v52 = vadd.f32 %v9677_v61, %v9613_v6  ;;  %v9616_v35 = vadd.f32 %v11827_v50, %v17261_v33  ;;  %11918 = vmatprep.mubr.f32.mxu0 %v9730_v15 }
 0x810   : > { %v9685_v24 = vpop.f32.mrb[208].mxu1 }
 0x811   : > { %v9681_v46 = vadd.f32 %v9680_v26, %v9616_v35  ;;  %v11828_v29 = vpop.f32.mrb[216].mxu0  ;;  %v9687_v3 = vpop.f32.mrb[209].mxu1  ;;  %11919 = vmatmul.mubr.f32.vlgmr.msra.gmra.mrb[224].mxu0 %v9731_v31  ;;  %v9709_v58 = vmul.f32 %v17278_v36, %v9678_v52 }
 0x812   : > { %v11829_v45 = vpop.f32.mrb[217].mxu0  ;;  %v9688_v47 = vpop.f32.mrb[210].mxu1 }
 0x813   : > { %v11830_v57 = vadd.f32 %v11829_v45, %v11828_v29  ;;  %v11831_v41 = vpop.f32.mrb[218].mxu0  ;;  %v9690_v55 = vpop.f32.mrb[211].mxu1  ;;  %v9724_v2 = vadd.f32 %v17283_v27, %v9709_v58  ;;  %v9710_v62 = vmul.f32 %v17278_v36, %v9681_v46 }
 0x814   : > { %v11832_v60 = vpop.f32.mrb[219].mxu0 }
 0x815   : > { %v9621_v33 = vadd.f32 %v11830_v57, %v17265_v54  ;;  %v11833_v28 = vadd.f32 %v11832_v60, %v11831_v41  ;;  %v9732_v4 = vmax.f32 %v9724_v2, 0.0  ;;  %v9725_v25 = vadd.f32 %v17283_v27, %v9710_v62 }
 0x817   : > { %v9686_v14 = vadd.f32 %v9685_v24, %v9621_v33  ;;  %v9624_v63 = vadd.f32 %v11833_v28, %v17267_v9  ;;  %11921 = vmatprep.mubr.f32.mxu0 %v9732_v4  ;;  %v9733_v1 = vmax.f32 %v9725_v25, 0.0 }
 0x819   : > { %v9689_v12 = vadd.f32 %v9688_v47, %v9624_v63  ;;  %v11834_v11 = vpop.f32.mrb[220].mxu0  ;;  %11922 = vmatmul.mubr.f32.gmra.mrb[226].mxu0 %v9733_v1  ;;  %v9711_v44 = vmul.f32 %v17278_v36, %v9686_v14  ;;  %v9934_v63 = vpop.permute.xlu1 %9933 }
 0x81a   : > { %v11835_v17 = vpop.f32.mrb[221].mxu0 }
 0x81b   : > { %v11836_v18 = vadd.f32 %v11835_v17, %v11834_v11  ;;  %v11837_v49 = vpop.f32.mrb[222].mxu0  ;;  %v9726_v21 = vadd.f32 %v17283_v27, %v9711_v44  ;;  %v9712_v54 = vmul.f32 %v17278_v36, %v9689_v12  ;;  %v9932_v11 = vpop.permute.xlu0 %9931 }
 0x81c   : > { %v11838_v40 = vpop.f32.mrb[223].mxu0  ;;  %v9693_v51 = vpop.f32.mrb[212].mxu1 }
 0x81d   : > { %v11839_v48 = vadd.f32 %v11838_v40, %v11837_v49  ;;  %v9629_v61 = vadd.f32 %v11836_v18, %v17271_v37  ;;  %v9695_v9 = vpop.f32.mrb[213].mxu1  ;;  %v9734_v5 = vmax.f32 %v9726_v21, 0.0  ;;  %v9727_v7 = vadd.f32 %v17283_v27, %v9712_v54 }
 0x81e   : > { %v9696_v16 = vpop.f32.mrb[214].mxu1 }
 0x81f   : > { %v9694_v34 = vadd.f32 %v9693_v51, %v9629_v61  ;;  %v9632_v30 = vadd.f32 %v11839_v48, %v17273_v20  ;;  %v9698_v26 = vpop.f32.mrb[215].mxu1  ;;  %11924 = vmatprep.mubr.f32.mxu0 %v9734_v5  ;;  %v9735_v38 = vmax.f32 %v9727_v7, 0.0  ;;  %v9938_v5 = vpop.permute.xlu1 %9937 }
 0x821   : > { %v9713_v0 = vmul.f32 %v17278_v36, %v9694_v34  ;;  %v9697_v59 = vadd.f32 %v9696_v16, %v9632_v30  ;;  %11925 = vmatmul.mubr.f32.gmra.mrb[228].mxu0 %v9735_v38 }
 0x823   : > { %v9714_v32 = vmul.f32 %v17278_v36, %v9697_v59  ;;  %v9728_v8 = vadd.f32 %v17283_v27, %v9713_v0 }
 0x825   : > { %v9729_v37 = vadd.f32 %v17283_v27, %v9714_v32  ;;  %v9736_v23 = vmax.f32 %v9728_v8, 0.0 }
 0x827   : > { %v9737_v42 = vmax.f32 %v9729_v37, 0.0  ;;  %11927 = vmatprep.mubr.f32.mxu1 %v9736_v23 }
 0x829   : > { %11928 = vmatmul.mubr.f32.vlgmr.msra.gmra.mrb[216].mxu1 %v9737_v42 }
 0x8e4   : > { %v11920_v6 = vpop.f32.mrb[224].mxu0 }
 0x8e5   : > { %v10770_v50 = vmul.f32 -1.442695, %v11920_v6  ;;  %v9820_v20 = vpop.f32.mrb[225].mxu0  ;;  %v9942_v6 = vpop.permute.xlu1 %9941 }
 0x8e6   : > { %v10769_v15 = vmul.f32 -1.442695, %v9820_v20 }
 0x8e7   : > { %12450 = vpow2.f32 %v10770_v50 }
 0x8e8   : > { %12452 = vpow2.f32 %v10769_v15 }
 0x8ec   : > { %v11923_v31 = vpop.f32.mrb[226].mxu0 }
 0x8ed   : > { %v10772_v52 = vmul.f32 -1.442695, %v11923_v31  ;;  %v9830_v35 = vpop.f32.mrb[227].mxu0 }
 0x8ee   : > { %v10771_v24 = vmul.f32 -1.442695, %v9830_v35 }
 0x8ef   : > { %12454 = vpow2.f32 %v10772_v52 }
 0x8f0   : > { %12456 = vpow2.f32 %v10771_v24 }
 0x8f1   : > { %v12451_v36 = vpop.eup %12450 }
 0x8f2   : > { %v12453_v46 = vpop.eup %12452  ;;  %v9884_v29 = vadd.f32 1.0, %v12451_v36 }
 0x8f3   : > { %v9883_v27 = vadd.f32 1.0, %v12453_v46 }
 0x8f4   : > { %12458 = vrcp.f32 %v9884_v29  ;;  %v11926_v3 = vpop.f32.mrb[228].mxu0 }
 0x8f5   : > { %12460 = vrcp.f32 %v9883_v27  ;;  %v10774_v58 = vmul.f32 -1.442695, %v11926_v3  ;;  %v9840_v45 = vpop.f32.mrb[229].mxu0  ;;  %v9946_v27 = vpop.permute.xlu1 %9945 }
 0x8f6   : > { %v10773_v47 = vmul.f32 -1.442695, %v9840_v45 }
 0x8f7   : > { %12462 = vpow2.f32 %v10774_v58 }
 0x8f8   : > { %12464 = vpow2.f32 %v10773_v47 }
 0x8f9   : > { %v12455_v57 = vpop.eup %12454 }
 0x8fa   : > { %v12457_v41 = vpop.eup %12456  ;;  %v9886_v55 = vadd.f32 1.0, %v12455_v57 }
 0x8fb   : > { %v9885_v2 = vadd.f32 1.0, %v12457_v41 }
 0x8fc   : > { %12466 = vrcp.f32 %v9886_v55  ;;  %v11929_v62 = vpop.f32.mrb[216].mxu1 }
 0x8fd   : > { %12468 = vrcp.f32 %v9885_v2  ;;  %v10776_v60 = vmul.f32 -1.442695, %v11929_v62  ;;  %v9850_v33 = vpop.f32.mrb[217].mxu1 }
 0x8fe   : > { %v12459_v28 = vpop.eup %12458  ;;  %v10775_v4 = vmul.f32 -1.442695, %v9850_v33 }
 0x8ff   : > { %v12461_v25 = vpop.eup %12460  ;;  %v9916_v14 = vsub.f32 1.0, %v12459_v28  ;;  %12470 = vpow2.f32 %v10776_v60  ;;  %v9908_v44 = vmul.f32 %v12459_v28, %v16192_v19 }
 0x900   : > { %v9915_v1 = vsub.f32 1.0, %v12461_v25  ;;  %12472 = vpow2.f32 %v10775_v4  ;;  %v9907_v49 = vmul.f32 %v12461_v25, %v16164_v10  ;;  %v9936_v10 = vpop.permute.xlu0 %9935 }
 0x901   : > { %v12463_v12 = vpop.eup %12462  ;;  %v9956_v17 = vmul.f32 %v9934_v63, %v9916_v14 }
 0x902   : > { %v12465_v18 = vpop.eup %12464  ;;  %v9955_v21 = vmul.f32 %v9932_v11, %v9915_v1  ;;  %v9888_v54 = vadd.f32 1.0, %v12463_v12 }
 0x903   : > { %v9964_v40 = vadd.f32 %v9956_v17, %v9908_v44  ;;  %v9887_v51 = vadd.f32 1.0, %v12465_v18 }
 0x904   : > { %v9963_v48 = vadd.f32 %v9955_v21, %v9907_v49  ;;  %12474 = vrcp.f32 %v9888_v54  ;;  %v9940_v20 = vpop.permute.xlu0 %9939 }
 0x905   : > { %9972 = vst.msk [vmem:[%s17312_s29 + $0x8] sm:$0xff] %vm1111_vm11, %v9964_v40  ;;  %12476 = vrcp.f32 %v9887_v51 }
 0x906   : > { %v12467_v19 = vpop.eup %12466  ;;  %9971 = vst.msk [vmem:[%s17312_s29] sm:$0xff] %vm1111_vm11, %v9963_v48 }
 0x907   : > { %v12469_v61 = vpop.eup %12468  ;;  %v9918_v9 = vsub.f32 1.0, %v12467_v19  ;;  %v9910_v34 = vmul.f32 %v12467_v19, %v16190_v39 }
 0x908   : > { %v9917_v7 = vsub.f32 1.0, %v12469_v61  ;;  %v9909_v38 = vmul.f32 %v12469_v61, %v16172_v53  ;;  %v9944_v58 = vpop.permute.xlu0 %9943 }
 0x909   : > { %v12471_v16 = vpop.eup %12470  ;;  %v9958_v30 = vmul.f32 %v9938_v5, %v9918_v9 }
 0x90a   : > { %v12473_v26 = vpop.eup %12472  ;;  %v9957_v0 = vmul.f32 %v9936_v10, %v9917_v7  ;;  %v9890_v59 = vadd.f32 1.0, %v12471_v16 }
 0x90b   : > { %v9966_v32 = vadd.f32 %v9958_v30, %v9910_v34  ;;  %v9889_v8 = vadd.f32 1.0, %v12473_v26 }
 0x90c   : > { %v9965_v37 = vadd.f32 %v9957_v0, %v9909_v38  ;;  %12478 = vrcp.f32 %v9890_v59 }
 0x90d   : > { %9974 = vst.msk [vmem:[%s17312_s29 + $0x18] sm:$0xff] %vm1111_vm11, %v9966_v32  ;;  %12480 = vrcp.f32 %v9889_v8 }
 0x90e   : > { %v12475_v23 = vpop.eup %12474  ;;  %9973 = vst.msk [vmem:[%s17312_s29 + $0x10] sm:$0xff] %vm1111_vm11, %v9965_v37 }
 0x90f   : > { %v12477_v42 = vpop.eup %12476  ;;  %v9920_v39 = vsub.f32 1.0, %v12475_v23  ;;  %v9912_v53 = vmul.f32 %v12475_v23, %v16218_v22 }
 0x910   : > { %v9919_v50 = vsub.f32 1.0, %v12477_v42  ;;  %v9911_v31 = vmul.f32 %v12477_v42, %v16211_v13 }
 0x911   : > { %v9960_v15 = vmul.f32 %v9942_v6, %v9920_v39 }
 0x912   : > { %v9959_v52 = vmul.f32 %v9940_v20, %v9919_v50 }
 0x913   : > { %v9968_v35 = vadd.f32 %v9960_v15, %v9912_v53 }
 0x914   : > { %v9967_v24 = vadd.f32 %v9959_v52, %v9911_v31 }
 0x915   : > { %9976 = vst.msk [vmem:[%s17312_s29 + $0x28] sm:$0xff] %vm1111_vm11, %v9968_v35 }
 0x916   : > { %v12479_v36 = vpop.eup %12478  ;;  %9975 = vst.msk [vmem:[%s17312_s29 + $0x20] sm:$0xff] %vm1111_vm11, %v9967_v24 }
 0x917   : > { %v12481_v46 = vpop.eup %12480  ;;  %v9922_v29 = vsub.f32 1.0, %v12479_v36  ;;  %v9914_v22 = vmul.f32 %v12479_v36, %v16236_v43 }
 0x918   : > { %v9921_v3 = vsub.f32 1.0, %v12481_v46  ;;  %v9913_v13 = vmul.f32 %v12481_v46, %v16231_v56 }
 0x919   : > { %v9962_v45 = vmul.f32 %v9946_v27, %v9922_v29 }
 0x91a   : > { %v9961_v47 = vmul.f32 %v9944_v58, %v9921_v3 }
 0x91b   : > { %v9970_v57 = vadd.f32 %v9962_v45, %v9914_v22 }
 0x91c   : > { %v9969_v41 = vadd.f32 %v9961_v47, %v9913_v13 }
 0x91d   : > { %9978 = vst.msk [vmem:[%s17312_s29 + $0x38] sm:$0xff] %vm1111_vm11, %v9970_v57 }
 0x91e   : > { %9977 = vst.msk [vmem:[%s17312_s29 + $0x30] sm:$0xff] %vm1111_vm11, %v9969_v41 }
 0x91f PF: > { %s18_s27 = sadd.s32 1, %s12504_s27  }
 0x920   : > { %p15_p4 = scmp.ge.s32.totalorder %s18_s27, 4  }
 0x922   :  { %17 = sbr.rel (!%p15_p4) target bundleno = 1 (0x1), region = 84 }

</bundles_post_ra>
